<compile_context>
chip_gen: v6e
topology: v6e:2x2x1
jax: 0.10.0
libtpu: 0.0.40
codegen_flags: <defaults>
</compile_context>

<pallas_src>
import functools

import jax
import jax.numpy as jnp
from jax.experimental import pallas as pl
from jax.experimental.pallas import tpu as pltpu


# ----------------------------- 3x3 convolution ------------------------------

def _conv3x3_kernel(x_ref, w_ref, o_ref, patch_ref):
    # x_ref: (1, H+2, W+2, Cin) padded input tile (one batch element)
    # w_ref: (9*Cin, Cout) bf16 weights, row order (dy*3+dx)*Cin + ci
    # o_ref: (1, H, W, Cout)
    # patch_ref: VMEM scratch (H*W, 9*Cin) f32 -- im2col buffer
    _, H, W, Cout = o_ref.shape
    Cin = x_ref.shape[-1]
    for dy in range(3):
        for dx in range(3):
            sl = x_ref[0, dy:dy + H, dx:dx + W, :].reshape(H * W, Cin)
            j = dy * 3 + dx
            patch_ref[:, j * Cin:(j + 1) * Cin] = sl
    # one deep-contraction MXU matmul (K = 9*Cin), bf16 operands, f32 accumulate
    acc = jnp.dot(patch_ref[...].astype(jnp.bfloat16), w_ref[...],
                  preferred_element_type=jnp.float32)
    o_ref[0] = acc.reshape(H, W, Cout).astype(o_ref.dtype)


def conv3x3(x_nhwc, w_hwio):
    B, H, W, Cin = x_nhwc.shape
    Cout = w_hwio.shape[-1]
    # TODO(synk): halo is handled by a wrapper-side pad; for large H/W this
    # should become an in-kernel halo with a row-strip grid (bounded VMEM,
    # more pipeline steps per TensorCore).
    x_pad = jnp.pad(x_nhwc, ((0, 0), (1, 1), (1, 1), (0, 0)))
    w2 = w_hwio.reshape(9 * Cin, Cout).astype(jnp.bfloat16)
    return pl.pallas_call(
        _conv3x3_kernel,
        out_shape=jax.ShapeDtypeStruct((B, H, W, Cout), jnp.float32),
        grid_spec=pltpu.PrefetchScalarGridSpec(
            num_scalar_prefetch=0,
            grid=(B,),
            in_specs=[
                pl.BlockSpec((1, H + 2, W + 2, Cin), lambda b: (b, 0, 0, 0)),
                pl.BlockSpec((9 * Cin, Cout), lambda b: (0, 0)),
            ],
            out_specs=pl.BlockSpec((1, H, W, Cout), lambda b: (b, 0, 0, 0)),
            scratch_shapes=[pltpu.VMEM((H * W, 9 * Cin), jnp.float32)],
        ),
        compiler_params=pltpu.CompilerParams(dimension_semantics=("parallel",)),
    )(x_pad, w2)


# ------------------- fused f/g/h + BN + attention + i + i_bn ----------------

def _fused_attention_kernel(x_ref, wfgh_ref, bfgh_ref, bnw_ref, bnb_ref,
                            iw_ref, ib_ref, ibnw_ref, ibnb_ref, o_ref,
                            *, B, HW, C8, eps=1e-5):
    # x_ref: (B*HW, Cm) conv1 output.   o_ref: (B*HW, Cm) = i_bn(i(att@h)) + x
    x = x_ref[...]                                          # (B*HW, Cm) f32
    inv_n = 1.0 / float(B * HW)

    # fused f/g/h 1x1 convs (channel matmul) + bias
    fgh = jnp.dot(x, wfgh_ref[...],
                  preferred_element_type=jnp.float32) + bfgh_ref[...]   # (B*HW, 3*C8)

    # BatchNorm (training mode, biased variance over the whole batch) computed
    # in-kernel; gamma is pre-folded into the h BN weight/bias by the wrapper.
    mean = jnp.sum(fgh, axis=0, keepdims=True) * inv_n
    var = jnp.maximum(jnp.sum(fgh * fgh, axis=0, keepdims=True) * inv_n
                      - mean * mean, 0.0)
    scale = bnw_ref[...] * jax.lax.rsqrt(var + eps)
    shift = bnb_ref[...] - mean * scale
    fghn = fgh * scale + shift                              # (B*HW, 3*C8)

    # fold the i 1x1 conv into h:  (att @ h) @ i_w == att @ (h @ i_w)
    hi = jnp.dot(fghn[:, 2 * C8:3 * C8], iw_ref[...],
                 preferred_element_type=jnp.float32)        # (B*HW, Cm)

    for b in range(B):      # B is small and static -> unrolled
        f = fghn[b * HW:(b + 1) * HW, 0:C8]
        g = fghn[b * HW:(b + 1) * HW, C8:2 * C8]
        # att[p, q] = sum_c f[p, c] * g[q, c]  (== torch.bmm(f^T, g))
        # TODO(synk): K=C8 underfills the MXU; a VPU outer-product form (or a
        # q-tiled grid for large HW so att never exceeds VMEM) would be better.
        att = jax.lax.dot_general(f, g, (((1,), (1,)), ((), ())),
                                  preferred_element_type=jnp.float32)   # (HW, HW)
        # torch softmax(att, dim=1) -> normalize over the "p" axis = axis 0 here
        m = jnp.max(att, axis=0, keepdims=True)
        e = jnp.exp(att - m)
        s = jnp.sum(e, axis=0, keepdims=True)
        prob = e * pl.reciprocal(s, approx=True)
        # torch.bmm(att, h) with the i conv already folded in -> lane-dense (HW, Cm)
        o_ref[b * HW:(b + 1) * HW, :] = (
            jnp.dot(prob, hi[b * HW:(b + 1) * HW, :],
                    preferred_element_type=jnp.float32) + ib_ref[...])

    # i_bn (batch stats) + residual, applied in-place on the output tile
    y = o_ref[...]
    imean = jnp.sum(y, axis=0, keepdims=True) * inv_n
    ivar = jnp.maximum(jnp.sum(y * y, axis=0, keepdims=True) * inv_n
                       - imean * imean, 0.0)
    iscale = ibnw_ref[...] * jax.lax.rsqrt(ivar + eps)
    ishift = ibnb_ref[...] - imean * iscale
    o_ref[...] = (y * iscale + ishift + x).astype(o_ref.dtype)


def fused_attention(x2d, w_fgh, b_fgh, bn_w, bn_b, i_w, i_b, i_bn_w, i_bn_b,
                    *, B, HW, C8):
    N, Cm = x2d.shape
    kern = functools.partial(_fused_attention_kernel, B=B, HW=HW, C8=C8)
    # single-block kernel: everything stays in VMEM (fgh, att, i output never
    # touch HBM).  TODO(synk): for large B*HW add a grid with two-pass BN stats.
    return pl.pallas_call(
        kern,
        out_shape=jax.ShapeDtypeStruct((N, Cm), jnp.float32),
    )(x2d, w_fgh, b_fgh, bn_w, bn_b, i_w, i_b, i_bn_w, i_bn_b)


# ------------------------------- glue (JAX) ---------------------------------

def attention_forward(x_nchw, p):
    x = jnp.transpose(x_nchw, (0, 2, 3, 1)).astype(jnp.float32)     # NHWC
    B, H, W, _ = x.shape
    Cm = p["conv1_w"].shape[-1]
    C8 = Cm // 8
    HW = H * W

    # conv1 (3x3, no bias)
    out = conv3x3(x, p["conv1_w"])                                  # (B, H, W, Cm)
    x2d = out.reshape(B * HW, Cm)

    # pack f/g/h 1x1-conv weights and BatchNorm params; gamma folds exactly
    # into the h BN affine: gamma * h_bn(v) == BN with (gamma*w, gamma*b).
    w_fgh = jnp.concatenate([p["f_w"], p["g_w"], p["h_w"]], axis=1)          # (Cm, 3*C8)
    b_fgh = jnp.concatenate([p["f_b"], p["g_b"], p["h_b"]]).reshape(1, 3 * C8)
    bn_w = jnp.concatenate([p["f_bn_w"], p["g_bn_w"],
                            p["gamma"] * p["h_bn_w"]]).reshape(1, 3 * C8)
    bn_b = jnp.concatenate([p["f_bn_b"], p["g_bn_b"],
                            p["gamma"] * p["h_bn_b"]]).reshape(1, 3 * C8)

    post2d = fused_attention(
        x2d, w_fgh, b_fgh, bn_w, bn_b,
        p["i_w"], p["i_b"].reshape(1, Cm),
        p["i_bn_w"].reshape(1, Cm), p["i_bn_b"].reshape(1, Cm),
        B=B, HW=HW, C8=C8)                                          # (B*HW, Cm)

    # conv2 (3x3, no bias)
    y = conv3x3(post2d.reshape(B, H, W, Cm), p["conv2_w"])          # (B, H, W, Cout)
    return jnp.transpose(y, (0, 3, 1, 2))                           # back to NCHW


def init_params(key, cin, cm, cout):
    c8 = cm // 8
    ks = jax.random.split(key, 18)
    n = lambda k, shp, s=0.1: (s * jax.random.normal(k, shp)).astype(jnp.float32)
    return {
        "conv1_w": n(ks[0], (3, 3, cin, cm)),
        "f_w": n(ks[1], (cm, c8)), "f_b": n(ks[2], (c8,)),
        "f_bn_w": 1.0 + n(ks[3], (c8,)), "f_bn_b": n(ks[4], (c8,)),
        "g_w": n(ks[5], (cm, c8)), "g_b": n(ks[6], (c8,)),
        "g_bn_w": 1.0 + n(ks[7], (c8,)), "g_bn_b": n(ks[8], (c8,)),
        "h_w": n(ks[9], (cm, c8)), "h_b": n(ks[10], (c8,)),
        "h_bn_w": 1.0 + n(ks[11], (c8,)), "h_bn_b": n(ks[12], (c8,)),
        "i_w": n(ks[13], (c8, cm)), "i_b": n(ks[14], (cm,)),
        "i_bn_w": 1.0 + n(ks[15], (cm,)), "i_bn_b": n(ks[16], (cm,)),
        # PyTorch inits gamma to 0; use a deterministic nonzero value so the
        # attention bmm path is actually exercised.
        "gamma": jnp.float32(0.5),
        "conv2_w": n(ks[17], (3, 3, cm, cout)),
    }


if __name__ == "__main__":
    key = jax.random.PRNGKey(0)
    k_p, k_x = jax.random.split(key)

    B, Cin, Cm, Cout, H, W = 2, 16, 32, 16, 16, 16   # middle//8 == 4
    params = init_params(k_p, Cin, Cm, Cout)
    x = jax.random.normal(k_x, (B, Cin, H, W), jnp.float32)   # NCHW like PyTorch

    y = jax.jit(attention_forward)(x, params)
    jax.block_until_ready(y)
    assert y.shape == (B, Cout, H, W)
    print("KERNEL_OK")
</pallas_src>

<mosaic_0001>
module attributes {stable_mosaic.version = 11 : i64} {
  func.func @_conv3x3_kernel(%arg0: i32, %arg1: memref<1x18x18x16xf32, #tpu.memory_space<vmem>>, %arg2: memref<144x32xbf16, #tpu.memory_space<vmem>>, %arg3: memref<1x16x16x32xf32, #tpu.memory_space<vmem>>, %arg4: memref<256x144xf32, #tpu.memory_space<vmem>>) attributes {dimension_semantics = [#tpu.dimension_semantics<parallel>], iteration_bounds = array<i64: 2>, scalar_prefetch = 0 : i64, scratch_operands = 1 : i64, tpu.core_type = #tpu.core_type<tc>, window_params = [{transform_indices = @transform_0, window_bounds = array<i64: 1, 18, 18, 16>}, {pipeline_mode = #tpu.pipeline_mode<synchronous>, transform_indices = @transform_1, window_bounds = array<i64: 144, 32>}, {transform_indices = @transform_2, window_bounds = array<i64: 1, 16, 16, 32>}]} {
    %c0 = arith.constant 0 : index
    %c0_0 = arith.constant 0 : index
    %c0_1 = arith.constant 0 : index
    %c0_2 = arith.constant 0 : index
    %0 = vector.load %arg1[%c0, %c0_0, %c0_1, %c0_2] : memref<1x18x18x16xf32, #tpu.memory_space<vmem>>, vector<1x16x16x16xf32>
    %1 = vector.shape_cast %0 : vector<1x16x16x16xf32> to vector<16x16x16xf32>
    %2 = vector.shape_cast %1 : vector<16x16x16xf32> to vector<256x16xf32>
    %c0_3 = arith.constant 0 : index
    %c0_4 = arith.constant 0 : index
    %3 = vector.load %arg4[%c0_3, %c0_4] : memref<256x144xf32, #tpu.memory_space<vmem>>, vector<256x16xf32>
    tpu.vector_store %arg4[%c0_3, %c0_4], %2 {strides = array<i32>} : memref<256x144xf32, #tpu.memory_space<vmem>>, vector<256x16xf32>,
    %c0_5 = arith.constant 0 : index
    %c0_6 = arith.constant 0 : index
    %c1 = arith.constant 1 : index
    %c0_7 = arith.constant 0 : index
    %4 = vector.load %arg1[%c0_5, %c0_6, %c1, %c0_7] : memref<1x18x18x16xf32, #tpu.memory_space<vmem>>, vector<1x16x16x16xf32>
    %5 = vector.shape_cast %4 : vector<1x16x16x16xf32> to vector<16x16x16xf32>
    %6 = vector.shape_cast %5 : vector<16x16x16xf32> to vector<256x16xf32>
    %c0_8 = arith.constant 0 : index
    %c16 = arith.constant 16 : index
    %7 = vector.load %arg4[%c0_8, %c16] : memref<256x144xf32, #tpu.memory_space<vmem>>, vector<256x16xf32>
    tpu.vector_store %arg4[%c0_8, %c16], %6 {strides = array<i32>} : memref<256x144xf32, #tpu.memory_space<vmem>>, vector<256x16xf32>,
    %c0_9 = arith.constant 0 : index
    %c0_10 = arith.constant 0 : index
    %c2 = arith.constant 2 : index
    %c0_11 = arith.constant 0 : index
    %8 = vector.load %arg1[%c0_9, %c0_10, %c2, %c0_11] : memref<1x18x18x16xf32, #tpu.memory_space<vmem>>, vector<1x16x16x16xf32>
    %9 = vector.shape_cast %8 : vector<1x16x16x16xf32> to vector<16x16x16xf32>
    %10 = vector.shape_cast %9 : vector<16x16x16xf32> to vector<256x16xf32>
    %c0_12 = arith.constant 0 : index
    %c32 = arith.constant 32 : index
    %11 = vector.load %arg4[%c0_12, %c32] : memref<256x144xf32, #tpu.memory_space<vmem>>, vector<256x16xf32>
    tpu.vector_store %arg4[%c0_12, %c32], %10 {strides = array<i32>} : memref<256x144xf32, #tpu.memory_space<vmem>>, vector<256x16xf32>,
    %c0_13 = arith.constant 0 : index
    %c1_14 = arith.constant 1 : index
    %c0_15 = arith.constant 0 : index
    %c0_16 = arith.constant 0 : index
    %12 = vector.load %arg1[%c0_13, %c1_14, %c0_15, %c0_16] : memref<1x18x18x16xf32, #tpu.memory_space<vmem>>, vector<1x16x16x16xf32>
    %13 = vector.shape_cast %12 : vector<1x16x16x16xf32> to vector<16x16x16xf32>
    %14 = vector.shape_cast %13 : vector<16x16x16xf32> to vector<256x16xf32>
    %c0_17 = arith.constant 0 : index
    %c48 = arith.constant 48 : index
    %15 = vector.load %arg4[%c0_17, %c48] : memref<256x144xf32, #tpu.memory_space<vmem>>, vector<256x16xf32>
    tpu.vector_store %arg4[%c0_17, %c48], %14 {strides = array<i32>} : memref<256x144xf32, #tpu.memory_space<vmem>>, vector<256x16xf32>,
    %c0_18 = arith.constant 0 : index
    %c1_19 = arith.constant 1 : index
    %c1_20 = arith.constant 1 : index
    %c0_21 = arith.constant 0 : index
    %16 = vector.load %arg1[%c0_18, %c1_19, %c1_20, %c0_21] : memref<1x18x18x16xf32, #tpu.memory_space<vmem>>, vector<1x16x16x16xf32>
    %17 = vector.shape_cast %16 : vector<1x16x16x16xf32> to vector<16x16x16xf32>
    %18 = vector.shape_cast %17 : vector<16x16x16xf32> to vector<256x16xf32>
    %c0_22 = arith.constant 0 : index
    %c64 = arith.constant 64 : index
    %19 = vector.load %arg4[%c0_22, %c64] : memref<256x144xf32, #tpu.memory_space<vmem>>, vector<256x16xf32>
    tpu.vector_store %arg4[%c0_22, %c64], %18 {strides = array<i32>} : memref<256x144xf32, #tpu.memory_space<vmem>>, vector<256x16xf32>,
    %c0_23 = arith.constant 0 : index
    %c1_24 = arith.constant 1 : index
    %c2_25 = arith.constant 2 : index
    %c0_26 = arith.constant 0 : index
    %20 = vector.load %arg1[%c0_23, %c1_24, %c2_25, %c0_26] : memref<1x18x18x16xf32, #tpu.memory_space<vmem>>, vector<1x16x16x16xf32>
    %21 = vector.shape_cast %20 : vector<1x16x16x16xf32> to vector<16x16x16xf32>
    %22 = vector.shape_cast %21 : vector<16x16x16xf32> to vector<256x16xf32>
    %c0_27 = arith.constant 0 : index
    %c80 = arith.constant 80 : index
    %23 = vector.load %arg4[%c0_27, %c80] : memref<256x144xf32, #tpu.memory_space<vmem>>, vector<256x16xf32>
    tpu.vector_store %arg4[%c0_27, %c80], %22 {strides = array<i32>} : memref<256x144xf32, #tpu.memory_space<vmem>>, vector<256x16xf32>,
    %c0_28 = arith.constant 0 : index
    %c2_29 = arith.constant 2 : index
    %c0_30 = arith.constant 0 : index
    %c0_31 = arith.constant 0 : index
    %24 = vector.load %arg1[%c0_28, %c2_29, %c0_30, %c0_31] : memref<1x18x18x16xf32, #tpu.memory_space<vmem>>, vector<1x16x16x16xf32>
    %25 = vector.shape_cast %24 : vector<1x16x16x16xf32> to vector<16x16x16xf32>
    %26 = vector.shape_cast %25 : vector<16x16x16xf32> to vector<256x16xf32>
    %c0_32 = arith.constant 0 : index
    %c96 = arith.constant 96 : index
    %27 = vector.load %arg4[%c0_32, %c96] : memref<256x144xf32, #tpu.memory_space<vmem>>, vector<256x16xf32>
    tpu.vector_store %arg4[%c0_32, %c96], %26 {strides = array<i32>} : memref<256x144xf32, #tpu.memory_space<vmem>>, vector<256x16xf32>,
    %c0_33 = arith.constant 0 : index
    %c2_34 = arith.constant 2 : index
    %c1_35 = arith.constant 1 : index
    %c0_36 = arith.constant 0 : index
    %28 = vector.load %arg1[%c0_33, %c2_34, %c1_35, %c0_36] : memref<1x18x18x16xf32, #tpu.memory_space<vmem>>, vector<1x16x16x16xf32>
    %29 = vector.shape_cast %28 : vector<1x16x16x16xf32> to vector<16x16x16xf32>
    %30 = vector.shape_cast %29 : vector<16x16x16xf32> to vector<256x16xf32>
    %c0_37 = arith.constant 0 : index
    %c112 = arith.constant 112 : index
    %31 = vector.load %arg4[%c0_37, %c112] : memref<256x144xf32, #tpu.memory_space<vmem>>, vector<256x16xf32>
    tpu.vector_store %arg4[%c0_37, %c112], %30 {strides = array<i32>} : memref<256x144xf32, #tpu.memory_space<vmem>>, vector<256x16xf32>,
    %c0_38 = arith.constant 0 : index
    %c2_39 = arith.constant 2 : index
    %c2_40 = arith.constant 2 : index
    %c0_41 = arith.constant 0 : index
    %32 = vector.load %arg1[%c0_38, %c2_39, %c2_40, %c0_41] : memref<1x18x18x16xf32, #tpu.memory_space<vmem>>, vector<1x16x16x16xf32>
    %33 = vector.shape_cast %32 : vector<1x16x16x16xf32> to vector<16x16x16xf32>
    %34 = vector.shape_cast %33 : vector<16x16x16xf32> to vector<256x16xf32>
    %c0_42 = arith.constant 0 : index
    %c128 = arith.constant 128 : index
    %35 = vector.load %arg4[%c0_42, %c128] : memref<256x144xf32, #tpu.memory_space<vmem>>, vector<256x16xf32>
    tpu.vector_store %arg4[%c0_42, %c128], %34 {strides = array<i32>} : memref<256x144xf32, #tpu.memory_space<vmem>>, vector<256x16xf32>,
    %c0_43 = arith.constant 0 : index
    %c0_44 = arith.constant 0 : index
    %36 = vector.load %arg4[%c0_43, %c0_44] : memref<256x144xf32, #tpu.memory_space<vmem>>, vector<256x144xf32>
    %37 = arith.truncf %36 : vector<256x144xf32> to vector<256x144xbf16>
    %c0_45 = arith.constant 0 : index
    %c0_46 = arith.constant 0 : index
    %38 = vector.load %arg2[%c0_45, %c0_46] : memref<144x32xbf16, #tpu.memory_space<vmem>>, vector<144x32xbf16>
    %cst = arith.constant dense<0.000000e+00> : vector<256x32xf32>
    %39 = tpu.matmul %37, %38, %cst {dimension_numbers = #tpu.dot_dimension_numbers<[1], [0], [0], [1], [0, 0, 1, 1], [], []>} : vector<256x144xbf16>, vector<144x32xbf16>, vector<256x32xf32> -> vector<256x32xf32>
    %40 = vector.shape_cast %39 : vector<256x32xf32> to vector<16x16x32xf32>
    %c0_47 = arith.constant 0 : index
    %c0_48 = arith.constant 0 : index
    %c0_49 = arith.constant 0 : index
    %c0_50 = arith.constant 0 : index
    %41 = vector.load %arg3[%c0_47, %c0_48, %c0_49, %c0_50] : memref<1x16x16x32xf32, #tpu.memory_space<vmem>>, vector<1x16x16x32xf32>
    %42 = vector.shape_cast %41 : vector<1x16x16x32xf32> to vector<16x16x32xf32>
    %43 = vector.shape_cast %40 : vector<16x16x32xf32> to vector<1x16x16x32xf32>
    tpu.vector_store %arg3[%c0_47, %c0_48, %c0_49, %c0_50], %43 {strides = array<i32>} : memref<1x16x16x32xf32, #tpu.memory_space<vmem>>, vector<1x16x16x32xf32>,
    return
  }
  func.func @transform_0(%arg0: i32) -> (i32, i32, i32, i32) {
    %c0_i32 = arith.constant 0 : i32
    %c0_i32_0 = arith.constant 0 : i32
    %c0_i32_1 = arith.constant 0 : i32
    %c0_i32_2 = arith.constant 0 : i32
    return %arg0, %c0_i32, %c0_i32_0, %c0_i32_1 : i32, i32, i32, i32
  }
  func.func @transform_1(%arg0: i32) -> (i32, i32) {
    %c0_i32 = arith.constant 0 : i32
    %c0_i32_0 = arith.constant 0 : i32
    %c0_i32_1 = arith.constant 0 : i32
    return %c0_i32, %c0_i32_0 : i32, i32
  }
  func.func @transform_2(%arg0: i32) -> (i32, i32, i32, i32) {
    %c0_i32 = arith.constant 0 : i32
    %c0_i32_0 = arith.constant 0 : i32
    %c0_i32_1 = arith.constant 0 : i32
    %c0_i32_2 = arith.constant 0 : i32
    return %arg0, %c0_i32, %c0_i32_0, %c0_i32_1 : i32, i32, i32, i32
  }
}

module attributes {stable_mosaic.version = 11 : i64} {
  func.func @_fused_attention_kernel(%arg0: memref<512x32xf32, #tpu.memory_space<vmem>>, %arg1: memref<32x12xf32, #tpu.memory_space<vmem>>, %arg2: memref<1x12xf32, #tpu.memory_space<vmem>>, %arg3: memref<1x12xf32, #tpu.memory_space<vmem>>, %arg4: memref<1x12xf32, #tpu.memory_space<vmem>>, %arg5: memref<4x32xf32, #tpu.memory_space<vmem>>, %arg6: memref<1x32xf32, #tpu.memory_space<vmem>>, %arg7: memref<1x32xf32, #tpu.memory_space<vmem>>, %arg8: memref<1x32xf32, #tpu.memory_space<vmem>>, %arg9: memref<512x32xf32, #tpu.memory_space<vmem>>) attributes {dimension_semantics = [], scalar_prefetch = 0 : i64, scratch_operands = 0 : i64, tpu.core_type = #tpu.core_type<tc>} {
    %c0 = arith.constant 0 : index
    %c0_0 = arith.constant 0 : index
    %0 = vector.load %arg0[%c0, %c0_0] : memref<512x32xf32, #tpu.memory_space<vmem>>, vector<512x32xf32>
    %c0_1 = arith.constant 0 : index
    %c0_2 = arith.constant 0 : index
    %1 = vector.load %arg1[%c0_1, %c0_2] : memref<32x12xf32, #tpu.memory_space<vmem>>, vector<32x12xf32>
    %cst = arith.constant dense<0.000000e+00> : vector<512x12xf32>
    %2 = tpu.matmul %0, %1, %cst {dimension_numbers = #tpu.dot_dimension_numbers<[1], [0], [0], [1], [0, 0, 1, 1], [], []>} : vector<512x32xf32>, vector<32x12xf32>, vector<512x12xf32> -> vector<512x12xf32>
    %c0_3 = arith.constant 0 : index
    %c0_4 = arith.constant 0 : index
    %3 = vector.load %arg2[%c0_3, %c0_4] : memref<1x12xf32, #tpu.memory_space<vmem>>, vector<1x12xf32>
    %4 = vector.broadcast %3 : vector<1x12xf32> to vector<512x12xf32>
    %5 = arith.addf %2, %4 : vector<512x12xf32>
    %cst_5 = arith.constant dense<0.000000e+00> : vector<12xf32>
    %6 = vector.multi_reduction <add>, %5, %cst_5 [0] : vector<512x12xf32> to vector<12xf32>
    %7 = vector.shape_cast %6 : vector<12xf32> to vector<1x12xf32>
    %cst_6 = arith.constant 0.001953125 : f32
    %8 = vector.broadcast %cst_6 : f32 to vector<1x12xf32>
    %9 = arith.mulf %7, %8 : vector<1x12xf32>
    %10 = arith.mulf %5, %5 : vector<512x12xf32>
    %cst_7 = arith.constant dense<0.000000e+00> : vector<12xf32>
    %11 = vector.multi_reduction <add>, %10, %cst_7 [0] : vector<512x12xf32> to vector<12xf32>
    %12 = vector.shape_cast %11 : vector<12xf32> to vector<1x12xf32>
    %cst_8 = arith.constant 0.001953125 : f32
    %13 = vector.broadcast %cst_8 : f32 to vector<1x12xf32>
    %14 = arith.mulf %12, %13 : vector<1x12xf32>
    %15 = arith.mulf %9, %9 : vector<1x12xf32>
    %16 = arith.subf %14, %15 : vector<1x12xf32>
    %cst_9 = arith.constant 0.000000e+00 : f32
    %17 = vector.broadcast %cst_9 : f32 to vector<1x12xf32>
    %18 = arith.maximumf %16, %17 : vector<1x12xf32>
    %c0_10 = arith.constant 0 : index
    %c0_11 = arith.constant 0 : index
    %19 = vector.load %arg3[%c0_10, %c0_11] : memref<1x12xf32, #tpu.memory_space<vmem>>, vector<1x12xf32>
    %cst_12 = arith.constant 9.99999974E-6 : f32
    %20 = vector.broadcast %cst_12 : f32 to vector<1x12xf32>
    %21 = arith.addf %18, %20 : vector<1x12xf32>
    %22 = math.rsqrt %21 : vector<1x12xf32>
    %23 = arith.mulf %19, %22 : vector<1x12xf32>
    %c0_13 = arith.constant 0 : index
    %c0_14 = arith.constant 0 : index
    %24 = vector.load %arg4[%c0_13, %c0_14] : memref<1x12xf32, #tpu.memory_space<vmem>>, vector<1x12xf32>
    %25 = arith.mulf %9, %23 : vector<1x12xf32>
    %26 = arith.subf %24, %25 : vector<1x12xf32>
    %27 = vector.broadcast %23 : vector<1x12xf32> to vector<512x12xf32>
    %28 = arith.mulf %5, %27 : vector<512x12xf32>
    %29 = vector.broadcast %26 : vector<1x12xf32> to vector<512x12xf32>
    %30 = arith.addf %28, %29 : vector<512x12xf32>
    %31 = vector.extract_strided_slice %30 {offsets = [0, 8], sizes = [512, 4], strides = [1, 1]} : vector<512x12xf32> to vector<512x4xf32>
    %c0_15 = arith.constant 0 : index
    %c0_16 = arith.constant 0 : index
    %32 = vector.load %arg5[%c0_15, %c0_16] : memref<4x32xf32, #tpu.memory_space<vmem>>, vector<4x32xf32>
    %cst_17 = arith.constant dense<0.000000e+00> : vector<512x32xf32>
    %33 = tpu.matmul %31, %32, %cst_17 {dimension_numbers = #tpu.dot_dimension_numbers<[1], [0], [0], [1], [0, 0, 1, 1], [], []>} : vector<512x4xf32>, vector<4x32xf32>, vector<512x32xf32> -> vector<512x32xf32>
    %34 = vector.extract_strided_slice %30 {offsets = [0, 0], sizes = [256, 4], strides = [1, 1]} : vector<512x12xf32> to vector<256x4xf32>
    %35 = vector.extract_strided_slice %30 {offsets = [0, 4], sizes = [256, 4], strides = [1, 1]} : vector<512x12xf32> to vector<256x4xf32>
    %cst_18 = arith.constant dense<0.000000e+00> : vector<256x256xf32>
    %36 = tpu.matmul %34, %35, %cst_18 {dimension_numbers = #tpu.dot_dimension_numbers<[1], [1], [0], [0], [0, 0, 1, 0], [], []>} : vector<256x4xf32>, vector<256x4xf32>, vector<256x256xf32> -> vector<256x256xf32>
    %cst_19 = arith.constant dense<0xFF800000> : vector<256xf32>
    %37 = vector.multi_reduction <maximumf>, %36, %cst_19 [0] : vector<256x256xf32> to vector<256xf32>
    %38 = vector.shape_cast %37 : vector<256xf32> to vector<1x256xf32>
    %39 = vector.broadcast %38 : vector<1x256xf32> to vector<256x256xf32>
    %40 = arith.subf %36, %39 : vector<256x256xf32>
    %41 = math.exp %40 : vector<256x256xf32>
    %cst_20 = arith.constant dense<0.000000e+00> : vector<256xf32>
    %42 = vector.multi_reduction <add>, %41, %cst_20 [0] : vector<256x256xf32> to vector<256xf32>
    %43 = vector.shape_cast %42 : vector<256xf32> to vector<1x256xf32>
    %44 = tpu.reciprocal %43 {approx = true} : vector<1x256xf32> -> vector<1x256xf32>
    %45 = vector.broadcast %44 : vector<1x256xf32> to vector<256x256xf32>
    %46 = arith.mulf %41, %45 : vector<256x256xf32>
    %47 = vector.extract_strided_slice %33 {offsets = [0, 0], sizes = [256, 32], strides = [1, 1]} : vector<512x32xf32> to vector<256x32xf32>
    %cst_21 = arith.constant dense<0.000000e+00> : vector<256x32xf32>
    %48 = tpu.matmul %46, %47, %cst_21 {dimension_numbers = #tpu.dot_dimension_numbers<[1], [0], [0], [1], [0, 0, 1, 1], [], []>} : vector<256x256xf32>, vector<256x32xf32>, vector<256x32xf32> -> vector<256x32xf32>
    %c0_22 = arith.constant 0 : index
    %c0_23 = arith.constant 0 : index
    %49 = vector.load %arg6[%c0_22, %c0_23] : memref<1x32xf32, #tpu.memory_space<vmem>>, vector<1x32xf32>
    %50 = vector.broadcast %49 : vector<1x32xf32> to vector<256x32xf32>
    %51 = arith.addf %48, %50 : vector<256x32xf32>
    %c0_24 = arith.constant 0 : index
    %c0_25 = arith.constant 0 : index
    %52 = vector.load %arg9[%c0_24, %c0_25] : memref<512x32xf32, #tpu.memory_space<vmem>>, vector<256x32xf32>
    tpu.vector_store %arg9[%c0_24, %c0_25], %51 {strides = array<i32>} : memref<512x32xf32, #tpu.memory_space<vmem>>, vector<256x32xf32>,
    %53 = vector.extract_strided_slice %30 {offsets = [256, 0], sizes = [256, 4], strides = [1, 1]} : vector<512x12xf32> to vector<256x4xf32>
    %54 = vector.extract_strided_slice %30 {offsets = [256, 4], sizes = [256, 4], strides = [1, 1]} : vector<512x12xf32> to vector<256x4xf32>
    %cst_26 = arith.constant dense<0.000000e+00> : vector<256x256xf32>
    %55 = tpu.matmul %53, %54, %cst_26 {dimension_numbers = #tpu.dot_dimension_numbers<[1], [1], [0], [0], [0, 0, 1, 0], [], []>} : vector<256x4xf32>, vector<256x4xf32>, vector<256x256xf32> -> vector<256x256xf32>
    %cst_27 = arith.constant dense<0xFF800000> : vector<256xf32>
    %56 = vector.multi_reduction <maximumf>, %55, %cst_27 [0] : vector<256x256xf32> to vector<256xf32>
    %57 = vector.shape_cast %56 : vector<256xf32> to vector<1x256xf32>
    %58 = vector.broadcast %57 : vector<1x256xf32> to vector<256x256xf32>
    %59 = arith.subf %55, %58 : vector<256x256xf32>
    %60 = math.exp %59 : vector<256x256xf32>
    %cst_28 = arith.constant dense<0.000000e+00> : vector<256xf32>
    %61 = vector.multi_reduction <add>, %60, %cst_28 [0] : vector<256x256xf32> to vector<256xf32>
    %62 = vector.shape_cast %61 : vector<256xf32> to vector<1x256xf32>
    %63 = tpu.reciprocal %62 {approx = true} : vector<1x256xf32> -> vector<1x256xf32>
    %64 = vector.broadcast %63 : vector<1x256xf32> to vector<256x256xf32>
    %65 = arith.mulf %60, %64 : vector<256x256xf32>
    %66 = vector.extract_strided_slice %33 {offsets = [256, 0], sizes = [256, 32], strides = [1, 1]} : vector<512x32xf32> to vector<256x32xf32>
    %cst_29 = arith.constant dense<0.000000e+00> : vector<256x32xf32>
    %67 = tpu.matmul %65, %66, %cst_29 {dimension_numbers = #tpu.dot_dimension_numbers<[1], [0], [0], [1], [0, 0, 1, 1], [], []>} : vector<256x256xf32>, vector<256x32xf32>, vector<256x32xf32> -> vector<256x32xf32>
    %c0_30 = arith.constant 0 : index
    %c0_31 = arith.constant 0 : index
    %68 = vector.load %arg6[%c0_30, %c0_31] : memref<1x32xf32, #tpu.memory_space<vmem>>, vector<1x32xf32>
    %69 = vector.broadcast %68 : vector<1x32xf32> to vector<256x32xf32>
    %70 = arith.addf %67, %69 : vector<256x32xf32>
    %c256 = arith.constant 256 : index
    %c0_32 = arith.constant 0 : index
    %71 = vector.load %arg9[%c256, %c0_32] : memref<512x32xf32, #tpu.memory_space<vmem>>, vector<256x32xf32>
    tpu.vector_store %arg9[%c256, %c0_32], %70 {strides = array<i32>} : memref<512x32xf32, #tpu.memory_space<vmem>>, vector<256x32xf32>,
    %c0_33 = arith.constant 0 : index
    %c0_34 = arith.constant 0 : index
    %72 = vector.load %arg9[%c0_33, %c0_34] : memref<512x32xf32, #tpu.memory_space<vmem>>, vector<512x32xf32>
    %cst_35 = arith.constant dense<0.000000e+00> : vector<32xf32>
    %73 = vector.multi_reduction <add>, %72, %cst_35 [0] : vector<512x32xf32> to vector<32xf32>
    %74 = vector.shape_cast %73 : vector<32xf32> to vector<1x32xf32>
    %cst_36 = arith.constant 0.001953125 : f32
    %75 = vector.broadcast %cst_36 : f32 to vector<1x32xf32>
    %76 = arith.mulf %74, %75 : vector<1x32xf32>
    %77 = arith.mulf %72, %72 : vector<512x32xf32>
    %cst_37 = arith.constant dense<0.000000e+00> : vector<32xf32>
    %78 = vector.multi_reduction <add>, %77, %cst_37 [0] : vector<512x32xf32> to vector<32xf32>
    %79 = vector.shape_cast %78 : vector<32xf32> to vector<1x32xf32>
    %cst_38 = arith.constant 0.001953125 : f32
    %80 = vector.broadcast %cst_38 : f32 to vector<1x32xf32>
    %81 = arith.mulf %79, %80 : vector<1x32xf32>
    %82 = arith.mulf %76, %76 : vector<1x32xf32>
    %83 = arith.subf %81, %82 : vector<1x32xf32>
    %cst_39 = arith.constant 0.000000e+00 : f32
    %84 = vector.broadcast %cst_39 : f32 to vector<1x32xf32>
    %85 = arith.maximumf %83, %84 : vector<1x32xf32>
    %c0_40 = arith.constant 0 : index
    %c0_41 = arith.constant 0 : index
    %86 = vector.load %arg7[%c0_40, %c0_41] : memref<1x32xf32, #tpu.memory_space<vmem>>, vector<1x32xf32>
    %cst_42 = arith.constant 9.99999974E-6 : f32
    %87 = vector.broadcast %cst_42 : f32 to vector<1x32xf32>
    %88 = arith.addf %85, %87 : vector<1x32xf32>
    %89 = math.rsqrt %88 : vector<1x32xf32>
    %90 = arith.mulf %86, %89 : vector<1x32xf32>
    %c0_43 = arith.constant 0 : index
    %c0_44 = arith.constant 0 : index
    %91 = vector.load %arg8[%c0_43, %c0_44] : memref<1x32xf32, #tpu.memory_space<vmem>>, vector<1x32xf32>
    %92 = arith.mulf %76, %90 : vector<1x32xf32>
    %93 = arith.subf %91, %92 : vector<1x32xf32>
    %94 = vector.broadcast %90 : vector<1x32xf32> to vector<512x32xf32>
    %95 = arith.mulf %72, %94 : vector<512x32xf32>
    %96 = vector.broadcast %93 : vector<1x32xf32> to vector<512x32xf32>
    %97 = arith.addf %95, %96 : vector<512x32xf32>
    %98 = arith.addf %97, %0 : vector<512x32xf32>
    %c0_45 = arith.constant 0 : index
    %c0_46 = arith.constant 0 : index
    %99 = vector.load %arg9[%c0_45, %c0_46] : memref<512x32xf32, #tpu.memory_space<vmem>>, vector<512x32xf32>
    tpu.vector_store %arg9[%c0_45, %c0_46], %98 {strides = array<i32>} : memref<512x32xf32, #tpu.memory_space<vmem>>, vector<512x32xf32>,
    return
  }
}

module attributes {stable_mosaic.version = 11 : i64} {
  func.func @_conv3x3_kernel(%arg0: i32, %arg1: memref<1x18x18x32xf32, #tpu.memory_space<vmem>>, %arg2: memref<288x16xbf16, #tpu.memory_space<vmem>>, %arg3: memref<1x16x16x16xf32, #tpu.memory_space<vmem>>, %arg4: memref<256x288xf32, #tpu.memory_space<vmem>>) attributes {dimension_semantics = [#tpu.dimension_semantics<parallel>], iteration_bounds = array<i64: 2>, scalar_prefetch = 0 : i64, scratch_operands = 1 : i64, tpu.core_type = #tpu.core_type<tc>, window_params = [{transform_indices = @transform_0, window_bounds = array<i64: 1, 18, 18, 32>}, {pipeline_mode = #tpu.pipeline_mode<synchronous>, transform_indices = @transform_1, window_bounds = array<i64: 288, 16>}, {transform_indices = @transform_2, window_bounds = array<i64: 1, 16, 16, 16>}]} {
    %c0 = arith.constant 0 : index
    %c0_0 = arith.constant 0 : index
    %c0_1 = arith.constant 0 : index
    %c0_2 = arith.constant 0 : index
    %0 = vector.load %arg1[%c0, %c0_0, %c0_1, %c0_2] : memref<1x18x18x32xf32, #tpu.memory_space<vmem>>, vector<1x16x16x32xf32>
    %1 = vector.shape_cast %0 : vector<1x16x16x32xf32> to vector<16x16x32xf32>
    %2 = vector.shape_cast %1 : vector<16x16x32xf32> to vector<256x32xf32>
    %c0_3 = arith.constant 0 : index
    %c0_4 = arith.constant 0 : index
    %3 = vector.load %arg4[%c0_3, %c0_4] : memref<256x288xf32, #tpu.memory_space<vmem>>, vector<256x32xf32>
    tpu.vector_store %arg4[%c0_3, %c0_4], %2 {strides = array<i32>} : memref<256x288xf32, #tpu.memory_space<vmem>>, vector<256x32xf32>,
    %c0_5 = arith.constant 0 : index
    %c0_6 = arith.constant 0 : index
    %c1 = arith.constant 1 : index
    %c0_7 = arith.constant 0 : index
    %4 = vector.load %arg1[%c0_5, %c0_6, %c1, %c0_7] : memref<1x18x18x32xf32, #tpu.memory_space<vmem>>, vector<1x16x16x32xf32>
    %5 = vector.shape_cast %4 : vector<1x16x16x32xf32> to vector<16x16x32xf32>
    %6 = vector.shape_cast %5 : vector<16x16x32xf32> to vector<256x32xf32>
    %c0_8 = arith.constant 0 : index
    %c32 = arith.constant 32 : index
    %7 = vector.load %arg4[%c0_8, %c32] : memref<256x288xf32, #tpu.memory_space<vmem>>, vector<256x32xf32>
    tpu.vector_store %arg4[%c0_8, %c32], %6 {strides = array<i32>} : memref<256x288xf32, #tpu.memory_space<vmem>>, vector<256x32xf32>,
    %c0_9 = arith.constant 0 : index
    %c0_10 = arith.constant 0 : index
    %c2 = arith.constant 2 : index
    %c0_11 = arith.constant 0 : index
    %8 = vector.load %arg1[%c0_9, %c0_10, %c2, %c0_11] : memref<1x18x18x32xf32, #tpu.memory_space<vmem>>, vector<1x16x16x32xf32>
    %9 = vector.shape_cast %8 : vector<1x16x16x32xf32> to vector<16x16x32xf32>
    %10 = vector.shape_cast %9 : vector<16x16x32xf32> to vector<256x32xf32>
    %c0_12 = arith.constant 0 : index
    %c64 = arith.constant 64 : index
    %11 = vector.load %arg4[%c0_12, %c64] : memref<256x288xf32, #tpu.memory_space<vmem>>, vector<256x32xf32>
    tpu.vector_store %arg4[%c0_12, %c64], %10 {strides = array<i32>} : memref<256x288xf32, #tpu.memory_space<vmem>>, vector<256x32xf32>,
    %c0_13 = arith.constant 0 : index
    %c1_14 = arith.constant 1 : index
    %c0_15 = arith.constant 0 : index
    %c0_16 = arith.constant 0 : index
    %12 = vector.load %arg1[%c0_13, %c1_14, %c0_15, %c0_16] : memref<1x18x18x32xf32, #tpu.memory_space<vmem>>, vector<1x16x16x32xf32>
    %13 = vector.shape_cast %12 : vector<1x16x16x32xf32> to vector<16x16x32xf32>
    %14 = vector.shape_cast %13 : vector<16x16x32xf32> to vector<256x32xf32>
    %c0_17 = arith.constant 0 : index
    %c96 = arith.constant 96 : index
    %15 = vector.load %arg4[%c0_17, %c96] : memref<256x288xf32, #tpu.memory_space<vmem>>, vector<256x32xf32>
    tpu.vector_store %arg4[%c0_17, %c96], %14 {strides = array<i32>} : memref<256x288xf32, #tpu.memory_space<vmem>>, vector<256x32xf32>,
    %c0_18 = arith.constant 0 : index
    %c1_19 = arith.constant 1 : index
    %c1_20 = arith.constant 1 : index
    %c0_21 = arith.constant 0 : index
    %16 = vector.load %arg1[%c0_18, %c1_19, %c1_20, %c0_21] : memref<1x18x18x32xf32, #tpu.memory_space<vmem>>, vector<1x16x16x32xf32>
    %17 = vector.shape_cast %16 : vector<1x16x16x32xf32> to vector<16x16x32xf32>
    %18 = vector.shape_cast %17 : vector<16x16x32xf32> to vector<256x32xf32>
    %c0_22 = arith.constant 0 : index
    %c128 = arith.constant 128 : index
    %19 = vector.load %arg4[%c0_22, %c128] : memref<256x288xf32, #tpu.memory_space<vmem>>, vector<256x32xf32>
    tpu.vector_store %arg4[%c0_22, %c128], %18 {strides = array<i32>} : memref<256x288xf32, #tpu.memory_space<vmem>>, vector<256x32xf32>,
    %c0_23 = arith.constant 0 : index
    %c1_24 = arith.constant 1 : index
    %c2_25 = arith.constant 2 : index
    %c0_26 = arith.constant 0 : index
    %20 = vector.load %arg1[%c0_23, %c1_24, %c2_25, %c0_26] : memref<1x18x18x32xf32, #tpu.memory_space<vmem>>, vector<1x16x16x32xf32>
    %21 = vector.shape_cast %20 : vector<1x16x16x32xf32> to vector<16x16x32xf32>
    %22 = vector.shape_cast %21 : vector<16x16x32xf32> to vector<256x32xf32>
    %c0_27 = arith.constant 0 : index
    %c160 = arith.constant 160 : index
    %23 = vector.load %arg4[%c0_27, %c160] : memref<256x288xf32, #tpu.memory_space<vmem>>, vector<256x32xf32>
    tpu.vector_store %arg4[%c0_27, %c160], %22 {strides = array<i32>} : memref<256x288xf32, #tpu.memory_space<vmem>>, vector<256x32xf32>,
    %c0_28 = arith.constant 0 : index
    %c2_29 = arith.constant 2 : index
    %c0_30 = arith.constant 0 : index
    %c0_31 = arith.constant 0 : index
    %24 = vector.load %arg1[%c0_28, %c2_29, %c0_30, %c0_31] : memref<1x18x18x32xf32, #tpu.memory_space<vmem>>, vector<1x16x16x32xf32>
    %25 = vector.shape_cast %24 : vector<1x16x16x32xf32> to vector<16x16x32xf32>
    %26 = vector.shape_cast %25 : vector<16x16x32xf32> to vector<256x32xf32>
    %c0_32 = arith.constant 0 : index
    %c192 = arith.constant 192 : index
    %27 = vector.load %arg4[%c0_32, %c192] : memref<256x288xf32, #tpu.memory_space<vmem>>, vector<256x32xf32>
    tpu.vector_store %arg4[%c0_32, %c192], %26 {strides = array<i32>} : memref<256x288xf32, #tpu.memory_space<vmem>>, vector<256x32xf32>,
    %c0_33 = arith.constant 0 : index
    %c2_34 = arith.constant 2 : index
    %c1_35 = arith.constant 1 : index
    %c0_36 = arith.constant 0 : index
    %28 = vector.load %arg1[%c0_33, %c2_34, %c1_35, %c0_36] : memref<1x18x18x32xf32, #tpu.memory_space<vmem>>, vector<1x16x16x32xf32>
    %29 = vector.shape_cast %28 : vector<1x16x16x32xf32> to vector<16x16x32xf32>
    %30 = vector.shape_cast %29 : vector<16x16x32xf32> to vector<256x32xf32>
    %c0_37 = arith.constant 0 : index
    %c224 = arith.constant 224 : index
    %31 = vector.load %arg4[%c0_37, %c224] : memref<256x288xf32, #tpu.memory_space<vmem>>, vector<256x32xf32>
    tpu.vector_store %arg4[%c0_37, %c224], %30 {strides = array<i32>} : memref<256x288xf32, #tpu.memory_space<vmem>>, vector<256x32xf32>,
    %c0_38 = arith.constant 0 : index
    %c2_39 = arith.constant 2 : index
    %c2_40 = arith.constant 2 : index
    %c0_41 = arith.constant 0 : index
    %32 = vector.load %arg1[%c0_38, %c2_39, %c2_40, %c0_41] : memref<1x18x18x32xf32, #tpu.memory_space<vmem>>, vector<1x16x16x32xf32>
    %33 = vector.shape_cast %32 : vector<1x16x16x32xf32> to vector<16x16x32xf32>
    %34 = vector.shape_cast %33 : vector<16x16x32xf32> to vector<256x32xf32>
    %c0_42 = arith.constant 0 : index
    %c256 = arith.constant 256 : index
    %35 = vector.load %arg4[%c0_42, %c256] : memref<256x288xf32, #tpu.memory_space<vmem>>, vector<256x32xf32>
    tpu.vector_store %arg4[%c0_42, %c256], %34 {strides = array<i32>} : memref<256x288xf32, #tpu.memory_space<vmem>>, vector<256x32xf32>,
    %c0_43 = arith.constant 0 : index
    %c0_44 = arith.constant 0 : index
    %36 = vector.load %arg4[%c0_43, %c0_44] : memref<256x288xf32, #tpu.memory_space<vmem>>, vector<256x288xf32>
    %37 = arith.truncf %36 : vector<256x288xf32> to vector<256x288xbf16>
    %c0_45 = arith.constant 0 : index
    %c0_46 = arith.constant 0 : index
    %38 = vector.load %arg2[%c0_45, %c0_46] : memref<288x16xbf16, #tpu.memory_space<vmem>>, vector<288x16xbf16>
    %cst = arith.constant dense<0.000000e+00> : vector<256x16xf32>
    %39 = tpu.matmul %37, %38, %cst {dimension_numbers = #tpu.dot_dimension_numbers<[1], [0], [0], [1], [0, 0, 1, 1], [], []>} : vector<256x288xbf16>, vector<288x16xbf16>, vector<256x16xf32> -> vector<256x16xf32>
    %40 = vector.shape_cast %39 : vector<256x16xf32> to vector<16x16x16xf32>
    %c0_47 = arith.constant 0 : index
    %c0_48 = arith.constant 0 : index
    %c0_49 = arith.constant 0 : index
    %c0_50 = arith.constant 0 : index
    %41 = vector.load %arg3[%c0_47, %c0_48, %c0_49, %c0_50] : memref<1x16x16x16xf32, #tpu.memory_space<vmem>>, vector<1x16x16x16xf32>
    %42 = vector.shape_cast %41 : vector<1x16x16x16xf32> to vector<16x16x16xf32>
    %43 = vector.shape_cast %40 : vector<16x16x16xf32> to vector<1x16x16x16xf32>
    tpu.vector_store %arg3[%c0_47, %c0_48, %c0_49, %c0_50], %43 {strides = array<i32>} : memref<1x16x16x16xf32, #tpu.memory_space<vmem>>, vector<1x16x16x16xf32>,
    return
  }
  func.func @transform_0(%arg0: i32) -> (i32, i32, i32, i32) {
    %c0_i32 = arith.constant 0 : i32
    %c0_i32_0 = arith.constant 0 : i32
    %c0_i32_1 = arith.constant 0 : i32
    %c0_i32_2 = arith.constant 0 : i32
    return %arg0, %c0_i32, %c0_i32_0, %c0_i32_1 : i32, i32, i32, i32
  }
  func.func @transform_1(%arg0: i32) -> (i32, i32) {
    %c0_i32 = arith.constant 0 : i32
    %c0_i32_0 = arith.constant 0 : i32
    %c0_i32_1 = arith.constant 0 : i32
    return %c0_i32, %c0_i32_0 : i32, i32
  }
  func.func @transform_2(%arg0: i32) -> (i32, i32, i32, i32) {
    %c0_i32 = arith.constant 0 : i32
    %c0_i32_0 = arith.constant 0 : i32
    %c0_i32_1 = arith.constant 0 : i32
    %c0_i32_2 = arith.constant 0 : i32
    return %arg0, %c0_i32, %c0_i32_0, %c0_i32_1 : i32, i32, i32, i32
  }
}

</mosaic_0001>

<bundles_post_ra>
// kernel: attention_forward.3
= control target key start
LH: loop header
LB: loop body
LE: loop exit
PB: predicated region body
PF: predicated region fallthrough
CT: control target
= control target key end

     0   :  { %s2395_s9 = smov 0   ;;  %s3545_s0 = inlined_call_operand.vmem [shape: f32[2,18,18,16], index: 0, kind: input, shape index: {}]   ;;  %s3546_s1 = inlined_call_operand.vmem [shape: bf16[144,32], index: 1, kind: input, shape index: {}]   ;;  %s3547_s2 = inlined_call_operand.vmem [shape: f32[2,16,16,32], index: 2, kind: output, shape index: {}]  }
   0x1 LB: > { %s2092_s10 = sadd.s32 4294967295, %s2370_s9   ;;  %p2096_p0 = scmp.ge.s32.totalorder %s2370_s9, 1  ;;  %s2370_s9 = sphi %s2395_s9, %s12_s9  }
   0x2   : > { %p112_p1 = scmp.lt.s32.totalorder %s2370_s9, 3 }
   0x4   : > { %p113_p2 = pnand %p2096_p0, %p112_p1 }
   0x6   : > { %116 = sbr.rel (%p113_p2) target bundleno = 787 (0x313), region = 28 }
   0xb   : > { %p134_p3 = scmp.lt.s32.totalorder %s2092_s10, 1  ;;  %s2372_s15 = smov 16   ;;  %vm177_vm0 = vcmask 130048   ;;  %vm370_vm1 = vcmask 261248   ;;  %vm563_vm2 = vcmask 392448   ;;  %vm757_vm3 = vcmask 523648  }
   0xc   : > { %s2373_s16 = smov 32   ;;  %s2375_s19 = smov 48   ;;  %vm950_vm4 = vcmask 654848   ;;  %vm1143_vm5 = vcmask 786048   ;;  %vm1337_vm6 = vcmask 917248   ;;  %vm1530_vm7 = vcmask 1048448  }
   0xd   : > { %s3559_s10 = smov (!%p134_p3, %s2092_s10), 1  ;;  %s2376_s24 = smov 64   ;;  %vm2004_vm8 = vcmask 261120  }
   0xe   : > { %s2338_s11 = smul.u32 432, %s3559_s10  ;;  %s2377_s29 = smov 80  }
   0xf   : > { %s2378_s6 = smov 96   ;;  %s2379_s13 = smov 112  }
  0x10   : > { %s2409_s14 = scalar_lea.vmem %s3545_s0, %s2338_s11 }
  0x11   : > { %v2412_v0 = vld [vmem:[%s2409_s14 + $0x19] sm:$0xff]  ;;  %v210_v1 = vld [vmem:[%s2409_s14 + $0x1] sm:$0xff]  ;;  %v211_v3 = vld [vmem:[%s2409_s14 + $0x9] sm:$0xff] }
  0x12   : > { %278 = vrot.lane.b32.xlu1 %v2412_v0, %s2372_s15  ;;  %274 = vrot.lane.b32.xlu0 %v210_v1, %s2372_s15  ;;  %v2419_v2 = vld [vmem:[%s2409_s14 + $0x21] sm:$0xff]  ;;  %v2426_v4 = vld [vmem:[%s2409_s14 + $0x39] sm:$0xff] }
  0x13   : > { %v2429_v5 = vld [vmem:[%s2409_s14 + $0x31] sm:$0xff]  ;;  %v2439_v7 = vld [vmem:[%s2409_s14 + $0x49] sm:$0xff]  ;;  %v2449_v9 = vld [vmem:[%s2409_s14 + $0x61] sm:$0xff] }
  0x14   : > { %v2436_v6 = vld [vmem:[%s2409_s14 + $0x51] sm:$0xff]  ;;  %v2446_v8 = vld [vmem:[%s2409_s14 + $0x69] sm:$0xff]  ;;  %v221_v10 = vld [vmem:[%s2409_s14 + $0x81] sm:$0xff] }
  0x15   : > { %v220_v11 = vld [vmem:[%s2409_s14 + $0x79] sm:$0xff]  ;;  %v222_v17 = vld [vmem:[%s2409_s14 + $0x91] sm:$0xff]  ;;  %v146_v19 = vld [vmem:[%s2409_s14 + $0x8] sm:$0xff] }
  0x16   : > { %280 = vrot.lane.b32.xlu1 %v2419_v2, %s2372_s15  ;;  %276 = vrot.lane.b32.xlu0 %v211_v3, %s2372_s15  ;;  %v2458_v12 = vld [vmem:[%s2409_s14 + $0xfa] sm:$0xff]  ;;  %v2461_v13 = vld [vmem:[%s2409_s14 + $0xf2] sm:$0xff]  ;;  %179 = vst.msk [vmem:[#allocation2 + $0x10] sm:$0xff] %vm177_vm0, %v146_v19 }
  0x17   : > { %1611 = vst.msk [vmem:[#allocation2 + $0x108] sm:$0xff] %vm177_vm0, %v2461_v13  ;;  %1612 = vst.msk [vmem:[#allocation2 + $0x118] sm:$0xff] %vm177_vm0, %v2458_v12  ;;  %v2470_v14 = vld [vmem:[%s2409_s14 + $0x18] sm:$0xff]  ;;  %v145_v15 = vld [vmem:[%s2409_s14] sm:$0xff] }
  0x18   : > { %v223_v16 = vld [vmem:[%s2409_s14 + $0x99] sm:$0xff]  ;;  %180 = vst.msk [vmem:[#allocation2 + $0x20] sm:$0xff] %vm177_vm0, %v2470_v14  ;;  %178 = vst.msk [vmem:[#allocation2] sm:$0xff] %vm177_vm0, %v145_v15  ;;  %v225_v21 = vld [vmem:[%s2409_s14 + $0xb1] sm:$0xff] }
  0x19   : > { %v2479_v18 = vld [vmem:[%s2409_s14 + $0x20] sm:$0xff]  ;;  %v2485_v20 = vld [vmem:[%s2409_s14 + $0x38] sm:$0xff]  ;;  %v224_v22 = vld [vmem:[%s2409_s14 + $0xa9] sm:$0xff] }
  0x1a   : > { %284 = vrot.lane.b32.xlu1 %v2426_v4, %s2372_s15  ;;  %282 = vrot.lane.b32.xlu0 %v2429_v5, %s2372_s15  ;;  %181 = vst.msk [vmem:[#allocation2 + $0x30] sm:$0xff] %vm177_vm0, %v2479_v18  ;;  %183 = vst.msk [vmem:[#allocation2 + $0x50] sm:$0xff] %vm177_vm0, %v2485_v20  ;;  %v2493_v23 = vld [vmem:[%s2409_s14 + $0x30] sm:$0xff]  ;;  %v2496_v24 = vld [vmem:[%s2409_s14 + $0xd8] sm:$0xff] }
  0x1b   : > { %v2499_v25 = vld [vmem:[%s2409_s14 + $0x50] sm:$0xff]  ;;  %182 = vst.msk [vmem:[#allocation2 + $0x40] sm:$0xff] %vm177_vm0, %v2493_v23  ;;  %v2508_v26 = vld [vmem:[%s2409_s14 + $0x48] sm:$0xff]  ;;  %v2511_v27 = vld [vmem:[%s2409_s14 + $0xe0] sm:$0xff] }
  0x1c   : > { %185 = vst.msk [vmem:[#allocation2 + $0x70] sm:$0xff] %vm177_vm0, %v2499_v25  ;;  %196 = vst.msk [vmem:[#allocation2 + $0x120] sm:$0xff] %vm177_vm0, %v2496_v24  ;;  %v2518_v28 = vld [vmem:[%s2409_s14 + $0x68] sm:$0xff]  ;;  %v2521_v29 = vld [vmem:[%s2409_s14 + $0x60] sm:$0xff] }
  0x1d   : > { %184 = vst.msk [vmem:[#allocation2 + $0x60] sm:$0xff] %vm177_vm0, %v2508_v26  ;;  %v2524_v30 = vld [vmem:[%s2409_s14 + $0x80] sm:$0xff]  ;;  %197 = vst.msk [vmem:[#allocation2 + $0x130] sm:$0xff] %vm177_vm0, %v2511_v27  ;;  %v2535_v31 = vld [vmem:[%s2409_s14 + $0x78] sm:$0xff] }
  0x1e   : > { %288 = vrot.lane.b32.xlu1 %v2436_v6, %s2372_s15  ;;  %286 = vrot.lane.b32.xlu0 %v2439_v7, %s2372_s15  ;;  %187 = vst.msk [vmem:[#allocation2 + $0x90] sm:$0xff] %vm177_vm0, %v2518_v28  ;;  %186 = vst.msk [vmem:[#allocation2 + $0x80] sm:$0xff] %vm177_vm0, %v2521_v29  ;;  %v2538_v32 = vld [vmem:[%s2409_s14 + $0x98] sm:$0xff]  ;;  %v2541_v33 = vld [vmem:[%s2409_s14 + $0x90] sm:$0xff] }
  0x1f   : > { %189 = vst.msk [vmem:[#allocation2 + $0xb0] sm:$0xff] %vm177_vm0, %v2524_v30  ;;  %v227_v34 = vld [vmem:[%s2409_s14 + $0xc9] sm:$0xff]  ;;  %v226_v35 = vld [vmem:[%s2409_s14 + $0xc1] sm:$0xff]  ;;  %188 = vst.msk [vmem:[#allocation2 + $0xa0] sm:$0xff] %vm177_vm0, %v2535_v31 }
  0x20   : > { %191 = vst.msk [vmem:[#allocation2 + $0xd0] sm:$0xff] %vm177_vm0, %v2538_v32  ;;  %190 = vst.msk [vmem:[#allocation2 + $0xc0] sm:$0xff] %vm177_vm0, %v2541_v33  ;;  %v160_v36 = vld [vmem:[%s2409_s14 + $0xb0] sm:$0xff]  ;;  %v159_v37 = vld [vmem:[%s2409_s14 + $0xa8] sm:$0xff] }
  0x21   : > { %v162_v38 = vld [vmem:[%s2409_s14 + $0xc8] sm:$0xff]  ;;  %193 = vst.msk [vmem:[#allocation2 + $0xf0] sm:$0xff] %vm177_vm0, %v160_v36  ;;  %192 = vst.msk [vmem:[#allocation2 + $0xe0] sm:$0xff] %vm177_vm0, %v159_v37  ;;  %v161_v39 = vld [vmem:[%s2409_s14 + $0xc0] sm:$0xff] }
  0x22   : > { %292 = vrot.lane.b32.xlu1 %v2446_v8, %s2372_s15  ;;  %290 = vrot.lane.b32.xlu0 %v2449_v9, %s2372_s15  ;;  %195 = vst.msk [vmem:[#allocation2 + $0x110] sm:$0xff] %vm177_vm0, %v162_v38  ;;  %v2561_v40 = vld [vmem:[%s2409_s14 + $0xf0] sm:$0xff]  ;;  %194 = vst.msk [vmem:[#allocation2 + $0x100] sm:$0xff] %vm177_vm0, %v161_v39  ;;  %v2565_v41 = vld [vmem:[%s2409_s14 + $0xf8] sm:$0xff] }
  0x23   : > { %198 = vst.msk [vmem:[#allocation2 + $0x140] sm:$0xff] %vm177_vm0, %v2561_v40  ;;  %v2570_v42 = vld [vmem:[%s2409_s14 + $0x110] sm:$0xff]  ;;  %v2573_v43 = vld [vmem:[%s2409_s14 + $0x108] sm:$0xff]  ;;  %199 = vst.msk [vmem:[#allocation2 + $0x150] sm:$0xff] %vm177_vm0, %v2565_v41 }
  0x24   : > { %201 = vst.msk [vmem:[#allocation2 + $0x170] sm:$0xff] %vm177_vm0, %v2570_v42  ;;  %200 = vst.msk [vmem:[#allocation2 + $0x160] sm:$0xff] %vm177_vm0, %v2573_v43  ;;  %v2584_v44 = vld [vmem:[%s2409_s14 + $0xe1] sm:$0xff]  ;;  %v2587_v45 = vld [vmem:[%s2409_s14 + $0xd9] sm:$0xff] }
  0x25   : > { %v2590_v46 = vld [vmem:[%s2409_s14 + $0x128] sm:$0xff]  ;;  %v2593_v47 = vld [vmem:[%s2409_s14 + $0x120] sm:$0xff]  ;;  %v2607_v49 = vld [vmem:[%s2409_s14 + $0xf1] sm:$0xff] }
  0x26   : > { %296 = vrot.lane.b32.xlu1 %v221_v10, %s2372_s15  ;;  %294 = vrot.lane.b32.xlu0 %v220_v11, %s2372_s15  ;;  %203 = vst.msk [vmem:[#allocation2 + $0x190] sm:$0xff] %vm177_vm0, %v2590_v46  ;;  %202 = vst.msk [vmem:[#allocation2 + $0x180] sm:$0xff] %vm177_vm0, %v2593_v47  ;;  %v2604_v48 = vld [vmem:[%s2409_s14 + $0xf9] sm:$0xff]  ;;  %v2624_v52 = vld [vmem:[%s2409_s14 + $0x111] sm:$0xff] }
  0x27   : > { %v2610_v50 = vld [vmem:[%s2409_s14 + $0x140] sm:$0xff]  ;;  %v2613_v51 = vld [vmem:[%s2409_s14 + $0x138] sm:$0xff]  ;;  %v2627_v53 = vld [vmem:[%s2409_s14 + $0x109] sm:$0xff] }
  0x28   : > { %205 = vst.msk [vmem:[#allocation2 + $0x1b0] sm:$0xff] %vm177_vm0, %v2610_v50  ;;  %204 = vst.msk [vmem:[#allocation2 + $0x1a0] sm:$0xff] %vm177_vm0, %v2613_v51  ;;  %v2630_v54 = vld [vmem:[%s2409_s14 + $0x158] sm:$0xff]  ;;  %v2633_v55 = vld [vmem:[%s2409_s14 + $0x150] sm:$0xff] }
  0x29   : > { %3552 = vst [vmem:[#allocation3_spill] sm:$0xff] %v2630_v54  ;;  %207 = vst.msk [vmem:[#allocation2 + $0x1d0] sm:$0xff] %vm177_vm0, %v2630_v54  ;;  %v2644_v56 = vld [vmem:[%s2409_s14 + $0x129] sm:$0xff]  ;;  %v2647_v57 = vld [vmem:[%s2409_s14 + $0x121] sm:$0xff] }
  0x2a   : > { %300 = vrot.lane.b32.xlu1 %v223_v16, %s2372_s15  ;;  %298 = vrot.lane.b32.xlu0 %v222_v17, %s2372_s15  ;;  %206 = vst.msk [vmem:[#allocation2 + $0x1c0] sm:$0xff] %vm177_vm0, %v2633_v55  ;;  %v2650_v58 = vld [vmem:[%s2409_s14 + $0x170] sm:$0xff]  ;;  %v2653_v59 = vld [vmem:[%s2409_s14 + $0x168] sm:$0xff] }
  0x2b   : > { %3553 = vst [vmem:[#allocation4_spill] sm:$0xff] %v2650_v58  ;;  %3554 = vst [vmem:[#allocation5_spill] sm:$0xff] %v2653_v59  ;;  %v237_v60 = vld [vmem:[%s2409_s14 + $0x141] sm:$0xff]  ;;  %v236_v61 = vld [vmem:[%s2409_s14 + $0x139] sm:$0xff] }
  0x2c   : > { %209 = vst.msk [vmem:[#allocation2 + $0x1f0] sm:$0xff] %vm177_vm0, %v2650_v58  ;;  %208 = vst.msk [vmem:[#allocation2 + $0x1e0] sm:$0xff] %vm177_vm0, %v2653_v59  ;;  %v239_v62 = vld [vmem:[%s2409_s14 + $0x159] sm:$0xff]  ;;  %v238_v63 = vld [vmem:[%s2409_s14 + $0x151] sm:$0xff]  ;;  %v2374_v58 = vmov 0  }
  0x2d   : > { %v241_v1 = vld [vmem:[%s2409_s14 + $0x171] sm:$0xff]  ;;  %v240_v3 = vld [vmem:[%s2409_s14 + $0x169] sm:$0xff]  ;;  %v2683_v16 = vld [vmem:[%s2409_s14 + $0x1a] sm:$0xff]  ;;  %1843 = vmatprep.subr.bf16.mxu0 %v2374_v58  ;;  %2320 = vmatprep.subr.bf16.mxu1 %v2374_v58 }
  0x2e   : > { %304 = vrot.lane.b32.xlu1 %v225_v21, %s2372_s15  ;;  %302 = vrot.lane.b32.xlu0 %v224_v22, %s2372_s15  ;;  %v404_v10 = vld [vmem:[%s2409_s14 + $0xa] sm:$0xff]  ;;  %v403_v11 = vld [vmem:[%s2409_s14 + $0x2] sm:$0xff] }
  0x2f   : > { %v2680_v15 = vld [vmem:[%s2409_s14 + $0x22] sm:$0xff]  ;;  %v2690_v17 = vld [vmem:[%s2409_s14 + $0x3a] sm:$0xff]  ;;  %v2693_v19 = vld [vmem:[%s2409_s14 + $0x32] sm:$0xff] }
  0x30   : > { %v2700_v21 = vld [vmem:[%s2409_s14 + $0x52] sm:$0xff]  ;;  %v2703_v22 = vld [vmem:[%s2409_s14 + $0x4a] sm:$0xff]  ;;  %v414_v36 = vld [vmem:[%s2409_s14 + $0x82] sm:$0xff] }
  0x31   : > { %v413_v37 = vld [vmem:[%s2409_s14 + $0x7a] sm:$0xff]  ;;  %v415_v39 = vld [vmem:[%s2409_s14 + $0x92] sm:$0xff] }
  0x32   : > { %308 = vrot.lane.b32.xlu1 %v227_v34, %s2372_s15  ;;  %306 = vrot.lane.b32.xlu0 %v226_v35, %s2372_s15  ;;  %v2710_v34 = vld [vmem:[%s2409_s14 + $0x6a] sm:$0xff]  ;;  %v2713_v35 = vld [vmem:[%s2409_s14 + $0x62] sm:$0xff] }
  0x33   : > { %v416_v38 = vld [vmem:[%s2409_s14 + $0x9a] sm:$0xff] }
  0x36   : > { %312 = vrot.lane.b32.xlu1 %v2584_v44, %s2372_s15  ;;  %310 = vrot.lane.b32.xlu0 %v2587_v45, %s2372_s15 }
  0x3a   : > { %316 = vrot.lane.b32.xlu1 %v2604_v48, %s2372_s15  ;;  %314 = vrot.lane.b32.xlu0 %v2607_v49, %s2372_s15 }
  0x3e   : > { %320 = vrot.lane.b32.xlu1 %v2624_v52, %s2372_s15  ;;  %318 = vrot.lane.b32.xlu0 %v2627_v53, %s2372_s15 }
  0x42   : > { %324 = vrot.lane.b32.xlu1 %v2644_v56, %s2372_s15  ;;  %322 = vrot.lane.b32.xlu0 %v2647_v57, %s2372_s15 }
  0x46   : > { %328 = vrot.lane.b32.xlu1 %v237_v60, %s2372_s15  ;;  %326 = vrot.lane.b32.xlu0 %v236_v61, %s2372_s15  ;;  %v418_v60 = vld [vmem:[%s2409_s14 + $0xb2] sm:$0xff]  ;;  %v417_v61 = vld [vmem:[%s2409_s14 + $0xaa] sm:$0xff] }
  0x4a   : > { %332 = vrot.lane.b32.xlu1 %v239_v62, %s2372_s15  ;;  %330 = vrot.lane.b32.xlu0 %v238_v63, %s2372_s15  ;;  %v420_v62 = vld [vmem:[%s2409_s14 + $0xca] sm:$0xff]  ;;  %v419_v63 = vld [vmem:[%s2409_s14 + $0xc2] sm:$0xff] }
  0x4e   : > { %336 = vrot.lane.b32.xlu1 %v241_v1, %s2372_s15  ;;  %334 = vrot.lane.b32.xlu0 %v240_v3, %s2372_s15  ;;  %v2736_v1 = vld [vmem:[%s2409_s14 + $0xe2] sm:$0xff]  ;;  %v2739_v3 = vld [vmem:[%s2409_s14 + $0xda] sm:$0xff] }
  0x52   : > { %469 = vrot.lane.b32.xlu1 %v404_v10, %s2373_s16  ;;  %467 = vrot.lane.b32.xlu0 %v403_v11, %s2373_s16  ;;  %v2750_v10 = vld [vmem:[%s2409_s14 + $0x112] sm:$0xff]  ;;  %v2753_v11 = vld [vmem:[%s2409_s14 + $0x10a] sm:$0xff] }
  0x56   : > { %473 = vrot.lane.b32.xlu1 %v2680_v15, %s2373_s16  ;;  %471 = vrot.lane.b32.xlu0 %v2683_v16, %s2373_s16 }
  0x5a   : > { %477 = vrot.lane.b32.xlu1 %v2690_v17, %s2373_s16  ;;  %475 = vrot.lane.b32.xlu0 %v2693_v19, %s2373_s16 }
  0x5e   : > { %481 = vrot.lane.b32.xlu1 %v2700_v21, %s2373_s16  ;;  %479 = vrot.lane.b32.xlu0 %v2703_v22, %s2373_s16 }
  0x62   : > { %485 = vrot.lane.b32.xlu1 %v2710_v34, %s2373_s16  ;;  %483 = vrot.lane.b32.xlu0 %v2713_v35, %s2373_s16 }
  0x66   : > { %489 = vrot.lane.b32.xlu1 %v414_v36, %s2373_s16  ;;  %487 = vrot.lane.b32.xlu0 %v413_v37, %s2373_s16  ;;  %v2760_v36 = vld [vmem:[%s2409_s14 + $0x12a] sm:$0xff]  ;;  %v2763_v37 = vld [vmem:[%s2409_s14 + $0x122] sm:$0xff] }
  0x6a   : > { %493 = vrot.lane.b32.xlu1 %v416_v38, %s2373_s16  ;;  %491 = vrot.lane.b32.xlu0 %v415_v39, %s2373_s16  ;;  %v430_v38 = vld [vmem:[%s2409_s14 + $0x142] sm:$0xff]  ;;  %v429_v39 = vld [vmem:[%s2409_s14 + $0x13a] sm:$0xff] }
  0x6e   : > { %497 = vrot.lane.b32.xlu1 %v418_v60, %s2373_s16  ;;  %495 = vrot.lane.b32.xlu0 %v417_v61, %s2373_s16 }
  0x72   : > { %501 = vrot.lane.b32.xlu1 %v420_v62, %s2373_s16  ;;  %499 = vrot.lane.b32.xlu0 %v419_v63, %s2373_s16  ;;  %v2355_v62 = vld [vmem:[%s3546_s1 + $0x38] sm:$0xff]  }
  0x73   : > { %v431_v63 = vld [vmem:[%s2409_s14 + $0x152] sm:$0xff]  ;;  %1844 = vmatpush1.bf16.msra.mxu0 %v2355_v62  ;;  %2329 = vmatpush1.bf16.msra.mxu1 %v2355_v62 }
  0x74   : > { %1845 = vmatprep.subr.bf16.mxu0 %v2374_v58  ;;  %2321 = vmatprep.subr.bf16.mxu1 %v2374_v58 }
  0x76   : > { %505 = vrot.lane.b32.xlu1 %v2736_v1, %s2373_s16  ;;  %503 = vrot.lane.b32.xlu0 %v2739_v3, %s2373_s16 }
  0x7a   : > { %509 = vrot.lane.b32.xlu1 %v2458_v12, %s2373_s16  ;;  %507 = vrot.lane.b32.xlu0 %v2461_v13, %s2373_s16 }
  0x7e   : > { %513 = vrot.lane.b32.xlu1 %v2750_v10, %s2373_s16  ;;  %511 = vrot.lane.b32.xlu0 %v2753_v11, %s2373_s16 }
  0x82   : > { %517 = vrot.lane.b32.xlu1 %v2760_v36, %s2373_s16  ;;  %515 = vrot.lane.b32.xlu0 %v2763_v37, %s2373_s16 }
  0x84   : > { %v279_v60 = vpop.permute.xlu1 %278  ;;  %v275_v61 = vpop.permute.xlu0 %274 }
  0x85   : > { %373 = vst.msk [vmem:[#allocation2 + $0x20] sm:$0xff] %vm370_vm1, %v279_v60  ;;  %371 = vst.msk [vmem:[#allocation2] sm:$0xff] %vm370_vm1, %v275_v61 }
  0x86   : > { %521 = vrot.lane.b32.xlu1 %v430_v38, %s2373_s16  ;;  %519 = vrot.lane.b32.xlu0 %v429_v39, %s2373_s16  ;;  %v2356_v38 = vld [vmem:[%s3546_s1 + $0x30] sm:$0xff]  }
  0x87   : > { %1846 = vmatpush1.bf16.msra.mxu0 %v2356_v38  ;;  %2330 = vmatpush1.bf16.msra.mxu1 %v2356_v38  ;;  %v2261_v38 = vld [vmem:[%s2409_s14 + $0x3a] sm:$0xff] }
  0x88   : > { %v281_v59 = vpop.permute.xlu1 %280  ;;  %v277_v54 = vpop.permute.xlu0 %276  ;;  %1847 = vmatprep.subr.bf16.mxu0 %v2374_v58  ;;  %2322 = vmatprep.subr.bf16.mxu1 %v2374_v58  ;;  %1596 = vst.msk [vmem:[#allocation2 + $0x18] sm:$0xff] %vm177_vm0, %v2261_v38 }
  0x89   : > { %374 = vst.msk [vmem:[#allocation2 + $0x30] sm:$0xff] %vm370_vm1, %v281_v59  ;;  %372 = vst.msk [vmem:[#allocation2 + $0x10] sm:$0xff] %vm370_vm1, %v277_v54 }
  0x8a   : > { %661 = vrot.lane.b32.xlu1 %v2470_v14, %s2375_s19  ;;  %523 = vrot.lane.b32.xlu0 %v431_v63, %s2373_s16  ;;  %v2357_v14 = vld [vmem:[%s3546_s1 + $0x28] sm:$0xff]  }
  0x8b   : > { %1848 = vmatpush1.bf16.msra.mxu0 %v2357_v14  ;;  %2331 = vmatpush1.bf16.msra.mxu1 %v2357_v14 }
  0x8c   : > { %v285_v39 = vpop.permute.xlu1 %284  ;;  %v283_v60 = vpop.permute.xlu0 %282  ;;  %1849 = vmatprep.subr.bf16.mxu0 %v2374_v58  ;;  %2323 = vmatprep.subr.bf16.mxu1 %v2374_v58 }
  0x8d   : > { %376 = vst.msk [vmem:[#allocation2 + $0x50] sm:$0xff] %vm370_vm1, %v285_v39  ;;  %375 = vst.msk [vmem:[#allocation2 + $0x40] sm:$0xff] %vm370_vm1, %v283_v60 }
  0x8e   : > { %693 = vrot.lane.b32.xlu1 %v2496_v24, %s2375_s19  ;;  %663 = vrot.lane.b32.xlu0 %v2479_v18, %s2375_s19  ;;  %v2358_v18 = vld [vmem:[%s3546_s1 + $0x20] sm:$0xff]  }
  0x8f   : > { %1850 = vmatpush1.bf16.msra.mxu0 %v2358_v18  ;;  %2332 = vmatpush1.bf16.msra.mxu1 %v2358_v18 }
  0x90   : > { %v289_v54 = vpop.permute.xlu1 %288  ;;  %v287_v59 = vpop.permute.xlu0 %286  ;;  %1851 = vmatprep.subr.bf16.mxu0 %v2374_v58  ;;  %2324 = vmatprep.subr.bf16.mxu1 %v2374_v58 }
  0x91   : > { %378 = vst.msk [vmem:[#allocation2 + $0x70] sm:$0xff] %vm370_vm1, %v289_v54  ;;  %377 = vst.msk [vmem:[#allocation2 + $0x60] sm:$0xff] %vm370_vm1, %v287_v59  ;;  %v1630_v59 = vld [vmem:[#allocation2 + $0x18] sm:$0xff] }
  0x92   : > { %854 = vrot.lane.b32.xlu1 %v2412_v0, %s2376_s24  ;;  %695 = vrot.lane.b32.xlu0 %v2511_v27, %s2375_s19  ;;  %v2359_v0 = vld [vmem:[%s3546_s1 + $0x18] sm:$0xff]  }
  0x93   : > { %1852 = vmatpush1.bf16.msra.mxu0 %v2359_v0  ;;  %2333 = vmatpush1.bf16.msra.mxu1 %v2359_v0  ;;  %v1662_v0 = vld [vmem:[#allocation2 + $0x118] sm:$0xff] }
  0x94   : > { %v293_v24 = vpop.permute.xlu1 %292  ;;  %v291_v61 = vpop.permute.xlu0 %290  ;;  %1853 = vmatprep.subr.bf16.mxu0 %v2374_v58  ;;  %2325 = vmatprep.subr.bf16.mxu1 %v2374_v58 }
  0x95   : > { %380 = vst.msk [vmem:[#allocation2 + $0x90] sm:$0xff] %vm370_vm1, %v293_v24  ;;  %379 = vst.msk [vmem:[#allocation2 + $0x80] sm:$0xff] %vm370_vm1, %v291_v61 }
  0x96   : > { %886 = vrot.lane.b32.xlu1 %v2587_v45, %s2376_s24  ;;  %856 = vrot.lane.b32.xlu0 %v2419_v2, %s2376_s24  ;;  %v2360_v2 = vld [vmem:[%s3546_s1 + $0x10] sm:$0xff]  }
  0x97   : > { %1854 = vmatpush1.bf16.msra.mxu0 %v2360_v2  ;;  %2334 = vmatpush1.bf16.msra.mxu1 %v2360_v2 }
  0x98   : > { %v297_v27 = vpop.permute.xlu1 %296  ;;  %v295_v62 = vpop.permute.xlu0 %294  ;;  %1855 = vmatprep.subr.bf16.mxu0 %v2374_v58  ;;  %2326 = vmatprep.subr.bf16.mxu1 %v2374_v58 }
  0x99   : > { %382 = vst.msk [vmem:[#allocation2 + $0xb0] sm:$0xff] %vm370_vm1, %v297_v27  ;;  %381 = vst.msk [vmem:[#allocation2 + $0xa0] sm:$0xff] %vm370_vm1, %v295_v62 }
  0x9a   : > { %1047 = vrot.lane.b32.xlu1 %v2683_v16, %s2377_s29  ;;  %888 = vrot.lane.b32.xlu0 %v2584_v44, %s2376_s24  ;;  %v2361_v44 = vld [vmem:[%s3546_s1 + $0x8] sm:$0xff]   ;;  %v2260_v16 = vld [vmem:[%s2409_s14 + $0x32] sm:$0xff] }
  0x9b   : > { %1856 = vmatpush1.bf16.msra.mxu0 %v2361_v44  ;;  %2335 = vmatpush1.bf16.msra.mxu1 %v2361_v44  ;;  %1595 = vst.msk [vmem:[#allocation2 + $0x8] sm:$0xff] %vm177_vm0, %v2260_v16 }
  0x9c   : > { %v301_v45 = vpop.permute.xlu1 %300  ;;  %v299_v63 = vpop.permute.xlu0 %298  ;;  %1857 = vmatprep.subr.bf16.mxu0 %v2374_v58  ;;  %2327 = vmatprep.subr.bf16.mxu1 %v2374_v58 }
  0x9d   : > { %384 = vst.msk [vmem:[#allocation2 + $0xd0] sm:$0xff] %vm370_vm1, %v301_v45  ;;  %383 = vst.msk [vmem:[#allocation2 + $0xc0] sm:$0xff] %vm370_vm1, %v299_v63 }
  0x9e   : > { %1079 = vrot.lane.b32.xlu1 %v2739_v3, %s2377_s29  ;;  %1049 = vrot.lane.b32.xlu0 %v2680_v15, %s2377_s29  ;;  %v2362_v15 = vld [vmem:[%s3546_s1] sm:$0xff]  }
  0x9f   : > { %1858 = vmatpush1.bf16.msra.mxu0 %v2362_v15  ;;  %2336 = vmatpush1.bf16.msra.mxu1 %v2362_v15  ;;  %v2915_v15 = vld [vmem:[%s2409_s14 + $0x82] sm:$0xff] }
  0xa0   : > { %v305_v39 = vpop.permute.xlu1 %304  ;;  %v303_v60 = vpop.permute.xlu0 %302  ;;  %1873 = vmatprep.subr.bf16.mxu0 %v2374_v58  ;;  %2328 = vmatprep.subr.bf16.mxu1 %v2374_v58  ;;  %v1660_v58 = vld [vmem:[#allocation2 + $0x108] sm:$0xff]  ;;  %1602 = vst.msk [vmem:[#allocation2 + $0x78] sm:$0xff] %vm177_vm0, %v2915_v15 }
  0xa1   : > { %386 = vst.msk [vmem:[#allocation2 + $0xf0] sm:$0xff] %vm370_vm1, %v305_v39  ;;  %385 = vst.msk [vmem:[#allocation2 + $0xe0] sm:$0xff] %vm370_vm1, %v303_v60  ;;  %v1708_v2 = vpack.c.bf16 %v1662_v0, %v1660_v58  ;;  %v2912_v60 = vld [vmem:[%s2409_s14 + $0x13a] sm:$0xff] }
  0xa2   : > { %1241 = vrot.lane.b32.xlu1 %v2493_v23, %s2378_s6  ;;  %1081 = vrot.lane.b32.xlu0 %v2736_v1, %s2377_s29  ;;  %v2363_v1 = vld [vmem:[%s3546_s1 + $0x40] sm:$0xff]   ;;  %v1628_v54 = vld [vmem:[#allocation2 + $0x8] sm:$0xff]  ;;  %1617 = vst.msk [vmem:[#allocation2 + $0x168] sm:$0xff] %vm177_vm0, %v2912_v60 }
  0xa3   : > { %1874 = vmatpush2.bf16.msra.mxu0 %v2363_v1  ;;  %v1692_v61 = vpack.c.bf16 %v1630_v59, %v1628_v54  ;;  %2337 = vmatpush2.bf16.msra.mxu1 %v2363_v1 }
  0xa4   : > { %v309_v3 = vpop.permute.xlu1 %308  ;;  %v307_v14 = vpop.permute.xlu0 %306  ;;  %2309 = vmatprep.mubr.msk.bf16.mxu1 %vm177_vm0, %v1708_v2 }
  0xa5   : > { %388 = vst.msk [vmem:[#allocation2 + $0x110] sm:$0xff] %vm370_vm1, %v309_v3  ;;  %387 = vst.msk [vmem:[#allocation2 + $0x100] sm:$0xff] %vm370_vm1, %v307_v14  ;;  %2301 = vmatprep.mubr.msk.bf16.mxu0 %vm177_vm0, %v1692_v61  ;;  %v2928_v3 = vld [vmem:[%s2409_s14 + $0x142] sm:$0xff] }
  0xa6   : > { %1273 = vrot.lane.b32.xlu1 %v2561_v40, %s2378_s6  ;;  %1243 = vrot.lane.b32.xlu0 %v2485_v20, %s2378_s6  ;;  %1618 = vst.msk [vmem:[#allocation2 + $0x178] sm:$0xff] %vm177_vm0, %v2928_v3 }
  0xa8   : > { %v313_v18 = vpop.permute.xlu1 %312  ;;  %v311_v24 = vpop.permute.xlu0 %310 }
  0xa9   : > { %390 = vst.msk [vmem:[#allocation2 + $0x130] sm:$0xff] %vm370_vm1, %v313_v18  ;;  %389 = vst.msk [vmem:[#allocation2 + $0x120] sm:$0xff] %vm370_vm1, %v311_v24 }
  0xaa   : > { %1434 = vrot.lane.b32.xlu1 %v2429_v5, %s2379_s13  ;;  %1275 = vrot.lane.b32.xlu0 %v2565_v41, %s2378_s6 }
  0xac   : > { %v317_v27 = vpop.permute.xlu1 %316  ;;  %v315_v62 = vpop.permute.xlu0 %314 }
  0xad   : > { %392 = vst.msk [vmem:[#allocation2 + $0x150] sm:$0xff] %vm370_vm1, %v317_v27  ;;  %391 = vst.msk [vmem:[#allocation2 + $0x140] sm:$0xff] %vm370_vm1, %v315_v62 }
  0xae   : > { %1466 = vrot.lane.b32.xlu1 %v2607_v49, %s2379_s13  ;;  %1436 = vrot.lane.b32.xlu0 %v2426_v4, %s2379_s13 }
  0xb0   : > { %v321_v45 = vpop.permute.xlu1 %320  ;;  %v319_v63 = vpop.permute.xlu0 %318 }
  0xb1   : > { %394 = vst.msk [vmem:[#allocation2 + $0x170] sm:$0xff] %vm370_vm1, %v321_v45  ;;  %393 = vst.msk [vmem:[#allocation2 + $0x160] sm:$0xff] %vm370_vm1, %v319_v63  ;;  %v3000_v63 = vld [vmem:[%s2409_s14 + $0x152] sm:$0xff] }
  0xb2   : > { %665 = vrot.lane.b32.xlu1 %v2493_v23, %s2375_s19  ;;  %1468 = vrot.lane.b32.xlu0 %v2604_v48, %s2379_s13  ;;  %v2901_v23 = vld [vmem:[%s2409_s14 + $0x7a] sm:$0xff]  ;;  %1619 = vst.msk [vmem:[#allocation2 + $0x188] sm:$0xff] %vm177_vm0, %v3000_v63 }
  0xb3   : > { %1601 = vst.msk [vmem:[#allocation2 + $0x68] sm:$0xff] %vm177_vm0, %v2901_v23 }
  0xb4   : > { %v325_v44 = vpop.permute.xlu1 %324  ;;  %v323_v16 = vpop.permute.xlu0 %322 }
  0xb5   : > { %396 = vst.msk [vmem:[#allocation2 + $0x190] sm:$0xff] %vm370_vm1, %v325_v44  ;;  %395 = vst.msk [vmem:[#allocation2 + $0x180] sm:$0xff] %vm370_vm1, %v323_v16  ;;  %v3003_v44 = vld [vmem:[%s2409_s14 + $0x9a] sm:$0xff] }
  0xb6   : > { %697 = vrot.lane.b32.xlu1 %v2561_v40, %s2375_s19  ;;  %667 = vrot.lane.b32.xlu0 %v2485_v20, %s2375_s19  ;;  %1604 = vst.msk [vmem:[#allocation2 + $0x98] sm:$0xff] %vm177_vm0, %v3003_v44  ;;  %v3016_v16 = vld [vmem:[%s2409_s14 + $0x15a] sm:$0xff] }
  0xb7   : > { %1620 = vst.msk [vmem:[#allocation2 + $0x198] sm:$0xff] %vm177_vm0, %v3016_v16 }
  0xb8   : > { %v329_v38 = vpop.permute.xlu1 %328  ;;  %v327_v39 = vpop.permute.xlu0 %326 }
  0xb9   : > { %398 = vst.msk [vmem:[#allocation2 + $0x1b0] sm:$0xff] %vm370_vm1, %v329_v38  ;;  %397 = vst.msk [vmem:[#allocation2 + $0x1a0] sm:$0xff] %vm370_vm1, %v327_v39  ;;  %v2265_v38 = vld [vmem:[%s2409_s14 + $0x6a] sm:$0xff] }
  0xba   : > { %858 = vrot.lane.b32.xlu1 %v2429_v5, %s2376_s24  ;;  %699 = vrot.lane.b32.xlu0 %v2565_v41, %s2375_s19  ;;  %1600 = vst.msk [vmem:[#allocation2 + $0x58] sm:$0xff] %vm177_vm0, %v2265_v38 }
  0xbc   : > { %v333_v40 = vpop.permute.xlu1 %332  ;;  %v331_v20 = vpop.permute.xlu0 %330 }
  0xbd   : > { %400 = vst.msk [vmem:[#allocation2 + $0x1d0] sm:$0xff] %vm370_vm1, %v333_v40  ;;  %399 = vst.msk [vmem:[#allocation2 + $0x1c0] sm:$0xff] %vm370_vm1, %v331_v20 }
  0xbe   : > { %890 = vrot.lane.b32.xlu1 %v2607_v49, %s2376_s24  ;;  %860 = vrot.lane.b32.xlu0 %v2426_v4, %s2376_s24 }
  0xc0   : > { %v337_v5 = vpop.permute.xlu1 %336  ;;  %v335_v41 = vpop.permute.xlu0 %334 }
  0xc1   : > { %402 = vst.msk [vmem:[#allocation2 + $0x1f0] sm:$0xff] %vm370_vm1, %v337_v5  ;;  %401 = vst.msk [vmem:[#allocation2 + $0x1e0] sm:$0xff] %vm370_vm1, %v335_v41 }
  0xc2   : > { %1051 = vrot.lane.b32.xlu1 %v2693_v19, %s2377_s29  ;;  %892 = vrot.lane.b32.xlu0 %v2604_v48, %s2376_s24  ;;  %v2262_v19 = vld [vmem:[%s2409_s14 + $0x4a] sm:$0xff]  ;;  %v2263_v48 = vld [vmem:[%s2409_s14 + $0x52] sm:$0xff] }
  0xc3   : > { %1597 = vst.msk [vmem:[#allocation2 + $0x28] sm:$0xff] %vm177_vm0, %v2262_v19  ;;  %1598 = vst.msk [vmem:[#allocation2 + $0x38] sm:$0xff] %vm177_vm0, %v2263_v48 }
  0xc4   : > { %v470_v4 = vpop.permute.xlu1 %469  ;;  %v468_v49 = vpop.permute.xlu0 %467 }
  0xc5   : > { %565 = vst.msk [vmem:[#allocation2 + $0x10] sm:$0xff] %vm563_vm2, %v470_v4  ;;  %564 = vst.msk [vmem:[#allocation2] sm:$0xff] %vm563_vm2, %v468_v49 }
  0xc6   : > { %1083 = vrot.lane.b32.xlu1 %v2461_v13, %s2377_s29  ;;  %1053 = vrot.lane.b32.xlu0 %v2690_v17, %s2377_s29  ;;  %v2278_v13 = vld [vmem:[%s2409_s14 + $0x10a] sm:$0xff]  ;;  %v2279_v17 = vld [vmem:[%s2409_s14 + $0x112] sm:$0xff] }
  0xc7   : > { %1613 = vst.msk [vmem:[#allocation2 + $0x128] sm:$0xff] %vm177_vm0, %v2278_v13  ;;  %1614 = vst.msk [vmem:[#allocation2 + $0x138] sm:$0xff] %vm177_vm0, %v2279_v17  ;;  %v3086_v17 = vld [vmem:[%s2409_s14 + $0xaa] sm:$0xff] }
  0xc8   : > { %v474_v14 = vpop.permute.xlu1 %473  ;;  %v472_v1 = vpop.permute.xlu0 %471  ;;  %1605 = vst.msk [vmem:[#allocation2 + $0xa8] sm:$0xff] %vm177_vm0, %v3086_v17 }
  0xc9   : > { %567 = vst.msk [vmem:[#allocation2 + $0x30] sm:$0xff] %vm563_vm2, %v474_v14  ;;  %566 = vst.msk [vmem:[#allocation2 + $0x20] sm:$0xff] %vm563_vm2, %v472_v1 }
  0xca   : > { %1245 = vrot.lane.b32.xlu1 %v2508_v26, %s2378_s6  ;;  %1085 = vrot.lane.b32.xlu0 %v2458_v12, %s2377_s29 }
  0xcc   : > { %v478_v54 = vpop.permute.xlu1 %477  ;;  %v476_v59 = vpop.permute.xlu0 %475 }
  0xcd   : > { %569 = vst.msk [vmem:[#allocation2 + $0x50] sm:$0xff] %vm563_vm2, %v478_v54  ;;  %568 = vst.msk [vmem:[#allocation2 + $0x40] sm:$0xff] %vm563_vm2, %v476_v59  ;;  %v3099_v54 = vld [vmem:[%s2409_s14 + $0x172] sm:$0xff]  ;;  %v3102_v59 = vld [vmem:[%s2409_s14 + $0x16a] sm:$0xff] }
  0xce   : > { %1277 = vrot.lane.b32.xlu1 %v2573_v43, %s2378_s6  ;;  %1247 = vrot.lane.b32.xlu0 %v2499_v25, %s2378_s6  ;;  %1621 = vst.msk [vmem:[#allocation2 + $0x1a8] sm:$0xff] %vm177_vm0, %v3102_v59  ;;  %1622 = vst.msk [vmem:[#allocation2 + $0x1b8] sm:$0xff] %vm177_vm0, %v3099_v54 }
  0xd0   : > { %v482_v18 = vpop.permute.xlu1 %481  ;;  %v480_v12 = vpop.permute.xlu0 %479 }
  0xd1   : > { %571 = vst.msk [vmem:[#allocation2 + $0x70] sm:$0xff] %vm563_vm2, %v482_v18  ;;  %570 = vst.msk [vmem:[#allocation2 + $0x60] sm:$0xff] %vm563_vm2, %v480_v12 }
  0xd2   : > { %1438 = vrot.lane.b32.xlu1 %v2439_v7, %s2379_s13  ;;  %1279 = vrot.lane.b32.xlu0 %v2570_v42, %s2378_s6 }
  0xd4   : > { %v486_v24 = vpop.permute.xlu1 %485  ;;  %v484_v61 = vpop.permute.xlu0 %483 }
  0xd5   : > { %573 = vst.msk [vmem:[#allocation2 + $0x90] sm:$0xff] %vm563_vm2, %v486_v24  ;;  %572 = vst.msk [vmem:[#allocation2 + $0x80] sm:$0xff] %vm563_vm2, %v484_v61  ;;  %v2235_v61 = vld [vmem:[%s2409_s14 + $0x81] sm:$0xff] }
  0xd6   : > { %1470 = vrot.lane.b32.xlu1 %v2627_v53, %s2379_s13  ;;  %1440 = vrot.lane.b32.xlu0 %v2436_v6, %s2379_s13 }
  0xd8   : > { %v490_v58 = vpop.permute.xlu1 %489  ;;  %v488_v0 = vpop.permute.xlu0 %487 }
  0xd9   : > { %575 = vst.msk [vmem:[#allocation2 + $0xb0] sm:$0xff] %vm563_vm2, %v490_v58  ;;  %574 = vst.msk [vmem:[#allocation2 + $0xa0] sm:$0xff] %vm563_vm2, %v488_v0 }
  0xda   : > { %669 = vrot.lane.b32.xlu1 %v2508_v26, %s2375_s19  ;;  %1472 = vrot.lane.b32.xlu0 %v2624_v52, %s2379_s13  ;;  %v2989_v26 = vld [vmem:[%s2409_s14 + $0x92] sm:$0xff] }
  0xdb   : > { %1603 = vst.msk [vmem:[#allocation2 + $0x88] sm:$0xff] %vm177_vm0, %v2989_v26 }
  0xdc   : > { %v494_v27 = vpop.permute.xlu1 %493  ;;  %v492_v62 = vpop.permute.xlu0 %491 }
  0xdd   : > { %577 = vst.msk [vmem:[#allocation2 + $0xd0] sm:$0xff] %vm563_vm2, %v494_v27  ;;  %576 = vst.msk [vmem:[#allocation2 + $0xc0] sm:$0xff] %vm563_vm2, %v492_v62  ;;  %v1632_v27 = vld [vmem:[#allocation2 + $0x28] sm:$0xff]  ;;  %v1634_v62 = vld [vmem:[#allocation2 + $0x38] sm:$0xff] }
  0xde   : > { %701 = vrot.lane.b32.xlu1 %v2573_v43, %s2375_s19  ;;  %671 = vrot.lane.b32.xlu0 %v2499_v25, %s2375_s19 }
  0xe0   : > { %v498_v2 = vpop.permute.xlu1 %497  ;;  %v496_v45 = vpop.permute.xlu0 %495 }
  0xe1   : > { %579 = vst.msk [vmem:[#allocation2 + $0xf0] sm:$0xff] %vm563_vm2, %v498_v2  ;;  %578 = vst.msk [vmem:[#allocation2 + $0xe0] sm:$0xff] %vm563_vm2, %v496_v45  ;;  %v2251_v2 = vld [vmem:[%s2409_s14 + $0x141] sm:$0xff] }
  0xe2   : > { %862 = vrot.lane.b32.xlu1 %v2439_v7, %s2376_s24  ;;  %703 = vrot.lane.b32.xlu0 %v2570_v42, %s2375_s19 }
  0xe4   : > { %v502_v43 = vpop.permute.xlu1 %501  ;;  %v500_v25 = vpop.permute.xlu0 %499 }
  0xe5   : > { %581 = vst.msk [vmem:[#allocation2 + $0x110] sm:$0xff] %vm563_vm2, %v502_v43  ;;  %580 = vst.msk [vmem:[#allocation2 + $0x100] sm:$0xff] %vm563_vm2, %v500_v25 }
  0xe6   : > { %894 = vrot.lane.b32.xlu1 %v2627_v53, %s2376_s24  ;;  %864 = vrot.lane.b32.xlu0 %v2436_v6, %s2376_s24 }
  0xe8   : > { %v506_v7 = vpop.permute.xlu1 %505  ;;  %v504_v42 = vpop.permute.xlu0 %503 }
  0xe9   : > { %583 = vst.msk [vmem:[#allocation2 + $0x130] sm:$0xff] %vm563_vm2, %v506_v7  ;;  %582 = vst.msk [vmem:[#allocation2 + $0x120] sm:$0xff] %vm563_vm2, %v504_v42  ;;  %v1694_v42 = vpack.c.bf16 %v1634_v62, %v1632_v27 }
  0xea   : > { %1055 = vrot.lane.b32.xlu1 %v2703_v22, %s2377_s29  ;;  %896 = vrot.lane.b32.xlu0 %v2624_v52, %s2376_s24  ;;  %v2264_v22 = vld [vmem:[%s2409_s14 + $0x62] sm:$0xff] }
  0xeb   : > { %1599 = vst.msk [vmem:[#allocation2 + $0x48] sm:$0xff] %vm177_vm0, %v2264_v22  ;;  %v1666_v22 = vld [vmem:[#allocation2 + $0x138] sm:$0xff] }
  0xec   : > { %v510_v6 = vpop.permute.xlu1 %509  ;;  %v508_v53 = vpop.permute.xlu0 %507 }
  0xed   : > { %585 = vst.msk [vmem:[#allocation2 + $0x150] sm:$0xff] %vm563_vm2, %v510_v6  ;;  %584 = vst.msk [vmem:[#allocation2 + $0x140] sm:$0xff] %vm563_vm2, %v508_v53  ;;  %v1664_v53 = vld [vmem:[#allocation2 + $0x128] sm:$0xff] }
  0xee   : > { %1087 = vrot.lane.b32.xlu1 %v2753_v11, %s2377_s29  ;;  %1057 = vrot.lane.b32.xlu0 %v2700_v21, %s2377_s29  ;;  %v2280_v11 = vld [vmem:[%s2409_s14 + $0x122] sm:$0xff]  ;;  %v2281_v21 = vld [vmem:[%s2409_s14 + $0x12a] sm:$0xff] }
  0xef   : > { %1615 = vst.msk [vmem:[#allocation2 + $0x148] sm:$0xff] %vm177_vm0, %v2280_v11  ;;  %1616 = vst.msk [vmem:[#allocation2 + $0x158] sm:$0xff] %vm177_vm0, %v2281_v21  ;;  %v1710_v21 = vpack.c.bf16 %v1666_v22, %v1664_v53 }
  0xf0   : > { %v514_v52 = vpop.permute.xlu1 %513  ;;  %v512_v39 = vpop.permute.xlu0 %511 }
  0xf1   : > { %587 = vst.msk [vmem:[#allocation2 + $0x170] sm:$0xff] %vm563_vm2, %v514_v52  ;;  %586 = vst.msk [vmem:[#allocation2 + $0x160] sm:$0xff] %vm563_vm2, %v512_v39 }
  0xf2   : > { %1249 = vrot.lane.b32.xlu1 %v2521_v29, %s2378_s6  ;;  %1089 = vrot.lane.b32.xlu0 %v2750_v10, %s2377_s29 }
  0xf4   : > { %v518_v40 = vpop.permute.xlu1 %517  ;;  %v516_v20 = vpop.permute.xlu0 %515 }
  0xf5   : > { %589 = vst.msk [vmem:[#allocation2 + $0x190] sm:$0xff] %vm563_vm2, %v518_v40  ;;  %588 = vst.msk [vmem:[#allocation2 + $0x180] sm:$0xff] %vm563_vm2, %v516_v20 }
  0xf6   : > { %1281 = vrot.lane.b32.xlu1 %v2593_v47, %s2378_s6  ;;  %1251 = vrot.lane.b32.xlu0 %v2518_v28, %s2378_s6 }
  0xf8   : > { %v522_v5 = vpop.permute.xlu1 %521  ;;  %v520_v10 = vpop.permute.xlu0 %519 }
  0xf9   : > { %591 = vst.msk [vmem:[#allocation2 + $0x1b0] sm:$0xff] %vm563_vm2, %v522_v5  ;;  %590 = vst.msk [vmem:[#allocation2 + $0x1a0] sm:$0xff] %vm563_vm2, %v520_v10 }
  0xfa   : > { %1442 = vrot.lane.b32.xlu1 %v2449_v9, %s2379_s13  ;;  %1283 = vrot.lane.b32.xlu0 %v2590_v46, %s2378_s6 }
  0xfc   : > { %v662_v41 = vpop.permute.xlu1 %661  ;;  %v524_v4 = vpop.permute.xlu0 %523 }
  0xfd   : > { %758 = vst.msk [vmem:[#allocation2] sm:$0xff] %vm757_vm3, %v662_v41  ;;  %v3168_v41 = vld [vmem:[%s2409_s14 + $0xca] sm:$0xff] }
  0xfe   : > { %592 = vst.msk [vmem:[#allocation2 + $0x1c0] sm:$0xff] %vm563_vm2, %v524_v4  ;;  %1474 = vrot.lane.b32.xlu1 %v2647_v57, %s2379_s13  ;;  %1444 = vrot.lane.b32.xlu0 %v2446_v8, %s2379_s13 }
  0xff   : > { %1608 = vst.msk [vmem:[#allocation2 + $0xd8] sm:$0xff] %vm177_vm0, %v3168_v41 }
 0x100   : > { %v694_v49 = vpop.permute.xlu1 %693  ;;  %v664_v19 = vpop.permute.xlu0 %663 }
 0x101   : > { %774 = vst.msk [vmem:[#allocation2 + $0x100] sm:$0xff] %vm757_vm3, %v694_v49  ;;  %759 = vst.msk [vmem:[#allocation2 + $0x10] sm:$0xff] %vm757_vm3, %v664_v19  ;;  %v3183_v19 = vld [vmem:[%s2409_s14 + $0x18a] sm:$0xff] }
 0x102   : > { %673 = vrot.lane.b32.xlu1 %v2521_v29, %s2375_s19  ;;  %1476 = vrot.lane.b32.xlu0 %v2644_v56, %s2379_s13  ;;  %1624 = vst.msk [vmem:[#allocation2 + $0x1d8] sm:$0xff] %vm177_vm0, %v3183_v19 }
 0x104   : > { %v855_v48 = vpop.permute.xlu1 %854  ;;  %v696_v14 = vpop.permute.xlu0 %695 }
 0x105   : > { %951 = vst.msk [vmem:[#allocation2] sm:$0xff] %vm950_vm4, %v855_v48  ;;  %v3186_v48 = vld [vmem:[%s2409_s14 + $0x182] sm:$0xff] }
 0x106   : > { %775 = vst.msk [vmem:[#allocation2 + $0x110] sm:$0xff] %vm757_vm3, %v696_v14  ;;  %705 = vrot.lane.b32.xlu1 %v2593_v47, %s2375_s19  ;;  %675 = vrot.lane.b32.xlu0 %v2518_v28, %s2375_s19  ;;  %v3083_v28 = vld [vmem:[%s2409_s14 + $0xb2] sm:$0xff] }
 0x107   : > { %1606 = vst.msk [vmem:[#allocation2 + $0xb8] sm:$0xff] %vm177_vm0, %v3083_v28  ;;  %1623 = vst.msk [vmem:[#allocation2 + $0x1c8] sm:$0xff] %vm177_vm0, %v3186_v48 }
 0x108   : > { %v887_v1 = vpop.permute.xlu1 %886  ;;  %v857_v29 = vpop.permute.xlu0 %856 }
 0x109   : > { %967 = vst.msk [vmem:[#allocation2 + $0x100] sm:$0xff] %vm950_vm4, %v887_v1  ;;  %952 = vst.msk [vmem:[#allocation2 + $0x10] sm:$0xff] %vm950_vm4, %v857_v29  ;;  %v2236_v1 = vld [vmem:[%s2409_s14 + $0x91] sm:$0xff] }
 0x10a   : > { %866 = vrot.lane.b32.xlu1 %v2449_v9, %s2376_s24  ;;  %707 = vrot.lane.b32.xlu0 %v2590_v46, %s2375_s19 }
 0x10c   : > { %v1048_v13 = vpop.permute.xlu1 %1047  ;;  %v889_v47 = vpop.permute.xlu0 %888 }
 0x10d   : > { %1144 = vst.msk [vmem:[#allocation2] sm:$0xff] %vm1143_vm5, %v1048_v13 }
 0x10e   : > { %968 = vst.msk [vmem:[#allocation2 + $0x110] sm:$0xff] %vm950_vm4, %v889_v47  ;;  %898 = vrot.lane.b32.xlu1 %v2647_v57, %s2376_s24  ;;  %868 = vrot.lane.b32.xlu0 %v2446_v8, %s2376_s24  ;;  %v2252_v47 = vld [vmem:[%s2409_s14 + $0x151] sm:$0xff] }
 0x110   : > { %v1080_v9 = vpop.permute.xlu1 %1079  ;;  %v1050_v46 = vpop.permute.xlu0 %1049 }
 0x111   : > { %1160 = vst.msk [vmem:[#allocation2 + $0x100] sm:$0xff] %vm1143_vm5, %v1080_v9  ;;  %1145 = vst.msk [vmem:[#allocation2 + $0x10] sm:$0xff] %vm1143_vm5, %v1050_v46  ;;  %v2237_v9 = vld [vmem:[%s2409_s14 + $0x99] sm:$0xff] }
 0x112   : > { %1059 = vrot.lane.b32.xlu1 %v2713_v35, %s2377_s29  ;;  %900 = vrot.lane.b32.xlu0 %v2644_v56, %s2376_s24 }
 0x114   : > { %v1242_v8 = vpop.permute.xlu1 %1241  ;;  %v1082_v57 = vpop.permute.xlu0 %1081 }
 0x115   : > { %1338 = vst.msk [vmem:[#allocation2] sm:$0xff] %vm1337_vm6, %v1242_v8 }
 0x116   : > { %1161 = vst.msk [vmem:[#allocation2 + $0x110] sm:$0xff] %vm1143_vm5, %v1082_v57  ;;  %1091 = vrot.lane.b32.xlu1 %v2763_v37, %s2377_s29  ;;  %1061 = vrot.lane.b32.xlu0 %v2710_v34, %s2377_s29  ;;  %v2234_v34 = vld [vmem:[%s2409_s14 + $0x79] sm:$0xff] }
 0x117   : > { %v1638_v57 = vld [vmem:[#allocation2 + $0x58] sm:$0xff] }
 0x118   : > { %v1274_v56 = vpop.permute.xlu1 %1273  ;;  %v1244_v35 = vpop.permute.xlu0 %1243 }
 0x119   : > { %1354 = vst.msk [vmem:[#allocation2 + $0x100] sm:$0xff] %vm1337_vm6, %v1274_v56  ;;  %1339 = vst.msk [vmem:[#allocation2 + $0x10] sm:$0xff] %vm1337_vm6, %v1244_v35  ;;  %v2253_v56 = vld [vmem:[%s2409_s14 + $0x159] sm:$0xff] }
 0x11a   : > { %1253 = vrot.lane.b32.xlu1 %v2535_v31, %s2378_s6  ;;  %1093 = vrot.lane.b32.xlu0 %v2760_v36, %s2377_s29  ;;  %v2250_v36 = vld [vmem:[%s2409_s14 + $0x139] sm:$0xff] }
 0x11c   : > { %v1435_v18 = vpop.permute.xlu1 %1434  ;;  %v1276_v37 = vpop.permute.xlu0 %1275 }
 0x11d   : > { %1531 = vst.msk [vmem:[#allocation2] sm:$0xff] %vm1530_vm7, %v1435_v18 }
 0x11e   : > { %1355 = vst.msk [vmem:[#allocation2 + $0x110] sm:$0xff] %vm1337_vm6, %v1276_v37  ;;  %1285 = vrot.lane.b32.xlu1 %v2613_v51, %s2378_s6  ;;  %1255 = vrot.lane.b32.xlu0 %v2524_v30, %s2378_s6 }
 0x120   : > { %v1467_v12 = vpop.permute.xlu1 %1466  ;;  %v1437_v24 = vpop.permute.xlu0 %1436 }
 0x121   : > { %1547 = vst.msk [vmem:[#allocation2 + $0x100] sm:$0xff] %vm1530_vm7, %v1467_v12  ;;  %1532 = vst.msk [vmem:[#allocation2 + $0x10] sm:$0xff] %vm1530_vm7, %v1437_v24 }
 0x122   : > { %1446 = vrot.lane.b32.xlu1 %v2234_v34, %s2379_s13  ;;  %1287 = vrot.lane.b32.xlu0 %v2610_v50, %s2378_s6 }
 0x124   : > { %v666_v58 = vpop.permute.xlu1 %665  ;;  %v1469_v0 = vpop.permute.xlu0 %1468  ;;  %v1627_v25 = vld [vmem:[#allocation2] sm:$0xff] }
 0x125   : > { %760 = vst.msk [vmem:[#allocation2 + $0x20] sm:$0xff] %vm757_vm3, %v666_v58  ;;  %v2111_v58 = vld [vmem:[%s2409_s14 + $0x98] sm:$0xff] }
 0x126   : > { %1548 = vst.msk [vmem:[#allocation2 + $0x110] sm:$0xff] %vm1530_vm7, %v1469_v0  ;;  %1478 = vrot.lane.b32.xlu1 %v2250_v36, %s2379_s13  ;;  %1448 = vrot.lane.b32.xlu0 %v2235_v61, %s2379_s13 }
 0x128   : > { %v698_v45 = vpop.permute.xlu1 %697  ;;  %v668_v43 = vpop.permute.xlu0 %667  ;;  %v1629_v7 = vld [vmem:[#allocation2 + $0x10] sm:$0xff]  ;;  %v1659_v39 = vld [vmem:[#allocation2 + $0x100] sm:$0xff] }
 0x129   : > { %776 = vst.msk [vmem:[#allocation2 + $0x120] sm:$0xff] %vm757_vm3, %v698_v45  ;;  %761 = vst.msk [vmem:[#allocation2 + $0x30] sm:$0xff] %vm757_vm3, %v668_v43  ;;  %v1691_v6 = vpack.c.bf16 %v1629_v7, %v1627_v25 }
 0x12a   : > { %677 = vrot.lane.b32.xlu1 %v2535_v31, %s2375_s19  ;;  %1480 = vrot.lane.b32.xlu0 %v2251_v2, %s2379_s13 }
 0x12b   : > { %1876 = vmatmul.mubr.bf16.vlgmr.msra.gmra.mxu0 %v1691_v6 }
 0x12c   : > { %v859_v38 = vpop.permute.xlu1 %858  ;;  %v700_v52 = vpop.permute.xlu0 %699  ;;  %2302 = vmatprep.mubr.msk.bf16.mxu0 %vm177_vm0, %v1694_v42 }
 0x12d   : > { %v1661_v11 = vld [vmem:[#allocation2 + $0x110] sm:$0xff]  ;;  %953 = vst.msk [vmem:[#allocation2 + $0x20] sm:$0xff] %vm950_vm4, %v859_v38  ;;  %v2206_v38 = vld [vmem:[%s2409_s14 + $0xa8] sm:$0xff] }
 0x12e   : > { %777 = vst.msk [vmem:[#allocation2 + $0x130] sm:$0xff] %vm757_vm3, %v700_v52  ;;  %v1707_v40 = vpack.c.bf16 %v1661_v11, %v1659_v39  ;;  %709 = vrot.lane.b32.xlu1 %v2613_v51, %s2375_s19  ;;  %679 = vrot.lane.b32.xlu0 %v2524_v30, %s2375_s19 }
 0x130   : > { %1940 = vmatmul.mubr.bf16.vlgmr.msra.gmra.mxu1 %v1707_v40  ;;  %v891_v31 = vpop.permute.xlu1 %890  ;;  %v861_v20 = vpop.permute.xlu0 %860 }
 0x131   : > { %2310 = vmatprep.mubr.msk.bf16.mxu1 %vm177_vm0, %v1710_v21  ;;  %969 = vst.msk [vmem:[#allocation2 + $0x120] sm:$0xff] %vm950_vm4, %v891_v31  ;;  %954 = vst.msk [vmem:[#allocation2 + $0x30] sm:$0xff] %vm950_vm4, %v861_v20  ;;  %v2238_v21 = vld [vmem:[%s2409_s14 + $0xa9] sm:$0xff] }
 0x132   : > { %870 = vrot.lane.b32.xlu1 %v2234_v34, %s2376_s24  ;;  %711 = vrot.lane.b32.xlu0 %v2610_v50, %s2375_s19  ;;  %v3171_v50 = vld [vmem:[%s2409_s14 + $0xc2] sm:$0xff] }
 0x133   : > { %1607 = vst.msk [vmem:[#allocation2 + $0xc8] sm:$0xff] %vm177_vm0, %v3171_v50  ;;  %v3557_v20 = vld [vmem:[#allocation4_spill] sm:$0xff] }
 0x134   : > { %v1052_v51 = vpop.permute.xlu1 %1051  ;;  %v893_v5 = vpop.permute.xlu0 %892 }
 0x135   : > { %1146 = vst.msk [vmem:[#allocation2 + $0x20] sm:$0xff] %vm1143_vm5, %v1052_v51  ;;  %v2254_v51 = vld [vmem:[%s2409_s14 + $0x169] sm:$0xff] }
 0x136   : > { %970 = vst.msk [vmem:[#allocation2 + $0x130] sm:$0xff] %vm950_vm4, %v893_v5  ;;  %902 = vrot.lane.b32.xlu1 %v2250_v36, %s2376_s24  ;;  %872 = vrot.lane.b32.xlu0 %v2235_v61, %s2376_s24  ;;  %v1668_v36 = vld [vmem:[#allocation2 + $0x148] sm:$0xff]  ;;  %v1670_v61 = vld [vmem:[#allocation2 + $0x158] sm:$0xff] }
 0x137   : > { %v1712_v45 = vpack.c.bf16 %v1670_v61, %v1668_v36  ;;  %v2239_v5 = vld [vmem:[%s2409_s14 + $0xb1] sm:$0xff] }
 0x138   : > { %v1084_v30 = vpop.permute.xlu1 %1083  ;;  %v1054_v10 = vpop.permute.xlu0 %1053 }
 0x139   : > { %1162 = vst.msk [vmem:[#allocation2 + $0x120] sm:$0xff] %vm1143_vm5, %v1084_v30  ;;  %1147 = vst.msk [vmem:[#allocation2 + $0x30] sm:$0xff] %vm1143_vm5, %v1054_v10 }
 0x13a   : > { %1063 = vrot.lane.b32.xlu1 %v2901_v23, %s2377_s29  ;;  %904 = vrot.lane.b32.xlu0 %v2251_v2, %s2376_s24 }
 0x13c   : > { %v1246_v4 = vpop.permute.xlu1 %1245  ;;  %v1086_v49 = vpop.permute.xlu0 %1085 }
 0x13d   : > { %1340 = vst.msk [vmem:[#allocation2 + $0x20] sm:$0xff] %vm1337_vm6, %v1246_v4  ;;  %v1640_v4 = vld [vmem:[#allocation2 + $0x68] sm:$0xff] }
 0x13e   : > { %1163 = vst.msk [vmem:[#allocation2 + $0x130] sm:$0xff] %vm1143_vm5, %v1086_v49  ;;  %1095 = vrot.lane.b32.xlu1 %v2912_v60, %s2377_s29  ;;  %1065 = vrot.lane.b32.xlu0 %v2915_v15, %s2377_s29  ;;  %v1642_v49 = vld [vmem:[#allocation2 + $0x78] sm:$0xff] }
 0x140   : > { %v1278_v23 = vpop.permute.xlu1 %1277  ;;  %v1248_v14 = vpop.permute.xlu0 %1247 }
 0x141   : > { %1356 = vst.msk [vmem:[#allocation2 + $0x120] sm:$0xff] %vm1337_vm6, %v1278_v23  ;;  %1341 = vst.msk [vmem:[#allocation2 + $0x30] sm:$0xff] %vm1337_vm6, %v1248_v14  ;;  %v2255_v23 = vld [vmem:[%s2409_s14 + $0x171] sm:$0xff] }
 0x142   : > { %1257 = vrot.lane.b32.xlu1 %v2541_v33, %s2378_s6  ;;  %1097 = vrot.lane.b32.xlu0 %v2928_v3, %s2377_s29  ;;  %v3555_v3 = vld [vmem:[#allocation3_spill] sm:$0xff] }
 0x144   : > { %v1439_v60 = vpop.permute.xlu1 %1438  ;;  %v1280_v15 = vpop.permute.xlu0 %1279 }
 0x145   : > { %1533 = vst.msk [vmem:[#allocation2 + $0x20] sm:$0xff] %vm1530_vm7, %v1439_v60 }
 0x146   : > { %1357 = vst.msk [vmem:[#allocation2 + $0x130] sm:$0xff] %vm1337_vm6, %v1280_v15  ;;  %1289 = vrot.lane.b32.xlu1 %v2633_v55, %s2378_s6  ;;  %1259 = vrot.lane.b32.xlu0 %v2538_v32, %s2378_s6  ;;  %v1636_v32 = vld [vmem:[#allocation2 + $0x48] sm:$0xff] }
 0x147   : > { %v1696_v12 = vpack.c.bf16 %v1638_v57, %v1636_v32 }
 0x148   : > { %v1471_v29 = vpop.permute.xlu1 %1470  ;;  %v1441_v13 = vpop.permute.xlu0 %1440 }
 0x149   : > { %1549 = vst.msk [vmem:[#allocation2 + $0x120] sm:$0xff] %vm1530_vm7, %v1471_v29  ;;  %1534 = vst.msk [vmem:[#allocation2 + $0x30] sm:$0xff] %vm1530_vm7, %v1441_v13  ;;  %v1698_v29 = vpack.c.bf16 %v1642_v49, %v1640_v4 }
 0x14a   : > { %1450 = vrot.lane.b32.xlu1 %v2236_v1, %s2379_s13  ;;  %1291 = vrot.lane.b32.xlu0 %v3555_v3, %s2378_s6 }
 0x14c   : > { %v670_v46 = vpop.permute.xlu1 %669  ;;  %v1473_v8 = vpop.permute.xlu0 %1472  ;;  %v1631_v37 = vld [vmem:[#allocation2 + $0x20] sm:$0xff] }
 0x14d   : > { %762 = vst.msk [vmem:[#allocation2 + $0x40] sm:$0xff] %vm757_vm3, %v670_v46 }
 0x14e   : > { %1550 = vst.msk [vmem:[#allocation2 + $0x130] sm:$0xff] %vm1530_vm7, %v1473_v8  ;;  %1482 = vrot.lane.b32.xlu1 %v2252_v47, %s2379_s13  ;;  %1452 = vrot.lane.b32.xlu0 %v2237_v9, %s2379_s13 }
 0x150   : > { %v702_v35 = vpop.permute.xlu1 %701  ;;  %v672_v18 = vpop.permute.xlu0 %671  ;;  %v1633_v34 = vld [vmem:[#allocation2 + $0x30] sm:$0xff]  ;;  %v1663_v62 = vld [vmem:[#allocation2 + $0x120] sm:$0xff] }
 0x151   : > { %778 = vst.msk [vmem:[#allocation2 + $0x140] sm:$0xff] %vm757_vm3, %v702_v35  ;;  %763 = vst.msk [vmem:[#allocation2 + $0x50] sm:$0xff] %vm757_vm3, %v672_v18  ;;  %v1693_v24 = vpack.c.bf16 %v1633_v34, %v1631_v37  ;;  %v2128_v35 = vld [vmem:[%s2409_s14 + $0x168] sm:$0xff] }
 0x152   : > { %681 = vrot.lane.b32.xlu1 %v2541_v33, %s2375_s19  ;;  %1484 = vrot.lane.b32.xlu0 %v2253_v56, %s2379_s13 }
 0x153   : > { %1884 = vmatmul.mubr.bf16.gmra.mxu0 %v1693_v24 }
 0x154   : > { %v863_v0 = vpop.permute.xlu1 %862  ;;  %v704_v27 = vpop.permute.xlu0 %703  ;;  %2303 = vmatprep.mubr.msk.bf16.mxu0 %vm177_vm0, %v1696_v12 }
 0x155   : > { %v1665_v2 = vld [vmem:[#allocation2 + $0x130] sm:$0xff]  ;;  %955 = vst.msk [vmem:[#allocation2 + $0x40] sm:$0xff] %vm950_vm4, %v863_v0 }
 0x156   : > { %779 = vst.msk [vmem:[#allocation2 + $0x150] sm:$0xff] %vm757_vm3, %v704_v27  ;;  %v1709_v43 = vpack.c.bf16 %v1665_v2, %v1663_v62  ;;  %713 = vrot.lane.b32.xlu1 %v2633_v55, %s2375_s19  ;;  %683 = vrot.lane.b32.xlu0 %v2111_v58, %s2375_s19  ;;  %v2209_v62 = vld [vmem:[%s2409_s14 + $0xc8] sm:$0xff] }
 0x158   : > { %1948 = vmatmul.mubr.bf16.gmra.mxu1 %v1709_v43  ;;  %v895_v33 = vpop.permute.xlu1 %894  ;;  %v865_v25 = vpop.permute.xlu0 %864  ;;  %v2224_v43 = vld [vmem:[%s2409_s14 + $0x180] sm:$0xff] }
 0x159   : > { %2311 = vmatprep.mubr.msk.bf16.mxu1 %vm177_vm0, %v1712_v45  ;;  %971 = vst.msk [vmem:[#allocation2 + $0x140] sm:$0xff] %vm950_vm4, %v895_v33  ;;  %956 = vst.msk [vmem:[#allocation2 + $0x50] sm:$0xff] %vm950_vm4, %v865_v25 }
 0x15a   : > { %874 = vrot.lane.b32.xlu1 %v2236_v1, %s2376_s24  ;;  %715 = vrot.lane.b32.xlu0 %v3555_v3, %s2375_s19  ;;  %v1672_v3 = vld [vmem:[#allocation2 + $0x168] sm:$0xff] }
 0x15c   : > { %v1056_v7 = vpop.permute.xlu1 %1055  ;;  %v897_v42 = vpop.permute.xlu0 %896 }
 0x15d   : > { %1148 = vst.msk [vmem:[#allocation2 + $0x40] sm:$0xff] %vm1143_vm5, %v1056_v7  ;;  %v2241_v7 = vld [vmem:[%s2409_s14 + $0xc9] sm:$0xff] }
 0x15e   : > { %972 = vst.msk [vmem:[#allocation2 + $0x150] sm:$0xff] %vm950_vm4, %v897_v42  ;;  %906 = vrot.lane.b32.xlu1 %v2252_v47, %s2376_s24  ;;  %876 = vrot.lane.b32.xlu0 %v2237_v9, %s2376_s24  ;;  %v1674_v47 = vld [vmem:[#allocation2 + $0x178] sm:$0xff]  ;;  %v2240_v42 = vld [vmem:[%s2409_s14 + $0xc1] sm:$0xff] }
 0x15f   : > { %v1714_v57 = vpack.c.bf16 %v1674_v47, %v1672_v3  ;;  %v2274_v3 = vld [vmem:[%s2409_s14 + $0xda] sm:$0xff]  ;;  %v2275_v47 = vld [vmem:[%s2409_s14 + $0xe2] sm:$0xff] }
 0x160   : > { %v1088_v55 = vpop.permute.xlu1 %1087  ;;  %v1058_v6 = vpop.permute.xlu0 %1057  ;;  %1609 = vst.msk [vmem:[#allocation2 + $0xe8] sm:$0xff] %vm177_vm0, %v2274_v3  ;;  %1610 = vst.msk [vmem:[#allocation2 + $0xf8] sm:$0xff] %vm177_vm0, %v2275_v47  ;;  %v1684_v3 = vld [vmem:[#allocation2 + $0x1c8] sm:$0xff]  ;;  %v1686_v47 = vld [vmem:[#allocation2 + $0x1d8] sm:$0xff] }
 0x161   : > { %1164 = vst.msk [vmem:[#allocation2 + $0x140] sm:$0xff] %vm1143_vm5, %v1088_v55  ;;  %1149 = vst.msk [vmem:[#allocation2 + $0x50] sm:$0xff] %vm1143_vm5, %v1058_v6 }
 0x162   : > { %1067 = vrot.lane.b32.xlu1 %v2989_v26, %s2377_s29  ;;  %908 = vrot.lane.b32.xlu0 %v2253_v56, %s2376_s24  ;;  %v2207_v26 = vld [vmem:[%s2409_s14 + $0xb0] sm:$0xff] }
 0x164   : > { %v1250_v53 = vpop.permute.xlu1 %1249  ;;  %v1090_v22 = vpop.permute.xlu0 %1089 }
 0x165   : > { %1342 = vst.msk [vmem:[#allocation2 + $0x40] sm:$0xff] %vm1337_vm6, %v1250_v53  ;;  %v1644_v53 = vld [vmem:[#allocation2 + $0x88] sm:$0xff] }
 0x166   : > { %1165 = vst.msk [vmem:[#allocation2 + $0x150] sm:$0xff] %vm1143_vm5, %v1090_v22  ;;  %1099 = vrot.lane.b32.xlu1 %v3000_v63, %s2377_s29  ;;  %1069 = vrot.lane.b32.xlu0 %v3003_v44, %s2377_s29  ;;  %v3556_v44 = vld [vmem:[#allocation5_spill] sm:$0xff]  ;;  %v1646_v22 = vld [vmem:[#allocation2 + $0x98] sm:$0xff] }
 0x168   : > { %v1282_v52 = vpop.permute.xlu1 %1281  ;;  %v1252_v39 = vpop.permute.xlu0 %1251 }
 0x169   : > { %1358 = vst.msk [vmem:[#allocation2 + $0x140] sm:$0xff] %vm1337_vm6, %v1282_v52  ;;  %1343 = vst.msk [vmem:[#allocation2 + $0x50] sm:$0xff] %vm1337_vm6, %v1252_v39  ;;  %v2256_v52 = vld [vmem:[%s2409_s14 + $0x181] sm:$0xff] }
 0x16a   : > { %1261 = vrot.lane.b32.xlu1 %v2206_v38, %s2378_s6  ;;  %1101 = vrot.lane.b32.xlu0 %v3016_v16, %s2377_s29 }
 0x16c   : > { %v1443_v63 = vpop.permute.xlu1 %1442  ;;  %v1284_v11 = vpop.permute.xlu0 %1283 }
 0x16d   : > { %1535 = vst.msk [vmem:[#allocation2 + $0x40] sm:$0xff] %vm1530_vm7, %v1443_v63 }
 0x16e   : > { %1359 = vst.msk [vmem:[#allocation2 + $0x150] sm:$0xff] %vm1337_vm6, %v1284_v11  ;;  %1293 = vrot.lane.b32.xlu1 %v3556_v44, %s2378_s6  ;;  %1263 = vrot.lane.b32.xlu0 %v2207_v26, %s2378_s6  ;;  %v1700_v44 = vpack.c.bf16 %v1646_v22, %v1644_v53 }
 0x170   : > { %v1475_v40 = vpop.permute.xlu1 %1474  ;;  %v1445_v31 = vpop.permute.xlu0 %1444 }
 0x171   : > { %1551 = vst.msk [vmem:[#allocation2 + $0x140] sm:$0xff] %vm1530_vm7, %v1475_v40  ;;  %1536 = vst.msk [vmem:[#allocation2 + $0x50] sm:$0xff] %vm1530_vm7, %v1445_v31  ;;  %v1676_v40 = vld [vmem:[#allocation2 + $0x188] sm:$0xff]  ;;  %v1678_v31 = vld [vmem:[#allocation2 + $0x198] sm:$0xff] }
 0x172   : > { %1454 = vrot.lane.b32.xlu1 %v2238_v21, %s2379_s13  ;;  %1295 = vrot.lane.b32.xlu0 %v3557_v20, %s2378_s6 }
 0x174   : > { %v674_v30 = vpop.permute.xlu1 %673  ;;  %v1477_v10 = vpop.permute.xlu0 %1476  ;;  %v1635_v15 = vld [vmem:[#allocation2 + $0x40] sm:$0xff] }
 0x175   : > { %764 = vst.msk [vmem:[#allocation2 + $0x60] sm:$0xff] %vm757_vm3, %v674_v30 }
 0x176   : > { %1552 = vst.msk [vmem:[#allocation2 + $0x150] sm:$0xff] %vm1530_vm7, %v1477_v10  ;;  %1486 = vrot.lane.b32.xlu1 %v2254_v51, %s2379_s13  ;;  %1456 = vrot.lane.b32.xlu0 %v2239_v5, %s2379_s13  ;;  %v1716_v10 = vpack.c.bf16 %v1678_v31, %v1676_v40 }
 0x178   : > { %v706_v14 = vpop.permute.xlu1 %705  ;;  %v676_v60 = vpop.permute.xlu0 %675  ;;  %v1637_v1 = vld [vmem:[#allocation2 + $0x50] sm:$0xff]  ;;  %v1667_v8 = vld [vmem:[#allocation2 + $0x140] sm:$0xff] }
 0x179   : > { %780 = vst.msk [vmem:[#allocation2 + $0x160] sm:$0xff] %vm757_vm3, %v706_v14  ;;  %765 = vst.msk [vmem:[#allocation2 + $0x70] sm:$0xff] %vm757_vm3, %v676_v60  ;;  %v1695_v13 = vpack.c.bf16 %v1637_v1, %v1635_v15 }
 0x17a   : > { %525 = vrot.lane.b32.xlu1 %v3016_v16, %s2373_s16  ;;  %1488 = vrot.lane.b32.xlu0 %v2255_v23, %s2379_s13  ;;  %v2129_v16 = vld [vmem:[%s2409_s14 + $0x170] sm:$0xff] }
 0x17b   : > { %1892 = vmatmul.mubr.bf16.gmra.mxu0 %v1695_v13 }
 0x17c   : > { %v867_v9 = vpop.permute.xlu1 %866  ;;  %v708_v46 = vpop.permute.xlu0 %707  ;;  %2304 = vmatprep.mubr.msk.bf16.mxu0 %vm177_vm0, %v1698_v29 }
 0x17d   : > { %v1669_v32 = vld [vmem:[#allocation2 + $0x150] sm:$0xff]  ;;  %957 = vst.msk [vmem:[#allocation2 + $0x60] sm:$0xff] %vm950_vm4, %v867_v9 }
 0x17e   : > { %781 = vst.msk [vmem:[#allocation2 + $0x170] sm:$0xff] %vm757_vm3, %v708_v46  ;;  %v1711_v56 = vpack.c.bf16 %v1669_v32, %v1667_v8  ;;  %687 = vrot.lane.b32.xlu1 %v2207_v26, %s2375_s19  ;;  %685 = vrot.lane.b32.xlu0 %v2206_v38, %s2375_s19  ;;  %v2257_v38 = vld [vmem:[%s2409_s14 + $0x189] sm:$0xff]  ;;  %v2290_v8 = vld [vmem:[%s2409_s14 + $0x19a] sm:$0xff] }
 0x17f   : > { %v2291_v32 = vld [vmem:[%s2409_s14 + $0x1a2] sm:$0xff]  ;;  %1625 = vst.msk [vmem:[#allocation2 + $0x1e8] sm:$0xff] %vm177_vm0, %v2290_v8 }
 0x180   : > { %1956 = vmatmul.mubr.bf16.gmra.mxu1 %v1711_v56  ;;  %v899_v18 = vpop.permute.xlu1 %898  ;;  %v869_v37 = vpop.permute.xlu0 %868  ;;  %1626 = vst.msk [vmem:[#allocation2 + $0x1f8] sm:$0xff] %vm177_vm0, %v2291_v32  ;;  %v1720_v32 = vpack.c.bf16 %v1686_v47, %v1684_v3 }
 0x181   : > { %2312 = vmatprep.mubr.msk.bf16.mxu1 %vm177_vm0, %v1714_v57  ;;  %973 = vst.msk [vmem:[#allocation2 + $0x160] sm:$0xff] %vm950_vm4, %v899_v18  ;;  %958 = vst.msk [vmem:[#allocation2 + $0x70] sm:$0xff] %vm950_vm4, %v869_v37  ;;  %v1648_v18 = vld [vmem:[#allocation2 + $0xa8] sm:$0xff]  ;;  %v1650_v37 = vld [vmem:[#allocation2 + $0xb8] sm:$0xff] }
 0x182   : > { %719 = vrot.lane.b32.xlu1 %v2129_v16, %s2375_s19  ;;  %717 = vrot.lane.b32.xlu0 %v2128_v35, %s2375_s19 }
 0x184   : > { %v1060_v34 = vpop.permute.xlu1 %1059  ;;  %v901_v12 = vpop.permute.xlu0 %900 }
 0x185   : > { %1150 = vst.msk [vmem:[#allocation2 + $0x60] sm:$0xff] %vm1143_vm5, %v1060_v34  ;;  %v2243_v34 = vld [vmem:[%s2409_s14 + $0xe1] sm:$0xff] }
 0x186   : > { %974 = vst.msk [vmem:[#allocation2 + $0x170] sm:$0xff] %vm950_vm4, %v901_v12  ;;  %880 = vrot.lane.b32.xlu1 %v2239_v5, %s2376_s24  ;;  %878 = vrot.lane.b32.xlu0 %v2238_v21, %s2376_s24  ;;  %v2242_v12 = vld [vmem:[%s2409_s14 + $0xd9] sm:$0xff] }
 0x188   : > { %v1092_v24 = vpop.permute.xlu1 %1091  ;;  %v1062_v36 = vpop.permute.xlu0 %1061 }
 0x189   : > { %1166 = vst.msk [vmem:[#allocation2 + $0x160] sm:$0xff] %vm1143_vm5, %v1092_v24  ;;  %1151 = vst.msk [vmem:[#allocation2 + $0x70] sm:$0xff] %vm1143_vm5, %v1062_v36 }
 0x18a   : > { %912 = vrot.lane.b32.xlu1 %v2255_v23, %s2376_s24  ;;  %910 = vrot.lane.b32.xlu0 %v2254_v51, %s2376_s24 }
 0x18c   : > { %v1254_v61 = vpop.permute.xlu1 %1253  ;;  %v1094_v58 = vpop.permute.xlu0 %1093 }
 0x18d   : > { %1344 = vst.msk [vmem:[#allocation2 + $0x60] sm:$0xff] %vm1337_vm6, %v1254_v61 }
 0x18e   : > { %1167 = vst.msk [vmem:[#allocation2 + $0x170] sm:$0xff] %vm1143_vm5, %v1094_v58  ;;  %1073 = vrot.lane.b32.xlu1 %v3083_v28, %s2377_s29  ;;  %1071 = vrot.lane.b32.xlu0 %v3086_v17, %s2377_s29  ;;  %v2208_v28 = vld [vmem:[%s2409_s14 + $0xc0] sm:$0xff]  ;;  %v2225_v17 = vld [vmem:[%s2409_s14 + $0x188] sm:$0xff] }
 0x190   : > { %v1286_v0 = vpop.permute.xlu1 %1285  ;;  %v1256_v27 = vpop.permute.xlu0 %1255 }
 0x191   : > { %1360 = vst.msk [vmem:[#allocation2 + $0x160] sm:$0xff] %vm1337_vm6, %v1286_v0  ;;  %1345 = vst.msk [vmem:[#allocation2 + $0x70] sm:$0xff] %vm1337_vm6, %v1256_v27  ;;  %v1702_v0 = vpack.c.bf16 %v1650_v37, %v1648_v18 }
 0x192   : > { %1105 = vrot.lane.b32.xlu1 %v3099_v54, %s2377_s29  ;;  %1103 = vrot.lane.b32.xlu0 %v3102_v59, %s2377_s29 }
 0x194   : > { %v1447_v2 = vpop.permute.xlu1 %1446  ;;  %v1288_v45 = vpop.permute.xlu0 %1287 }
 0x195   : > { %1537 = vst.msk [vmem:[#allocation2 + $0x60] sm:$0xff] %vm1530_vm7, %v1447_v2  ;;  %v2259_v2 = vld [vmem:[%s2409_s14 + $0x1a1] sm:$0xff] }
 0x196   : > { %1361 = vst.msk [vmem:[#allocation2 + $0x170] sm:$0xff] %vm1337_vm6, %v1288_v45  ;;  %1267 = vrot.lane.b32.xlu1 %v2209_v62, %s2378_s6  ;;  %1265 = vrot.lane.b32.xlu0 %v2208_v28, %s2378_s6  ;;  %v2258_v45 = vld [vmem:[%s2409_s14 + $0x199] sm:$0xff] }
 0x198   : > { %v1479_v33 = vpop.permute.xlu1 %1478  ;;  %v1449_v25 = vpop.permute.xlu0 %1448 }
 0x199   : > { %1553 = vst.msk [vmem:[#allocation2 + $0x160] sm:$0xff] %vm1530_vm7, %v1479_v33  ;;  %1538 = vst.msk [vmem:[#allocation2 + $0x70] sm:$0xff] %vm1530_vm7, %v1449_v25 }
 0x19a   : > { %1299 = vrot.lane.b32.xlu1 %v2225_v17, %s2378_s6  ;;  %1297 = vrot.lane.b32.xlu0 %v2224_v43, %s2378_s6 }
 0x19c   : > { %v678_v55 = vpop.permute.xlu1 %677  ;;  %v1481_v6 = vpop.permute.xlu0 %1480  ;;  %v1639_v63 = vld [vmem:[#allocation2 + $0x60] sm:$0xff] }
 0x19d   : > { %766 = vst.msk [vmem:[#allocation2 + $0x80] sm:$0xff] %vm757_vm3, %v678_v55 }
 0x19e   : > { %1554 = vst.msk [vmem:[#allocation2 + $0x170] sm:$0xff] %vm1530_vm7, %v1481_v6  ;;  %1460 = vrot.lane.b32.xlu1 %v2241_v7, %s2379_s13  ;;  %1458 = vrot.lane.b32.xlu0 %v2240_v42, %s2379_s13 }
 0x1a0   : > { %v710_v39 = vpop.permute.xlu1 %709  ;;  %v680_v26 = vpop.permute.xlu0 %679  ;;  %v1641_v11 = vld [vmem:[#allocation2 + $0x70] sm:$0xff]  ;;  %v1671_v5 = vld [vmem:[#allocation2 + $0x160] sm:$0xff] }
 0x1a1   : > { %782 = vst.msk [vmem:[#allocation2 + $0x180] sm:$0xff] %vm757_vm3, %v710_v39  ;;  %767 = vst.msk [vmem:[#allocation2 + $0x90] sm:$0xff] %vm757_vm3, %v680_v26  ;;  %v1697_v21 = vpack.c.bf16 %v1641_v11, %v1639_v63 }
 0x1a2   : > { %1492 = vrot.lane.b32.xlu1 %v2257_v38, %s2379_s13  ;;  %1490 = vrot.lane.b32.xlu0 %v2256_v52, %s2379_s13 }
 0x1a3   : > { %1900 = vmatmul.mubr.bf16.gmra.mxu0 %v1697_v21 }
 0x1a4   : > { %v871_v20 = vpop.permute.xlu1 %870  ;;  %v712_v51 = vpop.permute.xlu0 %711  ;;  %2305 = vmatprep.mubr.msk.bf16.mxu0 %vm177_vm0, %v1700_v44 }
 0x1a5   : > { %v1673_v30 = vld [vmem:[#allocation2 + $0x170] sm:$0xff]  ;;  %959 = vst.msk [vmem:[#allocation2 + $0x80] sm:$0xff] %vm950_vm4, %v871_v20 }
 0x1a6   : > { %783 = vst.msk [vmem:[#allocation2 + $0x190] sm:$0xff] %vm757_vm3, %v712_v51  ;;  %v1713_v4 = vpack.c.bf16 %v1673_v30, %v1671_v5  ;;  %529 = vrot.lane.b32.xlu1 %v3099_v54, %s2373_s16  ;;  %527 = vrot.lane.b32.xlu0 %v3102_v59, %s2373_s16 }
 0x1a8   : > { %1964 = vmatmul.mubr.bf16.gmra.mxu1 %v1713_v4  ;;  %v903_v49 = vpop.permute.xlu1 %902  ;;  %v873_v23 = vpop.permute.xlu0 %872  ;;  %v1654_v4 = vld [vmem:[#allocation2 + $0xd8] sm:$0xff] }
 0x1a9   : > { %2313 = vmatprep.mubr.msk.bf16.mxu1 %vm177_vm0, %v1716_v10  ;;  %975 = vst.msk [vmem:[#allocation2 + $0x180] sm:$0xff] %vm950_vm4, %v903_v49  ;;  %960 = vst.msk [vmem:[#allocation2 + $0x90] sm:$0xff] %vm950_vm4, %v873_v23  ;;  %v1652_v10 = vld [vmem:[#allocation2 + $0xc8] sm:$0xff] }
 0x1aa   : > { %691 = vrot.lane.b32.xlu1 %v2209_v62, %s2375_s19  ;;  %689 = vrot.lane.b32.xlu0 %v2208_v28, %s2375_s19  ;;  %v1680_v62 = vld [vmem:[#allocation2 + $0x1a8] sm:$0xff]  ;;  %v1682_v28 = vld [vmem:[#allocation2 + $0x1b8] sm:$0xff] }
 0x1ac   : > { %v1064_v14 = vpop.permute.xlu1 %1063  ;;  %v905_v60 = vpop.permute.xlu0 %904 }
 0x1ad   : > { %1152 = vst.msk [vmem:[#allocation2 + $0x80] sm:$0xff] %vm1143_vm5, %v1064_v14 }
 0x1ae   : > { %976 = vst.msk [vmem:[#allocation2 + $0x190] sm:$0xff] %vm950_vm4, %v905_v60  ;;  %723 = vrot.lane.b32.xlu1 %v2225_v17, %s2375_s19  ;;  %721 = vrot.lane.b32.xlu0 %v2224_v43, %s2375_s19 }
 0x1b0   : > { %v1096_v54 = vpop.permute.xlu1 %1095  ;;  %v1066_v59 = vpop.permute.xlu0 %1065 }
 0x1b1   : > { %1168 = vst.msk [vmem:[#allocation2 + $0x180] sm:$0xff] %vm1143_vm5, %v1096_v54  ;;  %1153 = vst.msk [vmem:[#allocation2 + $0x90] sm:$0xff] %vm1143_vm5, %v1066_v59 }
 0x1b2   : > { %884 = vrot.lane.b32.xlu1 %v2241_v7, %s2376_s24  ;;  %882 = vrot.lane.b32.xlu0 %v2240_v42, %s2376_s24  ;;  %v1718_v7 = vpack.c.bf16 %v1682_v28, %v1680_v62 }
 0x1b4   : > { %v1258_v15 = vpop.permute.xlu1 %1257  ;;  %v1098_v1 = vpop.permute.xlu0 %1097 }
 0x1b5   : > { %1346 = vst.msk [vmem:[#allocation2 + $0x80] sm:$0xff] %vm1337_vm6, %v1258_v15  ;;  %v1704_v15 = vpack.c.bf16 %v1654_v4, %v1652_v10 }
 0x1b6   : > { %1169 = vst.msk [vmem:[#allocation2 + $0x190] sm:$0xff] %vm1143_vm5, %v1098_v1  ;;  %916 = vrot.lane.b32.xlu1 %v2257_v38, %s2376_s24  ;;  %914 = vrot.lane.b32.xlu0 %v2256_v52, %s2376_s24 }
 0x1b8   : > { %v1290_v29 = vpop.permute.xlu1 %1289  ;;  %v1260_v13 = vpop.permute.xlu0 %1259 }
 0x1b9   : > { %1362 = vst.msk [vmem:[#allocation2 + $0x180] sm:$0xff] %vm1337_vm6, %v1290_v29  ;;  %1347 = vst.msk [vmem:[#allocation2 + $0x90] sm:$0xff] %vm1337_vm6, %v1260_v13 }
 0x1ba   : > { %1077 = vrot.lane.b32.xlu1 %v3168_v41, %s2377_s29  ;;  %1075 = vrot.lane.b32.xlu0 %v3171_v50, %s2377_s29  ;;  %v2211_v41 = vld [vmem:[%s2409_s14 + $0xe0] sm:$0xff]  ;;  %v2210_v50 = vld [vmem:[%s2409_s14 + $0xd8] sm:$0xff] }
 0x1bc   : > { %v1451_v9 = vpop.permute.xlu1 %1450  ;;  %v1292_v46 = vpop.permute.xlu0 %1291 }
 0x1bd   : > { %1539 = vst.msk [vmem:[#allocation2 + $0x80] sm:$0xff] %vm1530_vm7, %v1451_v9 }
 0x1be   : > { %1363 = vst.msk [vmem:[#allocation2 + $0x190] sm:$0xff] %vm1337_vm6, %v1292_v46  ;;  %1109 = vrot.lane.b32.xlu1 %v3183_v19, %s2377_s29  ;;  %1107 = vrot.lane.b32.xlu0 %v3186_v48, %s2377_s29  ;;  %v2227_v19 = vld [vmem:[%s2409_s14 + $0x1a0] sm:$0xff]  ;;  %v2226_v48 = vld [vmem:[%s2409_s14 + $0x198] sm:$0xff]  ;;  %s2319_s14 = sshll.u32 %s3559_s10, 8 }
 0x1bf   : > { %s3428_s17 = scalar_lea.vmem %s3547_s2, %s2319_s14 }
 0x1c0   : > { %v1483_v57 = vpop.permute.xlu1 %1482  ;;  %v1453_v56 = vpop.permute.xlu0 %1452 }
 0x1c1   : > { %1555 = vst.msk [vmem:[#allocation2 + $0x180] sm:$0xff] %vm1530_vm7, %v1483_v57  ;;  %1540 = vst.msk [vmem:[#allocation2 + $0x90] sm:$0xff] %vm1530_vm7, %v1453_v56 }
 0x1c2   : > { %1271 = vrot.lane.b32.xlu1 %v2211_v41, %s2378_s6  ;;  %1269 = vrot.lane.b32.xlu0 %v2210_v50, %s2378_s6 }
 0x1c4   : > { %v682_v16 = vpop.permute.xlu1 %681  ;;  %v1485_v35 = vpop.permute.xlu0 %1484  ;;  %v1643_v61 = vld [vmem:[#allocation2 + $0x80] sm:$0xff] }
 0x1c5   : > { %768 = vst.msk [vmem:[#allocation2 + $0xa0] sm:$0xff] %vm757_vm3, %v682_v16 }
 0x1c6   : > { %1556 = vst.msk [vmem:[#allocation2 + $0x190] sm:$0xff] %vm1530_vm7, %v1485_v35  ;;  %1303 = vrot.lane.b32.xlu1 %v2227_v19, %s2378_s6  ;;  %1301 = vrot.lane.b32.xlu0 %v2226_v48, %s2378_s6 }
 0x1c8   : > { %v714_v24 = vpop.permute.xlu1 %713  ;;  %v684_v36 = vpop.permute.xlu0 %683  ;;  %v1645_v58 = vld [vmem:[#allocation2 + $0x90] sm:$0xff]  ;;  %v1675_v33 = vld [vmem:[#allocation2 + $0x180] sm:$0xff] }
 0x1c9   : > { %784 = vst.msk [vmem:[#allocation2 + $0x1a0] sm:$0xff] %vm757_vm3, %v714_v24  ;;  %769 = vst.msk [vmem:[#allocation2 + $0xb0] sm:$0xff] %vm757_vm3, %v684_v36  ;;  %v1699_v27 = vpack.c.bf16 %v1645_v58, %v1643_v61 }
 0x1ca   : > { %1464 = vrot.lane.b32.xlu1 %v2243_v34, %s2379_s13  ;;  %1462 = vrot.lane.b32.xlu0 %v2242_v12, %s2379_s13 }
 0x1cb   : > { %1908 = vmatmul.mubr.bf16.gmra.mxu0 %v1699_v27 }
 0x1cc   : > { %v875_v17 = vpop.permute.xlu1 %874  ;;  %v716_v43 = vpop.permute.xlu0 %715  ;;  %2306 = vmatprep.mubr.msk.bf16.mxu0 %vm177_vm0, %v1702_v0 }
 0x1cd   : > { %v1677_v25 = vld [vmem:[#allocation2 + $0x190] sm:$0xff]  ;;  %961 = vst.msk [vmem:[#allocation2 + $0xa0] sm:$0xff] %vm950_vm4, %v875_v17  ;;  %v1656_v17 = vld [vmem:[#allocation2 + $0xe8] sm:$0xff] }
 0x1ce   : > { %785 = vst.msk [vmem:[#allocation2 + $0x1b0] sm:$0xff] %vm757_vm3, %v716_v43  ;;  %v1715_v42 = vpack.c.bf16 %v1677_v25, %v1675_v33  ;;  %1496 = vrot.lane.b32.xlu1 %v2259_v2, %s2379_s13  ;;  %1494 = vrot.lane.b32.xlu0 %v2258_v45, %s2379_s13  ;;  %v1658_v43 = vld [vmem:[#allocation2 + $0xf8] sm:$0xff] }
 0x1d0   : > { %1972 = vmatmul.mubr.bf16.gmra.mxu1 %v1715_v42  ;;  %v907_v55 = vpop.permute.xlu1 %906  ;;  %v877_v6 = vpop.permute.xlu0 %876 }
 0x1d1   : > { %2314 = vmatprep.mubr.msk.bf16.mxu1 %vm177_vm0, %v1718_v7  ;;  %977 = vst.msk [vmem:[#allocation2 + $0x1a0] sm:$0xff] %vm950_vm4, %v907_v55  ;;  %962 = vst.msk [vmem:[#allocation2 + $0xb0] sm:$0xff] %vm950_vm4, %v877_v6 }
 0x1d4   : > { %v1068_v53 = vpop.permute.xlu1 %1067  ;;  %v909_v22 = vpop.permute.xlu0 %908 }
 0x1d5   : > { %1154 = vst.msk [vmem:[#allocation2 + $0xa0] sm:$0xff] %vm1143_vm5, %v1068_v53  ;;  %v1706_v53 = vpack.c.bf16 %v1658_v43, %v1656_v17 }
 0x1d6   : > { %978 = vst.msk [vmem:[#allocation2 + $0x1b0] sm:$0xff] %vm950_vm4, %v909_v22 }
 0x1d8   : > { %v1100_v38 = vpop.permute.xlu1 %1099  ;;  %v1070_v52 = vpop.permute.xlu0 %1069 }
 0x1d9   : > { %1170 = vst.msk [vmem:[#allocation2 + $0x1a0] sm:$0xff] %vm1143_vm5, %v1100_v38  ;;  %1155 = vst.msk [vmem:[#allocation2 + $0xb0] sm:$0xff] %vm1143_vm5, %v1070_v52 }
 0x1dc   : > { %v1262_v39 = vpop.permute.xlu1 %1261  ;;  %v1102_v26 = vpop.permute.xlu0 %1101 }
 0x1dd   : > { %1348 = vst.msk [vmem:[#allocation2 + $0xa0] sm:$0xff] %vm1337_vm6, %v1262_v39  ;;  %v1688_v39 = vld [vmem:[#allocation2 + $0x1e8] sm:$0xff] }
 0x1de   : > { %1171 = vst.msk [vmem:[#allocation2 + $0x1b0] sm:$0xff] %vm1143_vm5, %v1102_v26  ;;  %v1690_v26 = vld [vmem:[#allocation2 + $0x1f8] sm:$0xff] }
 0x1e0   : > { %v1294_v63 = vpop.permute.xlu1 %1293  ;;  %v1264_v11 = vpop.permute.xlu0 %1263 }
 0x1e1   : > { %1364 = vst.msk [vmem:[#allocation2 + $0x1a0] sm:$0xff] %vm1337_vm6, %v1294_v63  ;;  %1349 = vst.msk [vmem:[#allocation2 + $0xb0] sm:$0xff] %vm1337_vm6, %v1264_v11 }
 0x1e4   : > { %v1455_v44 = vpop.permute.xlu1 %1454  ;;  %v1296_v21 = vpop.permute.xlu0 %1295 }
 0x1e5   : > { %1541 = vst.msk [vmem:[#allocation2 + $0xa0] sm:$0xff] %vm1530_vm7, %v1455_v44 }
 0x1e6   : > { %1365 = vst.msk [vmem:[#allocation2 + $0x1b0] sm:$0xff] %vm1337_vm6, %v1296_v21 }
 0x1e8   : > { %v1487_v40 = vpop.permute.xlu1 %1486  ;;  %v1457_v31 = vpop.permute.xlu0 %1456 }
 0x1e9   : > { %1557 = vst.msk [vmem:[#allocation2 + $0x1a0] sm:$0xff] %vm1530_vm7, %v1487_v40  ;;  %1542 = vst.msk [vmem:[#allocation2 + $0xb0] sm:$0xff] %vm1530_vm7, %v1457_v31  ;;  %v1722_v31 = vpack.c.bf16 %v1690_v26, %v1688_v39 }
 0x1eb   : > { %v1877_v20 = vpop.f32.mrf.mxu0 }
 0x1ec   : > { %2005 = vst.msk [vmem:[%s3428_s17] sm:$0xff] %vm2004_vm8, %v1877_v20  ;;  %v526_v51 = vpop.permute.xlu1 %525  ;;  %v1489_v5 = vpop.permute.xlu0 %1488  ;;  %v1647_v54 = vld [vmem:[#allocation2 + $0xa0] sm:$0xff] }
 0x1ed   : > { %593 = vst.msk [vmem:[#allocation2 + $0x1d0] sm:$0xff] %vm563_vm2, %v526_v51  ;;  %v1879_v30 = vpop.f32.mrf.mxu0 }
 0x1ee   : > { %1558 = vst.msk [vmem:[#allocation2 + $0x1b0] sm:$0xff] %vm1530_vm7, %v1489_v5 }
 0x1ef   : > { %v1880_v49 = vpop.f32.mrf.mxu0 }
 0x1f0   : > { %v1941_v23 = vpop.f32.mrf.mxu1  ;;  %2006 = vst.msk [vmem:[%s3428_s17 + $0x8] sm:$0xff] %vm2004_vm8, %v1880_v49  ;;  %v688_v14 = vpop.permute.xlu1 %687  ;;  %v1649_v59 = vld [vmem:[#allocation2 + $0xb0] sm:$0xff]  ;;  %v1679_v50 = vld [vmem:[#allocation2 + $0x1a0] sm:$0xff] }
 0x1f1   : > { %2021 = vst.msk [vmem:[%s3428_s17 + $0x80] sm:$0xff] %vm2004_vm8, %v1941_v23  ;;  %v686_v60 = vpop.permute.xlu0 %685  ;;  %v1882_v1 = vpop.f32.mrf.mxu0  ;;  %v1701_v13 = vpack.c.bf16 %v1649_v59, %v1647_v54 }
 0x1f2   : > { %771 = vst.msk [vmem:[#allocation2 + $0xd0] sm:$0xff] %vm757_vm3, %v688_v14  ;;  %770 = vst.msk [vmem:[#allocation2 + $0xc0] sm:$0xff] %vm757_vm3, %v686_v60  ;;  %v1943_v29 = vpop.f32.mrf.mxu1 }
 0x1f3   : > { %1916 = vmatmul.mubr.bf16.gmra.mxu0 %v1701_v13 }
 0x1f4   : > { %v1944_v9 = vpop.f32.mrf.mxu1  ;;  %v720_v46 = vpop.permute.xlu1 %719  ;;  %2307 = vmatprep.mubr.msk.bf16.mxu0 %vm177_vm0, %v1704_v15 }
 0x1f5   : > { %2022 = vst.msk [vmem:[%s3428_s17 + $0x88] sm:$0xff] %vm2004_vm8, %v1944_v9  ;;  %v718_v41 = vpop.permute.xlu0 %717  ;;  %v1681_v8 = vld [vmem:[#allocation2 + $0x1b0] sm:$0xff] }
 0x1f6   : > { %787 = vst.msk [vmem:[#allocation2 + $0x1d0] sm:$0xff] %vm757_vm3, %v720_v46  ;;  %786 = vst.msk [vmem:[#allocation2 + $0x1c0] sm:$0xff] %vm757_vm3, %v718_v41  ;;  %v1946_v57 = vpop.f32.mrf.mxu1  ;;  %v1717_v56 = vpack.c.bf16 %v1681_v8, %v1679_v50 }
 0x1f8   : > { %1980 = vmatmul.mubr.bf16.gmra.mxu1 %v1717_v56  ;;  %v881_v19 = vpop.permute.xlu1 %880 }
 0x1f9   : > { %v879_v48 = vpop.permute.xlu0 %878  ;;  %2315 = vmatprep.mubr.msk.bf16.mxu1 %vm177_vm0, %v1720_v32  ;;  %964 = vst.msk [vmem:[#allocation2 + $0xd0] sm:$0xff] %vm950_vm4, %v881_v19 }
 0x1fa   : > { %963 = vst.msk [vmem:[#allocation2 + $0xc0] sm:$0xff] %vm950_vm4, %v879_v48 }
 0x1fc   : > { %v913_v16 = vpop.permute.xlu1 %912 }
 0x1fd   : > { %v911_v35 = vpop.permute.xlu0 %910  ;;  %980 = vst.msk [vmem:[#allocation2 + $0x1d0] sm:$0xff] %vm950_vm4, %v913_v16 }
 0x1fe   : > { %979 = vst.msk [vmem:[#allocation2 + $0x1c0] sm:$0xff] %vm950_vm4, %v911_v35 }
 0x200   : > { %v1074_v18 = vpop.permute.xlu1 %1073 }
 0x201   : > { %v1072_v37 = vpop.permute.xlu0 %1071  ;;  %1157 = vst.msk [vmem:[#allocation2 + $0xd0] sm:$0xff] %vm1143_vm5, %v1074_v18 }
 0x202   : > { %1156 = vst.msk [vmem:[#allocation2 + $0xc0] sm:$0xff] %vm1143_vm5, %v1072_v37 }
 0x204   : > { %v1106_v34 = vpop.permute.xlu1 %1105 }
 0x205   : > { %v1104_v12 = vpop.permute.xlu0 %1103  ;;  %1173 = vst.msk [vmem:[#allocation2 + $0x1d0] sm:$0xff] %vm1143_vm5, %v1106_v34 }
 0x206   : > { %1172 = vst.msk [vmem:[#allocation2 + $0x1c0] sm:$0xff] %vm1143_vm5, %v1104_v12 }
 0x208   : > { %v1268_v24 = vpop.permute.xlu1 %1267 }
 0x209   : > { %v1266_v36 = vpop.permute.xlu0 %1265  ;;  %1351 = vst.msk [vmem:[#allocation2 + $0xd0] sm:$0xff] %vm1337_vm6, %v1268_v24 }
 0x20a   : > { %1350 = vst.msk [vmem:[#allocation2 + $0xc0] sm:$0xff] %vm1337_vm6, %v1266_v36 }
 0x20c   : > { %v1300_v61 = vpop.permute.xlu1 %1299 }
 0x20d   : > { %v1298_v58 = vpop.permute.xlu0 %1297  ;;  %1367 = vst.msk [vmem:[#allocation2 + $0x1d0] sm:$0xff] %vm1337_vm6, %v1300_v61 }
 0x20e   : > { %1366 = vst.msk [vmem:[#allocation2 + $0x1c0] sm:$0xff] %vm1337_vm6, %v1298_v58 }
 0x210   : > { %v1461_v0 = vpop.permute.xlu1 %1460 }
 0x211   : > { %v1459_v27 = vpop.permute.xlu0 %1458  ;;  %1544 = vst.msk [vmem:[#allocation2 + $0xd0] sm:$0xff] %vm1530_vm7, %v1461_v0 }
 0x212   : > { %1543 = vst.msk [vmem:[#allocation2 + $0xc0] sm:$0xff] %vm1530_vm7, %v1459_v27 }
 0x213   : > { %v1885_v62 = vpop.f32.mrf.mxu0 }
 0x214   : > { %2007 = vst.msk [vmem:[%s3428_s17 + $0x10] sm:$0xff] %vm2004_vm8, %v1885_v62  ;;  %v1493_v28 = vpop.permute.xlu1 %1492 }
 0x215   : > { %v1491_v2 = vpop.permute.xlu0 %1490  ;;  %1560 = vst.msk [vmem:[#allocation2 + $0x1d0] sm:$0xff] %vm1530_vm7, %v1493_v28  ;;  %v1887_v45 = vpop.f32.mrf.mxu0 }
 0x216   : > { %1559 = vst.msk [vmem:[#allocation2 + $0x1c0] sm:$0xff] %vm1530_vm7, %v1491_v2 }
 0x217   : > { %v1888_v33 = vpop.f32.mrf.mxu0 }
 0x218   : > { %v1949_v25 = vpop.f32.mrf.mxu1  ;;  %2008 = vst.msk [vmem:[%s3428_s17 + $0x18] sm:$0xff] %vm2004_vm8, %v1888_v33  ;;  %v530_v7 = vpop.permute.xlu1 %529  ;;  %v1653_v6 = vld [vmem:[#allocation2 + $0xd0] sm:$0xff] }
 0x219   : > { %2023 = vst.msk [vmem:[%s3428_s17 + $0x90] sm:$0xff] %vm2004_vm8, %v1949_v25  ;;  %v528_v42 = vpop.permute.xlu0 %527  ;;  %v1651_v55 = vld [vmem:[#allocation2 + $0xc0] sm:$0xff]  ;;  %v1890_v22 = vpop.f32.mrf.mxu0 }
 0x21a   : > { %595 = vst.msk [vmem:[#allocation2 + $0x1f0] sm:$0xff] %vm563_vm2, %v530_v7  ;;  %594 = vst.msk [vmem:[#allocation2 + $0x1e0] sm:$0xff] %vm563_vm2, %v528_v42  ;;  %v1951_v38 = vpop.f32.mrf.mxu1  ;;  %v1703_v52 = vpack.c.bf16 %v1653_v6, %v1651_v55 }
 0x21c   : > { %1924 = vmatmul.mubr.bf16.gmra.mxu0 %v1703_v52  ;;  %v1952_v63 = vpop.f32.mrf.mxu1  ;;  %v692_v11 = vpop.permute.xlu1 %691  ;;  %v1685_v40 = vld [vmem:[#allocation2 + $0x1d0] sm:$0xff] }
 0x21d   : > { %2024 = vst.msk [vmem:[%s3428_s17 + $0x98] sm:$0xff] %vm2004_vm8, %v1952_v63  ;;  %v690_v44 = vpop.permute.xlu0 %689  ;;  %v1683_v21 = vld [vmem:[#allocation2 + $0x1c0] sm:$0xff]  ;;  %2308 = vmatprep.mubr.msk.bf16.mxu0 %vm177_vm0, %v1706_v53 }
 0x21e   : > { %773 = vst.msk [vmem:[#allocation2 + $0xf0] sm:$0xff] %vm757_vm3, %v692_v11  ;;  %772 = vst.msk [vmem:[#allocation2 + $0xe0] sm:$0xff] %vm757_vm3, %v690_v44  ;;  %v1954_v20 = vpop.f32.mrf.mxu1  ;;  %v1719_v51 = vpack.c.bf16 %v1685_v40, %v1683_v21 }
 0x220   : > { %1988 = vmatmul.mubr.bf16.gmra.mxu1 %v1719_v51  ;;  %v724_v5 = vpop.permute.xlu1 %723 }
 0x221   : > { %v722_v30 = vpop.permute.xlu0 %721  ;;  %2316 = vmatprep.mubr.msk.bf16.mxu1 %vm177_vm0, %v1722_v31  ;;  %789 = vst.msk [vmem:[#allocation2 + $0x1f0] sm:$0xff] %vm757_vm3, %v724_v5 }
 0x222   : > { %788 = vst.msk [vmem:[#allocation2 + $0x1e0] sm:$0xff] %vm757_vm3, %v722_v30 }
 0x224   : > { %v885_v10 = vpop.permute.xlu1 %884 }
 0x225   : > { %v883_v4 = vpop.permute.xlu0 %882  ;;  %966 = vst.msk [vmem:[#allocation2 + $0xf0] sm:$0xff] %vm950_vm4, %v885_v10 }
 0x226   : > { %965 = vst.msk [vmem:[#allocation2 + $0xe0] sm:$0xff] %vm950_vm4, %v883_v4 }
 0x228   : > { %v917_v49 = vpop.permute.xlu1 %916 }
 0x229   : > { %v915_v23 = vpop.permute.xlu0 %914  ;;  %982 = vst.msk [vmem:[#allocation2 + $0x1f0] sm:$0xff] %vm950_vm4, %v917_v49 }
 0x22a   : > { %981 = vst.msk [vmem:[#allocation2 + $0x1e0] sm:$0xff] %vm950_vm4, %v915_v23 }
 0x22c   : > { %v1078_v14 = vpop.permute.xlu1 %1077 }
 0x22d   : > { %v1076_v60 = vpop.permute.xlu0 %1075  ;;  %1159 = vst.msk [vmem:[#allocation2 + $0xf0] sm:$0xff] %vm1143_vm5, %v1078_v14 }
 0x22e   : > { %1158 = vst.msk [vmem:[#allocation2 + $0xe0] sm:$0xff] %vm1143_vm5, %v1076_v60 }
 0x230   : > { %v1110_v54 = vpop.permute.xlu1 %1109 }
 0x231   : > { %v1108_v59 = vpop.permute.xlu0 %1107  ;;  %1175 = vst.msk [vmem:[#allocation2 + $0x1f0] sm:$0xff] %vm1143_vm5, %v1110_v54 }
 0x232   : > { %1174 = vst.msk [vmem:[#allocation2 + $0x1e0] sm:$0xff] %vm1143_vm5, %v1108_v59 }
 0x234   : > { %v1272_v15 = vpop.permute.xlu1 %1271 }
 0x235   : > { %v1270_v1 = vpop.permute.xlu0 %1269  ;;  %1353 = vst.msk [vmem:[#allocation2 + $0xf0] sm:$0xff] %vm1337_vm6, %v1272_v15 }
 0x236   : > { %1352 = vst.msk [vmem:[#allocation2 + $0xe0] sm:$0xff] %vm1337_vm6, %v1270_v1 }
 0x238   : > { %v1304_v29 = vpop.permute.xlu1 %1303 }
 0x239   : > { %v1302_v13 = vpop.permute.xlu0 %1301  ;;  %1369 = vst.msk [vmem:[#allocation2 + $0x1f0] sm:$0xff] %vm1337_vm6, %v1304_v29 }
 0x23a   : > { %1368 = vst.msk [vmem:[#allocation2 + $0x1e0] sm:$0xff] %vm1337_vm6, %v1302_v13 }
 0x23b   : > { %v1893_v3 = vpop.f32.mrf.mxu0 }
 0x23c   : > { %2009 = vst.msk [vmem:[%s3428_s17 + $0x20] sm:$0xff] %vm2004_vm8, %v1893_v3  ;;  %v1465_v47 = vpop.permute.xlu1 %1464 }
 0x23d   : > { %v1463_v9 = vpop.permute.xlu0 %1462  ;;  %1546 = vst.msk [vmem:[#allocation2 + $0xf0] sm:$0xff] %vm1530_vm7, %v1465_v47  ;;  %v1895_v46 = vpop.f32.mrf.mxu0 }
 0x23e   : > { %1545 = vst.msk [vmem:[#allocation2 + $0xe0] sm:$0xff] %vm1530_vm7, %v1463_v9 }
 0x23f   : > { %v1896_v41 = vpop.f32.mrf.mxu0 }
 0x240   : > { %v1957_v50 = vpop.f32.mrf.mxu1  ;;  %2010 = vst.msk [vmem:[%s3428_s17 + $0x28] sm:$0xff] %vm2004_vm8, %v1896_v41  ;;  %v1497_v8 = vpop.permute.xlu1 %1496 }
 0x241   : > { %2025 = vst.msk [vmem:[%s3428_s17 + $0xa0] sm:$0xff] %vm2004_vm8, %v1957_v50  ;;  %v1495_v32 = vpop.permute.xlu0 %1494  ;;  %v1898_v57 = vpop.f32.mrf.mxu0 }
 0x242   : > { %1562 = vst.msk [vmem:[#allocation2 + $0x1f0] sm:$0xff] %vm1530_vm7, %v1497_v8  ;;  %1561 = vst.msk [vmem:[#allocation2 + $0x1e0] sm:$0xff] %vm1530_vm7, %v1495_v32  ;;  %v1959_v56 = vpop.f32.mrf.mxu1 }
 0x244   : > { %v1960_v19 = vpop.f32.mrf.mxu1  ;;  %v1657_v16 = vld [vmem:[#allocation2 + $0xf0] sm:$0xff] }
 0x245   : > { %2026 = vst.msk [vmem:[%s3428_s17 + $0xa8] sm:$0xff] %vm2004_vm8, %v1960_v19  ;;  %v1655_v48 = vld [vmem:[#allocation2 + $0xe0] sm:$0xff] }
 0x246   : > { %v1962_v35 = vpop.f32.mrf.mxu1  ;;  %v1705_v18 = vpack.c.bf16 %v1657_v16, %v1655_v48 }
 0x248   : > { %1932 = vmatmul.mubr.bf16.gmra.mxu0 %v1705_v18 }
 0x249   : > { %v1687_v37 = vld [vmem:[#allocation2 + $0x1e0] sm:$0xff]  ;;  %v1689_v34 = vld [vmem:[#allocation2 + $0x1f0] sm:$0xff] }
 0x24a   : > { %v1721_v12 = vpack.c.bf16 %v1689_v34, %v1687_v37 }
 0x24c   : > { %1996 = vmatmul.mubr.bf16.gmra.mxu1 %v1721_v12 }
 0x263   : > { %v1901_v24 = vpop.f32.mrf.mxu0 }
 0x264   : > { %2011 = vst.msk [vmem:[%s3428_s17 + $0x30] sm:$0xff] %vm2004_vm8, %v1901_v24 }
 0x265   : > { %v1903_v36 = vpop.f32.mrf.mxu0 }
 0x267   : > { %v1904_v61 = vpop.f32.mrf.mxu0 }
 0x268   : > { %v1965_v58 = vpop.f32.mrf.mxu1  ;;  %2012 = vst.msk [vmem:[%s3428_s17 + $0x38] sm:$0xff] %vm2004_vm8, %v1904_v61 }
 0x269   : > { %2027 = vst.msk [vmem:[%s3428_s17 + $0xb0] sm:$0xff] %vm2004_vm8, %v1965_v58  ;;  %v1906_v0 = vpop.f32.mrf.mxu0 }
 0x26a   : > { %v1967_v27 = vpop.f32.mrf.mxu1 }
 0x26c   : > { %v1968_v62 = vpop.f32.mrf.mxu1 }
 0x26d   : > { %2028 = vst.msk [vmem:[%s3428_s17 + $0xb8] sm:$0xff] %vm2004_vm8, %v1968_v62 }
 0x26e   : > { %v1970_v28 = vpop.f32.mrf.mxu1 }
 0x28b   : > { %v1909_v2 = vpop.f32.mrf.mxu0 }
 0x28c   : > { %2013 = vst.msk [vmem:[%s3428_s17 + $0x40] sm:$0xff] %vm2004_vm8, %v1909_v2 }
 0x28d   : > { %v1911_v45 = vpop.f32.mrf.mxu0 }
 0x28f   : > { %v1912_v17 = vpop.f32.mrf.mxu0 }
 0x290   : > { %v1973_v43 = vpop.f32.mrf.mxu1  ;;  %2014 = vst.msk [vmem:[%s3428_s17 + $0x48] sm:$0xff] %vm2004_vm8, %v1912_v17 }
 0x291   : > { %2029 = vst.msk [vmem:[%s3428_s17 + $0xc0] sm:$0xff] %vm2004_vm8, %v1973_v43  ;;  %v1914_v33 = vpop.f32.mrf.mxu0 }
 0x292   : > { %v1975_v25 = vpop.f32.mrf.mxu1 }
 0x294   : > { %v1976_v7 = vpop.f32.mrf.mxu1 }
 0x295   : > { %2030 = vst.msk [vmem:[%s3428_s17 + $0xc8] sm:$0xff] %vm2004_vm8, %v1976_v7 }
 0x296   : > { %v1978_v42 = vpop.f32.mrf.mxu1 }
 0x2b3   : > { %v1917_v55 = vpop.f32.mrf.mxu0 }
 0x2b4   : > { %2015 = vst.msk [vmem:[%s3428_s17 + $0x50] sm:$0xff] %vm2004_vm8, %v1917_v55 }
 0x2b5   : > { %v1919_v6 = vpop.f32.mrf.mxu0 }
 0x2b7   : > { %v1920_v53 = vpop.f32.mrf.mxu0 }
 0x2b8   : > { %v1981_v22 = vpop.f32.mrf.mxu1  ;;  %2016 = vst.msk [vmem:[%s3428_s17 + $0x58] sm:$0xff] %vm2004_vm8, %v1920_v53 }
 0x2b9   : > { %2031 = vst.msk [vmem:[%s3428_s17 + $0xd0] sm:$0xff] %vm2004_vm8, %v1981_v22  ;;  %v1922_v38 = vpop.f32.mrf.mxu0 }
 0x2ba   : > { %v1983_v52 = vpop.f32.mrf.mxu1 }
 0x2bc   : > { %v1984_v39 = vpop.f32.mrf.mxu1 }
 0x2bd   : > { %2032 = vst.msk [vmem:[%s3428_s17 + $0xd8] sm:$0xff] %vm2004_vm8, %v1984_v39 }
 0x2be   : > { %v1986_v26 = vpop.f32.mrf.mxu1 }
 0x2dc   : > { %v1925_v63 = vpop.f32.mrf.mxu0 }
 0x2dd   : > { %2017 = vst.msk [vmem:[%s3428_s17 + $0x60] sm:$0xff] %vm2004_vm8, %v1925_v63 }
 0x2de   : > { %v1927_v11 = vpop.f32.mrf.mxu0 }
 0x2e0   : > { %v1928_v44 = vpop.f32.mrf.mxu0  ;;  %v1989_v21 = vpop.f32.mrf.mxu1 }
 0x2e1   : > { %2018 = vst.msk [vmem:[%s3428_s17 + $0x68] sm:$0xff] %vm2004_vm8, %v1928_v44  ;;  %2033 = vst.msk [vmem:[%s3428_s17 + $0xe0] sm:$0xff] %vm2004_vm8, %v1989_v21 }
 0x2e2   : > { %v1930_v40 = vpop.f32.mrf.mxu0  ;;  %v1991_v31 = vpop.f32.mrf.mxu1 }
 0x2e4   : > { %v1992_v20 = vpop.f32.mrf.mxu1 }
 0x2e5   : > { %2034 = vst.msk [vmem:[%s3428_s17 + $0xe8] sm:$0xff] %vm2004_vm8, %v1992_v20 }
 0x2e6   : > { %v1994_v51 = vpop.f32.mrf.mxu1 }
 0x308   : > { %v1933_v5 = vpop.f32.mrf.mxu0 }
 0x309   : > { %2019 = vst.msk [vmem:[%s3428_s17 + $0x70] sm:$0xff] %vm2004_vm8, %v1933_v5 }
 0x30a   : > { %v1935_v30 = vpop.f32.mrf.mxu0 }
 0x30c   : > { %v1936_v10 = vpop.f32.mrf.mxu0  ;;  %v1997_v4 = vpop.f32.mrf.mxu1 }
 0x30d   : > { %2020 = vst.msk [vmem:[%s3428_s17 + $0x78] sm:$0xff] %vm2004_vm8, %v1936_v10  ;;  %2035 = vst.msk [vmem:[%s3428_s17 + $0xf0] sm:$0xff] %vm2004_vm8, %v1997_v4 }
 0x30e   : > { %v1938_v49 = vpop.f32.mrf.mxu0  ;;  %v1999_v23 = vpop.f32.mrf.mxu1 }
 0x310   : > { %v2000_v14 = vpop.f32.mrf.mxu1 }
 0x311   : > { %2036 = vst.msk [vmem:[%s3428_s17 + $0xf8] sm:$0xff] %vm2004_vm8, %v2000_v14 }
 0x312   : > { %v2002_v60 = vpop.f32.mrf.mxu1 }
 0x313 PF: > { %s12_s9 = sadd.s32 1, %s2370_s9  }
 0x314   : > { %p9_p4 = scmp.ge.s32.totalorder %s12_s9, 4  }
 0x316   :  { %11 = sbr.rel (!%p9_p4) target bundleno = 1 (0x1), region = 60 }

// kernel: attention_forward.4
= control target key start
LH: loop header
LB: loop body
LE: loop exit
PB: predicated region body
PF: predicated region fallthrough
CT: control target
= control target key end

     0   :  { %vm107_vm0 = vcmask 261120   ;;  %vm685_vm1 = vcmask 97280   ;;  %vm1490_vm2 = vcmask 1043456   ;;  %vm1361_vm3 = vcmask 31744   ;;  %s11423_s1 = inlined_call_operand.vmem [shape: f32[32,12], index: 1, kind: input, shape index: {}]   ;;  %s11424_s0 = inlined_call_operand.vmem [shape: f32[512,32], index: 0, kind: input, shape index: {}]   ;;  %s11425_s2 = inlined_call_operand.vmem [shape: f32[1,12], index: 2, kind: input, shape index: {}]   ;;  %s11426_s3 = inlined_call_operand.vmem [shape: f32[1,12], index: 3, kind: input, shape index: {}]   ;;  %s11427_s4 = inlined_call_operand.vmem [shape: f32[1,12], index: 4, kind: input, shape index: {}]   ;;  %s11428_s5 = inlined_call_operand.vmem [shape: f32[4,32], index: 5, kind: input, shape index: {}]   ;;  %s11429_s6 = inlined_call_operand.vmem [shape: f32[1,32], index: 6, kind: input, shape index: {}]   ;;  %s11430_s9 = inlined_call_operand.vmem [shape: f32[512,32], index: 9, kind: output, shape index: {}]   ;;  %s11431_s7 = inlined_call_operand.vmem [shape: f32[1,32], index: 7, kind: input, shape index: {}]   ;;  %s11432_s8 = inlined_call_operand.vmem [shape: f32[1,32], index: 8, kind: input, shape index: {}]  }
   0x1   :  { %v99_v0 = vld [vmem:[%s11423_s1 + $0x18] sm:$0xff]  ;;  %v98_v1 = vld [vmem:[%s11423_s1 + $0x10] sm:$0xff]  ;;  %v32_v2 = vld [vmem:[%s11424_s0] sm:$0xff] }
   0x2   :  { %5380 = vmatprep.subr.mxu0 %v99_v0  ;;  %v97_v3 = vld [vmem:[%s11423_s1 + $0x8] sm:$0xff]  ;;  %5388 = vmatprep.mubr.msk.f32.mxu0 %vm107_vm0, %v32_v2  ;;  %v96_v4 = vld [vmem:[%s11423_s1] sm:$0xff]  ;;  %v34_v6 = vld [vmem:[%s11424_s0 + $0x10] sm:$0xff] }
   0x3   :  { %5381 = vmatpush3.msra.mxu0 %v99_v0  ;;  %v33_v5 = vld [vmem:[%s11424_s0 + $0x8] sm:$0xff]  ;;  %v35_v7 = vld [vmem:[%s11424_s0 + $0x18] sm:$0xff]  ;;  %v36_v8 = vld [vmem:[%s11424_s0 + $0x20] sm:$0xff] }
   0x4   :  { %5382 = vmatprep.subr.mxu0 %v98_v1  ;;  %v37_v9 = vld [vmem:[%s11424_s0 + $0x28] sm:$0xff]  ;;  %v38_v10 = vld [vmem:[%s11424_s0 + $0x30] sm:$0xff]  ;;  %v39_v11 = vld [vmem:[%s11424_s0 + $0x38] sm:$0xff] }
   0x5   :  { %5383 = vmatpush3.msra.mxu0 %v98_v1  ;;  %v40_v12 = vld [vmem:[%s11424_s0 + $0x40] sm:$0xff]  ;;  %v41_v13 = vld [vmem:[%s11424_s0 + $0x48] sm:$0xff]  ;;  %v42_v14 = vld [vmem:[%s11424_s0 + $0x50] sm:$0xff] }
   0x6   :  { %5384 = vmatprep.subr.mxu0 %v97_v3  ;;  %v43_v15 = vld [vmem:[%s11424_s0 + $0x58] sm:$0xff]  ;;  %v44_v16 = vld [vmem:[%s11424_s0 + $0x60] sm:$0xff]  ;;  %v45_v17 = vld [vmem:[%s11424_s0 + $0x68] sm:$0xff] }
   0x7   :  { %5385 = vmatpush3.msra.mxu0 %v97_v3  ;;  %v46_v18 = vld [vmem:[%s11424_s0 + $0x70] sm:$0xff]  ;;  %v47_v19 = vld [vmem:[%s11424_s0 + $0x78] sm:$0xff]  ;;  %v48_v20 = vld [vmem:[%s11424_s0 + $0x80] sm:$0xff] }
   0x8   :  { %5386 = vmatprep.subr.mxu0 %v96_v4  ;;  %v49_v21 = vld [vmem:[%s11424_s0 + $0x88] sm:$0xff]  ;;  %v50_v22 = vld [vmem:[%s11424_s0 + $0x90] sm:$0xff]  ;;  %v51_v23 = vld [vmem:[%s11424_s0 + $0x98] sm:$0xff] }
   0x9   :  { %5387 = vmatpush3.msra.mxu0 %v96_v4  ;;  %v52_v24 = vld [vmem:[%s11424_s0 + $0xa0] sm:$0xff]  ;;  %v53_v25 = vld [vmem:[%s11424_s0 + $0xa8] sm:$0xff]  ;;  %v54_v26 = vld [vmem:[%s11424_s0 + $0xb0] sm:$0xff] }
   0xa   :  { %5389 = vmatmul.mubr.msk.f32.vlgmr.msra.gmra.mxu0 %vm107_vm0, %v33_v5  ;;  %v55_v27 = vld [vmem:[%s11424_s0 + $0xb8] sm:$0xff]  ;;  %v56_v28 = vld [vmem:[%s11424_s0 + $0xc0] sm:$0xff]  ;;  %v57_v29 = vld [vmem:[%s11424_s0 + $0xc8] sm:$0xff] }
   0xb   :  { %5391 = vmatprep.mubr.msk.f32.mxu0 %vm107_vm0, %v34_v6  ;;  %v58_v30 = vld [vmem:[%s11424_s0 + $0xd0] sm:$0xff]  ;;  %v59_v31 = vld [vmem:[%s11424_s0 + $0xd8] sm:$0xff]  ;;  %v60_v32 = vld [vmem:[%s11424_s0 + $0xe0] sm:$0xff] }
   0xc   :  { %v61_v33 = vld [vmem:[%s11424_s0 + $0xe8] sm:$0xff]  ;;  %v62_v34 = vld [vmem:[%s11424_s0 + $0xf0] sm:$0xff]  ;;  %v63_v35 = vld [vmem:[%s11424_s0 + $0xf8] sm:$0xff] }
   0xd   :  { %v64_v36 = vld [vmem:[%s11424_s0 + $0x100] sm:$0xff]  ;;  %v65_v37 = vld [vmem:[%s11424_s0 + $0x108] sm:$0xff]  ;;  %v66_v38 = vld [vmem:[%s11424_s0 + $0x110] sm:$0xff] }
   0xe   :  { %5392 = vmatmul.mubr.msk.f32.gmra.mxu0 %vm107_vm0, %v35_v7  ;;  %v67_v39 = vld [vmem:[%s11424_s0 + $0x118] sm:$0xff]  ;;  %v68_v40 = vld [vmem:[%s11424_s0 + $0x120] sm:$0xff]  ;;  %v69_v41 = vld [vmem:[%s11424_s0 + $0x128] sm:$0xff] }
   0xf   :  { %5394 = vmatprep.mubr.msk.f32.mxu0 %vm107_vm0, %v36_v8  ;;  %v70_v42 = vld [vmem:[%s11424_s0 + $0x130] sm:$0xff]  ;;  %v71_v43 = vld [vmem:[%s11424_s0 + $0x138] sm:$0xff]  ;;  %v72_v44 = vld [vmem:[%s11424_s0 + $0x140] sm:$0xff] }
  0x10   :  { %v73_v45 = vld [vmem:[%s11424_s0 + $0x148] sm:$0xff]  ;;  %v74_v46 = vld [vmem:[%s11424_s0 + $0x150] sm:$0xff]  ;;  %v75_v47 = vld [vmem:[%s11424_s0 + $0x158] sm:$0xff] }
  0x11   :  { %v76_v48 = vld [vmem:[%s11424_s0 + $0x160] sm:$0xff]  ;;  %v77_v49 = vld [vmem:[%s11424_s0 + $0x168] sm:$0xff]  ;;  %v78_v50 = vld [vmem:[%s11424_s0 + $0x170] sm:$0xff] }
  0x12   :  { %5395 = vmatmul.mubr.msk.f32.gmra.mxu0 %vm107_vm0, %v37_v9  ;;  %v79_v51 = vld [vmem:[%s11424_s0 + $0x178] sm:$0xff]  ;;  %v80_v52 = vld [vmem:[%s11424_s0 + $0x180] sm:$0xff]  ;;  %v81_v53 = vld [vmem:[%s11424_s0 + $0x188] sm:$0xff] }
  0x13   :  { %5397 = vmatprep.mubr.msk.f32.mxu0 %vm107_vm0, %v38_v10  ;;  %v82_v54 = vld [vmem:[%s11424_s0 + $0x190] sm:$0xff]  ;;  %v83_v55 = vld [vmem:[%s11424_s0 + $0x198] sm:$0xff]  ;;  %v84_v56 = vld [vmem:[%s11424_s0 + $0x1a0] sm:$0xff] }
  0x14   :  { %v85_v57 = vld [vmem:[%s11424_s0 + $0x1a8] sm:$0xff]  ;;  %v86_v58 = vld [vmem:[%s11424_s0 + $0x1b0] sm:$0xff]  ;;  %v87_v59 = vld [vmem:[%s11424_s0 + $0x1b8] sm:$0xff] }
  0x15   :  { %v88_v60 = vld [vmem:[%s11424_s0 + $0x1c0] sm:$0xff]  ;;  %v89_v61 = vld [vmem:[%s11424_s0 + $0x1c8] sm:$0xff]  ;;  %v90_v62 = vld [vmem:[%s11424_s0 + $0x1d0] sm:$0xff] }
  0x16   :  { %5398 = vmatmul.mubr.msk.f32.gmra.mxu0 %vm107_vm0, %v39_v11  ;;  %v91_v63 = vld [vmem:[%s11424_s0 + $0x1d8] sm:$0xff]  ;;  %v92_v0 = vld [vmem:[%s11424_s0 + $0x1e0] sm:$0xff]  ;;  %v93_v1 = vld [vmem:[%s11424_s0 + $0x1e8] sm:$0xff] }
  0x17   :  { %5400 = vmatprep.mubr.msk.f32.mxu0 %vm107_vm0, %v40_v12  ;;  %v94_v2 = vld [vmem:[%s11424_s0 + $0x1f0] sm:$0xff]  ;;  %v95_v3 = vld [vmem:[%s11424_s0 + $0x1f8] sm:$0xff]  ;;  %v6248_v4 = vld [vmem:[%s11425_s2] ss:$0 sm:$0xff] }
  0x1a   :  { %5401 = vmatmul.mubr.msk.f32.gmra.mxu0 %vm107_vm0, %v41_v13 }
  0x1b   :  { %5403 = vmatprep.mubr.msk.f32.mxu0 %vm107_vm0, %v42_v14 }
  0x1e   :  { %5404 = vmatmul.mubr.msk.f32.gmra.mxu0 %vm107_vm0, %v43_v15 }
  0x1f   :  { %5406 = vmatprep.mubr.msk.f32.mxu0 %vm107_vm0, %v44_v16 }
  0x22   :  { %5407 = vmatmul.mubr.msk.f32.gmra.mxu0 %vm107_vm0, %v45_v17 }
  0x23   :  { %5409 = vmatprep.mubr.msk.f32.mxu0 %vm107_vm0, %v46_v18 }
  0x26   :  { %5410 = vmatmul.mubr.msk.f32.gmra.mxu0 %vm107_vm0, %v47_v19 }
  0x27   :  { %5412 = vmatprep.mubr.msk.f32.mxu0 %vm107_vm0, %v48_v20 }
  0x2a   :  { %5413 = vmatmul.mubr.msk.f32.gmra.mxu0 %vm107_vm0, %v49_v21 }
  0x2b   :  { %5415 = vmatprep.mubr.msk.f32.mxu0 %vm107_vm0, %v50_v22 }
  0x2e   :  { %5416 = vmatmul.mubr.msk.f32.gmra.mxu0 %vm107_vm0, %v51_v23 }
  0x2f   :  { %5418 = vmatprep.mubr.msk.f32.mxu0 %vm107_vm0, %v52_v24 }
  0x32   :  { %5419 = vmatmul.mubr.msk.f32.gmra.mxu0 %vm107_vm0, %v53_v25 }
  0x33   :  { %5421 = vmatprep.mubr.msk.f32.mxu0 %vm107_vm0, %v54_v26 }
  0x36   :  { %5422 = vmatmul.mubr.msk.f32.gmra.mxu0 %vm107_vm0, %v55_v27 }
  0x37   :  { %5424 = vmatprep.mubr.msk.f32.mxu0 %vm107_vm0, %v56_v28 }
  0x3a   :  { %5425 = vmatmul.mubr.msk.f32.gmra.mxu0 %vm107_vm0, %v57_v29 }
  0x3b   :  { %5427 = vmatprep.mubr.msk.f32.mxu0 %vm107_vm0, %v58_v30 }
  0x3e   :  { %5428 = vmatmul.mubr.msk.f32.gmra.mxu0 %vm107_vm0, %v59_v31 }
  0x3f   :  { %5430 = vmatprep.mubr.msk.f32.mxu0 %vm107_vm0, %v60_v32 }
  0x42   :  { %5431 = vmatmul.mubr.msk.f32.gmra.mxu0 %vm107_vm0, %v61_v33 }
  0x43   :  { %5433 = vmatprep.mubr.msk.f32.mxu0 %vm107_vm0, %v62_v34 }
  0x46   :  { %5434 = vmatmul.mubr.msk.f32.gmra.mxu0 %vm107_vm0, %v63_v35 }
  0x47   :  { %5436 = vmatprep.mubr.msk.f32.mxu0 %vm107_vm0, %v64_v36 }
  0x4a   :  { %5437 = vmatmul.mubr.msk.f32.gmra.mxu0 %vm107_vm0, %v65_v37 }
  0x4b   :  { %5439 = vmatprep.mubr.msk.f32.mxu0 %vm107_vm0, %v66_v38 }
  0x4e   :  { %5440 = vmatmul.mubr.msk.f32.gmra.mxu0 %vm107_vm0, %v67_v39 }
  0x4f   :  { %5442 = vmatprep.mubr.msk.f32.mxu0 %vm107_vm0, %v68_v40 }
  0x52   :  { %5443 = vmatmul.mubr.msk.f32.gmra.mxu0 %vm107_vm0, %v69_v41 }
  0x53   :  { %5445 = vmatprep.mubr.msk.f32.mxu0 %vm107_vm0, %v70_v42 }
  0x56   :  { %5446 = vmatmul.mubr.msk.f32.gmra.mxu0 %vm107_vm0, %v71_v43 }
  0x57   :  { %5448 = vmatprep.mubr.msk.f32.mxu0 %vm107_vm0, %v72_v44 }
  0x5a   :  { %5449 = vmatmul.mubr.msk.f32.gmra.mxu0 %vm107_vm0, %v73_v45 }
  0x5b   :  { %5451 = vmatprep.mubr.msk.f32.mxu0 %vm107_vm0, %v74_v46 }
  0x5e   :  { %5452 = vmatmul.mubr.msk.f32.gmra.mxu0 %vm107_vm0, %v75_v47 }
  0x5f   :  { %5454 = vmatprep.mubr.msk.f32.mxu0 %vm107_vm0, %v76_v48 }
  0x62   :  { %5455 = vmatmul.mubr.msk.f32.gmra.mxu0 %vm107_vm0, %v77_v49 }
  0x63   :  { %5457 = vmatprep.mubr.msk.f32.mxu0 %vm107_vm0, %v78_v50 }
  0x66   :  { %5458 = vmatmul.mubr.msk.f32.gmra.mxu0 %vm107_vm0, %v79_v51 }
  0x67   :  { %5460 = vmatprep.mubr.msk.f32.mxu0 %vm107_vm0, %v80_v52 }
  0x6a   :  { %5461 = vmatmul.mubr.msk.f32.gmra.mxu0 %vm107_vm0, %v81_v53 }
  0x6b   :  { %5463 = vmatprep.mubr.msk.f32.mxu0 %vm107_vm0, %v82_v54 }
  0x6e   :  { %5464 = vmatmul.mubr.msk.f32.gmra.mxu0 %vm107_vm0, %v83_v55 }
  0x6f   :  { %5466 = vmatprep.mubr.msk.f32.mxu0 %vm107_vm0, %v84_v56 }
  0x72   :  { %5467 = vmatmul.mubr.msk.f32.gmra.mxu0 %vm107_vm0, %v85_v57 }
  0x73   :  { %5469 = vmatprep.mubr.msk.f32.mxu0 %vm107_vm0, %v86_v58 }
  0x76   :  { %5470 = vmatmul.mubr.msk.f32.gmra.mxu0 %vm107_vm0, %v87_v59 }
  0x77   :  { %5472 = vmatprep.mubr.msk.f32.mxu0 %vm107_vm0, %v88_v60 }
  0x7a   :  { %5473 = vmatmul.mubr.msk.f32.gmra.mxu0 %vm107_vm0, %v89_v61 }
  0x7b   :  { %5475 = vmatprep.mubr.msk.f32.mxu0 %vm107_vm0, %v90_v62 }
  0x7e   :  { %5476 = vmatmul.mubr.msk.f32.gmra.mxu0 %vm107_vm0, %v91_v63 }
  0x7f   :  { %5478 = vmatprep.mubr.msk.f32.mxu0 %vm107_vm0, %v92_v0 }
  0x82   :  { %5479 = vmatmul.mubr.msk.f32.gmra.mxu0 %vm107_vm0, %v93_v1 }
  0x83   :  { %5481 = vmatprep.mubr.msk.f32.mxu0 %vm107_vm0, %v94_v2 }
  0x86   :  { %5482 = vmatmul.mubr.msk.f32.gmra.mxu0 %vm107_vm0, %v95_v3 }
  0xca   :  { %v5390_v5 = vpop.f32.mrf.mxu0 }
  0xcb   :  { %v6251_v6 = vadd.f32 %v5390_v5, %v6248_v4 }
  0xcc   :  { %v366_v7 = vpop.f32.mrf.mxu0 }
  0xcd   :  { %v6254_v8 = vadd.f32 %v6248_v4, %v366_v7  ;;  %v821_v10 = vmul.f32 %v6251_v6, %v6251_v6  ;;  %v687_v15 = vsel %vm685_vm1, %v6251_v6, 0.0 }
  0xce   :  { %v5393_v9 = vpop.f32.mrf.mxu0 }
  0xcf   :  { %v686_v11 = vsel %vm685_vm1, %v6254_v8, 0.0  ;;  %v820_v12 = vmul.f32 %v6254_v8, %v6254_v8  ;;  %v6263_v13 = vadd.f32 %v5393_v9, %v6248_v4  ;;  %v885_v21 = vsel %vm685_vm1, %v821_v10, 0.0 }
  0xd0   :  { %v376_v14 = vpop.f32.mrf.mxu0  ;;  %v688_v18 = vadd.f32 %v687_v15, %v686_v11 }
  0xd1   :  { %v884_v16 = vsel %vm685_vm1, %v820_v12, 0.0  ;;  %v6269_v17 = vadd.f32 %v6248_v4, %v376_v14  ;;  %v823_v19 = vmul.f32 %v6263_v13, %v6263_v13  ;;  %v691_v28 = vsel %vm685_vm1, %v6263_v13, 0.0 }
  0xd2   :  { %v5396_v20 = vpop.f32.mrf.mxu0  ;;  %v886_v25 = vadd.f32 %v885_v21, %v884_v16 }
  0xd3   :  { %v689_v22 = vsel %vm685_vm1, %v6269_v17, 0.0  ;;  %v822_v23 = vmul.f32 %v6269_v17, %v6269_v17  ;;  %v6279_v24 = vadd.f32 %v5396_v20, %v6248_v4  ;;  %v889_v31 = vsel %vm685_vm1, %v823_v19, 0.0 }
  0xd4   :  { %v690_v26 = vadd.f32 %v689_v22, %v688_v18  ;;  %v386_v27 = vpop.f32.mrf.mxu0 }
  0xd5   :  { %v887_v29 = vsel %vm685_vm1, %v822_v23, 0.0  ;;  %v6285_v30 = vadd.f32 %v6248_v4, %v386_v27  ;;  %v825_v35 = vmul.f32 %v6279_v24, %v6279_v24  ;;  %v695_v42 = vsel %vm685_vm1, %v6279_v24, 0.0 }
  0xd6   :  { %v692_v32 = vadd.f32 %v691_v28, %v690_v26  ;;  %v888_v33 = vadd.f32 %v887_v29, %v886_v25  ;;  %v5399_v34 = vpop.f32.mrf.mxu0 }
  0xd7   :  { %v693_v36 = vsel %vm685_vm1, %v6285_v30, 0.0  ;;  %v824_v37 = vmul.f32 %v6285_v30, %v6285_v30  ;;  %v6295_v38 = vadd.f32 %v5399_v34, %v6248_v4  ;;  %v893_v49 = vsel %vm685_vm1, %v825_v35, 0.0 }
  0xd8   :  { %v890_v39 = vadd.f32 %v889_v31, %v888_v33  ;;  %v694_v40 = vadd.f32 %v693_v36, %v692_v32  ;;  %v396_v41 = vpop.f32.mrf.mxu0 }
  0xd9   :  { %v891_v43 = vsel %vm685_vm1, %v824_v37, 0.0  ;;  %v6301_v44 = vadd.f32 %v6248_v4, %v396_v41  ;;  %v827_v46 = vmul.f32 %v6295_v38, %v6295_v38  ;;  %v699_v56 = vsel %vm685_vm1, %v6295_v38, 0.0 }
  0xda   :  { %v892_v45 = vadd.f32 %v891_v43, %v890_v39  ;;  %v696_v47 = vadd.f32 %v695_v42, %v694_v40  ;;  %v5402_v48 = vpop.f32.mrf.mxu0 }
  0xdb   :  { %11637 = vst [vmem:[#allocation2_spill] sm:$0xff] %v6301_v44  ;;  %v697_v50 = vsel %vm685_vm1, %v6301_v44, 0.0  ;;  %v826_v51 = vmul.f32 %v6301_v44, %v6301_v44  ;;  %v6311_v52 = vadd.f32 %v5402_v48, %v6248_v4  ;;  %v897_v59 = vsel %vm685_vm1, %v827_v46, 0.0 }
  0xdc   :  { %v698_v53 = vadd.f32 %v697_v50, %v696_v47  ;;  %v894_v54 = vadd.f32 %v893_v49, %v892_v45  ;;  %v406_v55 = vpop.f32.mrf.mxu0 }
  0xdd   :  { %v895_v57 = vsel %vm685_vm1, %v826_v51, 0.0  ;;  %v6317_v58 = vadd.f32 %v6248_v4, %v406_v55  ;;  %v829_v63 = vmul.f32 %v6311_v52, %v6311_v52  ;;  %v703_v9 = vsel %vm685_vm1, %v6311_v52, 0.0 }
  0xde   :  { %v896_v60 = vadd.f32 %v895_v57, %v894_v54  ;;  %v700_v61 = vadd.f32 %v699_v56, %v698_v53  ;;  %v5405_v62 = vpop.f32.mrf.mxu0 }
  0xdf   :  { %11638 = vst [vmem:[#allocation3_spill] sm:$0xff] %v6317_v58  ;;  %v701_v0 = vsel %vm685_vm1, %v6317_v58, 0.0  ;;  %v828_v1 = vmul.f32 %v6317_v58, %v6317_v58  ;;  %v6327_v2 = vadd.f32 %v5405_v62, %v6248_v4  ;;  %v901_v18 = vsel %vm685_vm1, %v829_v63, 0.0 }
  0xe0   :  { %v702_v3 = vadd.f32 %v701_v0, %v700_v61  ;;  %v898_v5 = vadd.f32 %v897_v59, %v896_v60  ;;  %v416_v7 = vpop.f32.mrf.mxu0 }
  0xe1   :  { %11639 = vst [vmem:[#allocation4_spill] sm:$0xff] %v6327_v2  ;;  %v899_v10 = vsel %vm685_vm1, %v828_v1, 0.0  ;;  %v6333_v11 = vadd.f32 %v6248_v4, %v416_v7  ;;  %v831_v14 = vmul.f32 %v6327_v2, %v6327_v2  ;;  %v707_v26 = vsel %vm685_vm1, %v6327_v2, 0.0 }
  0xe2   :  { %v900_v12 = vadd.f32 %v899_v10, %v898_v5  ;;  %v704_v15 = vadd.f32 %v703_v9, %v702_v3  ;;  %v5408_v16 = vpop.f32.mrf.mxu0 }
  0xe3   :  { %11640 = vst [vmem:[#allocation5_spill] sm:$0xff] %v6333_v11  ;;  %v705_v19 = vsel %vm685_vm1, %v6333_v11, 0.0  ;;  %v830_v20 = vmul.f32 %v6333_v11, %v6333_v11  ;;  %v6343_v21 = vadd.f32 %v5408_v16, %v6248_v4  ;;  %v905_v29 = vsel %vm685_vm1, %v831_v14, 0.0 }
  0xe4   :  { %v706_v22 = vadd.f32 %v705_v19, %v704_v15  ;;  %v902_v23 = vadd.f32 %v901_v18, %v900_v12  ;;  %v426_v25 = vpop.f32.mrf.mxu0 }
  0xe5   :  { %11641 = vst [vmem:[#allocation6_spill] sm:$0xff] %v6343_v21  ;;  %v903_v27 = vsel %vm685_vm1, %v830_v20, 0.0  ;;  %v6349_v28 = vadd.f32 %v6248_v4, %v426_v25  ;;  %v833_v34 = vmul.f32 %v6343_v21, %v6343_v21  ;;  %v711_v42 = vsel %vm685_vm1, %v6343_v21, 0.0 }
  0xe6   :  { %v904_v31 = vadd.f32 %v903_v27, %v902_v23  ;;  %v708_v32 = vadd.f32 %v707_v26, %v706_v22  ;;  %v5411_v33 = vpop.f32.mrf.mxu0 }
  0xe7   :  { %11642 = vst [vmem:[#allocation7_spill] sm:$0xff] %v6349_v28  ;;  %v709_v35 = vsel %vm685_vm1, %v6349_v28, 0.0  ;;  %v832_v36 = vmul.f32 %v6349_v28, %v6349_v28  ;;  %v6359_v37 = vadd.f32 %v5411_v33, %v6248_v4  ;;  %v909_v50 = vsel %vm685_vm1, %v833_v34, 0.0 }
  0xe8   :  { %v710_v39 = vadd.f32 %v709_v35, %v708_v32  ;;  %v906_v40 = vadd.f32 %v905_v29, %v904_v31  ;;  %v436_v41 = vpop.f32.mrf.mxu0 }
  0xe9   :  { %11643 = vst [vmem:[#allocation8_spill] sm:$0xff] %v6359_v37  ;;  %v907_v43 = vsel %vm685_vm1, %v832_v36, 0.0  ;;  %v6365_v45 = vadd.f32 %v6248_v4, %v436_v41  ;;  %v835_v47 = vmul.f32 %v6359_v37, %v6359_v37  ;;  %v715_v59 = vsel %vm685_vm1, %v6359_v37, 0.0 }
  0xea   :  { %v908_v46 = vadd.f32 %v907_v43, %v906_v40  ;;  %v712_v48 = vadd.f32 %v711_v42, %v710_v39  ;;  %v5414_v49 = vpop.f32.mrf.mxu0 }
  0xeb   :  { %11644 = vst [vmem:[#allocation9_spill] sm:$0xff] %v6365_v45  ;;  %v713_v51 = vsel %vm685_vm1, %v6365_v45, 0.0  ;;  %v834_v53 = vmul.f32 %v6365_v45, %v6365_v45  ;;  %v6375_v54 = vadd.f32 %v5414_v49, %v6248_v4  ;;  %v913_v62 = vsel %vm685_vm1, %v835_v47, 0.0 }
  0xec   :  { %v714_v55 = vadd.f32 %v713_v51, %v712_v48  ;;  %v910_v56 = vadd.f32 %v909_v50, %v908_v46  ;;  %v446_v57 = vpop.f32.mrf.mxu0 }
  0xed   :  { %11645 = vst [vmem:[#allocation10_spill] sm:$0xff] %v6375_v54  ;;  %v911_v60 = vsel %vm685_vm1, %v834_v53, 0.0  ;;  %v6381_v61 = vadd.f32 %v6248_v4, %v446_v57  ;;  %v837_v3 = vmul.f32 %v6375_v54, %v6375_v54  ;;  %v719_v15 = vsel %vm685_vm1, %v6375_v54, 0.0 }
  0xee   :  { %v912_v63 = vadd.f32 %v911_v60, %v910_v56  ;;  %v716_v0 = vadd.f32 %v715_v59, %v714_v55  ;;  %v5417_v1 = vpop.f32.mrf.mxu0 }
  0xef   :  { %11646 = vst [vmem:[#allocation11_spill] sm:$0xff] %v6381_v61  ;;  %v717_v5 = vsel %vm685_vm1, %v6381_v61, 0.0  ;;  %v836_v7 = vmul.f32 %v6381_v61, %v6381_v61  ;;  %v6391_v9 = vadd.f32 %v5417_v1, %v6248_v4  ;;  %v917_v25 = vsel %vm685_vm1, %v837_v3, 0.0 }
  0xf0   :  { %v718_v10 = vadd.f32 %v717_v5, %v716_v0  ;;  %v914_v12 = vadd.f32 %v913_v62, %v912_v63  ;;  %v456_v14 = vpop.f32.mrf.mxu0 }
  0xf1   :  { %11647 = vst [vmem:[#allocation12_spill] sm:$0xff] %v6391_v9  ;;  %v915_v16 = vsel %vm685_vm1, %v836_v7, 0.0  ;;  %v6397_v18 = vadd.f32 %v6248_v4, %v456_v14  ;;  %v839_v20 = vmul.f32 %v6391_v9, %v6391_v9  ;;  %v723_v34 = vsel %vm685_vm1, %v6391_v9, 0.0 }
  0xf2   :  { %v916_v19 = vadd.f32 %v915_v16, %v914_v12  ;;  %v720_v22 = vadd.f32 %v719_v15, %v718_v10  ;;  %v5420_v23 = vpop.f32.mrf.mxu0 }
  0xf3   :  { %11648 = vst [vmem:[#allocation13_spill] sm:$0xff] %v6397_v18  ;;  %v721_v26 = vsel %vm685_vm1, %v6397_v18, 0.0  ;;  %v838_v27 = vmul.f32 %v6397_v18, %v6397_v18  ;;  %v6407_v29 = vadd.f32 %v5420_v23, %v6248_v4  ;;  %v921_v39 = vsel %vm685_vm1, %v839_v20, 0.0 }
  0xf4   :  { %v722_v31 = vadd.f32 %v721_v26, %v720_v22  ;;  %v918_v32 = vadd.f32 %v917_v25, %v916_v19  ;;  %v466_v33 = vpop.f32.mrf.mxu0 }
  0xf5   :  { %11649 = vst [vmem:[#allocation14_spill] sm:$0xff] %v6407_v29  ;;  %v919_v35 = vsel %vm685_vm1, %v838_v27, 0.0  ;;  %v6413_v36 = vadd.f32 %v6248_v4, %v466_v33  ;;  %v841_v43 = vmul.f32 %v6407_v29, %v6407_v29  ;;  %v727_v53 = vsel %vm685_vm1, %v6407_v29, 0.0 }
  0xf6   :  { %v920_v40 = vadd.f32 %v919_v35, %v918_v32  ;;  %v724_v41 = vadd.f32 %v723_v34, %v722_v31  ;;  %v5423_v42 = vpop.f32.mrf.mxu0 }
  0xf7   :  { %11650 = vst [vmem:[#allocation15_spill] sm:$0xff] %v6413_v36  ;;  %v725_v46 = vsel %vm685_vm1, %v6413_v36, 0.0  ;;  %v840_v47 = vmul.f32 %v6413_v36, %v6413_v36  ;;  %v6423_v48 = vadd.f32 %v5423_v42, %v6248_v4  ;;  %v925_v63 = vsel %vm685_vm1, %v841_v43, 0.0 }
  0xf8   :  { %v726_v49 = vadd.f32 %v725_v46, %v724_v41  ;;  %v922_v50 = vadd.f32 %v921_v39, %v920_v40  ;;  %v476_v51 = vpop.f32.mrf.mxu0 }
  0xf9   :  { %11651 = vst [vmem:[#allocation16_spill] sm:$0xff] %v6423_v48  ;;  %v923_v55 = vsel %vm685_vm1, %v840_v47, 0.0  ;;  %v6429_v56 = vadd.f32 %v6248_v4, %v476_v51  ;;  %v843_v59 = vmul.f32 %v6423_v48, %v6423_v48  ;;  %v731_v12 = vsel %vm685_vm1, %v6423_v48, 0.0 }
  0xfa   :  { %v924_v57 = vadd.f32 %v923_v55, %v922_v50  ;;  %v728_v60 = vadd.f32 %v727_v53, %v726_v49  ;;  %v5426_v62 = vpop.f32.mrf.mxu0 }
  0xfb   :  { %11652 = vst [vmem:[#allocation17_spill] sm:$0xff] %v6429_v56  ;;  %v729_v0 = vsel %vm685_vm1, %v6429_v56, 0.0  ;;  %v842_v1 = vmul.f32 %v6429_v56, %v6429_v56  ;;  %v6439_v3 = vadd.f32 %v5426_v62, %v6248_v4  ;;  %v929_v16 = vsel %vm685_vm1, %v843_v59, 0.0 }
  0xfc   :  { %v730_v5 = vadd.f32 %v729_v0, %v728_v60  ;;  %v926_v7 = vadd.f32 %v925_v63, %v924_v57  ;;  %v486_v10 = vpop.f32.mrf.mxu0 }
  0xfd   :  { %11653 = vst [vmem:[#allocation18_spill] sm:$0xff] %v6439_v3  ;;  %v927_v14 = vsel %vm685_vm1, %v842_v1, 0.0  ;;  %v6445_v15 = vadd.f32 %v6248_v4, %v486_v10  ;;  %v845_v23 = vmul.f32 %v6439_v3, %v6439_v3  ;;  %v735_v34 = vsel %vm685_vm1, %v6439_v3, 0.0 }
  0xfe   :  { %v928_v19 = vadd.f32 %v927_v14, %v926_v7  ;;  %v732_v20 = vadd.f32 %v731_v12, %v730_v5  ;;  %v5429_v22 = vpop.f32.mrf.mxu0 }
  0xff   :  { %11654 = vst [vmem:[#allocation19_spill] sm:$0xff] %v6445_v15  ;;  %v733_v25 = vsel %vm685_vm1, %v6445_v15, 0.0  ;;  %v844_v26 = vmul.f32 %v6445_v15, %v6445_v15  ;;  %v6455_v27 = vadd.f32 %v5429_v22, %v6248_v4  ;;  %v933_v46 = vsel %vm685_vm1, %v845_v23, 0.0 }
 0x100   :  { %v734_v31 = vadd.f32 %v733_v25, %v732_v20  ;;  %v930_v32 = vadd.f32 %v929_v16, %v928_v19  ;;  %v496_v33 = vpop.f32.mrf.mxu0 }
 0x101   :  { %11655 = vst [vmem:[#allocation20_spill] sm:$0xff] %v6455_v27  ;;  %v931_v35 = vsel %vm685_vm1, %v844_v26, 0.0  ;;  %v6461_v39 = vadd.f32 %v6248_v4, %v496_v33  ;;  %v847_v41 = vmul.f32 %v6455_v27, %v6455_v27  ;;  %v739_v57 = vsel %vm685_vm1, %v6455_v27, 0.0 }
 0x102   :  { %v932_v40 = vadd.f32 %v931_v35, %v930_v32  ;;  %v736_v42 = vadd.f32 %v735_v34, %v734_v31  ;;  %v5432_v43 = vpop.f32.mrf.mxu0 }
 0x103   :  { %11656 = vst [vmem:[#allocation21_spill] sm:$0xff] %v6461_v39  ;;  %v737_v47 = vsel %vm685_vm1, %v6461_v39, 0.0  ;;  %v846_v49 = vmul.f32 %v6461_v39, %v6461_v39  ;;  %v6471_v50 = vadd.f32 %v5432_v43, %v6248_v4  ;;  %v937_v62 = vsel %vm685_vm1, %v847_v41, 0.0 }
 0x104   :  { %v738_v51 = vadd.f32 %v737_v47, %v736_v42  ;;  %v934_v53 = vadd.f32 %v933_v46, %v932_v40  ;;  %v506_v55 = vpop.f32.mrf.mxu0 }
 0x105   :  { %11657 = vst [vmem:[#allocation22_spill] sm:$0xff] %v6471_v50  ;;  %v935_v59 = vsel %vm685_vm1, %v846_v49, 0.0  ;;  %v6477_v60 = vadd.f32 %v6248_v4, %v506_v55  ;;  %v849_v5 = vmul.f32 %v6471_v50, %v6471_v50  ;;  %v743_v20 = vsel %vm685_vm1, %v6471_v50, 0.0 }
 0x106   :  { %v936_v63 = vadd.f32 %v935_v59, %v934_v53  ;;  %v740_v0 = vadd.f32 %v739_v57, %v738_v51  ;;  %v5435_v1 = vpop.f32.mrf.mxu0 }
 0x107   :  { %v741_v7 = vsel %vm685_vm1, %v6477_v60, 0.0  ;;  %v848_v10 = vmul.f32 %v6477_v60, %v6477_v60  ;;  %v6487_v12 = vadd.f32 %v5435_v1, %v6248_v4  ;;  %v941_v33 = vsel %vm685_vm1, %v849_v5, 0.0 }
 0x108   :  { %v742_v14 = vadd.f32 %v741_v7, %v740_v0  ;;  %v938_v16 = vadd.f32 %v937_v62, %v936_v63  ;;  %v516_v19 = vpop.f32.mrf.mxu0 }
 0x109   :  { %11658 = vst [vmem:[#allocation23_spill] sm:$0xff] %v6487_v12  ;;  %v939_v22 = vsel %vm685_vm1, %v848_v10, 0.0  ;;  %v6493_v23 = vadd.f32 %v6248_v4, %v516_v19  ;;  %v851_v26 = vmul.f32 %v6487_v12, %v6487_v12  ;;  %v747_v46 = vsel %vm685_vm1, %v6487_v12, 0.0 }
 0x10a   :  { %v940_v25 = vadd.f32 %v939_v22, %v938_v16  ;;  %v744_v31 = vadd.f32 %v743_v20, %v742_v14  ;;  %v5438_v32 = vpop.f32.mrf.mxu0 }
 0x10b   :  { %v745_v34 = vsel %vm685_vm1, %v6493_v23, 0.0  ;;  %v850_v35 = vmul.f32 %v6493_v23, %v6493_v23  ;;  %v6503_v40 = vadd.f32 %v5438_v32, %v6248_v4  ;;  %v945_v51 = vsel %vm685_vm1, %v851_v26, 0.0 }
 0x10c   :  { %v746_v41 = vadd.f32 %v745_v34, %v744_v31  ;;  %v942_v42 = vadd.f32 %v941_v33, %v940_v25  ;;  %v526_v43 = vpop.f32.mrf.mxu0 }
 0x10d   :  { %v943_v47 = vsel %vm685_vm1, %v850_v35, 0.0  ;;  %v6509_v49 = vadd.f32 %v6248_v4, %v526_v43  ;;  %v853_v59 = vmul.f32 %v6503_v40, %v6503_v40  ;;  %v751_v10 = vsel %vm685_vm1, %v6503_v40, 0.0 }
 0x10e   :  { %v944_v53 = vadd.f32 %v943_v47, %v942_v42  ;;  %v748_v55 = vadd.f32 %v747_v46, %v746_v41  ;;  %v5441_v57 = vpop.f32.mrf.mxu0 }
 0x10f   :  { %v749_v62 = vsel %vm685_vm1, %v6509_v49, 0.0  ;;  %v852_v63 = vmul.f32 %v6509_v49, %v6509_v49  ;;  %v6519_v0 = vadd.f32 %v5441_v57, %v6248_v4  ;;  %v949_v26 = vsel %vm685_vm1, %v853_v59, 0.0 }
 0x110   :  { %v750_v1 = vadd.f32 %v749_v62, %v748_v55  ;;  %v946_v5 = vadd.f32 %v945_v51, %v944_v53  ;;  %v536_v7 = vpop.f32.mrf.mxu0 }
 0x111   :  { %v947_v14 = vsel %vm685_vm1, %v852_v63, 0.0  ;;  %v6525_v16 = vadd.f32 %v6248_v4, %v536_v7  ;;  %v855_v20 = vmul.f32 %v6519_v0, %v6519_v0  ;;  %v755_v42 = vsel %vm685_vm1, %v6519_v0, 0.0 }
 0x112   :  { %v948_v19 = vadd.f32 %v947_v14, %v946_v5  ;;  %v752_v22 = vadd.f32 %v751_v10, %v750_v1  ;;  %v5444_v25 = vpop.f32.mrf.mxu0 }
 0x113   :  { %v753_v31 = vsel %vm685_vm1, %v6525_v16, 0.0  ;;  %v854_v32 = vmul.f32 %v6525_v16, %v6525_v16  ;;  %v6535_v33 = vadd.f32 %v5444_v25, %v6248_v4  ;;  %v953_v47 = vsel %vm685_vm1, %v855_v20, 0.0 }
 0x114   :  { %v754_v34 = vadd.f32 %v753_v31, %v752_v22  ;;  %v950_v35 = vadd.f32 %v949_v26, %v948_v19  ;;  %v546_v41 = vpop.f32.mrf.mxu0 }
 0x115   :  { %v951_v43 = vsel %vm685_vm1, %v854_v32, 0.0  ;;  %v6541_v46 = vadd.f32 %v6248_v4, %v546_v41  ;;  %v857_v57 = vmul.f32 %v6535_v33, %v6535_v33  ;;  %v759_v10 = vsel %vm685_vm1, %v6535_v33, 0.0 }
 0x116   :  { %v952_v51 = vadd.f32 %v951_v43, %v950_v35  ;;  %v756_v53 = vadd.f32 %v755_v42, %v754_v34  ;;  %v5447_v55 = vpop.f32.mrf.mxu0 }
 0x117   :  { %v757_v59 = vsel %vm685_vm1, %v6541_v46, 0.0  ;;  %v856_v62 = vmul.f32 %v6541_v46, %v6541_v46  ;;  %v6551_v63 = vadd.f32 %v5447_v55, %v6248_v4  ;;  %v957_v31 = vsel %vm685_vm1, %v857_v57, 0.0 }
 0x118   :  { %v758_v1 = vadd.f32 %v757_v59, %v756_v53  ;;  %v954_v5 = vadd.f32 %v953_v47, %v952_v51  ;;  %v556_v7 = vpop.f32.mrf.mxu0 }
 0x119   :  { %v955_v14 = vsel %vm685_vm1, %v856_v62, 0.0  ;;  %v6557_v19 = vadd.f32 %v6248_v4, %v556_v7  ;;  %v859_v22 = vmul.f32 %v6551_v63, %v6551_v63  ;;  %v763_v47 = vsel %vm685_vm1, %v6551_v63, 0.0 }
 0x11a   :  { %v956_v20 = vadd.f32 %v955_v14, %v954_v5  ;;  %v760_v25 = vadd.f32 %v759_v10, %v758_v1  ;;  %v5450_v26 = vpop.f32.mrf.mxu0 }
 0x11b   :  { %v761_v32 = vsel %vm685_vm1, %v6557_v19, 0.0  ;;  %v858_v34 = vmul.f32 %v6557_v19, %v6557_v19  ;;  %v6567_v35 = vadd.f32 %v5450_v26, %v6248_v4  ;;  %v961_v55 = vsel %vm685_vm1, %v859_v22, 0.0 }
 0x11c   :  { %v762_v41 = vadd.f32 %v761_v32, %v760_v25  ;;  %v958_v42 = vadd.f32 %v957_v31, %v956_v20  ;;  %v566_v43 = vpop.f32.mrf.mxu0 }
 0x11d   :  { %v959_v51 = vsel %vm685_vm1, %v858_v34, 0.0  ;;  %v6573_v53 = vadd.f32 %v6248_v4, %v566_v43  ;;  %v861_v1 = vmul.f32 %v6567_v35, %v6567_v35  ;;  %v767_v22 = vsel %vm685_vm1, %v6567_v35, 0.0 }
 0x11e   :  { %v960_v57 = vadd.f32 %v959_v51, %v958_v42  ;;  %v764_v59 = vadd.f32 %v763_v47, %v762_v41  ;;  %v5453_v62 = vpop.f32.mrf.mxu0 }
 0x11f   :  { %v765_v5 = vsel %vm685_vm1, %v6573_v53, 0.0  ;;  %v860_v7 = vmul.f32 %v6573_v53, %v6573_v53  ;;  %v6583_v10 = vadd.f32 %v5453_v62, %v6248_v4  ;;  %v965_v43 = vsel %vm685_vm1, %v861_v1, 0.0 }
 0x120   :  { %v766_v14 = vadd.f32 %v765_v5, %v764_v59  ;;  %v962_v20 = vadd.f32 %v961_v55, %v960_v57  ;;  %v576_v25 = vpop.f32.mrf.mxu0 }
 0x121   :  { %v963_v26 = vsel %vm685_vm1, %v860_v7, 0.0  ;;  %v6589_v31 = vadd.f32 %v6248_v4, %v576_v25  ;;  %v863_v34 = vmul.f32 %v6583_v10, %v6583_v10  ;;  %v771_v5 = vsel %vm685_vm1, %v6583_v10, 0.0 }
 0x122   :  { %v964_v32 = vadd.f32 %v963_v26, %v962_v20  ;;  %v768_v41 = vadd.f32 %v767_v22, %v766_v14  ;;  %v5456_v42 = vpop.f32.mrf.mxu0 }
 0x123   :  { %v769_v47 = vsel %vm685_vm1, %v6589_v31, 0.0  ;;  %v862_v51 = vmul.f32 %v6589_v31, %v6589_v31  ;;  %v6599_v55 = vadd.f32 %v5456_v42, %v6248_v4  ;;  %v969_v1 = vsel %vm685_vm1, %v863_v34, 0.0 }
 0x124   :  { %v770_v57 = vadd.f32 %v769_v47, %v768_v41  ;;  %v966_v59 = vadd.f32 %v965_v43, %v964_v32  ;;  %v586_v62 = vpop.f32.mrf.mxu0 }
 0x125   :  { %v967_v7 = vsel %vm685_vm1, %v862_v51, 0.0  ;;  %v6605_v14 = vadd.f32 %v6248_v4, %v586_v62  ;;  %v865_v26 = vmul.f32 %v6599_v55, %v6599_v55  ;;  %v775_v34 = vsel %vm685_vm1, %v6599_v55, 0.0 }
 0x126   :  { %v968_v20 = vadd.f32 %v967_v7, %v966_v59  ;;  %v772_v25 = vadd.f32 %v771_v5, %v770_v57  ;;  %v5459_v22 = vpop.f32.mrf.mxu0 }
 0x127   :  { %v773_v32 = vsel %vm685_vm1, %v6605_v14, 0.0  ;;  %v864_v41 = vmul.f32 %v6605_v14, %v6605_v14  ;;  %v6615_v42 = vadd.f32 %v5459_v22, %v6248_v4  ;;  %v973_v22 = vsel %vm685_vm1, %v865_v26, 0.0 }
 0x128   :  { %v774_v43 = vadd.f32 %v773_v32, %v772_v25  ;;  %v970_v47 = vadd.f32 %v969_v1, %v968_v20  ;;  %v596_v51 = vpop.f32.mrf.mxu0 }
 0x129   :  { %v971_v57 = vsel %vm685_vm1, %v864_v41, 0.0  ;;  %v6621_v59 = vadd.f32 %v6248_v4, %v596_v51  ;;  %v867_v5 = vmul.f32 %v6615_v42, %v6615_v42 }
 0x12a   :  { %v972_v62 = vadd.f32 %v971_v57, %v970_v47  ;;  %v776_v7 = vadd.f32 %v775_v34, %v774_v43  ;;  %v5462_v12 = vpop.f32.mrf.mxu0  ;;  %v779_v47 = vsel %vm685_vm1, %v6615_v42, 0.0 }
 0x12b   :  { %v777_v1 = vsel %vm685_vm1, %v6621_v59, 0.0  ;;  %v866_v20 = vmul.f32 %v6621_v59, %v6621_v59  ;;  %v6631_v25 = vadd.f32 %v5462_v12, %v6248_v4  ;;  %v977_v26 = vsel %vm685_vm1, %v867_v5, 0.0 }
 0x12c   :  { %v778_v32 = vadd.f32 %v777_v1, %v776_v7  ;;  %v974_v41 = vadd.f32 %v973_v22, %v972_v62  ;;  %v606_v51 = vpop.f32.mrf.mxu0 }
 0x12d   :  { %v975_v43 = vsel %vm685_vm1, %v866_v20, 0.0  ;;  %v6637_v34 = vadd.f32 %v6248_v4, %v606_v51  ;;  %v869_v12 = vmul.f32 %v6631_v25, %v6631_v25  ;;  %v783_v5 = vsel %vm685_vm1, %v6631_v25, 0.0 }
 0x12e   :  { %v976_v57 = vadd.f32 %v975_v43, %v974_v41  ;;  %v780_v39 = vadd.f32 %v779_v47, %v778_v32  ;;  %v5465_v50 = vpop.f32.mrf.mxu0 }
 0x12f   :  { %v781_v62 = vsel %vm685_vm1, %v6637_v34, 0.0  ;;  %v868_v7 = vmul.f32 %v6637_v34, %v6637_v34  ;;  %v6647_v22 = vadd.f32 %v5465_v50, %v6248_v4  ;;  %v981_v50 = vsel %vm685_vm1, %v869_v12, 0.0 }
 0x130   :  { %v782_v1 = vadd.f32 %v781_v62, %v780_v39  ;;  %v978_v20 = vadd.f32 %v977_v26, %v976_v57  ;;  %v616_v51 = vpop.f32.mrf.mxu0 }
 0x131   :  { %v979_v32 = vsel %vm685_vm1, %v868_v7, 0.0  ;;  %v6653_v41 = vadd.f32 %v6248_v4, %v616_v51  ;;  %v871_v43 = vmul.f32 %v6647_v22, %v6647_v22 }
 0x132   :  { %v980_v47 = vadd.f32 %v979_v32, %v978_v20  ;;  %v784_v15 = vadd.f32 %v783_v5, %v782_v1  ;;  %v5468_v27 = vpop.f32.mrf.mxu0  ;;  %v787_v20 = vsel %vm685_vm1, %v6647_v22, 0.0 }
 0x133   :  { %v785_v39 = vsel %vm685_vm1, %v6653_v41, 0.0  ;;  %v870_v26 = vmul.f32 %v6653_v41, %v6653_v41  ;;  %v6663_v57 = vadd.f32 %v5468_v27, %v6248_v4  ;;  %v985_v12 = vsel %vm685_vm1, %v871_v43, 0.0 }
 0x134   :  { %v786_v62 = vadd.f32 %v785_v39, %v784_v15  ;;  %v982_v7 = vadd.f32 %v981_v50, %v980_v47  ;;  %v626_v51 = vpop.f32.mrf.mxu0 }
 0x135   :  { %v983_v1 = vsel %vm685_vm1, %v870_v26, 0.0  ;;  %v6669_v5 = vadd.f32 %v6248_v4, %v626_v51  ;;  %v873_v27 = vmul.f32 %v6663_v57, %v6663_v57  ;;  %v791_v43 = vsel %vm685_vm1, %v6663_v57, 0.0 }
 0x136   :  { %v984_v32 = vadd.f32 %v983_v1, %v982_v7  ;;  %v788_v56 = vadd.f32 %v787_v20, %v786_v62  ;;  %v5471_v3 = vpop.f32.mrf.mxu0 }
 0x137   :  { %v789_v15 = vsel %vm685_vm1, %v6669_v5, 0.0  ;;  %v872_v47 = vmul.f32 %v6669_v5, %v6669_v5  ;;  %v6679_v50 = vadd.f32 %v5471_v3, %v6248_v4  ;;  %v989_v3 = vsel %vm685_vm1, %v873_v27, 0.0 }
 0x138   :  { %v790_v39 = vadd.f32 %v789_v15, %v788_v56  ;;  %v986_v26 = vadd.f32 %v985_v12, %v984_v32  ;;  %v636_v51 = vpop.f32.mrf.mxu0 }
 0x139   :  { %v987_v62 = vsel %vm685_vm1, %v872_v47, 0.0  ;;  %v6685_v7 = vadd.f32 %v6248_v4, %v636_v51  ;;  %v875_v1 = vmul.f32 %v6679_v50, %v6679_v50 }
 0x13a   :  { %v988_v20 = vadd.f32 %v987_v62, %v986_v26  ;;  %v792_v36 = vadd.f32 %v791_v43, %v790_v39  ;;  %v5474_v48 = vpop.f32.mrf.mxu0  ;;  %v795_v26 = vsel %vm685_vm1, %v6679_v50, 0.0 }
 0x13b   :  { %v793_v56 = vsel %vm685_vm1, %v6685_v7, 0.0  ;;  %v874_v12 = vmul.f32 %v6685_v7, %v6685_v7  ;;  %v6695_v32 = vadd.f32 %v5474_v48, %v6248_v4  ;;  %v993_v27 = vsel %vm685_vm1, %v875_v1, 0.0 }
 0x13c   :  { %v794_v15 = vadd.f32 %v793_v56, %v792_v36  ;;  %v990_v47 = vadd.f32 %v989_v3, %v988_v20  ;;  %v646_v51 = vpop.f32.mrf.mxu0 }
 0x13d   :  { %v991_v39 = vsel %vm685_vm1, %v874_v12, 0.0  ;;  %v6701_v43 = vadd.f32 %v6248_v4, %v646_v51  ;;  %v877_v48 = vmul.f32 %v6695_v32, %v6695_v32  ;;  %v799_v1 = vsel %vm685_vm1, %v6695_v32, 0.0 }
 0x13e   :  { %v992_v62 = vadd.f32 %v991_v39, %v990_v47  ;;  %v796_v18 = vadd.f32 %v795_v26, %v794_v15  ;;  %v5477_v29 = vpop.f32.mrf.mxu0 }
 0x13f   :  { %11659 = vst [vmem:[#allocation24_spill] sm:$0xff] %v6701_v43  ;;  %v797_v36 = vsel %vm685_vm1, %v6701_v43, 0.0  ;;  %v876_v20 = vmul.f32 %v6701_v43, %v6701_v43  ;;  %v6711_v3 = vadd.f32 %v5477_v29, %v6248_v4  ;;  %v997_v29 = vsel %vm685_vm1, %v877_v48, 0.0 }
 0x140   :  { %v798_v56 = vadd.f32 %v797_v36, %v796_v18  ;;  %v994_v12 = vadd.f32 %v993_v27, %v992_v62  ;;  %v656_v51 = vpop.f32.mrf.mxu0 }
 0x141   :  { %v995_v15 = vsel %vm685_vm1, %v876_v20, 0.0  ;;  %v6717_v47 = vadd.f32 %v6248_v4, %v656_v51  ;;  %v879_v39 = vmul.f32 %v6711_v3, %v6711_v3 }
 0x142   :  { %v996_v26 = vadd.f32 %v995_v15, %v994_v12  ;;  %v800_v61 = vadd.f32 %v799_v1, %v798_v56  ;;  %v5480_v9 = vpop.f32.mrf.mxu0  ;;  %v803_v12 = vsel %vm685_vm1, %v6711_v3, 0.0 }
 0x143   :  { %11660 = vst [vmem:[#allocation25_spill] sm:$0xff] %v6717_v47  ;;  %v801_v18 = vsel %vm685_vm1, %v6717_v47, 0.0  ;;  %v878_v27 = vmul.f32 %v6717_v47, %v6717_v47  ;;  %v6727_v62 = vadd.f32 %v5480_v9, %v6248_v4  ;;  %v1001_v48 = vsel %vm685_vm1, %v879_v39, 0.0 }
 0x144   :  { %v802_v36 = vadd.f32 %v801_v18, %v800_v61  ;;  %v998_v20 = vadd.f32 %v997_v29, %v996_v26  ;;  %v666_v51 = vpop.f32.mrf.mxu0 }
 0x145   :  { %v999_v56 = vsel %vm685_vm1, %v878_v27, 0.0  ;;  %v6733_v1 = vadd.f32 %v6248_v4, %v666_v51  ;;  %v881_v9 = vmul.f32 %v6727_v62, %v6727_v62  ;;  %v807_v39 = vsel %vm685_vm1, %v6727_v62, 0.0 }
 0x146   :  { %v1000_v15 = vadd.f32 %v999_v56, %v998_v20  ;;  %v804_v45 = vadd.f32 %v803_v12, %v802_v36  ;;  %v5483_v54 = vpop.f32.mrf.mxu0 }
 0x147   :  { %v805_v61 = vsel %vm685_vm1, %v6733_v1, 0.0  ;;  %v880_v26 = vmul.f32 %v6733_v1, %v6733_v1  ;;  %v6743_v29 = vadd.f32 %v5483_v54, %v6248_v4  ;;  %v1005_v28 = vsel %vm685_vm1, %v881_v9, 0.0 }
 0x148   :  { %v806_v18 = vadd.f32 %v805_v61, %v804_v45  ;;  %v1002_v27 = vadd.f32 %v1001_v48, %v1000_v15  ;;  %v676_v51 = vpop.f32.mrf.mxu0 }
 0x149   :  { %v1003_v36 = vsel %vm685_vm1, %v880_v26, 0.0  ;;  %v677_v20 = vadd.f32 %v6248_v4, %v676_v51  ;;  %v883_v37 = vmul.f32 %v6743_v29, %v6743_v29  ;;  %v811_v15 = vsel %vm685_vm1, %v6743_v29, 0.0 }
 0x14a   :  { %v1004_v12 = vadd.f32 %v1003_v36, %v1002_v27  ;;  %v808_v56 = vadd.f32 %v807_v39, %v806_v18 }
 0x14b   :  { %v809_v54 = vsel %vm685_vm1, %v677_v20, 0.0  ;;  %v882_v11 = vmul.f32 %v677_v20, %v677_v20  ;;  %v1009_v4 = vsel %vm685_vm1, %v883_v37, 0.0  ;;  %v1029_v37 = vlaneseq }
 0x14c   :  { %v810_v45 = vadd.f32 %v809_v54, %v808_v56  ;;  %v1006_v48 = vadd.f32 %v1005_v28, %v1004_v12 }
 0x14d   :  { %v1007_v61 = vsel %vm685_vm1, %v882_v11, 0.0 }
 0x14e   :  { %v812_v26 = vadd.f32 %v811_v15, %v810_v45  ;;  %v1008_v21 = vadd.f32 %v1007_v61, %v1006_v48  ;;  %v1021_v61 = vld [vmem:[%s11426_s3] sm:$0x1]  ;;  %s5924_s3 = smov 120  }
 0x150   :  { %v813_v18 = vrot.slane %v812_v26, 4  ;;  %v1010_v27 = vadd.f32 %v1009_v4, %v1008_v21  ;;  %v1030_v21 = vshrl.u32 %v1029_v37, 7 }
 0x152   :  { %v814_v9 = vadd.f32 %v813_v18, %v812_v26  ;;  %v1011_v51 = vrot.slane %v1010_v27, 4  ;;  %v6760_v26 = vsub.s32 0, %v1030_v21 }
 0x154   :  { %v815_v39 = vrot.slane %v814_v9, 2  ;;  %v1012_v36 = vadd.f32 %v1011_v51, %v1010_v27  ;;  %11661 = vst [vmem:[#allocation26_spill] sm:$0xff] %v6760_v26 }
 0x156   :  { %v816_v58 = vadd.f32 %v815_v39, %v814_v9  ;;  %v1013_v2 = vrot.slane %v1012_v36, 2 }
 0x158   :  { %v817_v44 = vrot.slane %v816_v58, 1  ;;  %v1014_v56 = vadd.f32 %v1013_v2, %v1012_v36 }
 0x15a   :  { %v818_v28 = vadd.f32 %v817_v44, %v816_v58  ;;  %v1015_v12 = vrot.slane %v1014_v56, 1 }
 0x15c   :  { %v819_v54 = vmul.f32 0.001953125, %v818_v28  ;;  %v1016_v47 = vadd.f32 %v1015_v12, %v1014_v56 }
 0x15e   :  { %v1017_v43 = vmul.f32 0.001953125, %v1016_v47  ;;  %v1018_v11 = vmul.f32 %v819_v54, %v819_v54  ;;  %v1025_v47 = vld [vmem:[%s11427_s4] sm:$0x1] }
 0x160   :  { %v1019_v45 = vsub.f32 %v1017_v43, %v1018_v11 }
 0x162   :  { %v1020_v48 = vmax.f32 %v1019_v45, 0.0 }
 0x164   :  { %v1022_v15 = vadd.f32 1e-05, %v1020_v48 }
 0x166   :  { %5585 = vrsqrt.f32 %v1022_v15 }
 0x173   :  { %v5586_v4 = vpop.eup %5585 }
 0x174   :  { %v1024_v2 = vmul.f32 %v5586_v4, %v1021_v61 }
 0x176   :  { %v6763_v44 = vrot.slane %v1024_v2, %v6760_v26  ;;  %v1026_v43 = vmul.f32 %v1024_v2, %v819_v54 }
 0x178   :  { %v6766_v58 = vmul.f32 %v6763_v44, %v677_v20  ;;  %v1027_v18 = vsub.f32 %v1025_v47, %v1026_v43  ;;  %v1034_v27 = vmul.f32 %v6763_v44, %v6254_v8  ;;  %v6775_v9 = vmul.f32 %v6763_v44, %v6251_v6 }
 0x179   :  { %v1036_v20 = vmul.f32 %v6763_v44, %v6269_v17  ;;  %v1037_v39 = vmul.f32 %v6763_v44, %v6263_v13  ;;  %v6786_v36 = vmul.f32 %v6763_v44, %v6285_v30  ;;  %v1039_v8 = vmul.f32 %v6763_v44, %v6279_v24 }
 0x17a   :  { %v6778_v51 = vrot.slane %v1027_v18, %v6760_v26  ;;  %v1041_v6 = vmul.f32 %v6763_v44, %v6295_v38  ;;  %v1043_v56 = vmul.f32 %v6763_v44, %v6311_v52  ;;  %v6796_v28 = vmul.f32 %v6763_v44, %v6477_v60 }
 0x17b   :  { %v6800_v13 = vmul.f32 %v6763_v44, %v6493_v23  ;;  %v6804_v17 = vmul.f32 %v6763_v44, %v6509_v49  ;;  %v1067_v24 = vmul.f32 %v6763_v44, %v6503_v40  ;;  %v6810_v30 = vmul.f32 %v6763_v44, %v6525_v16 }
 0x17c   :  { %v1069_v38 = vmul.f32 %v6763_v44, %v6519_v0  ;;  %v1070_v52 = vmul.f32 %v6763_v44, %v6541_v46  ;;  %v1071_v60 = vmul.f32 %v6763_v44, %v6535_v33  ;;  %v6820_v23 = vmul.f32 %v6763_v44, %v6733_v1 }
 0x17d   :  { %v1072_v40 = vmul.f32 %v6763_v44, %v6557_v19  ;;  %v1073_v49 = vmul.f32 %v6763_v44, %v6551_v63  ;;  %v1097_v16 = vmul.f32 %v6763_v44, %v6743_v29  ;;  %v6829_v0 = vadd.f32 %v6778_v51, %v1036_v20 }
 0x17e   :  { %v1074_v46 = vmul.f32 %v6763_v44, %v6573_v53  ;;  %v1075_v33 = vmul.f32 %v6763_v44, %v6567_v35  ;;  %v1076_v1 = vmul.f32 %v6763_v44, %v6589_v31  ;;  %v1077_v19 = vmul.f32 %v6763_v44, %v6583_v10 }
 0x17f   :  { %v1079_v63 = vmul.f32 %v6763_v44, %v6599_v55  ;;  %v1081_v29 = vmul.f32 %v6763_v44, %v6615_v42  ;;  %v1083_v12 = vmul.f32 %v6763_v44, %v6631_v25  ;;  %v1085_v53 = vmul.f32 %v6763_v44, %v6647_v22  ;;  %1237 = vrot.lane.b32.xlu1 %v6829_v0, %s5924_s3 }
 0x180   :  { %v1087_v35 = vmul.f32 %v6763_v44, %v6663_v57  ;;  %v1089_v10 = vmul.f32 %v6763_v44, %v6679_v50  ;;  %v1091_v31 = vmul.f32 %v6763_v44, %v6695_v32  ;;  %v1093_v55 = vmul.f32 %v6763_v44, %v6711_v3 }
 0x181   :  { %v1095_v42 = vmul.f32 %v6763_v44, %v6727_v62  ;;  %v6860_v25 = vadd.f32 %v6778_v51, %v1037_v39  ;;  %v6863_v22 = vadd.f32 %v6778_v51, %v1039_v8  ;;  %v6866_v57 = vadd.f32 %v6778_v51, %v1067_v24 }
 0x182   :  { %v6869_v50 = vadd.f32 %v6778_v51, %v1069_v38  ;;  %v6872_v32 = vadd.f32 %v6778_v51, %v1071_v60  ;;  %v6875_v3 = vadd.f32 %v6778_v51, %v1073_v49  ;;  %v6878_v62 = vadd.f32 %v6778_v51, %v1075_v33 }
 0x183   :  { %v6881_v54 = vadd.f32 %v6778_v51, %v1077_v19  ;;  %v6884_v11 = vadd.f32 %v6778_v51, %v1079_v63  ;;  %v6887_v45 = vadd.f32 %v6778_v51, %v1081_v29  ;;  %v6890_v48 = vadd.f32 %v6778_v51, %v1083_v12  ;;  %1239 = vrot.lane.b32.xlu1 %v6860_v25, %s5924_s3 }
 0x184   :  { %v6895_v15 = vadd.f32 %v6778_v51, %v1085_v53  ;;  %v6898_v37 = vadd.f32 %v6778_v51, %v1087_v35  ;;  %v6901_v21 = vadd.f32 %v6778_v51, %v1089_v10  ;;  %v6904_v61 = vadd.f32 %v6778_v51, %v1091_v31  ;;  %v11676_v53 = vld [vmem:[#allocation2_spill] sm:$0xff]  ;;  %v11677_v10 = vld [vmem:[#allocation4_spill] sm:$0xff] }
 0x185   :  { %v6907_v4 = vadd.f32 %v6778_v51, %v1093_v55  ;;  %v6910_v2 = vadd.f32 %v6778_v51, %v1095_v42  ;;  %v6913_v43 = vadd.f32 %v6778_v51, %v1097_v16  ;;  %v6916_v47 = vadd.f32 %v6778_v51, %v1034_v27  ;;  %v11667_v27 = vld [vmem:[#allocation24_spill] sm:$0xff] }
 0x186   :  { %11662 = vst [vmem:[#allocation27_spill] sm:$0xff] %v6904_v61  ;;  %v1078_v18 = vmul.f32 %v6763_v44, %v6605_v14  ;;  %v1080_v20 = vmul.f32 %v6763_v44, %v6621_v59  ;;  %v1082_v39 = vmul.f32 %v6763_v44, %v6637_v34  ;;  %v1084_v8 = vmul.f32 %v6763_v44, %v6653_v41  ;;  %v11668_v14 = vld [vmem:[#allocation25_spill] sm:$0xff] }
 0x187   :  { %11663 = vst [vmem:[#allocation28_spill] sm:$0xff] %v6907_v4  ;;  %11664 = vst [vmem:[#allocation29_spill] sm:$0xff] %v6910_v2  ;;  %v1086_v24 = vmul.f32 %v6763_v44, %v6669_v5  ;;  %v1088_v38 = vmul.f32 %v6763_v44, %v6685_v7  ;;  %v1090_v60 = vmul.f32 %v6763_v44, %v11667_v27  ;;  %1233 = vrot.lane.b32.xlu0 %v6916_v47, %s5924_s3  ;;  %v11681_v27 = vld [vmem:[#allocation8_spill] sm:$0xff] }
 0x188   :  { %11665 = vst [vmem:[#allocation30_spill] sm:$0xff] %v6913_v43  ;;  %11666 = vst [vmem:[#allocation31_spill] sm:$0xff] %v6916_v47  ;;  %1243 = vrot.lane.b32.xlu1 %v6863_v22, %s5924_s3  ;;  %v1092_v59 = vmul.f32 %v6763_v44, %v11668_v14  ;;  %v6940_v34 = vadd.f32 %v6778_v51, %v6775_v9  ;;  %v6943_v41 = vadd.f32 %v6778_v51, %v1041_v6  ;;  %v1168_v6 = vld [vmem:[%s11428_s5] sm:$0xf]  ;;  %v11696_v47 = vld [vmem:[#allocation20_spill] sm:$0xff]  ;;  %s5925_s5 = smov 124  }
 0x189   :  { %v6946_v5 = vadd.f32 %v6778_v51, %v1043_v56  ;;  %v6950_v7 = vadd.f32 %v6778_v51, %v6786_v36  ;;  %v6954_v49 = vadd.f32 %v6778_v51, %v6796_v28  ;;  %v6958_v16 = vadd.f32 %v6778_v51, %v6800_v13  ;;  %5484 = vmatprep.subr.msk.mxu1 %vm1490_vm2, %v1168_v6  ;;  %v11699_v43 = vld [vmem:[#allocation22_spill] sm:$0xff] }
 0x18a   :  { %11669 = vst [vmem:[#allocation24_spill] sm:$0xff] %v6940_v34  ;;  %v6962_v9 = vadd.f32 %v6778_v51, %v6804_v17  ;;  %v6969_v36 = vadd.f32 %v6778_v51, %v6810_v30  ;;  %v6972_v56 = vadd.f32 %v6778_v51, %v1070_v52  ;;  %v6975_v28 = vadd.f32 %v6778_v51, %v1072_v40 }
 0x18b   :  { %11670 = vst [vmem:[#allocation25_spill] sm:$0xff] %v6954_v49  ;;  %11671 = vst [vmem:[#allocation32_spill] sm:$0xff] %v6958_v16  ;;  %v6978_v13 = vadd.f32 %v6778_v51, %v1074_v46  ;;  %1235 = vrot.lane.b32.xlu0 %v6940_v34, %s5924_s3  ;;  %v6985_v17 = vadd.f32 %v6778_v51, %v1076_v1  ;;  %v6988_v30 = vadd.f32 %v6778_v51, %v1078_v18  ;;  %v11679_v18 = vld [vmem:[#allocation6_spill] sm:$0xff]  ;;  %v11702_v34 = vld [vmem:[#allocation23_spill] sm:$0xff] }
 0x18c   :  { %1247 = vrot.lane.b32.xlu1 %v6943_v41, %s5924_s3  ;;  %v6991_v52 = vadd.f32 %v6778_v51, %v1080_v20  ;;  %v6994_v40 = vadd.f32 %v6778_v51, %v1082_v39  ;;  %v6997_v46 = vadd.f32 %v6778_v51, %v1084_v8  ;;  %v7000_v33 = vadd.f32 %v6778_v51, %v1086_v24  ;;  %v11680_v24 = vld [vmem:[#allocation5_spill] sm:$0xff] }
 0x18d   :  { %v7003_v1 = vadd.f32 %v6778_v51, %v1088_v38  ;;  %5485 = vmatpush3.msk.msra.mxu1 %vm1490_vm2, %v1168_v6  ;;  %v7006_v19 = vadd.f32 %v6778_v51, %v1090_v60  ;;  %v7009_v63 = vadd.f32 %v6778_v51, %v1092_v59  ;;  %v7013_v29 = vadd.f32 %v6778_v51, %v6820_v23  ;;  %v11682_v6 = vld [vmem:[#allocation7_spill] sm:$0xff] }
 0x18e   :  { %v7017_v12 = vadd.f32 %v6778_v51, %v6766_v58  ;;  %v1040_v35 = vmul.f32 %v6763_v44, %v11676_v53  ;;  %v1045_v31 = vmul.f32 %v6763_v44, %v11677_v10  ;;  %v11678_v58 = vld [vmem:[#allocation3_spill] sm:$0xff]  ;;  %v1047_v20 = vmul.f32 %v6763_v44, %v11679_v18 }
 0x18f   :  { %11672 = vst [vmem:[#allocation33_spill] sm:$0xff] %v7006_v19  ;;  %11673 = vst [vmem:[#allocation34_spill] sm:$0xff] %v7009_v63  ;;  %1241 = vrot.lane.b32.xlu0 %v6950_v7, %s5924_s3  ;;  %v1042_v42 = vmul.f32 %v6763_v44, %v11678_v58  ;;  %v1044_v38 = vmul.f32 %v6763_v44, %v11680_v24  ;;  %v1049_v60 = vmul.f32 %v6763_v44, %v11681_v27 }
 0x190   :  { %11674 = vst [vmem:[#allocation35_spill] sm:$0xff] %v7013_v29  ;;  %11675 = vst [vmem:[#allocation36_spill] sm:$0xff] %v7017_v12  ;;  %1251 = vrot.lane.b32.xlu1 %v6946_v5, %s5924_s3  ;;  %v7028_v55 = vadd.f32 %v6778_v51, %v1045_v31  ;;  %v7031_v23 = vadd.f32 %v6778_v51, %v1040_v35  ;;  %v7042_v39 = vadd.f32 %v6778_v51, %v1047_v20  ;;  %v11683_v35 = vld [vmem:[#allocation10_spill] sm:$0xff]  ;;  %v11686_v20 = vld [vmem:[#allocation12_spill] sm:$0xff] }
 0x191   :  { %v7045_v8 = vadd.f32 %v6778_v51, %v1042_v42  ;;  %v7056_v14 = vadd.f32 %v6778_v51, %v1049_v60  ;;  %v7059_v59 = vadd.f32 %v6778_v51, %v1044_v38  ;;  %v1046_v53 = vmul.f32 %v6763_v44, %v11682_v6  ;;  %v11685_v42 = vld [vmem:[#allocation9_spill] sm:$0xff]  ;;  %v11687_v60 = vld [vmem:[#allocation11_spill] sm:$0xff]  ;;  %v11693_v12 = vld [vmem:[#allocation18_spill] sm:$0xff] }
 0x192   :  { %v1051_v10 = vmul.f32 %v6763_v44, %v11683_v35  ;;  %v1048_v18 = vmul.f32 %v6763_v44, %v11685_v42  ;;  %v1053_v24 = vmul.f32 %v6763_v44, %v11686_v20  ;;  %v1050_v6 = vmul.f32 %v6763_v44, %v11687_v60 }
 0x193   :  { %1245 = vrot.lane.b32.xlu0 %v7031_v23, %s5924_s3  ;;  %v7073_v58 = vadd.f32 %v6778_v51, %v1046_v53  ;;  %v11688_v53 = vld [vmem:[#allocation14_spill] sm:$0xff] }
 0x194   :  { %1255 = vrot.lane.b32.xlu1 %v7028_v55, %s5924_s3  ;;  %v7070_v31 = vadd.f32 %v6778_v51, %v1051_v10  ;;  %v7084_v38 = vadd.f32 %v6778_v51, %v1053_v24  ;;  %v7087_v27 = vadd.f32 %v6778_v51, %v1048_v18  ;;  %v1055_v35 = vmul.f32 %v6763_v44, %v11688_v53  ;;  %v11690_v18 = vld [vmem:[#allocation13_spill] sm:$0xff]  ;;  %v11691_v24 = vld [vmem:[#allocation16_spill] sm:$0xff] }
 0x195   :  { %v7101_v42 = vadd.f32 %v6778_v51, %v1050_v6  ;;  %v1052_v20 = vmul.f32 %v6763_v44, %v11690_v18  ;;  %v1057_v60 = vmul.f32 %v6763_v44, %v11691_v24  ;;  %v11692_v6 = vld [vmem:[#allocation15_spill] sm:$0xff]  ;;  %v1059_v18 = vmul.f32 %v6763_v44, %v11693_v12 }
 0x196   :  { %11684 = vst [vmem:[#allocation2_spill] sm:$0xff] %v7070_v31  ;;  %v7098_v10 = vadd.f32 %v6778_v51, %v1055_v35  ;;  %v1054_v26 = vmul.f32 %v6763_v44, %v11692_v6  ;;  %v1061_v6 = vmul.f32 %v6763_v44, %v11696_v47 }
 0x197   :  { %1249 = vrot.lane.b32.xlu0 %v7045_v8, %s5924_s3  ;;  %11689 = vst [vmem:[#allocation4_spill] sm:$0xff] %v7101_v42  ;;  %v7112_v53 = vadd.f32 %v6778_v51, %v1057_v60  ;;  %v7115_v35 = vadd.f32 %v6778_v51, %v1052_v20  ;;  %v7126_v24 = vadd.f32 %v6778_v51, %v1059_v18  ;;  %v11695_v20 = vld [vmem:[#allocation17_spill] sm:$0xff] }
 0x198   :  { %1259 = vrot.lane.b32.xlu1 %v7042_v39, %s5924_s3  ;;  %v7129_v60 = vadd.f32 %v6778_v51, %v1054_v26  ;;  %v7140_v12 = vadd.f32 %v6778_v51, %v1061_v6  ;;  %v11698_v26 = vld [vmem:[#allocation19_spill] sm:$0xff] }
 0x199   :  { %11694 = vst [vmem:[#allocation3_spill] sm:$0xff] %v7126_v24 }
 0x19a   :  { %11697 = vst [vmem:[#allocation6_spill] sm:$0xff] %v7140_v12 }
 0x19b   :  { %1253 = vrot.lane.b32.xlu0 %v7059_v59, %s5924_s3 }
 0x19c   :  { %1263 = vrot.lane.b32.xlu1 %v7056_v14, %s5924_s3 }
 0x19f   :  { %1257 = vrot.lane.b32.xlu0 %v7073_v58, %s5924_s3 }
 0x1a0   :  { %1267 = vrot.lane.b32.xlu1 %v7070_v31, %s5924_s3  ;;  %v1058_v31 = vmul.f32 %v6763_v44, %v11698_v26  ;;  %v1065_v26 = vmul.f32 %v6763_v44, %v11702_v34 }
 0x1a2   :  { %v7157_v6 = vadd.f32 %v6778_v51, %v1058_v31 }
 0x1a3   :  { %1261 = vrot.lane.b32.xlu0 %v7087_v27, %s5924_s3 }
 0x1a4   :  { %1271 = vrot.lane.b32.xlu1 %v7084_v38, %s5924_s3 }
 0x1a7   :  { %1265 = vrot.lane.b32.xlu0 %v7101_v42, %s5924_s3  ;;  %v1056_v42 = vmul.f32 %v6763_v44, %v11695_v20  ;;  %v1063_v20 = vmul.f32 %v6763_v44, %v11699_v43  ;;  %v7168_v43 = vadd.f32 %v6778_v51, %v1065_v26 }
 0x1a8   :  { %1275 = vrot.lane.b32.xlu1 %v7098_v10, %s5924_s3 }
 0x1a9   :  { %v7143_v18 = vadd.f32 %v6778_v51, %v1056_v42  ;;  %v7154_v47 = vadd.f32 %v6778_v51, %v1063_v20  ;;  %v11701_v42 = vld [vmem:[#allocation21_spill] sm:$0xff]  ;;  %11703 = vst [vmem:[#allocation8_spill] sm:$0xff] %v7168_v43 }
 0x1aa   :  { %v1060_v29 = vmul.f32 %v6763_v44, %v11701_v42 }
 0x1ab   :  { %1269 = vrot.lane.b32.xlu0 %v7115_v35, %s5924_s3  ;;  %11700 = vst [vmem:[#allocation5_spill] sm:$0xff] %v7154_v47 }
 0x1ac   :  { %1279 = vrot.lane.b32.xlu1 %v7112_v53, %s5924_s3  ;;  %v7171_v20 = vadd.f32 %v6778_v51, %v1060_v29 }
 0x1ae   :  { %11704 = vst [vmem:[#allocation7_spill] sm:$0xff] %v7171_v20 }
 0x1af   :  { %1273 = vrot.lane.b32.xlu0 %v7129_v60, %s5924_s3 }
 0x1b0   :  { %1283 = vrot.lane.b32.xlu1 %v7126_v24, %s5924_s3 }
 0x1b3   :  { %1277 = vrot.lane.b32.xlu0 %v7143_v18, %s5924_s3 }
 0x1b4   :  { %1287 = vrot.lane.b32.xlu1 %v7140_v12, %s5924_s3 }
 0x1b7   :  { %1281 = vrot.lane.b32.xlu0 %v7157_v6, %s5924_s3 }
 0x1b8   :  { %1291 = vrot.lane.b32.xlu1 %v7154_v47, %s5924_s3 }
 0x1bb   :  { %1285 = vrot.lane.b32.xlu0 %v7171_v20, %s5924_s3 }
 0x1bc   :  { %1295 = vrot.lane.b32.xlu1 %v7168_v43, %s5924_s3 }
 0x1bf   :  { %1289 = vrot.lane.b32.xlu0 %v6954_v49, %s5924_s3 }
 0x1c0   :  { %1299 = vrot.lane.b32.xlu1 %v6866_v57, %s5924_s3 }
 0x1c3   :  { %1293 = vrot.lane.b32.xlu0 %v6958_v16, %s5924_s3 }
 0x1c4   :  { %1909 = vrot.lane.b32.xlu1 %v7056_v14, %s5925_s5 }
 0x1c7   :  { %1297 = vrot.lane.b32.xlu0 %v6962_v9, %s5924_s3 }
 0x1c8   :  { %1303 = vrot.lane.b32.xlu1 %v6869_v50, %s5924_s3 }
 0x1cb   :  { %1941 = vrot.lane.b32.xlu0 %v7168_v43, %s5925_s5 }
 0x1cc   :  { %1907 = vrot.lane.b32.xlu1 %v7087_v27, %s5925_s5 }
 0x1cf   :  { %1301 = vrot.lane.b32.xlu0 %v6969_v36, %s5924_s3 }
 0x1d0   :  { %1307 = vrot.lane.b32.xlu1 %v6872_v32, %s5924_s3 }
 0x1d3   :  { %1939 = vrot.lane.b32.xlu0 %v6958_v16, %s5925_s5 }
 0x1d4   :  { %1905 = vrot.lane.b32.xlu1 %v7042_v39, %s5925_s5 }
 0x1d7   :  { %1305 = vrot.lane.b32.xlu0 %v6972_v56, %s5924_s3 }
 0x1d8   :  { %1311 = vrot.lane.b32.xlu1 %v6875_v3, %s5924_s3 }
 0x1db   :  { %1937 = vrot.lane.b32.xlu0 %v7154_v47, %s5925_s5  ;;  %v11707_v47 = vld [vmem:[#allocation30_spill] sm:$0xff] }
 0x1dc   :  { %1903 = vrot.lane.b32.xlu1 %v7073_v58, %s5925_s5 }
 0x1df   :  { %1309 = vrot.lane.b32.xlu0 %v6975_v28, %s5924_s3 }
 0x1e0   :  { %1315 = vrot.lane.b32.xlu1 %v6878_v62, %s5924_s3 }
 0x1e3   :  { %1935 = vrot.lane.b32.xlu0 %v6954_v49, %s5925_s5 }
 0x1e4   :  { %1901 = vrot.lane.b32.xlu1 %v7028_v55, %s5925_s5 }
 0x1e7   :  { %1313 = vrot.lane.b32.xlu0 %v6978_v13, %s5924_s3 }
 0x1e8   :  { %1319 = vrot.lane.b32.xlu1 %v6881_v54, %s5924_s3 }
 0x1eb   :  { %1933 = vrot.lane.b32.xlu0 %v7140_v12, %s5925_s5  ;;  %v11709_v12 = vld [vmem:[#allocation31_spill] sm:$0xff] }
 0x1ec   :  { %1899 = vrot.lane.b32.xlu1 %v7059_v59, %s5925_s5 }
 0x1ef   :  { %1317 = vrot.lane.b32.xlu0 %v6985_v17, %s5924_s3 }
 0x1f0   :  { %1323 = vrot.lane.b32.xlu1 %v6884_v11, %s5924_s3 }
 0x1f1   :  { %v1238_v44 = vpop.permute.xlu1 %1237 }
 0x1f3   :  { %1931 = vrot.lane.b32.xlu0 %v7171_v20, %s5925_s5 }
 0x1f4   :  { %1897 = vrot.lane.b32.xlu1 %v6946_v5, %s5925_s5 }
 0x1f5   :  { %v1240_v51 = vpop.permute.xlu1 %1239 }
 0x1f7   :  { %1321 = vrot.lane.b32.xlu0 %v6988_v30, %s5924_s3 }
 0x1f8   :  { %1327 = vrot.lane.b32.xlu1 %v6887_v45, %s5924_s3 }
 0x1f9   :  { %v1234_v34 = vpop.permute.xlu0 %1233 }
 0x1fa   :  { %v1244_v29 = vpop.permute.xlu1 %1243  ;;  %5486 = vmatprep.mubr.msk.f32.mxu1 %vm1361_vm3, %v1234_v34 }
 0x1fb   :  { %1929 = vrot.lane.b32.xlu0 %v7126_v24, %s5925_s5 }
 0x1fc   :  { %1895 = vrot.lane.b32.xlu1 %v7045_v8, %s5925_s5 }
 0x1fd   :  { %v1236_v31 = vpop.permute.xlu0 %1235 }
 0x1fe   :  { %v1248_v42 = vpop.permute.xlu1 %1247  ;;  %5487 = vmatmul.mubr.msk.f32.vlgmr.msra.gmra.mxu1 %vm1361_vm3, %v1236_v31 }
 0x1ff   :  { %1325 = vrot.lane.b32.xlu0 %v6991_v52, %s5924_s3  ;;  %5489 = vmatprep.mubr.msk.f32.mxu1 %vm1361_vm3, %v1238_v44 }
 0x200   :  { %1331 = vrot.lane.b32.xlu1 %v6890_v48, %s5924_s3 }
 0x201   :  { %v1242_v26 = vpop.permute.xlu0 %1241 }
 0x202   :  { %v1252_v34 = vpop.permute.xlu1 %1251  ;;  %5490 = vmatmul.mubr.msk.f32.gmra.mxu1 %vm1361_vm3, %v1240_v51 }
 0x203   :  { %1927 = vrot.lane.b32.xlu0 %v7157_v6, %s5925_s5  ;;  %5492 = vmatprep.mubr.msk.f32.mxu1 %vm1361_vm3, %v1242_v26 }
 0x204   :  { %1893 = vrot.lane.b32.xlu1 %v6943_v41, %s5925_s5 }
 0x205   :  { %v1246_v31 = vpop.permute.xlu0 %1245 }
 0x206   :  { %v1256_v43 = vpop.permute.xlu1 %1255  ;;  %5493 = vmatmul.mubr.msk.f32.gmra.mxu1 %vm1361_vm3, %v1244_v29 }
 0x207   :  { %1329 = vrot.lane.b32.xlu0 %v6994_v40, %s5924_s3  ;;  %5495 = vmatprep.mubr.msk.f32.mxu1 %vm1361_vm3, %v1246_v31 }
 0x208   :  { %1335 = vrot.lane.b32.xlu1 %v6895_v15, %s5924_s3 }
 0x209   :  { %v1250_v44 = vpop.permute.xlu0 %1249 }
 0x20a   :  { %v1260_v51 = vpop.permute.xlu1 %1259  ;;  %5496 = vmatmul.mubr.msk.f32.gmra.mxu1 %vm1361_vm3, %v1248_v42 }
 0x20b   :  { %1925 = vrot.lane.b32.xlu0 %v7112_v53, %s5925_s5  ;;  %5498 = vmatprep.mubr.msk.f32.mxu1 %vm1361_vm3, %v1250_v44 }
 0x20c   :  { %1891 = vrot.lane.b32.xlu1 %v7031_v23, %s5925_s5 }
 0x20d   :  { %v1254_v29 = vpop.permute.xlu0 %1253 }
 0x20e   :  { %v1264_v26 = vpop.permute.xlu1 %1263  ;;  %5499 = vmatmul.mubr.msk.f32.gmra.mxu1 %vm1361_vm3, %v1252_v34 }
 0x20f   :  { %1333 = vrot.lane.b32.xlu0 %v6997_v46, %s5924_s3  ;;  %5501 = vmatprep.mubr.msk.f32.mxu1 %vm1361_vm3, %v1254_v29 }
 0x210   :  { %1339 = vrot.lane.b32.xlu1 %v6898_v37, %s5924_s3 }
 0x211   :  { %v1258_v42 = vpop.permute.xlu0 %1257 }
 0x212   :  { %v1268_v31 = vpop.permute.xlu1 %1267  ;;  %5502 = vmatmul.mubr.msk.f32.gmra.mxu1 %vm1361_vm3, %v1256_v43 }
 0x213   :  { %1923 = vrot.lane.b32.xlu0 %v7143_v18, %s5925_s5  ;;  %5504 = vmatprep.mubr.msk.f32.mxu1 %vm1361_vm3, %v1258_v42 }
 0x214   :  { %1889 = vrot.lane.b32.xlu1 %v6863_v22, %s5925_s5 }
 0x215   :  { %v1262_v34 = vpop.permute.xlu0 %1261 }
 0x216   :  { %v1272_v44 = vpop.permute.xlu1 %1271  ;;  %5505 = vmatmul.mubr.msk.f32.gmra.mxu1 %vm1361_vm3, %v1260_v51 }
 0x217   :  { %1337 = vrot.lane.b32.xlu0 %v7000_v33, %s5924_s3  ;;  %5507 = vmatprep.mubr.msk.f32.mxu1 %vm1361_vm3, %v1262_v34 }
 0x218   :  { %1343 = vrot.lane.b32.xlu1 %v6901_v21, %s5924_s3 }
 0x219   :  { %v1266_v43 = vpop.permute.xlu0 %1265 }
 0x21a   :  { %v1276_v29 = vpop.permute.xlu1 %1275  ;;  %5508 = vmatmul.mubr.msk.f32.gmra.mxu1 %vm1361_vm3, %v1264_v26 }
 0x21b   :  { %1921 = vrot.lane.b32.xlu0 %v7098_v10, %s5925_s5  ;;  %5510 = vmatprep.mubr.msk.f32.mxu1 %vm1361_vm3, %v1266_v43 }
 0x21c   :  { %1887 = vrot.lane.b32.xlu1 %v6950_v7, %s5925_s5 }
 0x21d   :  { %v1270_v51 = vpop.permute.xlu0 %1269 }
 0x21e   :  { %v1280_v42 = vpop.permute.xlu1 %1279  ;;  %5511 = vmatmul.mubr.msk.f32.gmra.mxu1 %vm1361_vm3, %v1268_v31 }
 0x21f   :  { %1341 = vrot.lane.b32.xlu0 %v7003_v1, %s5924_s3  ;;  %5513 = vmatprep.mubr.msk.f32.mxu1 %vm1361_vm3, %v1270_v51 }
 0x220   :  { %1347 = vrot.lane.b32.xlu1 %v6904_v61, %s5924_s3 }
 0x221   :  { %v1274_v26 = vpop.permute.xlu0 %1273 }
 0x222   :  { %v1284_v34 = vpop.permute.xlu1 %1283  ;;  %5514 = vmatmul.mubr.msk.f32.gmra.mxu1 %vm1361_vm3, %v1272_v44 }
 0x223   :  { %1919 = vrot.lane.b32.xlu0 %v7129_v60, %s5925_s5  ;;  %5516 = vmatprep.mubr.msk.f32.mxu1 %vm1361_vm3, %v1274_v26 }
 0x224   :  { %1885 = vrot.lane.b32.xlu1 %v6860_v25, %s5925_s5 }
 0x225   :  { %v1278_v31 = vpop.permute.xlu0 %1277 }
 0x226   :  { %v1288_v43 = vpop.permute.xlu1 %1287  ;;  %5517 = vmatmul.mubr.msk.f32.gmra.mxu1 %vm1361_vm3, %v1276_v29 }
 0x227   :  { %1345 = vrot.lane.b32.xlu0 %v7006_v19, %s5924_s3  ;;  %5519 = vmatprep.mubr.msk.f32.mxu1 %vm1361_vm3, %v1278_v31 }
 0x228   :  { %1351 = vrot.lane.b32.xlu1 %v6907_v4, %s5924_s3 }
 0x229   :  { %v1282_v44 = vpop.permute.xlu0 %1281 }
 0x22a   :  { %v1292_v51 = vpop.permute.xlu1 %1291  ;;  %5520 = vmatmul.mubr.msk.f32.gmra.mxu1 %vm1361_vm3, %v1280_v42 }
 0x22b   :  { %1917 = vrot.lane.b32.xlu0 %v7084_v38, %s5925_s5  ;;  %5522 = vmatprep.mubr.msk.f32.mxu1 %vm1361_vm3, %v1282_v44  ;;  %v11705_v44 = vld [vmem:[#allocation24_spill] sm:$0xff] }
 0x22c   :  { %1883 = vrot.lane.b32.xlu1 %v6829_v0, %s5925_s5 }
 0x22d   :  { %v1286_v29 = vpop.permute.xlu0 %1285 }
 0x22e   :  { %v1296_v26 = vpop.permute.xlu1 %1295  ;;  %5523 = vmatmul.mubr.msk.f32.gmra.mxu1 %vm1361_vm3, %v1284_v34 }
 0x22f   :  { %1349 = vrot.lane.b32.xlu0 %v7009_v63, %s5924_s3  ;;  %5525 = vmatprep.mubr.msk.f32.mxu1 %vm1361_vm3, %v1286_v29  ;;  %v11706_v29 = vld [vmem:[#allocation35_spill] sm:$0xff] }
 0x230   :  { %1355 = vrot.lane.b32.xlu1 %v6910_v2, %s5924_s3 }
 0x231   :  { %v1290_v42 = vpop.permute.xlu0 %1289 }
 0x232   :  { %v1300_v31 = vpop.permute.xlu1 %1299  ;;  %5526 = vmatmul.mubr.msk.f32.gmra.mxu1 %vm1361_vm3, %v1288_v43 }
 0x233   :  { %1915 = vrot.lane.b32.xlu0 %v7115_v35, %s5925_s5  ;;  %5528 = vmatprep.mubr.msk.f32.mxu1 %vm1361_vm3, %v1290_v42  ;;  %v11708_v42 = vld [vmem:[#allocation2_spill] sm:$0xff] }
 0x234   :  { %1881 = vrot.lane.b32.xlu1 %v11705_v44, %s5925_s5 }
 0x235   :  { %v1294_v34 = vpop.permute.xlu0 %1293 }
 0x236   :  { %v1910_v16 = vpop.permute.xlu1 %1909  ;;  %5529 = vmatmul.mubr.msk.f32.gmra.mxu1 %vm1361_vm3, %v1292_v51 }
 0x237   :  { %1353 = vrot.lane.b32.xlu0 %v11706_v29, %s5924_s3  ;;  %5531 = vmatprep.mubr.msk.f32.mxu1 %vm1361_vm3, %v1294_v34  ;;  %v11710_v34 = vld [vmem:[#allocation36_spill] sm:$0xff] }
 0x238   :  { %1359 = vrot.lane.b32.xlu1 %v11707_v47, %s5924_s3 }
 0x239   :  { %v1298_v43 = vpop.permute.xlu0 %1297 }
 0x23a   :  { %v1304_v49 = vpop.permute.xlu1 %1303  ;;  %5532 = vmatmul.mubr.msk.f32.gmra.mxu1 %vm1361_vm3, %v1296_v26 }
 0x23b   :  { %1913 = vrot.lane.b32.xlu0 %v11708_v42, %s5925_s5  ;;  %5534 = vmatprep.mubr.msk.f32.mxu1 %vm1361_vm3, %v1298_v43  ;;  %v11711_v43 = vld [vmem:[#allocation4_spill] sm:$0xff] }
 0x23c   :  { %1879 = vrot.lane.b32.xlu1 %v11709_v12, %s5925_s5 }
 0x23d   :  { %v1942_v51 = vpop.permute.xlu0 %1941 }
 0x23e   :  { %v1908_v20 = vpop.permute.xlu1 %1907  ;;  %5535 = vmatmul.mubr.msk.f32.gmra.mxu1 %vm1361_vm3, %v1300_v31  ;;  %5188 = vmatprep.subr.msk.mxu1 %vm1361_vm3, %v1942_v51 }
 0x23f   :  { %1357 = vrot.lane.b32.xlu0 %v11710_v34, %s5924_s3  ;;  %5189 = vmatpush3.xpose.msk.msra.mxu1 %vm1361_vm3, %v1910_v16 }
 0x240   :  { %3028 = vrot.lane.b32.xlu1 %v6887_v45, %s5925_s5 }
 0x241   :  { %v1302_v26 = vpop.permute.xlu0 %1301 }
 0x242   :  { %v1308_v24 = vpop.permute.xlu1 %1307  ;;  %5537 = vmatprep.mubr.msk.f32.mxu1 %vm1361_vm3, %v1302_v26 }
 0x243   :  { %1911 = vrot.lane.b32.xlu0 %v11711_v43, %s5925_s5  ;;  %5538 = vmatmul.mubr.msk.f32.gmra.mxu1 %vm1361_vm3, %v1304_v49 }
 0x244   :  { %3026 = vrot.lane.b32.xlu1 %v6991_v52, %s5925_s5 }
 0x245   :  { %v1940_v31 = vpop.permute.xlu0 %1939 }
 0x246   :  { %v1906_v51 = vpop.permute.xlu1 %1905  ;;  %5190 = vmatprep.subr.msk.mxu1 %vm1361_vm3, %v1940_v31 }
 0x247   :  { %3060 = vrot.lane.b32.xlu0 %v11707_v47, %s5925_s5  ;;  %5191 = vmatpush3.xpose.msk.msra.mxu1 %vm1361_vm3, %v1908_v20 }
 0x248   :  { %3024 = vrot.lane.b32.xlu1 %v6884_v11, %s5925_s5 }
 0x249   :  { %v1306_v16 = vpop.permute.xlu0 %1305 }
 0x24a   :  { %v1312_v26 = vpop.permute.xlu1 %1311  ;;  %5540 = vmatprep.mubr.msk.f32.mxu1 %vm1361_vm3, %v1306_v16 }
 0x24b   :  { %3058 = vrot.lane.b32.xlu0 %v11710_v34, %s5925_s5  ;;  %5541 = vmatmul.mubr.msk.f32.gmra.mxu1 %vm1361_vm3, %v1308_v24 }
 0x24c   :  { %3022 = vrot.lane.b32.xlu1 %v6988_v30, %s5925_s5 }
 0x24d   :  { %v1938_v49 = vpop.permute.xlu0 %1937 }
 0x24e   :  { %v1904_v31 = vpop.permute.xlu1 %1903  ;;  %5192 = vmatprep.subr.msk.mxu1 %vm1361_vm3, %v1938_v49 }
 0x24f   :  { %3056 = vrot.lane.b32.xlu0 %v6910_v2, %s5925_s5  ;;  %5193 = vmatpush3.xpose.msk.msra.mxu1 %vm1361_vm3, %v1906_v51 }
 0x250   :  { %3020 = vrot.lane.b32.xlu1 %v6881_v54, %s5925_s5 }
 0x251   :  { %v1310_v20 = vpop.permute.xlu0 %1309 }
 0x252   :  { %v1316_v16 = vpop.permute.xlu1 %1315  ;;  %5543 = vmatprep.mubr.msk.f32.mxu1 %vm1361_vm3, %v1310_v20 }
 0x253   :  { %3054 = vrot.lane.b32.xlu0 %v11706_v29, %s5925_s5  ;;  %5544 = vmatmul.mubr.msk.f32.gmra.mxu1 %vm1361_vm3, %v1312_v26  ;;  %v11484_v26 = vmov 0.0  }
 0x254   :  { %3018 = vrot.lane.b32.xlu1 %v6985_v17, %s5925_s5  ;;  %2741 = vmatprep.subr.mxu0 %v11484_v26 }
 0x255   :  { %v1936_v24 = vpop.permute.xlu0 %1935 }
 0x256   :  { %v1902_v49 = vpop.permute.xlu1 %1901  ;;  %5194 = vmatprep.subr.msk.mxu1 %vm1361_vm3, %v1936_v24 }
 0x257   :  { %3052 = vrot.lane.b32.xlu0 %v6907_v4, %s5925_s5  ;;  %5195 = vmatpush3.xpose.msk.msra.mxu1 %vm1361_vm3, %v1904_v31 }
 0x258   :  { %3016 = vrot.lane.b32.xlu1 %v6878_v62, %s5925_s5 }
 0x259   :  { %v1314_v51 = vpop.permute.xlu0 %1313 }
 0x25a   :  { %v1320_v20 = vpop.permute.xlu1 %1319  ;;  %5546 = vmatprep.mubr.msk.f32.mxu1 %vm1361_vm3, %v1314_v51 }
 0x25b   :  { %3050 = vrot.lane.b32.xlu0 %v7009_v63, %s5925_s5  ;;  %5547 = vmatmul.mubr.msk.f32.gmra.mxu1 %vm1361_vm3, %v1316_v16 }
 0x25c   :  { %3014 = vrot.lane.b32.xlu1 %v6978_v13, %s5925_s5 }
 0x25d   :  { %v1934_v24 = vpop.permute.xlu0 %1933 }
 0x25e   :  { %v1900_v31 = vpop.permute.xlu1 %1899  ;;  %5196 = vmatprep.subr.msk.mxu1 %vm1361_vm3, %v1934_v24 }
 0x25f   :  { %3048 = vrot.lane.b32.xlu0 %v6904_v61, %s5925_s5  ;;  %5197 = vmatpush3.xpose.msk.msra.mxu1 %vm1361_vm3, %v1902_v49 }
 0x260   :  { %3012 = vrot.lane.b32.xlu1 %v6875_v3, %s5925_s5 }
 0x261   :  { %v1318_v51 = vpop.permute.xlu0 %1317 }
 0x262   :  { %v1324_v16 = vpop.permute.xlu1 %1323  ;;  %5549 = vmatprep.mubr.msk.f32.mxu1 %vm1361_vm3, %v1318_v51 }
 0x263   :  { %3046 = vrot.lane.b32.xlu0 %v7006_v19, %s5925_s5  ;;  %5550 = vmatmul.mubr.msk.f32.gmra.mxu1 %vm1361_vm3, %v1320_v20 }
 0x264   :  { %3010 = vrot.lane.b32.xlu1 %v6975_v28, %s5925_s5 }
 0x265   :  { %v1932_v24 = vpop.permute.xlu0 %1931 }
 0x266   :  { %v1898_v26 = vpop.permute.xlu1 %1897  ;;  %5198 = vmatprep.subr.msk.mxu1 %vm1361_vm3, %v1932_v24 }
 0x267   :  { %3044 = vrot.lane.b32.xlu0 %v6901_v21, %s5925_s5  ;;  %5199 = vmatpush3.xpose.msk.msra.mxu1 %vm1361_vm3, %v1900_v31 }
 0x268   :  { %3008 = vrot.lane.b32.xlu1 %v6872_v32, %s5925_s5 }
 0x269   :  { %v1322_v49 = vpop.permute.xlu0 %1321 }
 0x26a   :  { %v1328_v51 = vpop.permute.xlu1 %1327  ;;  %5552 = vmatprep.mubr.msk.f32.mxu1 %vm1361_vm3, %v1322_v49 }
 0x26b   :  { %3042 = vrot.lane.b32.xlu0 %v7003_v1, %s5925_s5  ;;  %5553 = vmatmul.mubr.msk.f32.gmra.mxu1 %vm1361_vm3, %v1324_v16 }
 0x26c   :  { %3006 = vrot.lane.b32.xlu1 %v6972_v56, %s5925_s5 }
 0x26d   :  { %v1930_v20 = vpop.permute.xlu0 %1929 }
 0x26e   :  { %v1896_v24 = vpop.permute.xlu1 %1895  ;;  %5200 = vmatprep.subr.msk.mxu1 %vm1361_vm3, %v1930_v20 }
 0x26f   :  { %3040 = vrot.lane.b32.xlu0 %v6898_v37, %s5925_s5  ;;  %5201 = vmatpush3.xpose.msk.msra.mxu1 %vm1361_vm3, %v1898_v26 }
 0x270   :  { %3004 = vrot.lane.b32.xlu1 %v6869_v50, %s5925_s5 }
 0x271   :  { %v1326_v31 = vpop.permute.xlu0 %1325 }
 0x272   :  { %5555 = vmatprep.mubr.msk.f32.mxu1 %vm1361_vm3, %v1326_v31  ;;  %v1332_v49 = vpop.permute.xlu1 %1331 }
 0x273   :  { %3038 = vrot.lane.b32.xlu0 %v7000_v33, %s5925_s5  ;;  %5556 = vmatmul.mubr.msk.f32.gmra.mxu1 %vm1361_vm3, %v1328_v51 }
 0x274   :  { %3002 = vrot.lane.b32.xlu1 %v6969_v36, %s5925_s5 }
 0x275   :  { %v1928_v16 = vpop.permute.xlu0 %1927 }
 0x276   :  { %5202 = vmatprep.subr.msk.mxu1 %vm1361_vm3, %v1928_v16  ;;  %v1894_v20 = vpop.permute.xlu1 %1893 }
 0x277   :  { %3036 = vrot.lane.b32.xlu0 %v6895_v15, %s5925_s5  ;;  %5203 = vmatpush3.xpose.msk.msra.mxu1 %vm1361_vm3, %v1896_v24 }
 0x278   :  { %3000 = vrot.lane.b32.xlu1 %v6866_v57, %s5925_s5 }
 0x279   :  { %v1330_v26 = vpop.permute.xlu0 %1329 }
 0x27a   :  { %5558 = vmatprep.mubr.msk.f32.mxu1 %vm1361_vm3, %v1330_v26  ;;  %v1336_v31 = vpop.permute.xlu1 %1335 }
 0x27b   :  { %3034 = vrot.lane.b32.xlu0 %v6997_v46, %s5925_s5  ;;  %5559 = vmatmul.mubr.msk.f32.gmra.mxu1 %vm1361_vm3, %v1332_v49 }
 0x27c   :  { %2998 = vrot.lane.b32.xlu1 %v6962_v9, %s5925_s5 }
 0x27d   :  { %v1926_v51 = vpop.permute.xlu0 %1925 }
 0x27e   :  { %5204 = vmatprep.subr.msk.mxu1 %vm1361_vm3, %v1926_v51  ;;  %v1892_v16 = vpop.permute.xlu1 %1891 }
 0x27f   :  { %3032 = vrot.lane.b32.xlu0 %v6890_v48, %s5925_s5  ;;  %5205 = vmatpush3.xpose.msk.msra.mxu1 %vm1361_vm3, %v1894_v20 }
 0x281   :  { %v1334_v24 = vpop.permute.xlu0 %1333 }
 0x282   :  { %5561 = vmatprep.mubr.msk.f32.mxu1 %vm1361_vm3, %v1334_v24  ;;  %v1340_v26 = vpop.permute.xlu1 %1339 }
 0x283   :  { %3030 = vrot.lane.b32.xlu0 %v6994_v40, %s5925_s5  ;;  %5562 = vmatmul.mubr.msk.f32.gmra.mxu1 %vm1361_vm3, %v1336_v31 }
 0x285   :  { %v1924_v49 = vpop.permute.xlu0 %1923 }
 0x286   :  { %5206 = vmatprep.subr.msk.mxu1 %vm1361_vm3, %v1924_v49  ;;  %v1890_v47 = vpop.permute.xlu1 %1889 }
 0x287   :  { %5207 = vmatpush3.xpose.msk.msra.mxu1 %vm1361_vm3, %v1892_v16 }
 0x289   :  { %v1338_v51 = vpop.permute.xlu0 %1337 }
 0x28a   :  { %5564 = vmatprep.mubr.msk.f32.mxu1 %vm1361_vm3, %v1338_v51  ;;  %v1344_v34 = vpop.permute.xlu1 %1343 }
 0x28b   :  { %5565 = vmatmul.mubr.msk.f32.gmra.mxu1 %vm1361_vm3, %v1340_v26 }
 0x28d   :  { %v1922_v20 = vpop.permute.xlu0 %1921 }
 0x28e   :  { %5208 = vmatprep.subr.msk.mxu1 %vm1361_vm3, %v1922_v20  ;;  %v1888_v24 = vpop.permute.xlu1 %1887 }
 0x28f   :  { %5209 = vmatpush3.xpose.msk.msra.mxu1 %vm1361_vm3, %v1890_v47 }
 0x291   :  { %v1342_v2 = vpop.permute.xlu0 %1341 }
 0x292   :  { %5567 = vmatprep.mubr.msk.f32.mxu1 %vm1361_vm3, %v1342_v2  ;;  %v1348_v31 = vpop.permute.xlu1 %1347 }
 0x293   :  { %5568 = vmatmul.mubr.msk.f32.gmra.mxu1 %vm1361_vm3, %v1344_v34 }
 0x295   :  { %v1920_v49 = vpop.permute.xlu0 %1919 }
 0x296   :  { %5210 = vmatprep.subr.msk.mxu1 %vm1361_vm3, %v1920_v49  ;;  %v1886_v16 = vpop.permute.xlu1 %1885 }
 0x297   :  { %5211 = vmatpush3.xpose.msk.msra.mxu1 %vm1361_vm3, %v1888_v24 }
 0x299   :  { %v1346_v51 = vpop.permute.xlu0 %1345 }
 0x29a   :  { %5570 = vmatprep.mubr.msk.f32.mxu1 %vm1361_vm3, %v1346_v51  ;;  %v1352_v26 = vpop.permute.xlu1 %1351 }
 0x29b   :  { %5571 = vmatmul.mubr.msk.f32.gmra.mxu1 %vm1361_vm3, %v1348_v31 }
 0x29d   :  { %v1918_v20 = vpop.permute.xlu0 %1917 }
 0x29e   :  { %5212 = vmatprep.subr.msk.mxu1 %vm1361_vm3, %v1918_v20  ;;  %v1884_v47 = vpop.permute.xlu1 %1883 }
 0x29f   :  { %5213 = vmatpush3.xpose.msk.msra.mxu1 %vm1361_vm3, %v1886_v16 }
 0x2a1   :  { %v1350_v2 = vpop.permute.xlu0 %1349 }
 0x2a2   :  { %5573 = vmatprep.mubr.msk.f32.mxu1 %vm1361_vm3, %v1350_v2  ;;  %v1356_v34 = vpop.permute.xlu1 %1355 }
 0x2a3   :  { %5574 = vmatmul.mubr.msk.f32.gmra.mxu1 %vm1361_vm3, %v1352_v26 }
 0x2a5   :  { %v1916_v49 = vpop.permute.xlu0 %1915 }
 0x2a6   :  { %5214 = vmatprep.subr.msk.mxu1 %vm1361_vm3, %v1916_v49  ;;  %v1882_v24 = vpop.permute.xlu1 %1881 }
 0x2a7   :  { %5215 = vmatpush3.xpose.msk.msra.mxu1 %vm1361_vm3, %v1884_v47 }
 0x2a9   :  { %v1354_v51 = vpop.permute.xlu0 %1353 }
 0x2aa   :  { %5576 = vmatprep.mubr.msk.f32.mxu1 %vm1361_vm3, %v1354_v51  ;;  %v1360_v31 = vpop.permute.xlu1 %1359 }
 0x2ab   :  { %5577 = vmatmul.mubr.msk.f32.gmra.mxu1 %vm1361_vm3, %v1356_v34 }
 0x2ad   :  { %v1914_v20 = vpop.permute.xlu0 %1913 }
 0x2ae   :  { %5216 = vmatprep.subr.msk.mxu1 %vm1361_vm3, %v1914_v20  ;;  %v1880_v16 = vpop.permute.xlu1 %1879 }
 0x2af   :  { %5217 = vmatpush3.xpose.msk.msra.mxu1 %vm1361_vm3, %v1882_v24 }
 0x2b1   :  { %v1358_v2 = vpop.permute.xlu0 %1357 }
 0x2b2   :  { %5579 = vmatprep.mubr.msk.f32.mxu1 %vm1361_vm3, %v1358_v2  ;;  %v3029_v26 = vpop.permute.xlu1 %3028 }
 0x2b3   :  { %5580 = vmatmul.mubr.msk.f32.gmra.mxu1 %vm1361_vm3, %v1360_v31 }
 0x2b4   :  { %5220 = vmatprep.mubr.msk.f32.mxu1 %vm1361_vm3, %v11709_v12 }
 0x2b5   :  { %v1912_v47 = vpop.permute.xlu0 %1911 }
 0x2b6   :  { %5218 = vmatprep.subr.msk.mxu1 %vm1361_vm3, %v1912_v47  ;;  %v3027_v49 = vpop.permute.xlu1 %3026 }
 0x2b7   :  { %5219 = vmatpush3.xpose.msk.msra.mxu1 %vm1361_vm3, %v1880_v16 }
 0x2b9   :  { %v3061_v34 = vpop.permute.xlu0 %3060 }
 0x2ba   :  { %5221 = vmatmul.mubr.msk.f32.vlgmr.msra.gmra.mxu1 %vm1361_vm3, %v11709_v12  ;;  %5284 = vmatprep.subr.msk.mxu1 %vm1361_vm3, %v3061_v34  ;;  %v3025_v24 = vpop.permute.xlu1 %3024 }
 0x2bb   :  { %5222 = vmatprep.mubr.msk.f32.mxu1 %vm1361_vm3, %v11705_v44  ;;  %5285 = vmatpush3.xpose.msk.msra.mxu1 %vm1361_vm3, %v3029_v26 }
 0x2bd   :  { %v3059_v51 = vpop.permute.xlu0 %3058 }
 0x2be   :  { %v7478_v31 = vpop.f32.mrf.mxu1  ;;  %5223 = vmatmul.mubr.msk.f32.gmra.mxu1 %vm1361_vm3, %v11705_v44  ;;  %5286 = vmatprep.subr.msk.mxu1 %vm1361_vm3, %v3059_v51  ;;  %v3023_v20 = vpop.permute.xlu1 %3022 }
 0x2bf   :  { %5224 = vmatprep.mubr.msk.f32.mxu1 %vm1361_vm3, %v6829_v0  ;;  %5287 = vmatpush3.xpose.msk.msra.mxu1 %vm1361_vm3, %v3027_v49 }
 0x2c0   :  { %v7486_v12 = vpop.f32.mrf.mxu1 }
 0x2c1   :  { %v3057_v16 = vpop.permute.xlu0 %3056 }
 0x2c2   :  { %v7488_v2 = vpop.f32.mrf.mxu1  ;;  %5225 = vmatmul.mubr.msk.f32.gmra.mxu1 %vm1361_vm3, %v6829_v0  ;;  %5288 = vmatprep.subr.msk.mxu1 %vm1361_vm3, %v3057_v16  ;;  %v3021_v26 = vpop.permute.xlu1 %3020 }
 0x2c3   :  { %5226 = vmatprep.mubr.msk.f32.mxu1 %vm1361_vm3, %v6860_v25  ;;  %5289 = vmatpush3.xpose.msk.msra.mxu1 %vm1361_vm3, %v3025_v24 }
 0x2c4   :  { %v7496_v44 = vpop.f32.mrf.mxu1 }
 0x2c5   :  { %v3055_v47 = vpop.permute.xlu0 %3054 }
 0x2c6   :  { %v7498_v49 = vpop.f32.mrf.mxu1  ;;  %5227 = vmatmul.mubr.msk.f32.gmra.mxu1 %vm1361_vm3, %v6860_v25  ;;  %5290 = vmatprep.subr.msk.mxu1 %vm1361_vm3, %v3055_v47  ;;  %v3019_v34 = vpop.permute.xlu1 %3018 }
 0x2c7   :  { %5228 = vmatprep.mubr.msk.f32.mxu1 %vm1361_vm3, %v6950_v7  ;;  %5291 = vmatpush3.xpose.msk.msra.mxu1 %vm1361_vm3, %v3023_v20 }
 0x2c8   :  { %v7506_v0 = vpop.f32.mrf.mxu1 }
 0x2c9   :  { %v3053_v51 = vpop.permute.xlu0 %3052 }
 0x2ca   :  { %v7508_v24 = vpop.f32.mrf.mxu1  ;;  %5229 = vmatmul.mubr.msk.f32.gmra.mxu1 %vm1361_vm3, %v6950_v7  ;;  %5292 = vmatprep.subr.msk.mxu1 %vm1361_vm3, %v3053_v51  ;;  %v3017_v16 = vpop.permute.xlu1 %3016 }
 0x2cb   :  { %5230 = vmatprep.mubr.msk.f32.mxu1 %vm1361_vm3, %v6863_v22  ;;  %5293 = vmatpush3.xpose.msk.msra.mxu1 %vm1361_vm3, %v3021_v26 }
 0x2cc   :  { %v7516_v25 = vpop.f32.mrf.mxu1 }
 0x2cd   :  { %v3051_v47 = vpop.permute.xlu0 %3050 }
 0x2ce   :  { %v7518_v20 = vpop.f32.mrf.mxu1  ;;  %5231 = vmatmul.mubr.msk.f32.gmra.mxu1 %vm1361_vm3, %v6863_v22  ;;  %5294 = vmatprep.subr.msk.mxu1 %vm1361_vm3, %v3051_v47  ;;  %v3015_v29 = vpop.permute.xlu1 %3014 }
 0x2cf   :  { %5232 = vmatprep.mubr.msk.f32.mxu1 %vm1361_vm3, %v7031_v23  ;;  %5295 = vmatpush3.xpose.msk.msra.mxu1 %vm1361_vm3, %v3019_v34 }
 0x2d0   :  { %v1600_v7 = vpop.f32.mrf.mxu1 }
 0x2d1   :  { %v3049_v51 = vpop.permute.xlu0 %3048 }
 0x2d2   :  { %v5503_v4 = vpop.f32.mrf.mxu1  ;;  %5233 = vmatmul.mubr.msk.f32.gmra.mxu1 %vm1361_vm3, %v7031_v23  ;;  %5296 = vmatprep.subr.msk.mxu1 %vm1361_vm3, %v3049_v51  ;;  %v3013_v26 = vpop.permute.xlu1 %3012 }
 0x2d3   :  { %5234 = vmatprep.mubr.msk.f32.mxu1 %vm1361_vm3, %v6943_v41  ;;  %5297 = vmatpush3.xpose.msk.msra.mxu1 %vm1361_vm3, %v3017_v16 }
 0x2d4   :  { %v1610_v22 = vpop.f32.mrf.mxu1 }
 0x2d5   :  { %v3047_v47 = vpop.permute.xlu0 %3046 }
 0x2d6   :  { %v5506_v63 = vpop.f32.mrf.mxu1  ;;  %5235 = vmatmul.mubr.msk.f32.gmra.mxu1 %vm1361_vm3, %v6943_v41  ;;  %5298 = vmatprep.subr.msk.mxu1 %vm1361_vm3, %v3047_v47  ;;  %v3011_v34 = vpop.permute.xlu1 %3010  ;;  %v11712_v47 = vmov 0.0  }
 0x2d7   :  { %5236 = vmatprep.mubr.msk.f32.mxu1 %vm1361_vm3, %v7045_v8  ;;  %5299 = vmatpush3.xpose.msk.msra.mxu1 %vm1361_vm3, %v3015_v29 }
 0x2d8   :  { %v1620_v23 = vpop.f32.mrf.mxu1 }
 0x2d9   :  { %v3045_v51 = vpop.permute.xlu0 %3044 }
 0x2da   :  { %v5509_v61 = vpop.f32.mrf.mxu1  ;;  %5237 = vmatmul.mubr.msk.f32.gmra.mxu1 %vm1361_vm3, %v7045_v8  ;;  %5300 = vmatprep.subr.msk.mxu1 %vm1361_vm3, %v3045_v51  ;;  %v3009_v16 = vpop.permute.xlu1 %3008 }
 0x2db   :  { %5238 = vmatprep.mubr.msk.f32.mxu1 %vm1361_vm3, %v6946_v5  ;;  %2742 = vmatpush1.msra.mxu0 %v5509_v61 }
 0x2dc   :  { %5301 = vmatpush3.xpose.msk.msra.mxu1 %vm1361_vm3, %v3013_v26  ;;  %v1630_v41 = vpop.f32.mrf.mxu1  ;;  %2743 = vmatprep.subr.mxu0 %v11712_v47 }
 0x2dd   :  { %2744 = vmatpush1.msra.mxu0 %v1630_v41  ;;  %v3043_v29 = vpop.permute.xlu0 %3042 }
 0x2de   :  { %v7545_v19 = vpop.f32.mrf.mxu1  ;;  %5239 = vmatmul.mubr.msk.f32.gmra.mxu1 %vm1361_vm3, %v6946_v5  ;;  %2745 = vmatprep.subr.mxu0 %v11712_v47  ;;  %v3007_v8 = vpop.permute.xlu1 %3006 }
 0x2df   :  { %5302 = vmatprep.subr.msk.mxu1 %vm1361_vm3, %v3043_v29  ;;  %5240 = vmatprep.mubr.msk.f32.mxu1 %vm1361_vm3, %v7059_v59 }
 0x2e0   :  { %2746 = vmatpush1.msra.mxu0 %v5506_v63  ;;  %5303 = vmatpush3.xpose.msk.msra.mxu1 %vm1361_vm3, %v3011_v34  ;;  %v7554_v61 = vpop.f32.mrf.mxu1 }
 0x2e1   :  { %2747 = vmatprep.subr.mxu0 %v11712_v47  ;;  %v3041_v26 = vpop.permute.xlu0 %3040 }
 0x2e2   :  { %2748 = vmatpush1.msra.mxu0 %v1620_v23  ;;  %v7557_v51 = vpop.f32.mrf.mxu1  ;;  %5241 = vmatmul.mubr.msk.f32.gmra.mxu1 %vm1361_vm3, %v7059_v59  ;;  %v3005_v63 = vpop.permute.xlu1 %3004 }
 0x2e3   :  { %2749 = vmatprep.subr.mxu0 %v11712_v47  ;;  %5304 = vmatprep.subr.msk.mxu1 %vm1361_vm3, %v3041_v26  ;;  %v11728_v26 = vld [vmem:[#allocation8_spill] sm:$0xff] }
 0x2e4   :  { %5242 = vmatprep.mubr.msk.f32.mxu1 %vm1361_vm3, %v7028_v55  ;;  %2750 = vmatpush1.msra.mxu0 %v5503_v4  ;;  %v7565_v5 = vpop.f32.mrf.mxu1 }
 0x2e5   :  { %5305 = vmatpush3.xpose.msk.msra.mxu1 %vm1361_vm3, %v3009_v16  ;;  %2751 = vmatprep.subr.mxu0 %v11712_v47  ;;  %v3039_v34 = vpop.permute.xlu0 %3038 }
 0x2e6   :  { %2752 = vmatpush1.msra.mxu0 %v1610_v22  ;;  %v7569_v23 = vpop.f32.mrf.mxu1  ;;  %5243 = vmatmul.mubr.msk.f32.gmra.mxu1 %vm1361_vm3, %v7028_v55  ;;  %v3003_v55 = vpop.permute.xlu1 %3002 }
 0x2e7   :  { %2753 = vmatprep.subr.mxu0 %v11712_v47  ;;  %5306 = vmatprep.subr.msk.mxu1 %vm1361_vm3, %v3039_v34 }
 0x2e8   :  { %5244 = vmatprep.mubr.msk.f32.mxu1 %vm1361_vm3, %v7073_v58  ;;  %2754 = vmatpush1.msra.mxu0 %v7518_v20  ;;  %v7578_v4 = vpop.f32.mrf.mxu1 }
 0x2e9   :  { %5307 = vmatpush3.xpose.msk.msra.mxu1 %vm1361_vm3, %v3007_v8  ;;  %2755 = vmatprep.subr.mxu0 %v11712_v47  ;;  %v3037_v59 = vpop.permute.xlu0 %3036 }
 0x2ea   :  { %2756 = vmatpush1.msra.mxu0 %v1600_v7  ;;  %v7582_v22 = vpop.f32.mrf.mxu1  ;;  %5245 = vmatmul.mubr.msk.f32.gmra.mxu1 %vm1361_vm3, %v7073_v58  ;;  %v3001_v16 = vpop.permute.xlu1 %3000 }
 0x2eb   :  { %2757 = vmatprep.subr.mxu0 %v11712_v47  ;;  %5308 = vmatprep.subr.msk.mxu1 %vm1361_vm3, %v3037_v59 }
 0x2ec   :  { %5246 = vmatprep.mubr.msk.f32.mxu1 %vm1361_vm3, %v7042_v39  ;;  %2758 = vmatpush1.msra.mxu0 %v7508_v24  ;;  %v7591_v20 = vpop.f32.mrf.mxu1 }
 0x2ed   :  { %5309 = vmatpush3.xpose.msk.msra.mxu1 %vm1361_vm3, %v3005_v63  ;;  %2759 = vmatprep.subr.mxu0 %v11712_v47  ;;  %v3035_v7 = vpop.permute.xlu0 %3034 }
 0x2ee   :  { %2760 = vmatpush1.msra.mxu0 %v7516_v25  ;;  %v5524_v58 = vpop.f32.mrf.mxu1  ;;  %5247 = vmatmul.mubr.msk.f32.gmra.mxu1 %vm1361_vm3, %v7042_v39 }
 0x2ef   :  { %2761 = vmatprep.subr.mxu0 %v11712_v47  ;;  %5310 = vmatprep.subr.msk.mxu1 %vm1361_vm3, %v3035_v7 }
 0x2f0   :  { %5248 = vmatprep.mubr.msk.f32.mxu1 %vm1361_vm3, %v7087_v27  ;;  %2762 = vmatpush1.msra.mxu0 %v7498_v49  ;;  %v1680_v24 = vpop.f32.mrf.mxu1 }
 0x2f1   :  { %5311 = vmatpush3.xpose.msk.msra.mxu1 %vm1361_vm3, %v3003_v55  ;;  %2763 = vmatprep.subr.mxu0 %v11712_v47  ;;  %v3033_v25 = vpop.permute.xlu0 %3032 }
 0x2f2   :  { %2764 = vmatpush1.msra.mxu0 %v7506_v0  ;;  %v5527_v41 = vpop.f32.mrf.mxu1  ;;  %5249 = vmatmul.mubr.msk.f32.gmra.mxu1 %vm1361_vm3, %v7087_v27  ;;  %v2999_v0 = vpop.permute.xlu1 %2998 }
 0x2f3   :  { %2765 = vmatprep.subr.mxu0 %v11712_v47  ;;  %5312 = vmatprep.subr.msk.mxu1 %vm1361_vm3, %v3033_v25 }
 0x2f4   :  { %5250 = vmatprep.mubr.msk.f32.mxu1 %vm1361_vm3, %v7056_v14  ;;  %2766 = vmatpush1.msra.mxu0 %v7488_v2  ;;  %v1690_v39 = vpop.f32.mrf.mxu1 }
 0x2f5   :  { %5313 = vmatpush3.xpose.msk.msra.mxu1 %vm1361_vm3, %v3001_v16  ;;  %2767 = vmatprep.subr.mxu0 %v11712_v47  ;;  %v3031_v49 = vpop.permute.xlu0 %3030 }
 0x2f6   :  { %2768 = vmatpush1.msra.mxu0 %v7496_v44  ;;  %v5530_v29 = vpop.f32.mrf.mxu1  ;;  %5251 = vmatmul.mubr.msk.f32.gmra.mxu1 %vm1361_vm3, %v7056_v14  ;;  %v11725_v44 = vld [vmem:[#allocation32_spill] sm:$0xff] }
 0x2f7   :  { %2769 = vmatprep.subr.mxu0 %v11712_v47  ;;  %5314 = vmatprep.subr.msk.mxu1 %vm1361_vm3, %v3031_v49 }
 0x2f8   :  { %5252 = vmatprep.mubr.msk.f32.mxu1 %vm1361_vm3, %v11711_v43  ;;  %2770 = vmatpush1.msra.mxu0 %v7478_v31  ;;  %v1700_v27 = vpop.f32.mrf.mxu1  ;;  %v11723_v31 = vld [vmem:[#allocation5_spill] sm:$0xff] }
 0x2f9   :  { %5315 = vmatpush3.xpose.msk.msra.mxu1 %vm1361_vm3, %v2999_v0  ;;  %2771 = vmatprep.subr.mxu0 %v11712_v47 }
 0x2fa   :  { %2772 = vmatpush1.msra.mxu0 %v7486_v12  ;;  %v5533_v2 = vpop.f32.mrf.mxu1  ;;  %5253 = vmatmul.mubr.msk.f32.gmra.mxu1 %vm1361_vm3, %v11711_v43 }
 0x2fb   :  { %2773 = vmatprep.subr.mxu0 %v11712_v47  ;;  %5254 = vmatprep.mubr.msk.f32.mxu1 %vm1361_vm3, %v11708_v42 }
 0x2fc   :  { %2774 = vmatpush2.msra.mxu0 %v5533_v2  ;;  %v1710_v14 = vpop.f32.mrf.mxu1 }
 0x2fd   :  { %2775 = vmatprep.subr.mxu0 %v11712_v47 }
 0x2fe   :  { %2776 = vmatpush2.msra.mxu0 %v1710_v14  ;;  %5255 = vmatmul.mubr.msk.f32.gmra.mxu1 %vm1361_vm3, %v11708_v42  ;;  %v11721_v42 = vld [vmem:[#allocation25_spill] sm:$0xff] }
 0x2ff   :  { %2777 = vmatprep.subr.mxu0 %v11712_v47  ;;  %5256 = vmatprep.mubr.msk.f32.mxu1 %vm1361_vm3, %v7115_v35 }
 0x300   :  { %2778 = vmatpush2.msra.mxu0 %v5530_v29 }
 0x301   :  { %2779 = vmatprep.subr.mxu0 %v11712_v47 }
 0x302   :  { %2780 = vmatpush2.msra.mxu0 %v1700_v27  ;;  %5257 = vmatmul.mubr.msk.f32.gmra.mxu1 %vm1361_vm3, %v7115_v35  ;;  %v11716_v35 = vld [vmem:[#allocation7_spill] sm:$0xff] }
 0x303   :  { %2781 = vmatprep.subr.mxu0 %v11712_v47  ;;  %5258 = vmatprep.mubr.msk.f32.mxu1 %vm1361_vm3, %v7084_v38 }
 0x304   :  { %2782 = vmatpush2.msra.mxu0 %v5527_v41 }
 0x305   :  { %2783 = vmatprep.subr.mxu0 %v11712_v47 }
 0x306   :  { %2784 = vmatpush2.msra.mxu0 %v1690_v39  ;;  %5259 = vmatmul.mubr.msk.f32.gmra.mxu1 %vm1361_vm3, %v7084_v38  ;;  %v7679_v38 = vpop.f32.mrf.mxu1 }
 0x307   :  { %2785 = vmatprep.subr.mxu0 %v11712_v47  ;;  %5260 = vmatprep.mubr.msk.f32.mxu1 %vm1361_vm3, %v7129_v60  ;;  %11713 = vst [vmem:[#allocation10_spill] sm:$0xff] %v7679_v38 }
 0x308   :  { %2786 = vmatpush2.msra.mxu0 %v5524_v58 }
 0x309   :  { %2787 = vmatprep.subr.mxu0 %v11712_v47 }
 0x30a   :  { %2788 = vmatpush2.msra.mxu0 %v1680_v24  ;;  %5261 = vmatmul.mubr.msk.f32.gmra.mxu1 %vm1361_vm3, %v7129_v60  ;;  %v11718_v60 = vld [vmem:[#allocation6_spill] sm:$0xff] }
 0x30b   :  { %2789 = vmatprep.subr.mxu0 %v11712_v47  ;;  %5262 = vmatprep.mubr.msk.f32.mxu1 %vm1361_vm3, %v7098_v10 }
 0x30c   :  { %2790 = vmatpush2.msra.mxu0 %v7582_v22 }
 0x30d   :  { %2791 = vmatprep.subr.mxu0 %v11712_v47 }
 0x30e   :  { %2792 = vmatpush2.msra.mxu0 %v7591_v20  ;;  %5263 = vmatmul.mubr.msk.f32.gmra.mxu1 %vm1361_vm3, %v7098_v10  ;;  %v11714_v10 = vld [vmem:[#allocation3_spill] sm:$0xff] }
 0x30f   :  { %2793 = vmatprep.subr.mxu0 %v11712_v47  ;;  %5264 = vmatprep.mubr.msk.f32.mxu1 %vm1361_vm3, %v7143_v18 }
 0x310   :  { %2794 = vmatpush2.msra.mxu0 %v7569_v23 }
 0x311   :  { %2795 = vmatprep.subr.mxu0 %v11712_v47 }
 0x312   :  { %2796 = vmatpush2.msra.mxu0 %v7578_v4  ;;  %5265 = vmatmul.mubr.msk.f32.gmra.mxu1 %vm1361_vm3, %v7143_v18 }
 0x313   :  { %2797 = vmatprep.subr.mxu0 %v11712_v47  ;;  %5266 = vmatprep.mubr.msk.f32.mxu1 %vm1361_vm3, %v7112_v53 }
 0x314   :  { %2798 = vmatpush2.msra.mxu0 %v7557_v51 }
 0x315   :  { %2799 = vmatprep.subr.mxu0 %v11712_v47 }
 0x316   :  { %2800 = vmatpush2.msra.mxu0 %v7565_v5  ;;  %5267 = vmatmul.mubr.msk.f32.gmra.mxu1 %vm1361_vm3, %v7112_v53  ;;  %v7689_v53 = vpop.f32.mrf.mxu1 }
 0x317   :  { %2801 = vmatprep.subr.mxu0 %v11712_v47  ;;  %5268 = vmatprep.mubr.msk.f32.mxu1 %vm1361_vm3, %v7157_v6  ;;  %11715 = vst [vmem:[#allocation9_spill] sm:$0xff] %v7689_v53 }
 0x318   :  { %2802 = vmatpush2.msra.mxu0 %v7545_v19  ;;  %v7695_v19 = vpop.f32.mrf.mxu1 }
 0x319   :  { %2803 = vmatprep.subr.mxu0 %v11712_v47  ;;  %11717 = vst [vmem:[#allocation12_spill] sm:$0xff] %v7695_v19 }
 0x31a   :  { %2804 = vmatpush2.msra.mxu0 %v7554_v61  ;;  %5269 = vmatmul.mubr.msk.f32.gmra.mxu1 %vm1361_vm3, %v7157_v6  ;;  %v7701_v18 = vpop.f32.mrf.mxu1 }
 0x31b   :  { %5270 = vmatprep.mubr.msk.f32.mxu1 %vm1361_vm3, %v11714_v10  ;;  %3860 = vmatprep.subr.mxu0 %v11712_v47  ;;  %11719 = vst [vmem:[#allocation11_spill] sm:$0xff] %v7701_v18 }
 0x31c   :  { %v7703_v6 = vpop.f32.mrf.mxu1 }
 0x31d   :  { %11720 = vst [vmem:[#allocation14_spill] sm:$0xff] %v7703_v6 }
 0x31e   :  { %5271 = vmatmul.mubr.msk.f32.gmra.mxu1 %vm1361_vm3, %v11714_v10  ;;  %v7709_v43 = vpop.f32.mrf.mxu1  ;;  %v11758_v10 = vld [vmem:[#allocation28_spill] sm:$0xff] }
 0x31f   :  { %5272 = vmatprep.mubr.msk.f32.mxu1 %vm1361_vm3, %v11716_v35  ;;  %11722 = vst [vmem:[#allocation13_spill] sm:$0xff] %v7709_v43 }
 0x320   :  { %v7715_v12 = vpop.f32.mrf.mxu1 }
 0x321   :  { %11724 = vst [vmem:[#allocation16_spill] sm:$0xff] %v7715_v12 }
 0x322   :  { %5273 = vmatmul.mubr.msk.f32.gmra.mxu1 %vm1361_vm3, %v11716_v35  ;;  %v7721_v8 = vpop.f32.mrf.mxu1 }
 0x323   :  { %5274 = vmatprep.mubr.msk.f32.mxu1 %vm1361_vm3, %v11718_v60  ;;  %11726 = vst [vmem:[#allocation15_spill] sm:$0xff] %v7721_v8 }
 0x324   :  { %v7723_v61 = vpop.f32.mrf.mxu1 }
 0x325   :  { %11727 = vst [vmem:[#allocation18_spill] sm:$0xff] %v7723_v61 }
 0x326   :  { %5275 = vmatmul.mubr.msk.f32.gmra.mxu1 %vm1361_vm3, %v11718_v60  ;;  %v7729_v51 = vpop.f32.mrf.mxu1 }
 0x327   :  { %5276 = vmatprep.mubr.msk.f32.mxu1 %vm1361_vm3, %v11721_v42  ;;  %11729 = vst [vmem:[#allocation17_spill] sm:$0xff] %v7729_v51 }
 0x328   :  { %v7735_v5 = vpop.f32.mrf.mxu1 }
 0x329   :  { %11730 = vst [vmem:[#allocation20_spill] sm:$0xff] %v7735_v5 }
 0x32a   :  { %5277 = vmatmul.mubr.msk.f32.gmra.mxu1 %vm1361_vm3, %v11721_v42  ;;  %v7741_v63 = vpop.f32.mrf.mxu1  ;;  %v11759_v42 = vld [vmem:[#allocation35_spill] sm:$0xff] }
 0x32b   :  { %5278 = vmatprep.mubr.msk.f32.mxu1 %vm1361_vm3, %v11723_v31  ;;  %11731 = vst [vmem:[#allocation19_spill] sm:$0xff] %v7741_v63 }
 0x32c   :  { %v7743_v34 = vpop.f32.mrf.mxu1 }
 0x32d   :  { %11732 = vst [vmem:[#allocation22_spill] sm:$0xff] %v7743_v34 }
 0x32e   :  { %5279 = vmatmul.mubr.msk.f32.gmra.mxu1 %vm1361_vm3, %v11723_v31  ;;  %v7749_v23 = vpop.f32.mrf.mxu1 }
 0x32f   :  { %5280 = vmatprep.mubr.msk.f32.mxu1 %vm1361_vm3, %v11725_v44  ;;  %11733 = vst [vmem:[#allocation21_spill] sm:$0xff] %v7749_v23 }
 0x332   :  { %5281 = vmatmul.mubr.msk.f32.gmra.mxu1 %vm1361_vm3, %v11725_v44 }
 0x333   :  { %5282 = vmatprep.mubr.msk.f32.mxu1 %vm1361_vm3, %v11728_v26 }
 0x336   :  { %5283 = vmatmul.mubr.msk.f32.gmra.mxu1 %vm1361_vm3, %v11728_v26  ;;  %v11762_v26 = vld [vmem:[#allocation29_spill] sm:$0xff] }
 0x337   :  { %5316 = vmatprep.mubr.msk.f32.mxu1 %vm1361_vm3, %v6962_v9 }
 0x33a   :  { %5317 = vmatmul.mubr.msk.f32.vlgmr.msra.gmra.mxu1 %vm1361_vm3, %v6962_v9  ;;  %v7755_v9 = vpop.f32.mrf.mxu1 }
 0x33b   :  { %5318 = vmatprep.mubr.msk.f32.mxu1 %vm1361_vm3, %v6866_v57  ;;  %11734 = vst [vmem:[#allocation23_spill] sm:$0xff] %v7755_v9 }
 0x33e   :  { %5319 = vmatmul.mubr.msk.f32.gmra.mxu1 %vm1361_vm3, %v6866_v57  ;;  %v7761_v57 = vpop.f32.mrf.mxu1 }
 0x33f   :  { %5320 = vmatprep.mubr.msk.f32.mxu1 %vm1361_vm3, %v6969_v36  ;;  %11735 = vst [vmem:[#allocation24_spill] sm:$0xff] %v7761_v57 }
 0x340   :  { %v7763_v4 = vpop.f32.mrf.mxu1 }
 0x341   :  { %11736 = vst [vmem:[#allocation2_spill] sm:$0xff] %v7763_v4 }
 0x342   :  { %5321 = vmatmul.mubr.msk.f32.gmra.mxu1 %vm1361_vm3, %v6969_v36  ;;  %v7769_v36 = vpop.f32.mrf.mxu1 }
 0x343   :  { %5322 = vmatprep.mubr.msk.f32.mxu1 %vm1361_vm3, %v6869_v50  ;;  %11737 = vst [vmem:[#allocation31_spill] sm:$0xff] %v7769_v36 }
 0x346   :  { %5323 = vmatmul.mubr.msk.f32.gmra.mxu1 %vm1361_vm3, %v6869_v50  ;;  %v7775_v50 = vpop.f32.mrf.mxu1 }
 0x347   :  { %5324 = vmatprep.mubr.msk.f32.mxu1 %vm1361_vm3, %v6972_v56  ;;  %11738 = vst [vmem:[#allocation4_spill] sm:$0xff] %v7775_v50 }
 0x34a   :  { %5325 = vmatmul.mubr.msk.f32.gmra.mxu1 %vm1361_vm3, %v6972_v56  ;;  %v7781_v56 = vpop.f32.mrf.mxu1 }
 0x34b   :  { %5326 = vmatprep.mubr.msk.f32.mxu1 %vm1361_vm3, %v6872_v32  ;;  %11739 = vst [vmem:[#allocation3_spill] sm:$0xff] %v7781_v56 }
 0x34c   :  { %v7783_v59 = vpop.f32.mrf.mxu1 }
 0x34d   :  { %11740 = vst [vmem:[#allocation7_spill] sm:$0xff] %v7783_v59 }
 0x34e   :  { %5327 = vmatmul.mubr.msk.f32.gmra.mxu1 %vm1361_vm3, %v6872_v32  ;;  %v7789_v32 = vpop.f32.mrf.mxu1 }
 0x34f   :  { %5328 = vmatprep.mubr.msk.f32.mxu1 %vm1361_vm3, %v6975_v28  ;;  %11741 = vst [vmem:[#allocation6_spill] sm:$0xff] %v7789_v32 }
 0x352   :  { %5329 = vmatmul.mubr.msk.f32.gmra.mxu1 %vm1361_vm3, %v6975_v28 }
 0x353   :  { %5330 = vmatprep.mubr.msk.f32.mxu1 %vm1361_vm3, %v6875_v3  ;;  %v7795_v28 = vpop.f32.mrf.mxu1 }
 0x354   :  { %11742 = vst [vmem:[#allocation25_spill] sm:$0xff] %v7795_v28 }
 0x356   :  { %5331 = vmatmul.mubr.msk.f32.gmra.mxu1 %vm1361_vm3, %v6875_v3  ;;  %v7801_v3 = vpop.f32.mrf.mxu1 }
 0x357   :  { %5332 = vmatprep.mubr.msk.f32.mxu1 %vm1361_vm3, %v6978_v13  ;;  %11743 = vst [vmem:[#allocation5_spill] sm:$0xff] %v7801_v3 }
 0x35a   :  { %5333 = vmatmul.mubr.msk.f32.gmra.mxu1 %vm1361_vm3, %v6978_v13 }
 0x35b   :  { %5334 = vmatprep.mubr.msk.f32.mxu1 %vm1361_vm3, %v6878_v62  ;;  %v7803_v22 = vpop.f32.mrf.mxu1 }
 0x35c   :  { %11744 = vst [vmem:[#allocation32_spill] sm:$0xff] %v7803_v22 }
 0x35d   :  { %v7809_v13 = vpop.f32.mrf.mxu1 }
 0x35e   :  { %5335 = vmatmul.mubr.msk.f32.gmra.mxu1 %vm1361_vm3, %v6878_v62  ;;  %11745 = vst [vmem:[#allocation8_spill] sm:$0xff] %v7809_v13 }
 0x35f   :  { %5336 = vmatprep.mubr.msk.f32.mxu1 %vm1361_vm3, %v6985_v17 }
 0x362   :  { %5337 = vmatmul.mubr.msk.f32.gmra.mxu1 %vm1361_vm3, %v6985_v17 }
 0x363   :  { %5338 = vmatprep.mubr.msk.f32.mxu1 %vm1361_vm3, %v6881_v54  ;;  %v7815_v62 = vpop.f32.mrf.mxu1 }
 0x364   :  { %11746 = vst [vmem:[#allocation37_spill] sm:$0xff] %v7815_v62 }
 0x365   :  { %v7821_v17 = vpop.f32.mrf.mxu1 }
 0x366   :  { %5339 = vmatmul.mubr.msk.f32.gmra.mxu1 %vm1361_vm3, %v6881_v54  ;;  %11747 = vst [vmem:[#allocation38_spill] sm:$0xff] %v7821_v17 }
 0x367   :  { %5340 = vmatprep.mubr.msk.f32.mxu1 %vm1361_vm3, %v6988_v30 }
 0x36a   :  { %5341 = vmatmul.mubr.msk.f32.gmra.mxu1 %vm1361_vm3, %v6988_v30 }
 0x36b   :  { %5342 = vmatprep.mubr.msk.f32.mxu1 %vm1361_vm3, %v6884_v11  ;;  %v7823_v55 = vpop.f32.mrf.mxu1 }
 0x36c   :  { %11748 = vst [vmem:[#allocation39_spill] sm:$0xff] %v7823_v55 }
 0x36d   :  { %v7829_v54 = vpop.f32.mrf.mxu1 }
 0x36e   :  { %5343 = vmatmul.mubr.msk.f32.gmra.mxu1 %vm1361_vm3, %v6884_v11  ;;  %11749 = vst [vmem:[#allocation40_spill] sm:$0xff] %v7829_v54 }
 0x36f   :  { %5344 = vmatprep.mubr.msk.f32.mxu1 %vm1361_vm3, %v6991_v52 }
 0x372   :  { %5345 = vmatmul.mubr.msk.f32.gmra.mxu1 %vm1361_vm3, %v6991_v52 }
 0x373   :  { %5346 = vmatprep.mubr.msk.f32.mxu1 %vm1361_vm3, %v6887_v45  ;;  %v7835_v30 = vpop.f32.mrf.mxu1 }
 0x374   :  { %11750 = vst [vmem:[#allocation41_spill] sm:$0xff] %v7835_v30 }
 0x375   :  { %v7841_v11 = vpop.f32.mrf.mxu1 }
 0x376   :  { %5347 = vmatmul.mubr.msk.f32.gmra.mxu1 %vm1361_vm3, %v6887_v45  ;;  %11751 = vst [vmem:[#allocation42_spill] sm:$0xff] %v7841_v11 }
 0x377   :  { %5348 = vmatprep.mubr.msk.f32.mxu1 %vm1361_vm3, %v6994_v40 }
 0x37a   :  { %v7843_v20 = vpop.f32.mrf.mxu1  ;;  %5349 = vmatmul.mubr.msk.f32.gmra.mxu1 %vm1361_vm3, %v6994_v40 }
 0x37b   :  { %5350 = vmatprep.mubr.msk.f32.mxu1 %vm1361_vm3, %v6890_v48 }
 0x37c   :  { %v7849_v52 = vpop.f32.mrf.mxu1 }
 0x37e   :  { %v7851_v7 = vpop.f32.mrf.mxu1  ;;  %5351 = vmatmul.mubr.msk.f32.gmra.mxu1 %vm1361_vm3, %v6890_v48 }
 0x37f   :  { %5352 = vmatprep.mubr.msk.f32.mxu1 %vm1361_vm3, %v6997_v46 }
 0x380   :  { %v7857_v45 = vpop.f32.mrf.mxu1 }
 0x382   :  { %v7859_v58 = vpop.f32.mrf.mxu1  ;;  %5353 = vmatmul.mubr.msk.f32.gmra.mxu1 %vm1361_vm3, %v6997_v46 }
 0x383   :  { %5354 = vmatprep.mubr.msk.f32.mxu1 %vm1361_vm3, %v6895_v15  ;;  %v2328_v18 = vmax.f32 %v7843_v20, %v7859_v58 }
 0x384   :  { %v7865_v40 = vpop.f32.mrf.mxu1 }
 0x386   :  { %v7867_v24 = vpop.f32.mrf.mxu1  ;;  %5355 = vmatmul.mubr.msk.f32.gmra.mxu1 %vm1361_vm3, %v6895_v15 }
 0x387   :  { %5356 = vmatprep.mubr.msk.f32.mxu1 %vm1361_vm3, %v7000_v33  ;;  %v2329_v19 = vmax.f32 %v7851_v7, %v7867_v24 }
 0x388   :  { %v7873_v48 = vpop.f32.mrf.mxu1 }
 0x389   :  { %11752 = vst [vmem:[#allocation43_spill] sm:$0xff] %v7873_v48 }
 0x38a   :  { %v7875_v16 = vpop.f32.mrf.mxu1  ;;  %5357 = vmatmul.mubr.msk.f32.gmra.mxu1 %vm1361_vm3, %v7000_v33 }
 0x38b   :  { %5358 = vmatprep.mubr.msk.f32.mxu1 %vm1361_vm3, %v6898_v37  ;;  %v2330_v6 = vmax.f32 %v2328_v18, %v7875_v16 }
 0x38c   :  { %v7881_v46 = vpop.f32.mrf.mxu1 }
 0x38e   :  { %v7883_v25 = vpop.f32.mrf.mxu1  ;;  %5359 = vmatmul.mubr.msk.f32.gmra.mxu1 %vm1361_vm3, %v6898_v37  ;;  %v11753_v37 = vld [vmem:[#allocation33_spill] sm:$0xff] }
 0x38f   :  { %5360 = vmatprep.mubr.msk.f32.mxu1 %vm1361_vm3, %v7003_v1  ;;  %v2331_v8 = vmax.f32 %v2329_v19, %v7883_v25 }
 0x390   :  { %v7889_v15 = vpop.f32.mrf.mxu1 }
 0x392   :  { %v7891_v41 = vpop.f32.mrf.mxu1  ;;  %5361 = vmatmul.mubr.msk.f32.gmra.mxu1 %vm1361_vm3, %v7003_v1  ;;  %v11755_v1 = vld [vmem:[#allocation27_spill] sm:$0xff] }
 0x393   :  { %5362 = vmatprep.mubr.msk.f32.mxu1 %vm1361_vm3, %v6901_v21  ;;  %v2332_v51 = vmax.f32 %v2330_v6, %v7891_v41 }
 0x394   :  { %v7897_v33 = vpop.f32.mrf.mxu1 }
 0x396   :  { %v7899_v39 = vpop.f32.mrf.mxu1  ;;  %5363 = vmatmul.mubr.msk.f32.gmra.mxu1 %vm1361_vm3, %v6901_v21  ;;  %v11756_v21 = vld [vmem:[#allocation34_spill] sm:$0xff] }
 0x397   :  { %5364 = vmatprep.mubr.msk.f32.mxu1 %vm1361_vm3, %v11753_v37  ;;  %v2333_v61 = vmax.f32 %v2331_v8, %v7899_v39 }
 0x398   :  { %v7905_v49 = vpop.f32.mrf.mxu1 }
 0x39a   :  { %v7907_v0 = vpop.f32.mrf.mxu1  ;;  %5365 = vmatmul.mubr.msk.f32.gmra.mxu1 %vm1361_vm3, %v11753_v37 }
 0x39b   :  { %11754 = vst [vmem:[#allocation33_spill] sm:$0xff] %v7907_v0  ;;  %5366 = vmatprep.mubr.msk.f32.mxu1 %vm1361_vm3, %v11755_v1  ;;  %v2334_v5 = vmax.f32 %v2332_v51, %v7907_v0 }
 0x39c   :  { %v7913_v29 = vpop.f32.mrf.mxu1 }
 0x39e   :  { %v7915_v27 = vpop.f32.mrf.mxu1  ;;  %5367 = vmatmul.mubr.msk.f32.gmra.mxu1 %vm1361_vm3, %v11755_v1 }
 0x39f   :  { %5368 = vmatprep.mubr.msk.f32.mxu1 %vm1361_vm3, %v11756_v21  ;;  %v2335_v23 = vmax.f32 %v2333_v61, %v7915_v27 }
 0x3a0   :  { %v7921_v2 = vpop.f32.mrf.mxu1 }
 0x3a2   :  { %v7923_v14 = vpop.f32.mrf.mxu1  ;;  %5369 = vmatmul.mubr.msk.f32.gmra.mxu1 %vm1361_vm3, %v11756_v21  ;;  %v11763_v21 = vld [vmem:[#allocation36_spill] sm:$0xff] }
 0x3a3   :  { %11757 = vst [vmem:[#allocation27_spill] sm:$0xff] %v7923_v14  ;;  %5370 = vmatprep.mubr.msk.f32.mxu1 %vm1361_vm3, %v11758_v10  ;;  %v2336_v57 = vmax.f32 %v2334_v5, %v7923_v14 }
 0x3a4   :  { %v7929_v35 = vpop.f32.mrf.mxu1 }
 0x3a6   :  { %v7931_v60 = vpop.f32.mrf.mxu1  ;;  %5371 = vmatmul.mubr.msk.f32.gmra.mxu1 %vm1361_vm3, %v11758_v10 }
 0x3a7   :  { %5372 = vmatprep.mubr.msk.f32.mxu1 %vm1361_vm3, %v11759_v42  ;;  %v2337_v18 = vmax.f32 %v2335_v23, %v7931_v60 }
 0x3a8   :  { %v7937_v31 = vpop.f32.mrf.mxu1 }
 0x3a9   :  { %11760 = vst [vmem:[#allocation34_spill] sm:$0xff] %v7937_v31 }
 0x3aa   :  { %v7939_v44 = vpop.f32.mrf.mxu1  ;;  %5373 = vmatmul.mubr.msk.f32.gmra.mxu1 %vm1361_vm3, %v11759_v42  ;;  %v11764_v42 = vld [vmem:[#allocation30_spill] sm:$0xff] }
 0x3ab   :  { %11761 = vst [vmem:[#allocation28_spill] sm:$0xff] %v7939_v44  ;;  %5374 = vmatprep.mubr.msk.f32.mxu1 %vm1361_vm3, %v11762_v26  ;;  %v2338_v19 = vmax.f32 %v2336_v57, %v7939_v44 }
 0x3ac   :  { %v7945_v37 = vpop.f32.mrf.mxu1 }
 0x3ae   :  { %v7947_v1 = vpop.f32.mrf.mxu1  ;;  %5375 = vmatmul.mubr.msk.f32.gmra.mxu1 %vm1361_vm3, %v11762_v26 }
 0x3af   :  { %5376 = vmatprep.mubr.msk.f32.mxu1 %vm1361_vm3, %v11763_v21  ;;  %v2339_v6 = vmax.f32 %v2337_v18, %v7947_v1  ;;  %v2366_v18 = vmax.f32 %v7857_v45, %v7873_v48 }
 0x3b0   :  { %v7953_v10 = vpop.f32.mrf.mxu1 }
 0x3b2   :  { %v7955_v36 = vpop.f32.mrf.mxu1  ;;  %5377 = vmatmul.mubr.msk.f32.gmra.mxu1 %vm1361_vm3, %v11763_v21 }
 0x3b3   :  { %5378 = vmatprep.mubr.msk.f32.mxu1 %vm1361_vm3, %v11764_v42  ;;  %v2340_v8 = vmax.f32 %v2338_v19, %v7955_v36 }
 0x3b4   :  { %v7961_v4 = vpop.f32.mrf.mxu1 }
 0x3b6   :  { %v7963_v56 = vpop.f32.mrf.mxu1  ;;  %5379 = vmatmul.mubr.msk.f32.gmra.mxu1 %vm1361_vm3, %v11764_v42 }
 0x3b7   :  { %11765 = vst [vmem:[#allocation35_spill] sm:$0xff] %v7963_v56  ;;  %v2341_v51 = vmax.f32 %v2339_v6, %v7963_v56 }
 0x3b8   :  { %v7967_v26 = vpop.f32.mrf.mxu1 }
 0x3ba   :  { %v7969_v50 = vpop.f32.mrf.mxu1 }
 0x3bb   :  { %v2342_v61 = vmax.f32 %v2340_v8, %v7969_v50  ;;  %v2365_v8 = vmax.f32 %v7849_v52, %v7865_v40 }
 0x3bc   :  { %v7971_v32 = vpop.f32.mrf.mxu1 }
 0x3be   :  { %v7973_v59 = vpop.f32.mrf.mxu1 }
 0x3bf   :  { %v2343_v5 = vmax.f32 %v2341_v51, %v7973_v59  ;;  %v2368_v51 = vmax.f32 %v2366_v18, %v7889_v15 }
 0x3c0   :  { %v7975_v3 = vpop.f32.mrf.mxu1 }
 0x3c1   :  { %v2370_v48 = vmax.f32 %v2368_v51, %v7905_v49 }
 0x3c2   :  { %v7977_v21 = vpop.f32.mrf.mxu1 }
 0x3c3   :  { %11766 = vst [vmem:[#allocation29_spill] sm:$0xff] %v7977_v21  ;;  %v2344_v23 = vmax.f32 %v2342_v61, %v7977_v21  ;;  %v2367_v21 = vmax.f32 %v2365_v8, %v7881_v46  ;;  %v2372_v18 = vmax.f32 %v2370_v48, %v7921_v2 }
 0x3c4   :  { %v7979_v28 = vpop.f32.mrf.mxu1 }
 0x3c5   :  { %v2374_v51 = vmax.f32 %v2372_v18, %v7937_v31 }
 0x3c6   :  { %v7981_v13 = vpop.f32.mrf.mxu1 }
 0x3c7   :  { %11767 = vst [vmem:[#allocation36_spill] sm:$0xff] %v7981_v13  ;;  %v2345_v57 = vmax.f32 %v2343_v5, %v7981_v13  ;;  %v2376_v48 = vmax.f32 %v2374_v51, %v7953_v10 }
 0x3c8   :  { %v7983_v22 = vpop.f32.mrf.mxu1 }
 0x3c9   :  { %v2378_v18 = vmax.f32 %v2376_v48, %v7967_v26 }
 0x3ca   :  { %v7985_v17 = vpop.f32.mrf.mxu1 }
 0x3cb   :  { %11768 = vst [vmem:[#allocation30_spill] sm:$0xff] %v7985_v17  ;;  %v2346_v19 = vmax.f32 %v2344_v23, %v7985_v17  ;;  %v2369_v17 = vmax.f32 %v2367_v21, %v7897_v33 }
 0x3cc   :  { %v7987_v42 = vpop.f32.mrf.mxu1 }
 0x3cd   :  { %v2371_v8 = vmax.f32 %v2369_v17, %v7913_v29 }
 0x3ce   :  { %v7989_v62 = vpop.f32.mrf.mxu1 }
 0x3cf   :  { %11769 = vst [vmem:[#allocation44_spill] sm:$0xff] %v7989_v62  ;;  %v2347_v6 = vmax.f32 %v2345_v57, %v7989_v62  ;;  %v2373_v21 = vmax.f32 %v2371_v8, %v7929_v35 }
 0x3d0   :  { %v7991_v54 = vpop.f32.mrf.mxu1 }
 0x3d1   :  { %v2375_v17 = vmax.f32 %v2373_v21, %v7945_v37 }
 0x3d2   :  { %v7993_v55 = vpop.f32.mrf.mxu1 }
 0x3d3   :  { %v2348_v61 = vmax.f32 %v2346_v19, %v7993_v55 }
 0x3d4   :  { %v7995_v11 = vpop.f32.mrf.mxu1 }
 0x3d6   :  { %v7997_v30 = vpop.f32.mrf.mxu1 }
 0x3d7   :  { %11770 = vst [vmem:[#allocation45_spill] sm:$0xff] %v7997_v30  ;;  %v2349_v5 = vmax.f32 %v2347_v6, %v7997_v30 }
 0x3d8   :  { %v7999_v53 = vpop.f32.mrf.mxu1 }
 0x3da   :  { %v8001_v38 = vpop.f32.mrf.mxu1 }
 0x3db   :  { %v2350_v23 = vmax.f32 %v2348_v61, %v8001_v38 }
 0x3dc   :  { %v8007_v43 = vpop.f32.mrf.mxu1 }
 0x3de   :  { %v8011_v12 = vpop.f32.mrf.mxu1 }
 0x3df   :  { %11771 = vst [vmem:[#allocation46_spill] sm:$0xff] %v8011_v12  ;;  %v2351_v57 = vmax.f32 %v2349_v5, %v8011_v12 }
 0x3e0   :  { %v8015_v63 = vpop.f32.mrf.mxu1 }
 0x3e2   :  { %v8019_v34 = vpop.f32.mrf.mxu1 }
 0x3e3   :  { %v2352_v19 = vmax.f32 %v2350_v23, %v8019_v34 }
 0x3e4   :  { %v8023_v47 = vpop.f32.mrf.mxu1 }
 0x3e6   :  { %v8027_v9 = vpop.f32.mrf.mxu1 }
 0x3e7   :  { %11772 = vst [vmem:[#allocation47_spill] sm:$0xff] %v8027_v9  ;;  %v2353_v6 = vmax.f32 %v2351_v57, %v8027_v9 }
 0x3e8   :  { %v8031_v0 = vpop.f32.mrf.mxu1 }
 0x3ea   :  { %v8035_v14 = vpop.f32.mrf.mxu1 }
 0x3eb   :  { %11773 = vst [vmem:[#allocation48_spill] sm:$0xff] %v8035_v14  ;;  %v2354_v61 = vmax.f32 %v2352_v19, %v8035_v14 }
 0x3ec   :  { %v8039_v44 = vpop.f32.mrf.mxu1 }
 0x3ee   :  { %v8045_v56 = vpop.f32.mrf.mxu1 }
 0x3ef   :  { %11774 = vst [vmem:[#allocation49_spill] sm:$0xff] %v8045_v56  ;;  %v2355_v5 = vmax.f32 %v2353_v6, %v8045_v56  ;;  %v2377_v6 = vmax.f32 %v2375_v17, %v7961_v4  ;;  %v2380_v56 = vmax.f32 %v2378_v18, %v7975_v3 }
 0x3f0   :  { %v8052_v13 = vpop.f32.mrf.mxu1 }
 0x3f1   :  { %v2379_v51 = vmax.f32 %v2377_v6, %v7971_v32 }
 0x3f2   :  { %v8058_v62 = vpop.f32.mrf.mxu1 }
 0x3f3   :  { %v2356_v23 = vmax.f32 %v2354_v61, %v8058_v62  ;;  %v2382_v61 = vmax.f32 %v2380_v56, %v7983_v22  ;;  %v2381_v21 = vmax.f32 %v2379_v51, %v7979_v28 }
 0x3f4   :  { %v8064_v30 = vpop.f32.mrf.mxu1 }
 0x3f5   :  { %v2384_v48 = vmax.f32 %v2382_v61, %v7991_v54  ;;  %v2383_v17 = vmax.f32 %v2381_v21, %v7987_v42 }
 0x3f6   :  { %v8070_v12 = vpop.f32.mrf.mxu1 }
 0x3f7   :  { %11775 = vst [vmem:[#allocation50_spill] sm:$0xff] %v8070_v12  ;;  %v2357_v57 = vmax.f32 %v2355_v5, %v8070_v12  ;;  %v2386_v18 = vmax.f32 %v2384_v48, %v7999_v53  ;;  %v2385_v6 = vmax.f32 %v2383_v17, %v7995_v11 }
 0x3f8   :  { %v8076_v9 = vpop.f32.mrf.mxu1 }
 0x3f9   :  { %11776 = vst [vmem:[#allocation51_spill] sm:$0xff] %v8076_v9  ;;  %v2358_v31 = vmax.f32 %v2356_v23, %v2357_v57  ;;  %v2388_v56 = vmax.f32 %v2386_v18, %v8015_v63  ;;  %v2387_v51 = vmax.f32 %v2385_v6, %v8007_v43 }
 0x3fa   :  { %v8080_v19 = vpop.f32.mrf.mxu1 }
 0x3fb   :  { %11777 = vst [vmem:[#allocation52_spill] sm:$0xff] %v8080_v19  ;;  %v2359_v8 = vrot.slane %v2358_v31, 4  ;;  %v2390_v61 = vmax.f32 %v2388_v56, %v8031_v0  ;;  %v2389_v21 = vmax.f32 %v2387_v51, %v8023_v47 }
 0x3fc   :  { %v8084_v14 = vpop.f32.mrf.mxu1 }
 0x3fd   :  { %11778 = vst [vmem:[#allocation53_spill] sm:$0xff] %v8084_v14  ;;  %v2360_v5 = vmax.f32 %v2358_v31, %v2359_v8  ;;  %v2392_v48 = vmax.f32 %v2390_v61, %v8052_v13  ;;  %v2391_v17 = vmax.f32 %v2389_v21, %v8039_v44 }
 0x3fe   :  { %v8088_v12 = vpop.f32.mrf.mxu1 }
 0x3ff   :  { %11779 = vst [vmem:[#allocation54_spill] sm:$0xff] %v8088_v12  ;;  %v2361_v23 = vrot.slane %v2360_v5, 2  ;;  %v2394_v18 = vmax.f32 %v2392_v48, %v8076_v9  ;;  %v2393_v6 = vmax.f32 %v2391_v17, %v8064_v30 }
 0x400   :  { %v8092_v57 = vpop.f32.mrf.mxu1 }
 0x401   :  { %11780 = vst [vmem:[#allocation55_spill] sm:$0xff] %v8092_v57  ;;  %v2362_v19 = vmax.f32 %v2360_v5, %v2361_v23  ;;  %v2395_v61 = vmax.f32 %v2393_v6, %v2394_v18 }
 0x402   :  { %v8096_v14 = vpop.f32.mrf.mxu1 }
 0x403   :  { %11781 = vst [vmem:[#allocation56_spill] sm:$0xff] %v8096_v14  ;;  %v2363_v31 = vrot.slane %v2362_v19, 1 }
 0x404   :  { %v8100_v8 = vpop.f32.mrf.mxu1 }
 0x405   :  { %11782 = vst [vmem:[#allocation57_spill] sm:$0xff] %v8100_v8  ;;  %v8108_v5 = vmax.f32 %v2362_v19, %v2363_v31 }
 0x406   :  { %v8104_v12 = vpop.f32.mrf.mxu1 }
 0x407   :  { %11783 = vst [vmem:[#allocation58_spill] sm:$0xff] %v8104_v12  ;;  %v2402_v56 = vsub.f32 %v7843_v20, %v8108_v5  ;;  %v2404_v51 = vsub.f32 %v7851_v7, %v8108_v5  ;;  %v2406_v19 = vsub.f32 %v7859_v58, %v8108_v5  ;;  %v2408_v21 = vsub.f32 %v7867_v24, %v8108_v5 }
 0x408   :  { %v8110_v23 = vpop.f32.mrf.mxu1  ;;  %v2410_v17 = vsub.f32 %v7875_v16, %v8108_v5  ;;  %v2396_v7 = vrot.slane %v2395_v61, 4  ;;  %v2412_v58 = vsub.f32 %v7883_v25, %v8108_v5  ;;  %v2414_v24 = vsub.f32 %v7891_v41, %v8108_v5  ;;  %v11789_v25 = vld [vmem:[#allocation33_spill] sm:$0xff] }
 0x409   :  { %11784 = vst [vmem:[#allocation59_spill] sm:$0xff] %v8110_v23  ;;  %v2466_v23 = vmul.f32 1.442695, %v2402_v56  ;;  %v2470_v8 = vmul.f32 1.442695, %v2404_v51 }
 0x40a   :  { %v8114_v57 = vpop.f32.mrf.mxu1  ;;  %v2474_v20 = vmul.f32 1.442695, %v2406_v19  ;;  %v2478_v18 = vmul.f32 1.442695, %v2408_v21  ;;  %v2482_v56 = vmul.f32 1.442695, %v2410_v17  ;;  %v2397_v16 = vmax.f32 %v2395_v61, %v2396_v7 }
 0x40b   :  { %5587 = vpow2.f32 %v2466_v23  ;;  %v2416_v19 = vsub.f32 %v7899_v39, %v8108_v5  ;;  %v2486_v23 = vmul.f32 1.442695, %v2412_v58  ;;  %v2490_v21 = vmul.f32 1.442695, %v2414_v24  ;;  %v11792_v39 = vld [vmem:[#allocation27_spill] sm:$0xff] }
 0x40c   :  { %v8123_v31 = vpop.f32.mrf.mxu1  ;;  %5589 = vpow2.f32 %v2470_v8  ;;  %v2418_v8 = vsub.f32 %v11789_v25, %v8108_v5  ;;  %v2398_v41 = vrot.slane %v2397_v16, 2  ;;  %v2420_v17 = vsub.f32 %v7915_v27, %v8108_v5 }
 0x40d   :  { %11785 = vst [vmem:[#allocation60_spill] sm:$0xff] %v8123_v31  ;;  %5591 = vpow2.f32 %v2474_v20  ;;  %v2494_v61 = vmul.f32 1.442695, %v2416_v19  ;;  %v2422_v7 = vsub.f32 %v11792_v39, %v8108_v5  ;;  %v2424_v24 = vsub.f32 %v7931_v60, %v8108_v5 }
 0x40e   :  { %v8127_v48 = vpop.f32.mrf.mxu1  ;;  %5593 = vpow2.f32 %v2478_v18  ;;  %v2498_v58 = vmul.f32 1.442695, %v2418_v8  ;;  %v2399_v25 = vmax.f32 %v2397_v16, %v2398_v41  ;;  %v2428_v60 = vsub.f32 %v7947_v1, %v8108_v5 }
 0x40f   :  { %11786 = vst [vmem:[#allocation61_spill] sm:$0xff] %v8127_v48  ;;  %5595 = vpow2.f32 %v2482_v56 }
 0x410   :  { %v8131_v9 = vpop.f32.mrf.mxu1  ;;  %5597 = vpow2.f32 %v2486_v23  ;;  %v11797_v23 = vld [vmem:[#allocation28_spill] sm:$0xff]  ;;  %v2400_v39 = vrot.slane %v2399_v25, 1 }
 0x411   :  { %11787 = vst [vmem:[#allocation62_spill] sm:$0xff] %v8131_v9  ;;  %5599 = vpow2.f32 %v2490_v21  ;;  %v2506_v21 = vmul.f32 1.442695, %v2422_v7  ;;  %v2430_v7 = vsub.f32 %v7955_v36, %v8108_v5 }
 0x412   :  { %v8135_v6 = vpop.f32.mrf.mxu1  ;;  %5601 = vpow2.f32 %v2494_v61  ;;  %v8187_v1 = vmax.f32 %v2399_v25, %v2400_v39 }
 0x413   :  { %5603 = vpow2.f32 %v2498_v58  ;;  %v2522_v25 = vmul.f32 1.442695, %v2430_v7 }
 0x414   :  { %v8139_v51 = vpop.f32.mrf.mxu1 }
 0x415   :  { %11788 = vst [vmem:[#allocation63_spill] sm:$0xff] %v8139_v51  ;;  %v2426_v51 = vsub.f32 %v11797_v23, %v8108_v5 }
 0x416   :  { %v8143_v9 = vpop.f32.mrf.mxu1 }
 0x417   :  { %v2514_v58 = vmul.f32 1.442695, %v2426_v51  ;;  %v2434_v51 = vsub.f32 %v7969_v50, %v8108_v5  ;;  %v2405_v50 = vsub.f32 %v7857_v45, %v8187_v1  ;;  %v11812_v45 = vld [vmem:[#allocation36_spill] sm:$0xff] }
 0x418   :  { %v8147_v31 = vpop.f32.mrf.mxu1  ;;  %v8157_v56 = vpop.eup %5587 }
 0x419   :  { %11790 = vst [vmem:[#allocation33_spill] sm:$0xff] %v8147_v31  ;;  %11794 = vst [vmem:[#allocation65_spill] sm:$0xff] %v8157_v56  ;;  %v2502_v31 = vmul.f32 1.442695, %v2420_v17  ;;  %v8163_v19 = vpop.eup %5589  ;;  %v2510_v17 = vmul.f32 1.442695, %v2424_v24 }
 0x41a   :  { %v8151_v20 = vpop.f32.mrf.mxu1  ;;  %11796 = vst [vmem:[#allocation67_spill] sm:$0xff] %v8163_v19  ;;  %v2594_v8 = vadd.f32 %v8163_v19, %v8157_v56  ;;  %v8171_v41 = vpop.eup %5591 }
 0x41b   :  { %11791 = vst [vmem:[#allocation64_spill] sm:$0xff] %v8151_v20  ;;  %11799 = vst [vmem:[#allocation68_spill] sm:$0xff] %v8171_v41  ;;  %5605 = vpow2.f32 %v2502_v31  ;;  %v8178_v23 = vpop.eup %5593  ;;  %v11804_v31 = vld [vmem:[#allocation35_spill] sm:$0xff] }
 0x41c   :  { %v8155_v18 = vpop.f32.mrf.mxu1  ;;  %v2595_v61 = vadd.f32 %v8171_v41, %v2594_v8  ;;  %11801 = vst [vmem:[#allocation70_spill] sm:$0xff] %v8178_v23  ;;  %5607 = vpow2.f32 %v2506_v21  ;;  %v2432_v24 = vsub.f32 %v11804_v31, %v8108_v5  ;;  %v2518_v8 = vmul.f32 1.442695, %v2428_v60 }
 0x41d   :  { %11793 = vst [vmem:[#allocation27_spill] sm:$0xff] %v8155_v18  ;;  %5609 = vpow2.f32 %v2510_v17  ;;  %v2436_v21 = vsub.f32 %v7973_v59, %v8108_v5 }
 0x41e   :  { %v8161_v27 = vpop.f32.mrf.mxu1  ;;  %v2596_v19 = vadd.f32 %v8178_v23, %v2595_v61  ;;  %5611 = vpow2.f32 %v2514_v58  ;;  %v2526_v60 = vmul.f32 1.442695, %v2432_v24  ;;  %v2530_v58 = vmul.f32 1.442695, %v2434_v51  ;;  %v11813_v51 = vld [vmem:[#allocation43_spill] sm:$0xff] }
 0x41f   :  { %11795 = vst [vmem:[#allocation66_spill] sm:$0xff] %v8161_v27  ;;  %5613 = vpow2.f32 %v2518_v8 }
 0x420   :  { %v8169_v16 = vpop.f32.mrf.mxu1  ;;  %5615 = vpow2.f32 %v2522_v25  ;;  %v2409_v25 = vsub.f32 %v11813_v51, %v8187_v1 }
 0x421   :  { %11798 = vst [vmem:[#allocation28_spill] sm:$0xff] %v8169_v16  ;;  %v8185_v16 = vpop.eup %5595  ;;  %5617 = vpow2.f32 %v2526_v60 }
 0x422   :  { %v8176_v18 = vpop.f32.mrf.mxu1  ;;  %11803 = vst [vmem:[#allocation72_spill] sm:$0xff] %v8185_v16  ;;  %v2597_v41 = vadd.f32 %v8185_v16, %v2596_v19  ;;  %v8194_v36 = vpop.eup %5597  ;;  %v2403_v19 = vsub.f32 %v7849_v52, %v8187_v1  ;;  %v2407_v52 = vsub.f32 %v7865_v40, %v8187_v1  ;;  %v11815_v40 = vld [vmem:[#allocation30_spill] sm:$0xff]  ;;  %5619 = vpow2.f32 %v2530_v58 }
 0x423   :  { %11800 = vst [vmem:[#allocation69_spill] sm:$0xff] %v8176_v18  ;;  %11805 = vst [vmem:[#allocation35_spill] sm:$0xff] %v8194_v36  ;;  %v8203_v17 = vpop.eup %5599  ;;  %v2446_v58 = vsub.f32 %v7993_v55, %v8108_v5 }
 0x424   :  { %v8183_v56 = vpop.f32.mrf.mxu1  ;;  %v2598_v39 = vadd.f32 %v8194_v36, %v2597_v41  ;;  %11807 = vst [vmem:[#allocation74_spill] sm:$0xff] %v8203_v17  ;;  %v8212_v59 = vpop.eup %5601  ;;  %v11809_v41 = vld [vmem:[#allocation29_spill] sm:$0xff]  ;;  %v2534_v36 = vmul.f32 1.442695, %v2436_v21  ;;  %v2472_v21 = vmul.f32 1.442695, %v2405_v50 }
 0x425   :  { %11802 = vst [vmem:[#allocation71_spill] sm:$0xff] %v8183_v56  ;;  %11808 = vst [vmem:[#allocation75_spill] sm:$0xff] %v8212_v59  ;;  %v2438_v7 = vsub.f32 %v11809_v41, %v8108_v5  ;;  %v8221_v8 = vpop.eup %5603  ;;  %v11818_v50 = vld [vmem:[#allocation44_spill] sm:$0xff] }
 0x426   :  { %v8192_v18 = vpop.f32.mrf.mxu1  ;;  %v2599_v31 = vadd.f32 %v8203_v17, %v2598_v39  ;;  %11811 = vst [vmem:[#allocation76_spill] sm:$0xff] %v8221_v8  ;;  %v2440_v39 = vsub.f32 %v11812_v45, %v8108_v5  ;;  %v2468_v17 = vmul.f32 1.442695, %v2403_v19  ;;  %5621 = vpow2.f32 %v2534_v36 }
 0x427   :  { %v2411_v19 = vsub.f32 %v7881_v46, %v8187_v1  ;;  %v2413_v36 = vsub.f32 %v7889_v15, %v8187_v1 }
 0x428   :  { %v8201_v61 = vpop.f32.mrf.mxu1  ;;  %v2600_v23 = vadd.f32 %v8212_v59, %v2599_v31  ;;  %v8230_v31 = vpop.eup %5605  ;;  %v2442_v59 = vsub.f32 %v11815_v40, %v8108_v5  ;;  %v2542_v56 = vmul.f32 1.442695, %v2440_v39  ;;  %5623 = vpow2.f32 %v2468_v17 }
 0x429   :  { %11806 = vst [vmem:[#allocation73_spill] sm:$0xff] %v8201_v61  ;;  %11814 = vst [vmem:[#allocation36_spill] sm:$0xff] %v8230_v31  ;;  %v8239_v51 = vpop.eup %5607  ;;  %5625 = vpow2.f32 %v2472_v21  ;;  %v2415_v17 = vsub.f32 %v7897_v33, %v8187_v1  ;;  %v2484_v39 = vmul.f32 1.442695, %v2411_v19  ;;  %v2450_v19 = vsub.f32 %v8001_v38, %v8108_v5 }
 0x42a   :  { %v8210_v16 = vpop.f32.mrf.mxu1  ;;  %v2601_v61 = vadd.f32 %v8221_v8, %v2600_v23  ;;  %v2476_v23 = vmul.f32 1.442695, %v2407_v52  ;;  %11817 = vst [vmem:[#allocation30_spill] sm:$0xff] %v8239_v51  ;;  %v2444_v8 = vsub.f32 %v11818_v50, %v8108_v5  ;;  %v8248_v46 = vpop.eup %5609  ;;  %v2546_v52 = vmul.f32 1.442695, %v2442_v59 }
 0x42b   :  { %11819 = vst [vmem:[#allocation44_spill] sm:$0xff] %v8248_v46  ;;  %v8257_v15 = vpop.eup %5611  ;;  %v2417_v59 = vsub.f32 %v7905_v49, %v8187_v1 }
 0x42c   :  { %v8219_v24 = vpop.f32.mrf.mxu1  ;;  %v2602_v45 = vadd.f32 %v8230_v31, %v2601_v61  ;;  %v2480_v61 = vmul.f32 1.442695, %v2409_v25  ;;  %11820 = vst [vmem:[#allocation77_spill] sm:$0xff] %v8257_v15  ;;  %v11821_v25 = vld [vmem:[#allocation45_spill] sm:$0xff]  ;;  %v8266_v33 = vpop.eup %5613 }
 0x42d   :  { %11810 = vst [vmem:[#allocation29_spill] sm:$0xff] %v8219_v24  ;;  %v2538_v24 = vmul.f32 1.442695, %v2438_v7  ;;  %v2448_v21 = vsub.f32 %v11821_v25, %v8108_v5  ;;  %11822 = vst [vmem:[#allocation45_spill] sm:$0xff] %v8266_v33  ;;  %v8275_v49 = vpop.eup %5615 }
 0x42e   :  { %v8228_v41 = vpop.f32.mrf.mxu1  ;;  %v2603_v40 = vadd.f32 %v8239_v51, %v2602_v45  ;;  %v2550_v51 = vmul.f32 1.442695, %v2444_v8  ;;  %v2492_v8 = vmul.f32 1.442695, %v2415_v17  ;;  %11824 = vst [vmem:[#allocation79_spill] sm:$0xff] %v8275_v49  ;;  %v2454_v17 = vsub.f32 %v8019_v34, %v8108_v5 }
 0x42f   :  { %5627 = vpow2.f32 %v2538_v24  ;;  %v2488_v24 = vmul.f32 1.442695, %v2413_v36  ;;  %v11825_v36 = vld [vmem:[#allocation46_spill] sm:$0xff] }
 0x430   :  { %v8237_v60 = vpop.f32.mrf.mxu1  ;;  %v2604_v50 = vadd.f32 %v8248_v46, %v2603_v40  ;;  %5629 = vpow2.f32 %v2476_v23  ;;  %v2554_v23 = vmul.f32 1.442695, %v2446_v58  ;;  %v2421_v58 = vsub.f32 %v7921_v2, %v8187_v1 }
 0x431   :  { %11816 = vst [vmem:[#allocation43_spill] sm:$0xff] %v8237_v60  ;;  %5631 = vpow2.f32 %v2542_v56  ;;  %v2419_v56 = vsub.f32 %v7913_v29, %v8187_v1  ;;  %v8284_v29 = vpop.eup %5617 }
 0x432   :  { %v8246_v7 = vpop.f32.mrf.mxu1  ;;  %v2605_v55 = vadd.f32 %v8257_v15, %v2604_v50  ;;  %5633 = vpow2.f32 %v2480_v61  ;;  %v2452_v61 = vsub.f32 %v11825_v36, %v8108_v5  ;;  %v2558_v15 = vmul.f32 1.442695, %v2448_v21  ;;  %11826 = vst [vmem:[#allocation46_spill] sm:$0xff] %v8284_v29 }
 0x433   :  { %5635 = vpow2.f32 %v2546_v52  ;;  %v2496_v52 = vmul.f32 1.442695, %v2417_v59  ;;  %v2423_v21 = vsub.f32 %v7929_v35, %v8187_v1  ;;  %v2500_v2 = vmul.f32 1.442695, %v2419_v56 }
 0x434   :  { %v8255_v45 = vpop.f32.mrf.mxu1  ;;  %v2606_v25 = vadd.f32 %v8266_v33, %v2605_v55  ;;  %5637 = vpow2.f32 %v2484_v39  ;;  %v2562_v39 = vmul.f32 1.442695, %v2450_v19  ;;  %v8288_v33 = vpop.eup %5619  ;;  %v2566_v34 = vmul.f32 1.442695, %v2452_v61 }
 0x435   :  { %5639 = vpow2.f32 %v2550_v51  ;;  %11827 = vst [vmem:[#allocation80_spill] sm:$0xff] %v8288_v33  ;;  %v8295_v59 = vpop.eup %5621  ;;  %v2504_v35 = vmul.f32 1.442695, %v2421_v58 }
 0x436   :  { %v8264_v40 = vpop.f32.mrf.mxu1  ;;  %v2607_v38 = vadd.f32 %v8275_v49, %v2606_v25  ;;  %5641 = vpow2.f32 %v2488_v24  ;;  %v11828_v25 = vld [vmem:[#allocation47_spill] sm:$0xff]  ;;  %v11833_v49 = vld [vmem:[#allocation48_spill] sm:$0xff] }
 0x437   :  { %5643 = vpow2.f32 %v2554_v23  ;;  %v2456_v36 = vsub.f32 %v11828_v25, %v8108_v5  ;;  %v8299_v23 = vpop.eup %5623  ;;  %v2458_v46 = vsub.f32 %v11833_v49, %v8108_v5  ;;  %v2570_v25 = vmul.f32 1.442695, %v2454_v17  ;;  %v11836_v49 = vld [vmem:[#allocation49_spill] sm:$0xff] }
 0x438   :  { %v8273_v50 = vpop.f32.mrf.mxu1  ;;  %v2608_v51 = vadd.f32 %v8284_v29, %v2607_v38  ;;  %5645 = vpow2.f32 %v2492_v8  ;;  %11829 = vst [vmem:[#allocation47_spill] sm:$0xff] %v8299_v23  ;;  %v11830_v38 = vld [vmem:[#allocation34_spill] sm:$0xff]  ;;  %v8306_v56 = vpop.eup %5625 }
 0x439   :  { %11823 = vst [vmem:[#allocation78_spill] sm:$0xff] %v8273_v50  ;;  %5647 = vpow2.f32 %v2558_v15  ;;  %v2425_v29 = vsub.f32 %v11830_v38, %v8187_v1  ;;  %11832 = vst [vmem:[#allocation81_spill] sm:$0xff] %v8306_v56  ;;  %v2427_v15 = vsub.f32 %v7945_v37, %v8187_v1  ;;  %v2508_v38 = vmul.f32 1.442695, %v2423_v21 }
 0x43a   :  { %v8282_v55 = vpop.f32.mrf.mxu1  ;;  %v2609_v19 = vadd.f32 %v8288_v33, %v2608_v51  ;;  %5649 = vpow2.f32 %v2496_v52  ;;  %v2631_v58 = vadd.f32 %v8306_v56, %v8299_v23  ;;  %v2574_v17 = vmul.f32 1.442695, %v2456_v36 }
 0x43b   :  { %5651 = vpow2.f32 %v2562_v39  ;;  %v2460_v39 = vsub.f32 %v11836_v49, %v8108_v5  ;;  %v2429_v37 = vsub.f32 %v7953_v10, %v8187_v1  ;;  %v2512_v21 = vmul.f32 1.442695, %v2425_v29 }
 0x43c   :  { %v8293_v24 = vpop.f32.mrf.mxu1  ;;  %v8312_v61 = vpop.eup %5627  ;;  %v2610_v51 = vadd.f32 %v8295_v59, %v2609_v19  ;;  %5653 = vpow2.f32 %v2500_v2  ;;  %v2462_v49 = vsub.f32 %v8058_v62, %v8108_v5  ;;  %v2578_v36 = vmul.f32 1.442695, %v2458_v46 }
 0x43d   :  { %11834 = vst [vmem:[#allocation48_spill] sm:$0xff] %v8312_v61  ;;  %v8319_v31 = vpop.eup %5629  ;;  %5655 = vpow2.f32 %v2566_v34  ;;  %v2431_v10 = vsub.f32 %v7961_v4, %v8187_v1  ;;  %v2516_v29 = vmul.f32 1.442695, %v2427_v15  ;;  %v2582_v46 = vmul.f32 1.442695, %v2460_v39 }
 0x43e   :  { %v8304_v8 = vpop.f32.mrf.mxu1  ;;  %11835 = vst [vmem:[#allocation82_spill] sm:$0xff] %v8319_v31  ;;  %v8325_v33 = vpop.eup %5631  ;;  %v2611_v2 = vadd.f32 %v8312_v61, %v2610_v51  ;;  %5657 = vpow2.f32 %v2504_v35  ;;  %v2632_v19 = vadd.f32 %v8319_v31, %v2631_v58  ;;  %v11841_v61 = vld [vmem:[#allocation50_spill] sm:$0xff]  ;;  %v2433_v4 = vsub.f32 %v7967_v26, %v8187_v1 }
 0x43f   :  { %11831 = vst [vmem:[#allocation34_spill] sm:$0xff] %v8304_v8  ;;  %11837 = vst [vmem:[#allocation49_spill] sm:$0xff] %v8325_v33  ;;  %v8331_v23 = vpop.eup %5633  ;;  %5659 = vpow2.f32 %v2570_v25  ;;  %v2464_v62 = vsub.f32 %v11841_v61, %v8108_v5  ;;  %v2520_v15 = vmul.f32 1.442695, %v2429_v37  ;;  %v2435_v5 = vsub.f32 %v7971_v32, %v8187_v1 }
 0x440   :  { %v8317_v52 = vpop.f32.mrf.mxu1  ;;  %11839 = vst [vmem:[#allocation84_spill] sm:$0xff] %v8331_v23  ;;  %v8337_v34 = vpop.eup %5635  ;;  %v2612_v51 = vadd.f32 %v8325_v33, %v2611_v2  ;;  %5661 = vpow2.f32 %v2508_v38  ;;  %v2633_v35 = vadd.f32 %v8331_v23, %v2632_v19  ;;  %v2586_v33 = vmul.f32 1.442695, %v2462_v49 }
 0x441   :  { %v8343_v31 = vpop.eup %5637  ;;  %5663 = vpow2.f32 %v2574_v17  ;;  %v2524_v39 = vmul.f32 1.442695, %v2431_v10  ;;  %v2437_v49 = vsub.f32 %v7975_v3, %v8187_v1 }
 0x442   :  { %v8329_v56 = vpop.f32.mrf.mxu1  ;;  %11840 = vst [vmem:[#allocation85_spill] sm:$0xff] %v8343_v31  ;;  %v8349_v25 = vpop.eup %5639  ;;  %v2613_v2 = vadd.f32 %v8337_v34, %v2612_v51  ;;  %5665 = vpow2.f32 %v2512_v21  ;;  %v2634_v38 = vadd.f32 %v8343_v31, %v2633_v35  ;;  %v2590_v51 = vmul.f32 1.442695, %v2464_v62 }
 0x443   :  { %11838 = vst [vmem:[#allocation83_spill] sm:$0xff] %v8329_v56  ;;  %v8355_v23 = vpop.eup %5641  ;;  %5667 = vpow2.f32 %v2578_v36  ;;  %v2528_v35 = vmul.f32 1.442695, %v2433_v4 }
 0x444   :  { %v8341_v58 = vpop.f32.mrf.mxu1  ;;  %11843 = vst [vmem:[#allocation86_spill] sm:$0xff] %v8355_v23  ;;  %v8359_v61 = vpop.eup %5643  ;;  %v2614_v26 = vadd.f32 %v8349_v25, %v2613_v2  ;;  %5669 = vpow2.f32 %v2516_v29  ;;  %v2635_v17 = vadd.f32 %v8355_v23, %v2634_v38  ;;  %v2532_v38 = vmul.f32 1.442695, %v2435_v5 }
 0x445   :  { %v8365_v21 = vpop.eup %5645  ;;  %5671 = vpow2.f32 %v2582_v46  ;;  %v2439_v46 = vsub.f32 %v7979_v28, %v8187_v1 }
 0x446   :  { %v8353_v19 = vpop.f32.mrf.mxu1  ;;  %11844 = vst [vmem:[#allocation87_spill] sm:$0xff] %v8365_v21  ;;  %v8369_v36 = vpop.eup %5647  ;;  %v2615_v32 = vadd.f32 %v8359_v61, %v2614_v26  ;;  %5673 = vpow2.f32 %v2520_v15  ;;  %v2636_v29 = vadd.f32 %v8365_v21, %v2635_v17  ;;  %v2441_v17 = vsub.f32 %v7983_v22, %v8187_v1 }
 0x447   :  { %11842 = vst [vmem:[#allocation50_spill] sm:$0xff] %v8353_v19  ;;  %v8375_v2 = vpop.eup %5649  ;;  %5675 = vpow2.f32 %v2586_v33  ;;  %v2536_v21 = vmul.f32 1.442695, %v2437_v49  ;;  %v2540_v22 = vmul.f32 1.442695, %v2439_v46 }
 0x448   :  { %v8363_v37 = vpop.f32.mrf.mxu1  ;;  %11845 = vst [vmem:[#allocation88_spill] sm:$0xff] %v8375_v2  ;;  %v8379_v62 = vpop.eup %5651  ;;  %v2616_v3 = vadd.f32 %v8369_v36, %v2615_v32  ;;  %5677 = vpow2.f32 %v2524_v39  ;;  %v2637_v26 = vadd.f32 %v8375_v2, %v2636_v29  ;;  %v2443_v29 = vsub.f32 %v7987_v42, %v8187_v1 }
 0x449   :  { %11846 = vst [vmem:[#allocation89_spill] sm:$0xff] %v8379_v62  ;;  %v8385_v4 = vpop.eup %5653  ;;  %5679 = vpow2.f32 %v2590_v51  ;;  %v2544_v42 = vmul.f32 1.442695, %v2441_v17 }
 0x44a   :  { %v8373_v10 = vpop.f32.mrf.mxu1  ;;  %11847 = vst [vmem:[#allocation90_spill] sm:$0xff] %v8385_v4  ;;  %v8389_v33 = vpop.eup %5655  ;;  %v2617_v28 = vadd.f32 %v8379_v62, %v2616_v3  ;;  %5681 = vpow2.f32 %v2528_v35  ;;  %v2638_v32 = vadd.f32 %v8385_v4, %v2637_v26  ;;  %v2445_v35 = vsub.f32 %v7991_v54, %v8187_v1 }
 0x44b   :  { %11848 = vst [vmem:[#allocation91_spill] sm:$0xff] %v8389_v33  ;;  %v8395_v5 = vpop.eup %5657  ;;  %5683 = vpow2.f32 %v2532_v38  ;;  %v2447_v38 = vsub.f32 %v7995_v11, %v8187_v1  ;;  %v2548_v54 = vmul.f32 1.442695, %v2443_v29 }
 0x44c   :  { %v8383_v15 = vpop.f32.mrf.mxu1  ;;  %11849 = vst [vmem:[#allocation92_spill] sm:$0xff] %v8395_v5  ;;  %v8399_v2 = vpop.eup %5659  ;;  %v2618_v51 = vadd.f32 %v8389_v33, %v2617_v28  ;;  %v2639_v23 = vadd.f32 %v8395_v5, %v2638_v32  ;;  %5685 = vpow2.f32 %v2536_v21  ;;  %v2552_v11 = vmul.f32 1.442695, %v2445_v35 }
 0x44d   :  { %11850 = vst [vmem:[#allocation93_spill] sm:$0xff] %v8399_v2  ;;  %v8405_v49 = vpop.eup %5661  ;;  %5687 = vpow2.f32 %v2540_v22 }
 0x44e   :  { %v8393_v39 = vpop.f32.mrf.mxu1  ;;  %11851 = vst [vmem:[#allocation94_spill] sm:$0xff] %v8405_v49  ;;  %v8409_v26 = vpop.eup %5663  ;;  %v2619_v4 = vadd.f32 %v8399_v2, %v2618_v51  ;;  %v2640_v31 = vadd.f32 %v8405_v49, %v2639_v23  ;;  %v2449_v23 = vsub.f32 %v7999_v53, %v8187_v1  ;;  %5689 = vpow2.f32 %v2544_v42 }
 0x44f   :  { %11852 = vst [vmem:[#allocation95_spill] sm:$0xff] %v8409_v26  ;;  %v8415_v46 = vpop.eup %5665  ;;  %5691 = vpow2.f32 %v2548_v54  ;;  %v2556_v53 = vmul.f32 1.442695, %v2447_v38  ;;  %v11862_v54 = vld [vmem:[#allocation52_spill] sm:$0xff] }
 0x450   :  { %v8403_v3 = vpop.f32.mrf.mxu1  ;;  %11854 = vst [vmem:[#allocation97_spill] sm:$0xff] %v8415_v46  ;;  %v8419_v32 = vpop.eup %5667  ;;  %v2620_v5 = vadd.f32 %v8409_v26, %v2619_v4  ;;  %v2641_v33 = vadd.f32 %v8415_v46, %v2640_v31  ;;  %v2451_v31 = vsub.f32 %v8007_v43, %v8187_v1  ;;  %5693 = vpow2.f32 %v2552_v11 }
 0x451   :  { %11855 = vst [vmem:[#allocation98_spill] sm:$0xff] %v8419_v32  ;;  %v8425_v21 = vpop.eup %5669  ;;  %v2560_v43 = vmul.f32 1.442695, %v2449_v23  ;;  %5695 = vpow2.f32 %v2556_v53 }
 0x452   :  { %v8413_v28 = vpop.f32.mrf.mxu1  ;;  %11856 = vst [vmem:[#allocation99_spill] sm:$0xff] %v8425_v21  ;;  %v8429_v17 = vpop.eup %5671  ;;  %v2621_v49 = vadd.f32 %v8419_v32, %v2620_v5  ;;  %v2642_v2 = vadd.f32 %v8425_v21, %v2641_v33  ;;  %v2453_v33 = vsub.f32 %v8015_v63, %v8187_v1  ;;  %v11863_v63 = vld [vmem:[#allocation54_spill] sm:$0xff] }
 0x453   :  { %11853 = vst [vmem:[#allocation96_spill] sm:$0xff] %v8413_v28  ;;  %11857 = vst [vmem:[#allocation100_spill] sm:$0xff] %v8429_v17  ;;  %v8435_v29 = vpop.eup %5673  ;;  %5697 = vpow2.f32 %v2560_v43 }
 0x454   :  { %v8423_v51 = vpop.f32.mrf.mxu1  ;;  %11858 = vst [vmem:[#allocation101_spill] sm:$0xff] %v8435_v29  ;;  %v8439_v22 = vpop.eup %5675  ;;  %v2622_v46 = vadd.f32 %v8429_v17, %v2621_v49  ;;  %v2643_v26 = vadd.f32 %v8435_v29, %v2642_v2  ;;  %v2455_v2 = vsub.f32 %v8023_v47, %v8187_v1  ;;  %v3447_v29 = vmax.f32 %v11862_v54, %v8096_v14 }
 0x455   :  { %v8445_v35 = vpop.eup %5677  ;;  %v3448_v17 = vmax.f32 %v11863_v63, %v8104_v12  ;;  %v2568_v12 = vmul.f32 1.442695, %v2453_v33 }
 0x456   :  { %v8433_v4 = vpop.f32.mrf.mxu1  ;;  %11859 = vst [vmem:[#allocation102_spill] sm:$0xff] %v8445_v35  ;;  %v8449_v42 = vpop.eup %5679  ;;  %v2623_v21 = vadd.f32 %v8439_v22, %v2622_v46  ;;  %v2644_v32 = vadd.f32 %v8445_v35, %v2643_v26  ;;  %v2564_v46 = vmul.f32 1.442695, %v2451_v31  ;;  %v2457_v35 = vsub.f32 %v8031_v0, %v8187_v1 }
 0x457   :  { %v8455_v38 = vpop.eup %5681  ;;  %v3449_v47 = vmax.f32 %v3447_v29, %v8114_v57  ;;  %v3450_v14 = vmax.f32 %v3448_v17, %v8127_v48  ;;  %v2572_v29 = vmul.f32 1.442695, %v2455_v2 }
 0x458   :  { %v8443_v5 = vpop.f32.mrf.mxu1  ;;  %11861 = vst [vmem:[#allocation104_spill] sm:$0xff] %v8455_v38  ;;  %v2624_v62 = vadd.f32 %v8449_v42, %v2623_v21  ;;  %v2645_v23 = vadd.f32 %v8455_v38, %v2644_v32  ;;  %v8467_v11 = vpop.eup %5683  ;;  %v2459_v32 = vsub.f32 %v8039_v44, %v8187_v1  ;;  %5699 = vpow2.f32 %v2564_v46  ;;  %v11868_v46 = vld [vmem:[#allocation69_spill] sm:$0xff] }
 0x459   :  { %11864 = vst [vmem:[#allocation105_spill] sm:$0xff] %v8467_v11  ;;  %v8476_v31 = vpop.eup %5685  ;;  %v3451_v38 = vmax.f32 %v3449_v47, %v8135_v6  ;;  %v3452_v0 = vmax.f32 %v3450_v14, %v8143_v9  ;;  %5701 = vpow2.f32 %v2568_v12  ;;  %v2576_v47 = vmul.f32 1.442695, %v2457_v35 }
 0x45a   :  { %v8453_v49 = vpop.f32.mrf.mxu1  ;;  %v2625_v54 = vrot.slane %v2624_v62, 4  ;;  %v2646_v21 = vadd.f32 %v8467_v11, %v2645_v23  ;;  %11865 = vst [vmem:[#allocation106_spill] sm:$0xff] %v8476_v31  ;;  %v8485_v33 = vpop.eup %5687  ;;  %v2461_v23 = vsub.f32 %v8052_v13, %v8187_v1  ;;  %5703 = vpow2.f32 %v2572_v29 }
 0x45b   :  { %11860 = vst [vmem:[#allocation103_spill] sm:$0xff] %v8453_v49  ;;  %11866 = vst [vmem:[#allocation107_spill] sm:$0xff] %v8485_v33  ;;  %v3453_v11 = vmax.f32 %v3451_v38, %v8151_v20  ;;  %v3454_v44 = vmax.f32 %v3452_v0, %v8161_v27  ;;  %v8494_v2 = vpop.eup %5689  ;;  %v2580_v38 = vmul.f32 1.442695, %v2459_v32  ;;  %5705 = vpow2.f32 %v2576_v47 }
 0x45c   :  { %v8465_v26 = vpop.f32.mrf.mxu1  ;;  %v2626_v63 = vadd.f32 %v2625_v54, %v2624_v62  ;;  %v2647_v17 = vadd.f32 %v8476_v31, %v2646_v21  ;;  %11867 = vst [vmem:[#allocation108_spill] sm:$0xff] %v8494_v2  ;;  %v2463_v54 = vsub.f32 %v8064_v30, %v8187_v1  ;;  %v8503_v35 = vpop.eup %5691 }
 0x45d   :  { %v3455_v21 = vmax.f32 %v3453_v11, %v11868_v46  ;;  %v3456_v13 = vmax.f32 %v3454_v44, %v8192_v18  ;;  %11869 = vst [vmem:[#allocation69_spill] sm:$0xff] %v8503_v35  ;;  %v2584_v11 = vmul.f32 1.442695, %v2461_v23  ;;  %v8512_v32 = vpop.eup %5693  ;;  %5707 = vpow2.f32 %v2580_v38  ;;  %v11875_v38 = vld [vmem:[#allocation53_spill] sm:$0xff] }
 0x45e   :  { %v8474_v53 = vpop.f32.mrf.mxu1  ;;  %v2627_v48 = vrot.slane %v2626_v63, 2  ;;  %v2648_v14 = vadd.f32 %v8485_v33, %v2647_v17  ;;  %v11870_v17 = vld [vmem:[#allocation51_spill] sm:$0xff] }
 0x45f   :  { %v2465_v33 = vsub.f32 %v11870_v17, %v8187_v1  ;;  %v3457_v27 = vmax.f32 %v3455_v21, %v8210_v16  ;;  %v3458_v30 = vmax.f32 %v3456_v13, %v8228_v41  ;;  %11871 = vst [vmem:[#allocation51_spill] sm:$0xff] %v8512_v32  ;;  %v8519_v13 = vpop.eup %5695  ;;  %5709 = vpow2.f32 %v2584_v11 }
 0x460   :  { %v8483_v43 = vpop.f32.mrf.mxu1  ;;  %v2628_v31 = vadd.f32 %v2627_v48, %v2626_v63  ;;  %v2649_v0 = vadd.f32 %v8494_v2, %v2648_v14  ;;  %v2588_v14 = vmul.f32 1.442695, %v2463_v54  ;;  %11872 = vst [vmem:[#allocation109_spill] sm:$0xff] %v8519_v13  ;;  %v11874_v54 = vld [vmem:[#allocation57_spill] sm:$0xff] }
 0x461   :  { %v3459_v29 = vmax.f32 %v3457_v27, %v8246_v7  ;;  %v3460_v44 = vmax.f32 %v3458_v30, %v8264_v40  ;;  %v2592_v47 = vmul.f32 1.442695, %v2465_v33  ;;  %v8526_v30 = vpop.eup %5697 }
 0x462   :  { %v8492_v62 = vpop.f32.mrf.mxu1  ;;  %v2629_v20 = vrot.slane %v2628_v31, 1  ;;  %v2650_v48 = vadd.f32 %v8503_v35, %v2649_v0  ;;  %11873 = vst [vmem:[#allocation110_spill] sm:$0xff] %v8526_v30  ;;  %5711 = vpow2.f32 %v2588_v14  ;;  %v11880_v14 = vld [vmem:[#allocation62_spill] sm:$0xff] }
 0x463   :  { %v3461_v23 = vmax.f32 %v3459_v29, %v8282_v55  ;;  %v3462_v0 = vmax.f32 %v3460_v44, %v8304_v8  ;;  %v11876_v29 = vld [vmem:[#allocation59_spill] sm:$0xff]  ;;  %5713 = vpow2.f32 %v2592_v47 }
 0x464   :  { %v8501_v12 = vpop.f32.mrf.mxu1  ;;  %v2651_v1 = vadd.f32 %v8512_v32, %v2650_v48  ;;  %v2630_v17 = vadd.f32 %v2629_v20, %v2628_v31  ;;  %v3484_v48 = vmax.f32 %v11875_v38, %v11874_v54  ;;  %v11877_v44 = vld [vmem:[#allocation55_spill] sm:$0xff] }
 0x465   :  { %v3463_v32 = vmax.f32 %v3461_v23, %v8329_v56  ;;  %v3464_v2 = vmax.f32 %v3462_v0, %v8353_v19  ;;  %v3485_v20 = vmax.f32 %v11877_v44, %v11876_v29  ;;  %v8537_v11 = vpop.eup %5699  ;;  %v11882_v29 = vld [vmem:[#allocation63_spill] sm:$0xff] }
 0x466   :  { %v8510_v63 = vpop.f32.mrf.mxu1  ;;  %v2652_v35 = vadd.f32 %v8519_v13, %v2651_v1  ;;  %11878 = vst [vmem:[#allocation53_spill] sm:$0xff] %v8537_v11  ;;  %v11879_v1 = vld [vmem:[#allocation60_spill] sm:$0xff]  ;;  %5715 = vrcp.f32 %v2630_v17 }
 0x467   :  { %v3486_v13 = vmax.f32 %v3484_v48, %v11879_v1  ;;  %v3465_v8 = vmax.f32 %v3463_v32, %v8373_v10  ;;  %v3466_v54 = vmax.f32 %v3464_v2, %v8393_v39  ;;  %v3487_v0 = vmax.f32 %v3485_v20, %v11880_v14  ;;  %v11883_v32 = vld [vmem:[#allocation33_spill] sm:$0xff] }
 0x468   :  { %v8517_v21 = vpop.f32.mrf.mxu1  ;;  %v2653_v33 = vadd.f32 %v8526_v30, %v2652_v35  ;;  %v8546_v30 = vpop.eup %5701 }
 0x469   :  { %11881 = vst [vmem:[#allocation55_spill] sm:$0xff] %v8546_v30  ;;  %v3488_v19 = vmax.f32 %v3486_v13, %v11882_v29  ;;  %v3467_v56 = vmax.f32 %v3465_v8, %v8413_v28  ;;  %v3468_v47 = vmax.f32 %v3466_v54, %v8433_v4  ;;  %v3489_v1 = vmax.f32 %v3487_v0, %v11883_v32  ;;  %v8555_v17 = vpop.eup %5703  ;;  %v11886_v29 = vld [vmem:[#allocation28_spill] sm:$0xff] }
 0x46a   :  { %v8524_v27 = vpop.f32.mrf.mxu1  ;;  %v2654_v23 = vadd.f32 %v8537_v11, %v2653_v33  ;;  %11884 = vst [vmem:[#allocation111_spill] sm:$0xff] %v8555_v17  ;;  %v11885_v33 = vld [vmem:[#allocation27_spill] sm:$0xff]  ;;  %v8564_v54 = vpop.eup %5705 }
 0x46b   :  { %v3490_v20 = vmax.f32 %v3488_v19, %v11885_v33  ;;  %v3469_v11 = vmax.f32 %v3467_v56, %v8453_v49  ;;  %v3470_v14 = vmax.f32 %v3468_v47, %v8474_v53  ;;  %v3491_v8 = vmax.f32 %v3489_v1, %v11886_v29  ;;  %11887 = vst [vmem:[#allocation112_spill] sm:$0xff] %v8564_v54  ;;  %v11889_v33 = vld [vmem:[#allocation73_spill] sm:$0xff]  ;;  %v8573_v47 = vpop.eup %5707 }
 0x46c   :  { %v8535_v31 = vpop.f32.mrf.mxu1  ;;  %v2655_v48 = vadd.f32 %v8546_v30, %v2654_v23  ;;  %v11888_v23 = vld [vmem:[#allocation71_spill] sm:$0xff]  ;;  %11890 = vst [vmem:[#allocation73_spill] sm:$0xff] %v8573_v47 }
 0x46d   :  { %v3492_v0 = vmax.f32 %v3490_v20, %v11888_v23  ;;  %v3471_v30 = vmax.f32 %v3469_v11, %v8492_v62  ;;  %v3472_v32 = vmax.f32 %v3470_v14, %v8510_v63  ;;  %v3493_v56 = vmax.f32 %v3491_v8, %v11889_v33  ;;  %v8582_v14 = vpop.eup %5709 }
 0x46e   :  { %v8544_v35 = vpop.f32.mrf.mxu1  ;;  %v2656_v13 = vadd.f32 %v8555_v17, %v2655_v48  ;;  %v11891_v48 = vld [vmem:[#allocation29_spill] sm:$0xff]  ;;  %11892 = vst [vmem:[#allocation113_spill] sm:$0xff] %v8582_v14 }
 0x46f   :  { %v3494_v1 = vmax.f32 %v3492_v0, %v11891_v48  ;;  %v3473_v17 = vmax.f32 %v3471_v30, %v8524_v27  ;;  %v3474_v29 = vmax.f32 %v3472_v32, %v8544_v35  ;;  %v3495_v11 = vmax.f32 %v3493_v56, %v8237_v60  ;;  %v8589_v48 = vpop.eup %5711 }
 0x470   :  { %v8553_v2 = vpop.f32.mrf.mxu1  ;;  %v2657_v19 = vadd.f32 %v8564_v54, %v2656_v13  ;;  %11893 = vst [vmem:[#allocation114_spill] sm:$0xff] %v8589_v48  ;;  %v8592_v56 = vpop.eup %5713 }
 0x471   :  { %v3496_v13 = vmax.f32 %v3494_v1, %v8255_v45  ;;  %v3497_v30 = vmax.f32 %v3495_v11, %v8273_v50  ;;  %11894 = vst [vmem:[#allocation115_spill] sm:$0xff] %v8592_v56 }
 0x472   :  { %v8562_v28 = vpop.f32.mrf.mxu1  ;;  %v2658_v20 = vadd.f32 %v8573_v47, %v2657_v19 }
 0x473   :  { %v3475_v8 = vmax.f32 %v3473_v17, %v8562_v28  ;;  %v3498_v32 = vmax.f32 %v3496_v13, %v8293_v24  ;;  %v3499_v60 = vmax.f32 %v3497_v30, %v8317_v52  ;;  %v8596_v1 = vpop.eup %5715 }
 0x474   :  { %v8571_v49 = vpop.f32.mrf.mxu1  ;;  %v2659_v0 = vadd.f32 %v8582_v14, %v2658_v20  ;;  %v8609_v30 = vmul.f32 %v8596_v1, %v8295_v59  ;;  %v8626_v59 = vmul.f32 %v8596_v1, %v8349_v25 }
 0x475   :  { %v3500_v17 = vmax.f32 %v3498_v32, %v8341_v58  ;;  %v3501_v11 = vmax.f32 %v3499_v60, %v8363_v37 }
 0x476   :  { %v8580_v23 = vpop.f32.mrf.mxu1  ;;  %v2660_v47 = vadd.f32 %v8589_v48, %v2659_v0 }
 0x477   :  { %v3476_v54 = vmax.f32 %v3474_v29, %v8580_v23  ;;  %v3502_v14 = vmax.f32 %v3500_v17, %v8383_v15  ;;  %v11897_v17 = vld [vmem:[#allocation49_spill] sm:$0xff] }
 0x478   :  { %v2661_v20 = vadd.f32 %v8592_v56, %v2660_v47  ;;  %v11896_v47 = vld [vmem:[#allocation48_spill] sm:$0xff]  ;;  %v11903_v56 = vld [vmem:[#allocation91_spill] sm:$0xff] }
 0x479   :  { %v3477_v19 = vmax.f32 %v3475_v8, %v3476_v54  ;;  %v3503_v54 = vmax.f32 %v3501_v11, %v8403_v3  ;;  %v11895_v8 = vld [vmem:[#allocation80_spill] sm:$0xff]  ;;  %v3504_v32 = vmax.f32 %v3502_v14, %v8423_v51  ;;  %v8614_v60 = vmul.f32 %v8596_v1, %v11896_v47 }
 0x47a   :  { %v2662_v13 = vrot.slane %v2661_v20, 4  ;;  %v8605_v0 = vmul.f32 %v8596_v1, %v11895_v8  ;;  %v8622_v11 = vmul.f32 %v8596_v1, %v8337_v34  ;;  %11898 = vst [vmem:[#allocation80_spill] sm:$0xff] %v8626_v59  ;;  %v8630_v14 = vmul.f32 %v8596_v1, %v8359_v61  ;;  %v11905_v59 = vld [vmem:[#allocation93_spill] sm:$0xff] }
 0x47b   :  { %v3478_v29 = vrot.slane %v3477_v19, 4  ;;  %v3505_v8 = vmax.f32 %v3503_v54, %v8443_v5  ;;  %v8643_v25 = vmul.f32 %v8596_v1, %v11903_v56  ;;  %v8647_v61 = vmul.f32 %v8596_v1, %v11905_v59  ;;  %v11909_v54 = vld [vmem:[#allocation98_spill] sm:$0xff] }
 0x47c   :  { %11899 = vst [vmem:[#allocation48_spill] sm:$0xff] %v8630_v14  ;;  %v11907_v14 = vld [vmem:[#allocation95_spill] sm:$0xff]  ;;  %v8664_v59 = vmul.f32 %v8596_v1, %v8439_v22 }
 0x47d   :  { %v3479_v50 = vmax.f32 %v3477_v19, %v3478_v29  ;;  %v8618_v19 = vmul.f32 %v8596_v1, %v11897_v17  ;;  %v2663_v29 = vadd.f32 %v2662_v13, %v2661_v20  ;;  %v8635_v17 = vmul.f32 %v8596_v1, %v8369_v36  ;;  %v11901_v20 = vld [vmem:[#allocation89_spill] sm:$0xff]  ;;  %11904 = vst [vmem:[#allocation91_spill] sm:$0xff] %v8643_v25 }
 0x47e   :  { %v8639_v13 = vmul.f32 %v8596_v1, %v11901_v20  ;;  %11906 = vst [vmem:[#allocation93_spill] sm:$0xff] %v8647_v61  ;;  %v3507_v36 = vmax.f32 %v3505_v8, %v8483_v43  ;;  %v8656_v20 = vmul.f32 %v8596_v1, %v11909_v54  ;;  %11913 = vst [vmem:[#allocation116_spill] sm:$0xff] %v8664_v59  ;;  %v8672_v54 = vpop.f32.mrf.mxu1 }
 0x47f   :  { %v3480_v48 = vrot.slane %v3479_v50, 2  ;;  %11900 = vst [vmem:[#allocation49_spill] sm:$0xff] %v8635_v17  ;;  %v2664_v34 = vrot.slane %v2663_v29, 2  ;;  %v3506_v8 = vmax.f32 %v3504_v32, %v8465_v26  ;;  %v11915_v32 = vld [vmem:[#allocation52_spill] sm:$0xff] }
 0x480   :  { %11902 = vst [vmem:[#allocation89_spill] sm:$0xff] %v8639_v13  ;;  %11910 = vst [vmem:[#allocation98_spill] sm:$0xff] %v8656_v20  ;;  %v11911_v13 = vld [vmem:[#allocation100_spill] sm:$0xff] }
 0x481   :  { %v3481_v47 = vmax.f32 %v3479_v50, %v3480_v48  ;;  %v8651_v50 = vmul.f32 %v8596_v1, %v11907_v14  ;;  %v8660_v17 = vmul.f32 %v8596_v1, %v11911_v13  ;;  %v2665_v56 = vadd.f32 %v2664_v34, %v2663_v29 }
 0x482   :  { %v8668_v14 = vmul.f32 %v8596_v1, %v8449_v42  ;;  %v3508_v20 = vmax.f32 %v3506_v8, %v8501_v12  ;;  %v11917_v8 = vld [vmem:[#allocation56_spill] sm:$0xff] }
 0x483   :  { %11908 = vst [vmem:[#allocation95_spill] sm:$0xff] %v8651_v50  ;;  %v3482_v48 = vrot.slane %v3481_v47, 1  ;;  %11912 = vst [vmem:[#allocation100_spill] sm:$0xff] %v8660_v17  ;;  %v3509_v50 = vmax.f32 %v3507_v36, %v8517_v21  ;;  %v2666_v61 = vrot.slane %v2665_v56, 1 }
 0x484   :  { %11914 = vst [vmem:[#allocation117_spill] sm:$0xff] %v8668_v14  ;;  %v3510_v22 = vmax.f32 %v3508_v20, %v8535_v31  ;;  %v11916_v14 = vld [vmem:[#allocation54_spill] sm:$0xff] }
 0x485   :  { %v3511_v13 = vmax.f32 %v3509_v50, %v8553_v2  ;;  %v8676_v29 = vmax.f32 %v3481_v47, %v3482_v48  ;;  %v2667_v34 = vadd.f32 %v2666_v61, %v2665_v56  ;;  %v11918_v47 = vld [vmem:[#allocation58_spill] sm:$0xff] }
 0x486   :  { %v3512_v42 = vmax.f32 %v3510_v22, %v8571_v49  ;;  %v11919_v22 = vld [vmem:[#allocation61_spill] sm:$0xff] }
 0x487   :  { %v3513_v59 = vmax.f32 %v3511_v13, %v8672_v54  ;;  %5717 = vrcp.f32 %v2667_v34  ;;  %v3521_v36 = vsub.f32 %v11915_v32, %v8676_v29  ;;  %v3523_v17 = vsub.f32 %v11916_v14, %v8676_v29 }
 0x488   :  { %v3525_v25 = vsub.f32 %v11917_v8, %v8676_v29  ;;  %v3527_v61 = vsub.f32 %v11918_v47, %v8676_v29  ;;  %v3529_v56 = vsub.f32 %v8114_v57, %v8676_v29  ;;  %v3531_v32 = vsub.f32 %v11919_v22, %v8676_v29  ;;  %v11922_v22 = vld [vmem:[#allocation65_spill] sm:$0xff] }
 0x489   :  { %v3514_v50 = vmax.f32 %v3512_v42, %v3513_v59  ;;  %v3585_v48 = vmul.f32 1.442695, %v3521_v36  ;;  %v3589_v20 = vmul.f32 1.442695, %v3523_v17  ;;  %v3533_v8 = vsub.f32 %v8135_v6, %v8676_v29 }
 0x48a   :  { %v3593_v13 = vmul.f32 1.442695, %v3525_v25  ;;  %v3597_v14 = vmul.f32 1.442695, %v3527_v61  ;;  %v3601_v59 = vmul.f32 1.442695, %v3529_v56  ;;  %v3535_v17 = vsub.f32 %v8143_v9, %v8676_v29 }
 0x48b   :  { %5719 = vpow2.f32 %v3585_v48  ;;  %v3515_v34 = vrot.slane %v3514_v50, 4  ;;  %v3605_v36 = vmul.f32 1.442695, %v3531_v32  ;;  %v11920_v25 = vld [vmem:[#allocation47_spill] sm:$0xff]  ;;  %v11921_v48 = vld [vmem:[#allocation64_spill] sm:$0xff]  ;;  %v2670_v6 = vmul.f32 %v8596_v1, %v11922_v22 }
 0x48c   :  { %5721 = vpow2.f32 %v3589_v20  ;;  %v3537_v20 = vsub.f32 %v11921_v48, %v8676_v29  ;;  %v3609_v61 = vmul.f32 1.442695, %v3533_v8  ;;  %v11925_v8 = vld [vmem:[#allocation23_spill] sm:$0xff] }
 0x48d   :  { %5723 = vpow2.f32 %v3593_v13  ;;  %v3516_v42 = vmax.f32 %v3514_v50, %v3515_v34  ;;  %v11923_v50 = vld [vmem:[#allocation66_spill] sm:$0xff]  ;;  %v3613_v13 = vmul.f32 1.442695, %v3535_v17  ;;  %v11924_v34 = vld [vmem:[#allocation81_spill] sm:$0xff]  ;;  %v11927_v48 = vld [vmem:[#allocation67_spill] sm:$0xff]  ;;  %v3543_v17 = vsub.f32 %v8192_v18, %v8676_v29 }
 0x48e   :  { %5725 = vpow2.f32 %v3597_v14  ;;  %v3539_v9 = vsub.f32 %v11923_v50, %v8676_v29  ;;  %v3541_v14 = vsub.f32 %v11868_v46, %v8676_v29  ;;  %v2672_v22 = vmul.f32 %v8596_v1, %v11927_v48  ;;  %v11928_v50 = vld [vmem:[#allocation24_spill] sm:$0xff] }
 0x48f   :  { %5727 = vpow2.f32 %v3601_v59  ;;  %v3517_v56 = vrot.slane %v3516_v42, 2  ;;  %v3617_v59 = vmul.f32 1.442695, %v3537_v20 }
 0x490   :  { %5729 = vpow2.f32 %v3605_v36  ;;  %v3625_v20 = vmul.f32 1.442695, %v3541_v14 }
 0x491   :  { %5731 = vpow2.f32 %v3609_v61 }
 0x492   :  { %5733 = vpow2.f32 %v3613_v13  ;;  %v3547_v13 = vsub.f32 %v8228_v41, %v8676_v29 }
 0x493   :  { %5735 = vpow2.f32 %v3617_v59  ;;  %v3549_v59 = vsub.f32 %v8246_v7, %v8676_v29  ;;  %v11935_v7 = vld [vmem:[#allocation19_spill] sm:$0xff] }
 0x494   :  { %v8697_v57 = vpop.eup %5717 }
 0x495   :  { %v2671_v47 = vmul.f32 %v8697_v57, %v11920_v25  ;;  %v2673_v32 = vmul.f32 %v8697_v57, %v11924_v34  ;;  %v11926_v25 = vmov 0.0   ;;  %v3629_v34 = vmul.f32 1.442695, %v3543_v17 }
 0x497   :  { %2805 = vmatprep.mubr.f32.mxu0 %v2671_v47  ;;  %v3518_v47 = vmax.f32 %v3516_v42, %v3517_v56  ;;  %v3545_v42 = vsub.f32 %v8210_v16, %v8676_v29  ;;  %v11929_v56 = vld [vmem:[#allocation22_spill] sm:$0xff]  ;;  %v11931_v16 = vld [vmem:[#allocation21_spill] sm:$0xff] }
 0x498   :  { %2806 = vmatmul.mubr.f32.vlgmr.msra.gmra.mxu0 %v2670_v6  ;;  %v8715_v36 = vpop.eup %5719  ;;  %v3621_v6 = vmul.f32 1.442695, %v3539_v9 }
 0x499   :  { %3861 = vmatpush1.msra.mxu0 %v11925_v8  ;;  %2810 = vmatprep.mubr.f32.mxu0 %v2673_v32  ;;  %v8720_v46 = vpop.eup %5721  ;;  %v3519_v9 = vrot.slane %v3518_v47, 1  ;;  %v3633_v8 = vmul.f32 1.442695, %v3545_v42 }
 0x49a   :  { %3862 = vmatprep.subr.mxu0 %v11926_v25  ;;  %v3713_v61 = vadd.f32 %v8720_v46, %v8715_v36  ;;  %v8728_v18 = vpop.eup %5723  ;;  %5737 = vpow2.f32 %v3621_v6  ;;  %v3551_v6 = vsub.f32 %v8264_v40, %v8676_v29 }
 0x49b   :  { %3863 = vmatpush1.msra.mxu0 %v11928_v50  ;;  %11930 = vst [vmem:[#allocation52_spill] sm:$0xff] %v8728_v18  ;;  %v8735_v14 = vpop.eup %5725  ;;  %5739 = vpow2.f32 %v3625_v20  ;;  %v8744_v17 = vmax.f32 %v3518_v47, %v3519_v9  ;;  %v3637_v50 = vmul.f32 1.442695, %v3547_v13  ;;  %v3553_v20 = vsub.f32 %v8282_v55, %v8676_v29  ;;  %v11937_v47 = vld [vmem:[#allocation34_spill] sm:$0xff] }
 0x49c   :  { %3864 = vmatprep.subr.mxu0 %v11926_v25  ;;  %2811 = vmatmul.mubr.f32.gmra.mxu0 %v2672_v22  ;;  %v3714_v32 = vadd.f32 %v8728_v18, %v3713_v61  ;;  %11932 = vst [vmem:[#allocation54_spill] sm:$0xff] %v8735_v14  ;;  %v11933_v22 = vld [vmem:[#allocation20_spill] sm:$0xff]  ;;  %v8742_v41 = vpop.eup %5727  ;;  %5741 = vpow2.f32 %v3629_v34  ;;  %v3641_v9 = vmul.f32 1.442695, %v3549_v59  ;;  %v11938_v34 = vld [vmem:[#allocation18_spill] sm:$0xff] }
 0x49d   :  { %3865 = vmatpush1.msra.mxu0 %v11929_v56  ;;  %11934 = vst [vmem:[#allocation56_spill] sm:$0xff] %v8742_v41  ;;  %v8751_v42 = vpop.eup %5729  ;;  %v3555_v56 = vsub.f32 %v11937_v47, %v8676_v29  ;;  %5743 = vpow2.f32 %v3633_v8  ;;  %v3645_v55 = vmul.f32 1.442695, %v3551_v6  ;;  %v11940_v8 = vld [vmem:[#allocation17_spill] sm:$0xff]  ;;  %v11943_v47 = vld [vmem:[#allocation68_spill] sm:$0xff]  ;;  %v11962_v18 = vld [vmem:[#allocation82_spill] sm:$0xff] }
 0x49e   :  { %3866 = vmatprep.subr.mxu0 %v11926_v25  ;;  %v3715_v48 = vadd.f32 %v8735_v14, %v3714_v32  ;;  %11936 = vst [vmem:[#allocation58_spill] sm:$0xff] %v8751_v42  ;;  %v8760_v13 = vpop.eup %5731  ;;  %v3522_v32 = vsub.f32 %v11875_v38, %v8744_v17  ;;  %5745 = vpow2.f32 %v3637_v50  ;;  %v2674_v38 = vmul.f32 %v8596_v1, %v11943_v47 }
 0x49f   :  { %3867 = vmatpush1.msra.mxu0 %v11931_v16  ;;  %11939 = vst [vmem:[#allocation61_spill] sm:$0xff] %v8760_v13  ;;  %v8769_v59 = vpop.eup %5733  ;;  %5747 = vpow2.f32 %v3641_v9  ;;  %v3653_v6 = vmul.f32 1.442695, %v3555_v56 }
 0x4a0   :  { %3868 = vmatprep.subr.mxu0 %v11926_v25  ;;  %v3716_v61 = vadd.f32 %v8742_v41, %v3715_v48  ;;  %v3524_v48 = vsub.f32 %v11877_v44, %v8744_v17  ;;  %11941 = vst [vmem:[#allocation47_spill] sm:$0xff] %v8769_v59  ;;  %v11949_v41 = vld [vmem:[#allocation72_spill] sm:$0xff]  ;;  %5749 = vpow2.f32 %v3645_v55 }
 0x4a1   :  { %3869 = vmatpush1.msra.mxu0 %v11933_v22  ;;  %v11942_v22 = vld [vmem:[#allocation83_spill] sm:$0xff]  ;;  %v8790_v56 = vmul.f32 %v8596_v1, %v11949_v41 }
 0x4a2   :  { %3870 = vmatprep.subr.mxu0 %v11926_v25  ;;  %v3717_v40 = vadd.f32 %v8751_v42, %v3716_v61  ;;  %v3557_v61 = vsub.f32 %v11942_v22, %v8676_v29  ;;  %v11948_v42 = vld [vmem:[#allocation70_spill] sm:$0xff]  ;;  %v11953_v41 = vld [vmem:[#allocation35_spill] sm:$0xff] }
 0x4a3   :  { %3871 = vmatpush1.msra.mxu0 %v11935_v7  ;;  %v3649_v7 = vmul.f32 1.442695, %v3553_v20  ;;  %v3587_v20 = vmul.f32 1.442695, %v3522_v32  ;;  %v8786_v47 = vmul.f32 %v8596_v1, %v11948_v42  ;;  %v3561_v42 = vsub.f32 %v8373_v10, %v8676_v29 }
 0x4a4   :  { %3872 = vmatprep.subr.mxu0 %v11926_v25  ;;  %v3718_v16 = vadd.f32 %v8760_v13, %v3717_v40  ;;  %v11944_v40 = vld [vmem:[#allocation57_spill] sm:$0xff]  ;;  %v11947_v13 = vld [vmem:[#allocation50_spill] sm:$0xff]  ;;  %v3657_v32 = vmul.f32 1.442695, %v3557_v61  ;;  %v8804_v55 = vmul.f32 %v8596_v1, %v11953_v41  ;;  %v3563_v10 = vsub.f32 %v8393_v39, %v8676_v29  ;;  %v11961_v39 = vld [vmem:[#allocation96_spill] sm:$0xff] }
 0x4a5   :  { %3873 = vmatpush1.msra.mxu0 %v11938_v34  ;;  %v3526_v44 = vsub.f32 %v11944_v40, %v8744_v17  ;;  %v11945_v34 = vld [vmem:[#allocation16_spill] sm:$0xff]  ;;  %v3559_v22 = vsub.f32 %v11947_v13, %v8676_v29  ;;  %5751 = vpow2.f32 %v3649_v7  ;;  %v11957_v7 = vld [vmem:[#allocation74_spill] sm:$0xff] }
 0x4a6   :  { %3874 = vmatprep.subr.mxu0 %v11926_v25  ;;  %v3719_v50 = vadd.f32 %v8769_v59, %v3718_v16  ;;  %v11950_v16 = vld [vmem:[#allocation59_spill] sm:$0xff]  ;;  %5753 = vpow2.f32 %v3653_v6  ;;  %v8817_v6 = vmul.f32 %v8596_v1, %v11957_v7  ;;  %v11958_v41 = vld [vmem:[#allocation62_spill] sm:$0xff]  ;;  %v2675_v7 = vmul.f32 %v8697_v57, %v11962_v18  ;;  %v11966_v18 = vld [vmem:[#allocation84_spill] sm:$0xff] }
 0x4a7   :  { %3875 = vmatpush1.msra.mxu0 %v11940_v8  ;;  %v8780_v8 = vpop.eup %5735  ;;  %v3528_v40 = vsub.f32 %v11950_v16, %v8744_v17  ;;  %v11951_v59 = vld [vmem:[#allocation15_spill] sm:$0xff]  ;;  %v3661_v61 = vmul.f32 1.442695, %v3559_v22  ;;  %5755 = vpow2.f32 %v3587_v20  ;;  %v3565_v22 = vsub.f32 %v11961_v39, %v8676_v29 }
 0x4a8   :  { %3876 = vmatprep.subr.mxu0 %v11926_v25  ;;  %11946 = vst [vmem:[#allocation64_spill] sm:$0xff] %v8780_v8  ;;  %v3720_v9 = vadd.f32 %v8780_v8, %v3719_v50  ;;  %v8797_v13 = vpop.eup %5737  ;;  %v11955_v8 = vld [vmem:[#allocation14_spill] sm:$0xff]  ;;  %v3665_v20 = vmul.f32 1.442695, %v3561_v42  ;;  %v3669_v42 = vmul.f32 1.442695, %v3563_v10  ;;  %2815 = vmatprep.mubr.f32.mxu0 %v2675_v7  ;;  %v2677_v39 = vmul.f32 %v8697_v57, %v11966_v18 }
 0x4a9   :  { %3877 = vmatpush1.msra.mxu0 %v11945_v34  ;;  %v3591_v34 = vmul.f32 1.442695, %v3524_v48  ;;  %11952 = vst [vmem:[#allocation65_spill] sm:$0xff] %v8797_v13  ;;  %v11954_v48 = vld [vmem:[#allocation60_spill] sm:$0xff]  ;;  %v8810_v14 = vpop.eup %5739  ;;  %v3571_v10 = vsub.f32 %v8474_v53, %v8676_v29  ;;  %v3673_v7 = vmul.f32 1.442695, %v3565_v22 }
 0x4aa   :  { %3878 = vmatprep.subr.mxu0 %v11926_v25  ;;  %v3721_v50 = vadd.f32 %v8797_v13, %v3720_v9  ;;  %v3530_v16 = vsub.f32 %v11954_v48, %v8744_v17  ;;  %11956 = vst [vmem:[#allocation66_spill] sm:$0xff] %v8810_v14  ;;  %v11959_v48 = vld [vmem:[#allocation13_spill] sm:$0xff]  ;;  %v8823_v13 = vpop.eup %5741  ;;  %2816 = vmatmul.mubr.f32.gmra.mxu0 %v2674_v38  ;;  %v11970_v18 = vld [vmem:[#allocation11_spill] sm:$0xff] }
 0x4ab   :  { %3879 = vmatpush1.msra.mxu0 %v11951_v59  ;;  %v3595_v59 = vmul.f32 1.442695, %v3526_v44  ;;  %v3532_v44 = vsub.f32 %v11958_v41, %v8744_v17  ;;  %5757 = vpow2.f32 %v3591_v34  ;;  %11960 = vst [vmem:[#allocation81_spill] sm:$0xff] %v8823_v13  ;;  %v11963_v41 = vld [vmem:[#allocation63_spill] sm:$0xff]  ;;  %2820 = vmatprep.mubr.f32.mxu0 %v2677_v39  ;;  %v11973_v22 = vld [vmem:[#allocation85_spill] sm:$0xff]  ;;  %v11974_v39 = vld [vmem:[#allocation10_spill] sm:$0xff] }
 0x4ac   :  { %3880 = vmatprep.subr.mxu0 %v11926_v25  ;;  %v3722_v9 = vadd.f32 %v8810_v14, %v3721_v50  ;;  %5759 = vpow2.f32 %v3657_v32  ;;  %v3534_v34 = vsub.f32 %v11963_v41, %v8744_v17  ;;  %v8834_v14 = vpop.eup %5743  ;;  %v3567_v32 = vsub.f32 %v8433_v4, %v8676_v29  ;;  %v11969_v4 = vld [vmem:[#allocation103_spill] sm:$0xff] }
 0x4ad   :  { %3881 = vmatpush1.msra.mxu0 %v11955_v8  ;;  %v3599_v8 = vmul.f32 1.442695, %v3528_v40  ;;  %5761 = vpow2.f32 %v3595_v59  ;;  %v3603_v40 = vmul.f32 1.442695, %v3530_v16  ;;  %11965 = vst [vmem:[#allocation23_spill] sm:$0xff] %v8834_v14  ;;  %v11967_v59 = vld [vmem:[#allocation33_spill] sm:$0xff] }
 0x4ae   :  { %3882 = vmatprep.subr.mxu0 %v11926_v25  ;;  %v3723_v50 = vadd.f32 %v8823_v13, %v3722_v9  ;;  %5763 = vpow2.f32 %v3661_v61  ;;  %v3536_v16 = vsub.f32 %v11967_v59, %v8744_v17  ;;  %v3607_v41 = vmul.f32 1.442695, %v3532_v44  ;;  %v11971_v59 = vld [vmem:[#allocation27_spill] sm:$0xff]  ;;  %2821 = vmatmul.mubr.f32.gmra.mxu0 %v8786_v47 }
 0x4af   :  { %3883 = vmatpush1.msra.mxu0 %v11959_v48  ;;  %v11964_v48 = vld [vmem:[#allocation12_spill] sm:$0xff]  ;;  %5765 = vpow2.f32 %v3599_v8  ;;  %v3569_v61 = vsub.f32 %v11969_v4, %v8676_v29  ;;  %v3538_v8 = vsub.f32 %v11971_v59, %v8744_v17  ;;  %v3611_v38 = vmul.f32 1.442695, %v3534_v34  ;;  %v11977_v47 = vld [vmem:[#allocation71_spill] sm:$0xff] }
 0x4b0   :  { %3884 = vmatprep.subr.mxu0 %v11926_v25  ;;  %v3724_v9 = vadd.f32 %v8834_v14, %v3723_v50  ;;  %5767 = vpow2.f32 %v3665_v20  ;;  %v3573_v4 = vsub.f32 %v8492_v62, %v8676_v29  ;;  %v3677_v53 = vmul.f32 1.442695, %v3567_v32  ;;  %v12009_v13 = vld [vmem:[#allocation3_spill] sm:$0xff] }
 0x4b1   :  { %3885 = vmatpush1.msra.mxu0 %v11964_v48  ;;  %v8844_v48 = vpop.eup %5745  ;;  %5769 = vpow2.f32 %v3603_v40  ;;  %v2679_v20 = vmul.f32 %v8697_v57, %v11973_v22  ;;  %v3615_v34 = vmul.f32 1.442695, %v3536_v16  ;;  %v3575_v62 = vsub.f32 %v8510_v63, %v8676_v29 }
 0x4b2   :  { %3886 = vmatprep.subr.mxu0 %v11926_v25  ;;  %11968 = vst [vmem:[#allocation67_spill] sm:$0xff] %v8844_v48  ;;  %v3725_v50 = vadd.f32 %v8844_v48, %v3724_v9  ;;  %v8855_v44 = vpop.eup %5747  ;;  %5771 = vpow2.f32 %v3669_v42  ;;  %v3577_v32 = vsub.f32 %v8524_v27, %v8676_v29  ;;  %v3681_v42 = vmul.f32 1.442695, %v3569_v61  ;;  %v12003_v48 = vld [vmem:[#allocation6_spill] sm:$0xff] }
 0x4b3   :  { %3887 = vmatpush1.msra.mxu0 %v11970_v18  ;;  %11972 = vst [vmem:[#allocation24_spill] sm:$0xff] %v8855_v44  ;;  %v11975_v18 = vld [vmem:[#allocation28_spill] sm:$0xff]  ;;  %5773 = vpow2.f32 %v3607_v41  ;;  %v8867_v59 = vpop.eup %5749  ;;  %2825 = vmatprep.mubr.f32.mxu0 %v2679_v20  ;;  %v3542_v41 = vsub.f32 %v11977_v47, %v8744_v17  ;;  %v3579_v27 = vsub.f32 %v8544_v35, %v8676_v29  ;;  %v3685_v61 = vmul.f32 1.442695, %v3571_v10  ;;  %v11980_v47 = vld [vmem:[#allocation29_spill] sm:$0xff] }
 0x4b4   :  { %3888 = vmatprep.subr.mxu0 %v11926_v25  ;;  %v3726_v9 = vadd.f32 %v8855_v44, %v3725_v50  ;;  %v3540_v40 = vsub.f32 %v11975_v18, %v8744_v17  ;;  %5775 = vpow2.f32 %v3673_v7  ;;  %v11976_v50 = vld [vmem:[#allocation9_spill] sm:$0xff]  ;;  %v8874_v22 = vpop.eup %5751  ;;  %v11978_v7 = vld [vmem:[#allocation86_spill] sm:$0xff]  ;;  %2826 = vmatmul.mubr.f32.gmra.mxu0 %v8790_v56  ;;  %v3581_v10 = vsub.f32 %v8562_v28, %v8676_v29 }
 0x4b5   :  { %3889 = vmatpush1.msra.mxu0 %v11974_v39  ;;  %5777 = vpow2.f32 %v3611_v38  ;;  %v3619_v39 = vmul.f32 1.442695, %v3538_v8  ;;  %v8880_v63 = vpop.eup %5753  ;;  %v2681_v20 = vmul.f32 %v8697_v57, %v11978_v7  ;;  %v11979_v18 = vld [vmem:[#allocation41_spill] sm:$0xff]  ;;  %v3544_v8 = vsub.f32 %v11889_v33, %v8744_v17 }
 0x4b6   :  { %3890 = vmatprep.subr.mxu0 %v11926_v25  ;;  %v3727_v16 = vadd.f32 %v8867_v59, %v3726_v9  ;;  %5779 = vpow2.f32 %v3677_v53  ;;  %v8887_v9 = vpop.eup %5755  ;;  %v3623_v38 = vmul.f32 1.442695, %v3540_v40  ;;  %v3689_v53 = vmul.f32 1.442695, %v3573_v4 }
 0x4b7   :  { %3891 = vmatpush1.msra.mxu0 %v11976_v50  ;;  %5781 = vpow2.f32 %v3615_v34  ;;  %v3546_v7 = vsub.f32 %v11980_v47, %v8744_v17  ;;  %2830 = vmatprep.mubr.f32.mxu0 %v2681_v20  ;;  %v3627_v56 = vmul.f32 1.442695, %v3542_v41  ;;  %v3693_v4 = vmul.f32 1.442695, %v3575_v62 }
 0x4b8   :  { %3892 = vmatprep.subr.mxu0 %v11926_v25  ;;  %v3728_v50 = vadd.f32 %v8874_v22, %v3727_v16  ;;  %v8894_v35 = vpop.eup %5757  ;;  %5783 = vpow2.f32 %v3681_v42  ;;  %v11981_v16 = vld [vmem:[#allocation42_spill] sm:$0xff]  ;;  %v11982_v42 = vld [vmem:[#allocation43_spill] sm:$0xff]  ;;  %2831 = vmatmul.mubr.f32.gmra.mxu0 %v8804_v55 }
 0x4b9   :  { %3893 = vmatpush2.msra.mxu0 %v11979_v18  ;;  %v8901_v33 = vpop.eup %5759  ;;  %5785 = vpow2.f32 %v3619_v39  ;;  %v3750_v34 = vadd.f32 %v8894_v35, %v8887_v9  ;;  %v3548_v20 = vsub.f32 %v11982_v42, %v8744_v17  ;;  %v11983_v18 = vld [vmem:[#allocation87_spill] sm:$0xff]  ;;  %v3631_v39 = vmul.f32 1.442695, %v3544_v8 }
 0x4ba   :  { %3894 = vmatprep.subr.mxu0 %v11926_v25  ;;  %v3729_v40 = vadd.f32 %v8880_v63, %v3728_v50  ;;  %v8907_v28 = vpop.eup %5761  ;;  %5787 = vpow2.f32 %v3685_v61  ;;  %v2683_v47 = vmul.f32 %v8697_v57, %v11983_v18  ;;  %v3583_v61 = vsub.f32 %v8580_v23, %v8676_v29  ;;  %v11986_v29 = vld [vmem:[#allocation78_spill] sm:$0xff] }
 0x4bb   :  { %3895 = vmatpush2.msra.mxu0 %v11981_v16  ;;  %v11984_v16 = vld [vmem:[#allocation39_spill] sm:$0xff]  ;;  %v8914_v50 = vpop.eup %5763  ;;  %5789 = vpow2.f32 %v3623_v38  ;;  %v3751_v44 = vadd.f32 %v8907_v28, %v3750_v34  ;;  %v3697_v42 = vmul.f32 1.442695, %v3577_v32  ;;  %v3550_v18 = vsub.f32 %v8255_v45, %v8744_v17  ;;  %v11987_v32 = vld [vmem:[#allocation88_spill] sm:$0xff] }
 0x4bc   :  { %3896 = vmatprep.subr.mxu0 %v11926_v25  ;;  %v3730_v41 = vadd.f32 %v8901_v33, %v3729_v40  ;;  %v8920_v62 = vpop.eup %5765  ;;  %5791 = vpow2.f32 %v3689_v53  ;;  %2835 = vmatprep.mubr.f32.mxu0 %v2683_v47  ;;  %v11985_v40 = vld [vmem:[#allocation40_spill] sm:$0xff]  ;;  %v3635_v55 = vmul.f32 1.442695, %v3546_v7  ;;  %v3701_v23 = vmul.f32 1.442695, %v3579_v27  ;;  %v11988_v47 = vld [vmem:[#allocation37_spill] sm:$0xff] }
 0x4bd   :  { %3897 = vmatpush2.msra.mxu0 %v11984_v16  ;;  %v8927_v8 = vpop.eup %5767  ;;  %5793 = vpow2.f32 %v3627_v56  ;;  %v3752_v34 = vadd.f32 %v8920_v62, %v3751_v44  ;;  %v3552_v45 = vsub.f32 %v11986_v29, %v8744_v17  ;;  %v2685_v53 = vmul.f32 %v8697_v57, %v11987_v32  ;;  %v11989_v29 = vld [vmem:[#allocation75_spill] sm:$0xff] }
 0x4be   :  { %3898 = vmatprep.subr.mxu0 %v11926_v25  ;;  %v3731_v38 = vadd.f32 %v8914_v50, %v3730_v41  ;;  %v8932_v16 = vpop.eup %5769  ;;  %5795 = vpow2.f32 %v3693_v4  ;;  %v3639_v44 = vmul.f32 1.442695, %v3548_v20  ;;  %2836 = vmatmul.mubr.f32.gmra.mxu0 %v8817_v6  ;;  %v3705_v4 = vmul.f32 1.442695, %v3581_v10 }
 0x4bf   :  { %3899 = vmatpush2.msra.mxu0 %v11985_v40  ;;  %v8939_v40 = vpop.eup %5771  ;;  %5797 = vpow2.f32 %v3631_v39  ;;  %v3753_v56 = vadd.f32 %v8932_v16, %v3752_v34  ;;  %v3554_v41 = vsub.f32 %v8293_v24, %v8744_v17  ;;  %2840 = vmatprep.mubr.f32.mxu0 %v2685_v53  ;;  %v2684_v32 = vmul.f32 %v8596_v1, %v11989_v29  ;;  %v11991_v53 = vld [vmem:[#allocation90_spill] sm:$0xff]  ;;  %v11992_v29 = vld [vmem:[#allocation32_spill] sm:$0xff] }
 0x4c0   :  { %3900 = vmatprep.subr.mxu0 %v11926_v25  ;;  %v3732_v7 = vadd.f32 %v8927_v8, %v3731_v38  ;;  %v8945_v27 = vpop.eup %5773  ;;  %5799 = vpow2.f32 %v3697_v42  ;;  %v11990_v38 = vld [vmem:[#allocation38_spill] sm:$0xff]  ;;  %v3643_v6 = vmul.f32 1.442695, %v3550_v18  ;;  %v3709_v24 = vmul.f32 1.442695, %v3583_v61 }
 0x4c1   :  { %3901 = vmatpush2.msra.mxu0 %v11988_v47  ;;  %v8952_v20 = vpop.eup %5775  ;;  %5801 = vpow2.f32 %v3635_v55  ;;  %v3754_v34 = vadd.f32 %v8945_v27, %v3753_v56  ;;  %v3556_v42 = vsub.f32 %v8317_v52, %v8744_v17  ;;  %v2687_v47 = vmul.f32 %v8697_v57, %v11991_v53  ;;  %v11994_v53 = vld [vmem:[#allocation8_spill] sm:$0xff] }
 0x4c2   :  { %3902 = vmatprep.subr.mxu0 %v11926_v25  ;;  %v3733_v39 = vadd.f32 %v8939_v40, %v3732_v7  ;;  %v8957_v10 = vpop.eup %5777  ;;  %5803 = vpow2.f32 %v3701_v23  ;;  %v3647_v55 = vmul.f32 1.442695, %v3552_v45  ;;  %2841 = vmatmul.mubr.f32.gmra.mxu0 %v2684_v32  ;;  %v3558_v52 = vsub.f32 %v8341_v58, %v8744_v17  ;;  %v11993_v23 = vld [vmem:[#allocation76_spill] sm:$0xff] }
 0x4c3   :  { %3903 = vmatpush2.msra.mxu0 %v11990_v38  ;;  %v8964_v38 = vpop.eup %5779  ;;  %5805 = vpow2.f32 %v3639_v44  ;;  %v3755_v7 = vadd.f32 %v8957_v10, %v3754_v34  ;;  %2845 = vmatprep.mubr.f32.mxu0 %v2687_v47  ;;  %v2686_v56 = vmul.f32 %v8596_v1, %v11993_v23  ;;  %v3651_v44 = vmul.f32 1.442695, %v3554_v41  ;;  %v11995_v34 = vld [vmem:[#allocation92_spill] sm:$0xff] }
 0x4c4   :  { %3904 = vmatprep.subr.mxu0 %v11926_v25  ;;  %v3734_v18 = vadd.f32 %v8952_v20, %v3733_v39  ;;  %v8969_v61 = vpop.eup %5781  ;;  %5807 = vpow2.f32 %v3705_v4  ;;  %v3560_v58 = vsub.f32 %v8363_v37, %v8744_v17  ;;  %v2689_v47 = vmul.f32 %v8697_v57, %v11995_v34  ;;  %v11998_v34 = vld [vmem:[#allocation5_spill] sm:$0xff] }
 0x4c5   :  { %3905 = vmatpush2.msra.mxu0 %v11992_v29  ;;  %v8976_v39 = vpop.eup %5783  ;;  %5809 = vpow2.f32 %v3643_v6  ;;  %v3756_v32 = vadd.f32 %v8969_v61, %v3755_v7  ;;  %v11996_v29 = vld [vmem:[#allocation25_spill] sm:$0xff]  ;;  %v3655_v41 = vmul.f32 1.442695, %v3556_v42  ;;  %v3562_v37 = vsub.f32 %v8383_v15, %v8744_v17  ;;  %v11997_v7 = vld [vmem:[#allocation36_spill] sm:$0xff] }
 0x4c6   :  { %3906 = vmatprep.subr.mxu0 %v11926_v25  ;;  %v3735_v45 = vadd.f32 %v8964_v38, %v3734_v18  ;;  %v8981_v4 = vpop.eup %5785  ;;  %5811 = vpow2.f32 %v3709_v24  ;;  %2846 = vmatmul.mubr.f32.gmra.mxu0 %v2686_v56  ;;  %v3564_v15 = vsub.f32 %v8403_v3, %v8744_v17  ;;  %v3566_v3 = vsub.f32 %v8423_v51, %v8744_v17 }
 0x4c7   :  { %3907 = vmatpush2.msra.mxu0 %v11994_v53  ;;  %v8988_v23 = vpop.eup %5787  ;;  %5813 = vpow2.f32 %v3647_v55  ;;  %v3757_v18 = vadd.f32 %v8981_v4, %v3756_v32  ;;  %2850 = vmatprep.mubr.f32.mxu0 %v2689_v47  ;;  %v2688_v53 = vmul.f32 %v8596_v1, %v11997_v7  ;;  %v3659_v55 = vmul.f32 1.442695, %v3558_v52  ;;  %v11999_v32 = vld [vmem:[#allocation94_spill] sm:$0xff]  ;;  %v12000_v7 = vld [vmem:[#allocation7_spill] sm:$0xff] }
 0x4c8   :  { %3908 = vmatprep.subr.mxu0 %v11926_v25  ;;  %v3736_v6 = vadd.f32 %v8976_v39, %v3735_v45  ;;  %v8993_v24 = vpop.eup %5789  ;;  %5815 = vpow2.f32 %v3651_v44  ;;  %v2691_v47 = vmul.f32 %v8697_v57, %v11999_v32  ;;  %v3663_v52 = vmul.f32 1.442695, %v3560_v58  ;;  %v12002_v32 = vld [vmem:[#allocation30_spill] sm:$0xff] }
 0x4c9   :  { %3909 = vmatpush2.msra.mxu0 %v11996_v29  ;;  %v9000_v29 = vpop.eup %5791  ;;  %v3758_v56 = vadd.f32 %v8993_v24, %v3757_v18  ;;  %5817 = vpow2.f32 %v3655_v41  ;;  %v3667_v41 = vmul.f32 1.442695, %v3562_v37  ;;  %v3568_v51 = vsub.f32 %v8443_v5, %v8744_v17 }
 0x4ca   :  { %3910 = vmatprep.subr.mxu0 %v11926_v25  ;;  %v3737_v42 = vadd.f32 %v8988_v23, %v3736_v6  ;;  %v9005_v45 = vpop.eup %5793  ;;  %2851 = vmatmul.mubr.f32.gmra.mxu0 %v2688_v53  ;;  %5819 = vpow2.f32 %v3659_v55  ;;  %v3671_v37 = vmul.f32 1.442695, %v3564_v15  ;;  %v3570_v5 = vsub.f32 %v8465_v26, %v8744_v17 }
 0x4cb   :  { %3911 = vmatpush2.msra.mxu0 %v11998_v34  ;;  %v9012_v34 = vpop.eup %5795  ;;  %v3759_v44 = vadd.f32 %v9005_v45, %v3758_v56  ;;  %2855 = vmatprep.mubr.f32.mxu0 %v2691_v47  ;;  %v12005_v56 = vld [vmem:[#allocation97_spill] sm:$0xff]  ;;  %5821 = vpow2.f32 %v3663_v52  ;;  %v3675_v52 = vmul.f32 1.442695, %v3566_v3  ;;  %v3572_v26 = vsub.f32 %v8483_v43, %v8744_v17 }
 0x4cc   :  { %3912 = vmatprep.subr.mxu0 %v11926_v25  ;;  %v3738_v6 = vadd.f32 %v9000_v29, %v3737_v42  ;;  %v9017_v18 = vpop.eup %5797  ;;  %v2693_v47 = vmul.f32 %v8697_v57, %v12005_v56  ;;  %v12008_v56 = vld [vmem:[#allocation44_spill] sm:$0xff]  ;;  %5823 = vpow2.f32 %v3667_v41  ;;  %v3679_v3 = vmul.f32 1.442695, %v3568_v51 }
 0x4cd   :  { %3913 = vmatpush2.msra.mxu0 %v12000_v7  ;;  %12001 = vst [vmem:[#allocation22_spill] sm:$0xff] %v9017_v18  ;;  %v2690_v7 = vmul.f32 %v8596_v1, %v12002_v32  ;;  %v9024_v14 = vpop.eup %5799  ;;  %v3760_v53 = vadd.f32 %v9017_v18, %v3759_v44  ;;  %v12006_v32 = vld [vmem:[#allocation4_spill] sm:$0xff]  ;;  %5825 = vpow2.f32 %v3671_v37  ;;  %v3574_v43 = vsub.f32 %v8501_v12, %v8744_v17 }
 0x4ce   :  { %3914 = vmatprep.subr.mxu0 %v11926_v25  ;;  %v3739_v58 = vadd.f32 %v9012_v34, %v3738_v6  ;;  %v9029_v42 = vpop.eup %5801  ;;  %5827 = vpow2.f32 %v3675_v52  ;;  %v3683_v51 = vmul.f32 1.442695, %v3570_v5  ;;  %v3578_v5 = vsub.f32 %v8535_v31, %v8744_v17  ;;  %v12016_v52 = vld [vmem:[#allocation45_spill] sm:$0xff] }
 0x4cf   :  { %3915 = vmatpush2.msra.mxu0 %v12003_v48  ;;  %12004 = vst [vmem:[#allocation21_spill] sm:$0xff] %v9029_v42  ;;  %v9036_v48 = vpop.eup %5803  ;;  %v3761_v55 = vadd.f32 %v9029_v42, %v3760_v53  ;;  %v12011_v53 = vld [vmem:[#allocation99_spill] sm:$0xff]  ;;  %5829 = vpow2.f32 %v3679_v3  ;;  %v12017_v3 = vld [vmem:[#allocation102_spill] sm:$0xff] }
 0x4d0   :  { %3916 = vmatprep.subr.mxu0 %v11926_v25  ;;  %v3740_v6 = vadd.f32 %v9024_v14, %v3739_v58  ;;  %2856 = vmatmul.mubr.f32.gmra.mxu0 %v2690_v7  ;;  %v9041_v44 = vpop.eup %5805  ;;  %5831 = vpow2.f32 %v3683_v51 }
 0x4d1   :  { %3917 = vmatpush2.msra.mxu0 %v12006_v32  ;;  %12007 = vst [vmem:[#allocation20_spill] sm:$0xff] %v9041_v44  ;;  %2860 = vmatprep.mubr.f32.mxu0 %v2693_v47  ;;  %v2692_v32 = vmul.f32 %v8596_v1, %v12008_v56  ;;  %v9048_v18 = vpop.eup %5807  ;;  %v3762_v7 = vadd.f32 %v9041_v44, %v3761_v55  ;;  %v12012_v56 = vld [vmem:[#allocation2_spill] sm:$0xff]  ;;  %v12014_v44 = vld [vmem:[#allocation31_spill] sm:$0xff] }
 0x4d2   :  { %3918 = vmatprep.subr.mxu0 %v11926_v25  ;;  %v3741_v15 = vadd.f32 %v9036_v48, %v3740_v6  ;;  %v9053_v58 = vpop.eup %5809  ;;  %v2695_v47 = vmul.f32 %v8697_v57, %v12011_v53  ;;  %v12013_v53 = vld [vmem:[#allocation77_spill] sm:$0xff] }
 0x4d3   :  { %3919 = vmatpush2.msra.mxu0 %v12009_v13  ;;  %12010 = vst [vmem:[#allocation19_spill] sm:$0xff] %v9053_v58  ;;  %v9060_v13 = vpop.eup %5811  ;;  %v3763_v41 = vadd.f32 %v9053_v58, %v3762_v7  ;;  %v12015_v7 = vld [vmem:[#allocation101_spill] sm:$0xff]  ;;  %v3687_v58 = vmul.f32 1.442695, %v3572_v26  ;;  %v3580_v26 = vsub.f32 %v8553_v2, %v8744_v17  ;;  %v3699_v2 = vmul.f32 1.442695, %v3578_v5 }
 0x4d4   :  { %3920 = vmatprep.subr.mxu0 %v11926_v25  ;;  %v3742_v6 = vadd.f32 %v9048_v18, %v3741_v15  ;;  %2861 = vmatmul.mubr.f32.gmra.mxu0 %v2692_v32  ;;  %v9065_v55 = vpop.eup %5813  ;;  %v2697_v12 = vmul.f32 %v8697_v57, %v12015_v7 }
 0x4d5   :  { %3921 = vmatpush2.msra.mxu0 %v12012_v56  ;;  %2865 = vmatprep.mubr.f32.mxu0 %v2695_v47  ;;  %v2694_v56 = vmul.f32 %v8596_v1, %v12013_v53  ;;  %v3764_v37 = vadd.f32 %v9065_v55, %v3763_v41  ;;  %v9074_v32 = vpop.eup %5815  ;;  %5833 = vpow2.f32 %v3687_v58  ;;  %v3584_v58 = vsub.f32 %v8672_v54, %v8744_v17 }
 0x4d6   :  { %3922 = vmatprep.subr.mxu0 %v11926_v25  ;;  %v3743_v15 = vadd.f32 %v9060_v13, %v3742_v6  ;;  %v3576_v25 = vsub.f32 %v8517_v21, %v8744_v17  ;;  %v2696_v6 = vmul.f32 %v8596_v1, %v12016_v52  ;;  %v3691_v21 = vmul.f32 1.442695, %v3574_v43 }
 0x4d7   :  { %3923 = vmatpush2.msra.mxu0 %v12014_v44  ;;  %v3765_v53 = vadd.f32 %v9074_v32, %v3764_v37  ;;  %v9081_v44 = vpop.eup %5817  ;;  %v3582_v43 = vsub.f32 %v8571_v49, %v8744_v17  ;;  %v3703_v49 = vmul.f32 1.442695, %v3580_v26  ;;  %v3711_v26 = vmul.f32 1.442695, %v3584_v58 }
 0x4d8   :  { %v3744_v47 = vrot.slane %v3743_v15, 4  ;;  %2866 = vmatmul.mubr.f32.gmra.mxu0 %v2694_v56  ;;  %v9088_v42 = vpop.eup %5819  ;;  %v2699_v56 = vmul.f32 %v8697_v57, %v12017_v3  ;;  %v3695_v31 = vmul.f32 1.442695, %v3576_v25  ;;  %5835 = vpow2.f32 %v3691_v21  ;;  %v12019_v25 = vld [vmem:[#allocation104_spill] sm:$0xff] }
 0x4d9   :  { %2870 = vmatprep.mubr.f32.mxu0 %v2697_v12  ;;  %v3766_v7 = vadd.f32 %v9081_v44, %v3765_v53  ;;  %v9095_v52 = vpop.eup %5821 }
 0x4da   :  { %v3745_v41 = vadd.f32 %v3744_v47, %v3743_v15  ;;  %v12018_v15 = vld [vmem:[#allocation79_spill] sm:$0xff]  ;;  %v9102_v3 = vpop.eup %5823  ;;  %5837 = vpow2.f32 %v3695_v31 }
 0x4db   :  { %v3767_v12 = vadd.f32 %v9088_v42, %v3766_v7  ;;  %v2698_v51 = vmul.f32 %v8596_v1, %v12018_v15  ;;  %v9109_v15 = vpop.eup %5825  ;;  %5839 = vpow2.f32 %v3699_v2 }
 0x4dc   :  { %v3746_v37 = vrot.slane %v3745_v41, 2  ;;  %2871 = vmatmul.mubr.f32.gmra.mxu0 %v2696_v6  ;;  %v2701_v6 = vmul.f32 %v8697_v57, %v12019_v25  ;;  %v9114_v17 = vpop.eup %5827  ;;  %5841 = vpow2.f32 %v3703_v49  ;;  %v12023_v49 = vld [vmem:[#allocation107_spill] sm:$0xff] }
 0x4dd   :  { %2875 = vmatprep.mubr.f32.mxu0 %v2699_v56  ;;  %v3768_v53 = vadd.f32 %v9095_v52, %v3767_v12  ;;  %v12021_v12 = vld [vmem:[#allocation105_spill] sm:$0xff] }
 0x4de   :  { %v3747_v47 = vadd.f32 %v3746_v37, %v3745_v41  ;;  %v3707_v41 = vmul.f32 1.442695, %v3582_v43  ;;  %v12020_v37 = vld [vmem:[#allocation46_spill] sm:$0xff]  ;;  %v2703_v31 = vmul.f32 %v8697_v57, %v12021_v12 }
 0x4df   :  { %v3769_v56 = vadd.f32 %v9102_v3, %v3768_v53  ;;  %v2700_v54 = vmul.f32 %v8596_v1, %v12020_v37  ;;  %v9119_v53 = vpop.eup %5829  ;;  %v12022_v1 = vld [vmem:[#allocation106_spill] sm:$0xff]  ;;  %v12024_v37 = vld [vmem:[#allocation108_spill] sm:$0xff] }
 0x4e0   :  { %v3748_v7 = vrot.slane %v3747_v47, 1  ;;  %2876 = vmatmul.mubr.f32.gmra.mxu0 %v2698_v51  ;;  %5843 = vpow2.f32 %v3707_v41  ;;  %v2705_v2 = vmul.f32 %v8697_v57, %v12022_v1 }
 0x4e1   :  { %2880 = vmatprep.mubr.f32.mxu0 %v2701_v6  ;;  %v3770_v21 = vadd.f32 %v9109_v15, %v3769_v56  ;;  %v2707_v56 = vmul.f32 %v8697_v57, %v12023_v49 }
 0x4e2   :  { %v3749_v5 = vadd.f32 %v3748_v7, %v3747_v47  ;;  %v9122_v47 = vpop.eup %5831 }
 0x4e3   :  { %v3771_v51 = vadd.f32 %v9114_v17, %v3770_v21  ;;  %v9128_v58 = vpop.eup %5833 }
 0x4e4   :  { %2881 = vmatmul.mubr.f32.gmra.mxu0 %v2700_v54  ;;  %5845 = vrcp.f32 %v3749_v5  ;;  %v2709_v54 = vmul.f32 %v8697_v57, %v12024_v37 }
 0x4e5   :  { %2885 = vmatprep.mubr.f32.mxu0 %v2703_v31  ;;  %v3772_v43 = vadd.f32 %v9119_v53, %v3771_v51  ;;  %5847 = vpow2.f32 %v3711_v26  ;;  %v9131_v7 = vpop.eup %5835 }
 0x4e7   :  { %v3773_v25 = vadd.f32 %v9122_v47, %v3772_v43  ;;  %v9137_v5 = vpop.eup %5837  ;;  %v12025_v43 = vld [vmem:[#allocation69_spill] sm:$0xff] }
 0x4e8   :  { %2886 = vmatmul.mubr.f32.gmra.mxu0 %v8605_v0  ;;  %v9140_v0 = vpop.eup %5839  ;;  %v2711_v1 = vmul.f32 %v8697_v57, %v12025_v43  ;;  %v12028_v43 = vld [vmem:[#allocation80_spill] sm:$0xff] }
 0x4e9   :  { %2890 = vmatprep.mubr.f32.mxu0 %v2705_v2  ;;  %v3774_v6 = vadd.f32 %v9128_v58, %v3773_v25  ;;  %v9146_v31 = vpop.eup %5841 }
 0x4eb   :  { %v3775_v41 = vadd.f32 %v9131_v7, %v3774_v6  ;;  %v12026_v6 = vld [vmem:[#allocation51_spill] sm:$0xff] }
 0x4ec   :  { %2891 = vmatmul.mubr.f32.gmra.mxu0 %v8609_v30  ;;  %v2713_v49 = vmul.f32 %v8697_v57, %v12026_v6  ;;  %v12031_v6 = vld [vmem:[#allocation53_spill] sm:$0xff] }
 0x4ed   :  { %2895 = vmatprep.mubr.f32.mxu0 %v2707_v56  ;;  %v3776_v21 = vadd.f32 %v9137_v5, %v3775_v41  ;;  %v9148_v26 = vpop.eup %5843 }
 0x4ef   :  { %v3777_v12 = vadd.f32 %v9140_v0, %v3776_v21 }
 0x4f0   :  { %2896 = vmatmul.mubr.f32.gmra.mxu0 %v8614_v60 }
 0x4f1   :  { %2900 = vmatprep.mubr.f32.mxu0 %v2709_v54  ;;  %v3778_v30 = vadd.f32 %v9146_v31, %v3777_v12  ;;  %v9151_v51 = vpop.eup %5845  ;;  %v12027_v12 = vld [vmem:[#allocation109_spill] sm:$0xff] }
 0x4f2   :  { %v9157_v25 = vpop.eup %5847  ;;  %v9164_v56 = vmul.f32 %v9151_v51, %v8867_v59  ;;  %v9168_v41 = vmul.f32 %v9151_v51, %v8874_v22  ;;  %v9172_v21 = vmul.f32 %v9151_v51, %v8880_v63  ;;  %v9180_v37 = vmul.f32 %v9151_v51, %v8914_v50 }
 0x4f3   :  { %v3779_v2 = vadd.f32 %v9148_v26, %v3778_v30  ;;  %v9184_v59 = vmul.f32 %v9151_v51, %v8927_v8  ;;  %v9189_v22 = vmul.f32 %v9151_v51, %v8939_v40  ;;  %v9193_v63 = vmul.f32 %v9151_v51, %v8952_v20 }
 0x4f4   :  { %2901 = vmatmul.mubr.f32.gmra.mxu0 %v8618_v19  ;;  %v9176_v19 = vmul.f32 %v9151_v51, %v8901_v33  ;;  %v9197_v33 = vmul.f32 %v9151_v51, %v8964_v38  ;;  %v9201_v50 = vmul.f32 %v9151_v51, %v8976_v39  ;;  %v9209_v8 = vmul.f32 %v9151_v51, %v9000_v29 }
 0x4f5   :  { %2905 = vmatprep.mubr.f32.mxu0 %v2711_v1  ;;  %v3780_v60 = vadd.f32 %v9157_v25, %v3779_v2  ;;  %v9213_v40 = vmul.f32 %v9151_v51, %v9012_v34  ;;  %v9217_v38 = vmul.f32 %v9151_v51, %v9024_v14  ;;  %v9221_v39 = vmul.f32 %v9151_v51, %v9036_v48  ;;  %v12029_v1 = vld [vmem:[#allocation110_spill] sm:$0xff] }
 0x4f6   :  { %v2715_v29 = vmul.f32 %v8697_v57, %v12027_v12  ;;  %v9231_v34 = vmul.f32 %v9151_v51, %v9060_v13  ;;  %v2717_v48 = vmul.f32 %v8697_v57, %v12029_v1  ;;  %v12033_v13 = vld [vmem:[#allocation55_spill] sm:$0xff] }
 0x4f7   :  { %v3781_v54 = vrot.slane %v3780_v60, 4  ;;  %v2721_v12 = vmul.f32 %v8697_v57, %v12033_v13 }
 0x4f8   :  { %2906 = vmatmul.mubr.f32.gmra.mxu0 %v8622_v11  ;;  %v9205_v11 = vmul.f32 %v9151_v51, %v8988_v23  ;;  %v9225_v23 = vmul.f32 %v9151_v51, %v9048_v18 }
 0x4f9   :  { %2910 = vmatprep.mubr.f32.mxu0 %v2713_v49  ;;  %v3782_v20 = vadd.f32 %v3781_v54, %v3780_v60  ;;  %v12030_v60 = vld [vmem:[#allocation48_spill] sm:$0xff]  ;;  %v2719_v49 = vmul.f32 %v8697_v57, %v12031_v6  ;;  %v12032_v54 = vld [vmem:[#allocation49_spill] sm:$0xff]  ;;  %v12040_v6 = vld [vmem:[#allocation95_spill] sm:$0xff] }
 0x4fb   :  { %v3783_v30 = vrot.slane %v3782_v20, 2 }
 0x4fc   :  { %2911 = vmatmul.mubr.f32.gmra.mxu0 %v12028_v43  ;;  %v12036_v43 = vld [vmem:[#allocation91_spill] sm:$0xff] }
 0x4fd   :  { %2915 = vmatprep.mubr.f32.mxu0 %v2715_v29  ;;  %v3784_v14 = vadd.f32 %v3783_v30, %v3782_v20  ;;  %v12034_v29 = vld [vmem:[#allocation89_spill] sm:$0xff]  ;;  %v12035_v20 = vld [vmem:[#allocation111_spill] sm:$0xff] }
 0x4fe   :  { %v2723_v30 = vmul.f32 %v8697_v57, %v12035_v20 }
 0x4ff   :  { %v3785_v2 = vrot.slane %v3784_v14, 1 }
 0x500   :  { %2916 = vmatmul.mubr.f32.gmra.mxu0 %v12030_v60  ;;  %v12039_v60 = vld [vmem:[#allocation73_spill] sm:$0xff] }
 0x501   :  { %2920 = vmatprep.mubr.f32.mxu0 %v2717_v48  ;;  %v3786_v18 = vadd.f32 %v3785_v2, %v3784_v14  ;;  %v12037_v14 = vld [vmem:[#allocation112_spill] sm:$0xff]  ;;  %v12038_v48 = vld [vmem:[#allocation93_spill] sm:$0xff] }
 0x502   :  { %v2725_v1 = vmul.f32 %v8697_v57, %v12037_v14  ;;  %v12043_v14 = vld [vmem:[#allocation114_spill] sm:$0xff] }
 0x503   :  { %5849 = vrcp.f32 %v3786_v18  ;;  %v2727_v18 = vmul.f32 %v8697_v57, %v12039_v60  ;;  %v12046_v60 = vld [vmem:[#allocation116_spill] sm:$0xff] }
 0x504   :  { %2921 = vmatmul.mubr.f32.gmra.mxu0 %v12032_v54 }
 0x505   :  { %2925 = vmatprep.mubr.f32.mxu0 %v2719_v49  ;;  %v12041_v49 = vld [vmem:[#allocation113_spill] sm:$0xff] }
 0x506   :  { %v2729_v54 = vmul.f32 %v8697_v57, %v12041_v49 }
 0x508   :  { %2926 = vmatmul.mubr.f32.gmra.mxu0 %v12034_v29 }
 0x509   :  { %2930 = vmatprep.mubr.f32.mxu0 %v2721_v12 }
 0x50c   :  { %2931 = vmatmul.mubr.f32.gmra.mxu0 %v12036_v43  ;;  %v12042_v43 = vld [vmem:[#allocation98_spill] sm:$0xff] }
 0x50d   :  { %2935 = vmatprep.mubr.f32.mxu0 %v2723_v30 }
 0x510   :  { %2936 = vmatmul.mubr.f32.gmra.mxu0 %v12038_v48  ;;  %v9249_v2 = vpop.eup %5849 }
 0x511   :  { %2940 = vmatprep.mubr.f32.mxu0 %v2725_v1  ;;  %v9258_v13 = vmul.f32 %v9249_v2, %v9065_v55  ;;  %v9262_v12 = vmul.f32 %v9249_v2, %v9074_v32  ;;  %v9266_v29 = vmul.f32 %v9249_v2, %v9081_v44  ;;  %v9270_v20 = vmul.f32 %v9249_v2, %v9088_v42  ;;  %v12044_v1 = vld [vmem:[#allocation100_spill] sm:$0xff] }
 0x512   :  { %v9274_v30 = vmul.f32 %v9249_v2, %v9095_v52  ;;  %v9278_v55 = vmul.f32 %v9249_v2, %v9102_v3  ;;  %v9282_v32 = vmul.f32 %v9249_v2, %v9109_v15  ;;  %v9286_v44 = vmul.f32 %v9249_v2, %v9114_v17 }
 0x513   :  { %v9290_v42 = vmul.f32 %v9249_v2, %v9119_v53  ;;  %v9295_v52 = vmul.f32 %v9249_v2, %v9122_v47  ;;  %v9299_v3 = vmul.f32 %v9249_v2, %v9128_v58  ;;  %v9303_v15 = vmul.f32 %v9249_v2, %v9131_v7 }
 0x514   :  { %2941 = vmatmul.mubr.f32.gmra.mxu0 %v12040_v6  ;;  %v9307_v17 = vmul.f32 %v9249_v2, %v9137_v5  ;;  %v9311_v53 = vmul.f32 %v9249_v2, %v9140_v0  ;;  %v9315_v47 = vmul.f32 %v9249_v2, %v9146_v31  ;;  %v9319_v58 = vmul.f32 %v9249_v2, %v9148_v26  ;;  %v12045_v0 = vld [vmem:[#allocation115_spill] sm:$0xff]  ;;  %v12047_v26 = vld [vmem:[#allocation117_spill] sm:$0xff] }
 0x515   :  { %2945 = vmatprep.mubr.f32.mxu0 %v2727_v18  ;;  %v9323_v7 = vmul.f32 %v9249_v2, %v9157_v25  ;;  %v2731_v5 = vmul.f32 %v8697_v57, %v12043_v14  ;;  %v2733_v48 = vmul.f32 %v8697_v57, %v12045_v0  ;;  %v3790_v31 = vmul.f32 %v9249_v2, %v8887_v9  ;;  %v12048_v9 = vld [vmem:[#allocation52_spill] sm:$0xff]  ;;  %v12052_v0 = vld [vmem:[#allocation61_spill] sm:$0xff] }
 0x516   :  { %v3789_v25 = vmul.f32 %v9151_v51, %v8715_v36  ;;  %v3792_v18 = vmul.f32 %v9249_v2, %v8894_v35  ;;  %v3791_v57 = vmul.f32 %v9151_v51, %v8720_v46  ;;  %v3794_v6 = vmul.f32 %v9249_v2, %v8907_v28  ;;  %v12049_v36 = vld [vmem:[#allocation54_spill] sm:$0xff]  ;;  %v12050_v46 = vld [vmem:[#allocation56_spill] sm:$0xff] }
 0x517   :  { %v3793_v49 = vmul.f32 %v9151_v51, %v12048_v9  ;;  %v3795_v35 = vmul.f32 %v9151_v51, %v12049_v36  ;;  %v3797_v28 = vmul.f32 %v9151_v51, %v12050_v46  ;;  %v3800_v14 = vmul.f32 %v9249_v2, %v8945_v27  ;;  %v12057_v9 = vld [vmem:[#allocation22_spill] sm:$0xff]  ;;  %v12059_v36 = vld [vmem:[#allocation21_spill] sm:$0xff]  ;;  %v12060_v46 = vld [vmem:[#allocation23_spill] sm:$0xff] }
 0x518   :  { %2946 = vmatmul.mubr.f32.gmra.mxu0 %v12042_v43  ;;  %v3798_v43 = vmul.f32 %v9249_v2, %v8932_v16  ;;  %v3801_v16 = vmul.f32 %v9151_v51, %v12052_v0 }
 0x519   :  { %2950 = vmatprep.mubr.f32.mxu0 %v2729_v54  ;;  %v3796_v54 = vmul.f32 %v9249_v2, %v8920_v62 }
 0x51c   :  { %2951 = vmatmul.mubr.f32.gmra.mxu0 %v12044_v1  ;;  %v3802_v1 = vmul.f32 %v9249_v2, %v8957_v10 }
 0x51d   :  { %2955 = vmatprep.mubr.f32.mxu0 %v2731_v5  ;;  %v12051_v5 = vld [vmem:[#allocation58_spill] sm:$0xff] }
 0x51e   :  { %v3799_v62 = vmul.f32 %v9151_v51, %v12051_v5  ;;  %v12061_v5 = vld [vmem:[#allocation20_spill] sm:$0xff] }
 0x520   :  { %2956 = vmatmul.mubr.f32.gmra.mxu0 %v12046_v60  ;;  %v12053_v60 = vld [vmem:[#allocation47_spill] sm:$0xff] }
 0x521   :  { %2960 = vmatprep.mubr.f32.mxu0 %v2733_v48  ;;  %v3804_v48 = vmul.f32 %v9249_v2, %v8969_v61  ;;  %v3803_v27 = vmul.f32 %v9151_v51, %v12053_v60 }
 0x524   :  { %2961 = vmatmul.mubr.f32.gmra.mxu0 %v12047_v26  ;;  %v12054_v26 = vld [vmem:[#allocation64_spill] sm:$0xff] }
 0x525   :  { %3924 = vmatprep.mubr.f32.mxu0 %v3790_v31  ;;  %v3806_v31 = vmul.f32 %v9249_v2, %v8981_v4  ;;  %v3805_v10 = vmul.f32 %v9151_v51, %v12054_v26 }
 0x528   :  { %3925 = vmatmul.mubr.f32.vlgmr.msra.gmra.mxu0 %v3789_v25  ;;  %v3808_v25 = vmul.f32 %v9249_v2, %v8993_v24 }
 0x529   :  { %3929 = vmatprep.mubr.f32.mxu0 %v3792_v18  ;;  %v12055_v18 = vld [vmem:[#allocation65_spill] sm:$0xff] }
 0x52a   :  { %v3807_v61 = vmul.f32 %v9151_v51, %v12055_v18 }
 0x52c   :  { %3930 = vmatmul.mubr.f32.gmra.mxu0 %v3791_v57  ;;  %v3810_v57 = vmul.f32 %v9249_v2, %v9005_v45  ;;  %v9385_v45 = vld [vmem:[%s11429_s6] ss:$0 sm:$0xff] }
 0x52d   :  { %3934 = vmatprep.mubr.f32.mxu0 %v3794_v6  ;;  %v12056_v6 = vld [vmem:[#allocation66_spill] sm:$0xff] }
 0x52e   :  { %v3809_v4 = vmul.f32 %v9151_v51, %v12056_v6 }
 0x530   :  { %3935 = vmatmul.mubr.f32.gmra.mxu0 %v3793_v49  ;;  %v3812_v49 = vmul.f32 %v9249_v2, %v12057_v9 }
 0x531   :  { %3939 = vmatprep.mubr.f32.mxu0 %v3796_v54  ;;  %v12058_v54 = vld [vmem:[#allocation81_spill] sm:$0xff] }
 0x532   :  { %v3811_v24 = vmul.f32 %v9151_v51, %v12058_v54 }
 0x534   :  { %3940 = vmatmul.mubr.f32.gmra.mxu0 %v3795_v35  ;;  %v3814_v35 = vmul.f32 %v9249_v2, %v12059_v36 }
 0x535   :  { %3944 = vmatprep.mubr.f32.mxu0 %v3798_v43 }
 0x538   :  { %3945 = vmatmul.mubr.f32.gmra.mxu0 %v3797_v28  ;;  %v3813_v28 = vmul.f32 %v9151_v51, %v12060_v46 }
 0x539   :  { %3949 = vmatprep.mubr.f32.mxu0 %v3800_v14 }
 0x53c   :  { %3950 = vmatmul.mubr.f32.gmra.mxu0 %v3799_v62  ;;  %v3816_v62 = vmul.f32 %v9249_v2, %v12061_v5 }
 0x53d   :  { %3954 = vmatprep.mubr.f32.mxu0 %v3802_v1 }
 0x540   :  { %3955 = vmatmul.mubr.f32.gmra.mxu0 %v3801_v16  ;;  %v12062_v16 = vld [vmem:[#allocation67_spill] sm:$0xff] }
 0x541   :  { %3959 = vmatprep.mubr.f32.mxu0 %v3804_v48  ;;  %v3815_v48 = vmul.f32 %v9151_v51, %v12062_v16 }
 0x544   :  { %3960 = vmatmul.mubr.f32.gmra.mxu0 %v3803_v27  ;;  %v12063_v27 = vld [vmem:[#allocation19_spill] sm:$0xff] }
 0x545   :  { %3964 = vmatprep.mubr.f32.mxu0 %v3806_v31  ;;  %v3818_v31 = vmul.f32 %v9249_v2, %v12063_v27 }
 0x548   :  { %3965 = vmatmul.mubr.f32.gmra.mxu0 %v3805_v10  ;;  %v12064_v10 = vld [vmem:[#allocation24_spill] sm:$0xff] }
 0x549   :  { %3969 = vmatprep.mubr.f32.mxu0 %v3808_v25  ;;  %v3817_v25 = vmul.f32 %v9151_v51, %v12064_v10 }
 0x54c   :  { %3970 = vmatmul.mubr.f32.gmra.mxu0 %v3807_v61 }
 0x54d   :  { %3974 = vmatprep.mubr.f32.mxu0 %v3810_v57 }
 0x550   :  { %3975 = vmatmul.mubr.f32.gmra.mxu0 %v3809_v4 }
 0x551   :  { %3979 = vmatprep.mubr.f32.mxu0 %v3812_v49 }
 0x554   :  { %3980 = vmatmul.mubr.f32.gmra.mxu0 %v3811_v24 }
 0x555   :  { %3984 = vmatprep.mubr.f32.mxu0 %v3814_v35 }
 0x558   :  { %v2807_v43 = vpop.f32.mrf.mxu0  ;;  %3985 = vmatmul.mubr.f32.gmra.mxu0 %v3813_v28 }
 0x559   :  { %v2808_v14 = vadd.f32 %v9385_v45, %v2807_v43  ;;  %3989 = vmatprep.mubr.f32.mxu0 %v3816_v62 }
 0x55a   :  { %v2809_v1 = vpop.f32.mrf.mxu0 }
 0x55b   :  { %2966 = vst.msk [vmem:[%s11430_s9] sm:$0xff] %vm107_vm0, %v2808_v14 }
 0x55c   :  { %v2812_v0 = vpop.f32.mrf.mxu0  ;;  %3990 = vmatmul.mubr.f32.gmra.mxu0 %v3815_v48 }
 0x55d   :  { %v2813_v60 = vadd.f32 %v9385_v45, %v2812_v0  ;;  %3994 = vmatprep.mubr.f32.mxu0 %v3818_v31 }
 0x55e   :  { %v2814_v26 = vpop.f32.mrf.mxu0 }
 0x55f   :  { %2967 = vst.msk [vmem:[%s11430_s9 + $0x8] sm:$0xff] %vm107_vm0, %v2813_v60 }
 0x560   :  { %3995 = vmatmul.mubr.f32.gmra.mxu0 %v3817_v25 }
 0x561   :  { %3999 = vmatprep.mubr.f32.mxu0 %v9258_v13 }
 0x564   :  { %4000 = vmatmul.mubr.f32.gmra.mxu0 %v9164_v56 }
 0x565   :  { %4004 = vmatprep.mubr.f32.mxu0 %v9262_v12 }
 0x568   :  { %4005 = vmatmul.mubr.f32.gmra.mxu0 %v9168_v41 }
 0x569   :  { %4009 = vmatprep.mubr.f32.mxu0 %v9266_v29 }
 0x56a   :  { %v2817_v2 = vpop.f32.mrf.mxu0 }
 0x56b   :  { %v2818_v51 = vadd.f32 %v9385_v45, %v2817_v2 }
 0x56c   :  { %4010 = vmatmul.mubr.f32.gmra.mxu0 %v9172_v21  ;;  %v2819_v13 = vpop.f32.mrf.mxu0 }
 0x56d   :  { %4014 = vmatprep.mubr.f32.mxu0 %v9270_v20  ;;  %2968 = vst.msk [vmem:[%s11430_s9 + $0x10] sm:$0xff] %vm107_vm0, %v2818_v51 }
 0x56e   :  { %v2822_v56 = vpop.f32.mrf.mxu0 }
 0x56f   :  { %v2823_v41 = vadd.f32 %v9385_v45, %v2822_v56 }
 0x570   :  { %4015 = vmatmul.mubr.f32.gmra.mxu0 %v9176_v19  ;;  %v2824_v21 = vpop.f32.mrf.mxu0 }
 0x571   :  { %4019 = vmatprep.mubr.f32.mxu0 %v9274_v30  ;;  %2969 = vst.msk [vmem:[%s11430_s9 + $0x18] sm:$0xff] %vm107_vm0, %v2823_v41 }
 0x574   :  { %4020 = vmatmul.mubr.f32.gmra.mxu0 %v9180_v37  ;;  %v2827_v19 = vpop.f32.mrf.mxu0 }
 0x575   :  { %4024 = vmatprep.mubr.f32.mxu0 %v9278_v55  ;;  %v2828_v12 = vadd.f32 %v9385_v45, %v2827_v19 }
 0x576   :  { %v2829_v29 = vpop.f32.mrf.mxu0 }
 0x577   :  { %2970 = vst.msk [vmem:[%s11430_s9 + $0x20] sm:$0xff] %vm107_vm0, %v2828_v12 }
 0x578   :  { %4025 = vmatmul.mubr.f32.gmra.mxu0 %v9184_v59  ;;  %v2832_v37 = vpop.f32.mrf.mxu0 }
 0x579   :  { %4029 = vmatprep.mubr.f32.mxu0 %v9282_v32  ;;  %v2833_v20 = vadd.f32 %v9385_v45, %v2832_v37 }
 0x57a   :  { %v2834_v30 = vpop.f32.mrf.mxu0 }
 0x57b   :  { %2971 = vst.msk [vmem:[%s11430_s9 + $0x28] sm:$0xff] %vm107_vm0, %v2833_v20 }
 0x57c   :  { %4030 = vmatmul.mubr.f32.gmra.mxu0 %v9189_v22 }
 0x57d   :  { %4034 = vmatprep.mubr.f32.mxu0 %v9286_v44 }
 0x57e   :  { %v2837_v59 = vpop.f32.mrf.mxu0 }
 0x57f   :  { %v2838_v55 = vadd.f32 %v9385_v45, %v2837_v59 }
 0x580   :  { %4035 = vmatmul.mubr.f32.gmra.mxu0 %v9193_v63  ;;  %v2839_v32 = vpop.f32.mrf.mxu0 }
 0x581   :  { %4039 = vmatprep.mubr.f32.mxu0 %v9290_v42  ;;  %2972 = vst.msk [vmem:[%s11430_s9 + $0x30] sm:$0xff] %vm107_vm0, %v2838_v55 }
 0x582   :  { %v2842_v22 = vpop.f32.mrf.mxu0 }
 0x583   :  { %v2843_v44 = vadd.f32 %v9385_v45, %v2842_v22 }
 0x584   :  { %4040 = vmatmul.mubr.f32.gmra.mxu0 %v9197_v33  ;;  %v2844_v18 = vpop.f32.mrf.mxu0 }
 0x585   :  { %4044 = vmatprep.mubr.f32.mxu0 %v9295_v52  ;;  %2973 = vst.msk [vmem:[%s11430_s9 + $0x38] sm:$0xff] %vm107_vm0, %v2843_v44 }
 0x586   :  { %v2847_v63 = vpop.f32.mrf.mxu0 }
 0x587   :  { %v2848_v42 = vadd.f32 %v9385_v45, %v2847_v63 }
 0x588   :  { %4045 = vmatmul.mubr.f32.gmra.mxu0 %v9201_v50  ;;  %v2849_v61 = vpop.f32.mrf.mxu0 }
 0x589   :  { %4049 = vmatprep.mubr.f32.mxu0 %v9299_v3  ;;  %2974 = vst.msk [vmem:[%s11430_s9 + $0x40] sm:$0xff] %vm107_vm0, %v2848_v42 }
 0x58a   :  { %v2852_v33 = vpop.f32.mrf.mxu0 }
 0x58b   :  { %v2853_v52 = vadd.f32 %v9385_v45, %v2852_v33 }
 0x58c   :  { %4050 = vmatmul.mubr.f32.gmra.mxu0 %v9205_v11  ;;  %v2854_v57 = vpop.f32.mrf.mxu0 }
 0x58d   :  { %4054 = vmatprep.mubr.f32.mxu0 %v9303_v15  ;;  %2975 = vst.msk [vmem:[%s11430_s9 + $0x48] sm:$0xff] %vm107_vm0, %v2853_v52 }
 0x590   :  { %v2857_v50 = vpop.f32.mrf.mxu0  ;;  %4055 = vmatmul.mubr.f32.gmra.mxu0 %v9209_v8 }
 0x591   :  { %v2858_v3 = vadd.f32 %v9385_v45, %v2857_v50  ;;  %4059 = vmatprep.mubr.f32.mxu0 %v9307_v17 }
 0x592   :  { %v2859_v6 = vpop.f32.mrf.mxu0 }
 0x593   :  { %2976 = vst.msk [vmem:[%s11430_s9 + $0x50] sm:$0xff] %vm107_vm0, %v2858_v3 }
 0x594   :  { %v2862_v11 = vpop.f32.mrf.mxu0  ;;  %4060 = vmatmul.mubr.f32.gmra.mxu0 %v9213_v40 }
 0x595   :  { %v2863_v15 = vadd.f32 %v9385_v45, %v2862_v11  ;;  %4064 = vmatprep.mubr.f32.mxu0 %v9311_v53 }
 0x596   :  { %v2864_v4 = vpop.f32.mrf.mxu0 }
 0x597   :  { %2977 = vst.msk [vmem:[%s11430_s9 + $0x58] sm:$0xff] %vm107_vm0, %v2863_v15 }
 0x598   :  { %v2867_v8 = vpop.f32.mrf.mxu0  ;;  %4065 = vmatmul.mubr.f32.gmra.mxu0 %v9217_v38 }
 0x599   :  { %v2868_v17 = vadd.f32 %v9385_v45, %v2867_v8  ;;  %4069 = vmatprep.mubr.f32.mxu0 %v9315_v47  ;;  %v4118_v8 = vld [vmem:[%s11430_s9 + $0x8] sm:$0xff] }
 0x59a   :  { %v2869_v9 = vpop.f32.mrf.mxu0 }
 0x59b   :  { %2978 = vst.msk [vmem:[%s11430_s9 + $0x60] sm:$0xff] %vm107_vm0, %v2868_v17  ;;  %v4117_v9 = vld [vmem:[%s11430_s9] sm:$0xff] }
 0x59c   :  { %v2872_v40 = vpop.f32.mrf.mxu0  ;;  %4070 = vmatmul.mubr.f32.gmra.mxu0 %v9221_v39 }
 0x59d   :  { %v2873_v53 = vadd.f32 %v9385_v45, %v2872_v40  ;;  %4074 = vmatprep.mubr.f32.mxu0 %v9319_v58 }
 0x59e   :  { %v2874_v49 = vpop.f32.mrf.mxu0 }
 0x59f   :  { %2979 = vst.msk [vmem:[%s11430_s9 + $0x68] sm:$0xff] %vm107_vm0, %v2873_v53  ;;  %v4119_v53 = vld [vmem:[%s11430_s9 + $0x10] sm:$0xff] }
 0x5a0   :  { %v2877_v38 = vpop.f32.mrf.mxu0  ;;  %4075 = vmatmul.mubr.f32.gmra.mxu0 %v9225_v23 }
 0x5a1   :  { %v2878_v47 = vadd.f32 %v9385_v45, %v2877_v38  ;;  %4079 = vmatprep.mubr.f32.mxu0 %v9323_v7  ;;  %v4316_v38 = vmul.f32 %v4118_v8, %v4118_v8 }
 0x5a2   :  { %v2879_v54 = vpop.f32.mrf.mxu0 }
 0x5a3   :  { %2980 = vst.msk [vmem:[%s11430_s9 + $0x70] sm:$0xff] %vm107_vm0, %v2878_v47  ;;  %v4315_v47 = vmul.f32 %v4117_v9, %v4117_v9  ;;  %v4120_v54 = vld [vmem:[%s11430_s9 + $0x18] sm:$0xff] }
 0x5a4   :  { %v2882_v39 = vpop.f32.mrf.mxu0  ;;  %4080 = vmatmul.mubr.f32.gmra.mxu0 %v9231_v34 }
 0x5a5   :  { %v2883_v58 = vadd.f32 %v9385_v45, %v2882_v39 }
 0x5a6   :  { %v2884_v24 = vpop.f32.mrf.mxu0 }
 0x5a7   :  { %2981 = vst.msk [vmem:[%s11430_s9 + $0x78] sm:$0xff] %vm107_vm0, %v2883_v58  ;;  %v4182_v58 = vsel %vm107_vm0, %v4118_v8, 0.0  ;;  %v4317_v24 = vmul.f32 %v4119_v53, %v4119_v53 }
 0x5a8   :  { %v2887_v23 = vpop.f32.mrf.mxu0 }
 0x5a9   :  { %v2888_v7 = vadd.f32 %v9385_v45, %v2887_v23 }
 0x5aa   :  { %v2889_v36 = vpop.f32.mrf.mxu0 }
 0x5ab   :  { %2982 = vst.msk [vmem:[%s11430_s9 + $0x80] sm:$0xff] %vm107_vm0, %v2888_v7  ;;  %v4121_v7 = vld [vmem:[%s11430_s9 + $0x20] sm:$0xff] }
 0x5ac   :  { %v2892_v35 = vpop.f32.mrf.mxu0 }
 0x5ad   :  { %v2893_v34 = vadd.f32 %v9385_v45, %v2892_v35  ;;  %v4181_v35 = vsel %vm107_vm0, %v4117_v9, 0.0 }
 0x5ae   :  { %v2894_v43 = vpop.f32.mrf.mxu0 }
 0x5af   :  { %2983 = vst.msk [vmem:[%s11430_s9 + $0x88] sm:$0xff] %vm107_vm0, %v2893_v34  ;;  %v4380_v34 = vsel %vm107_vm0, %v4316_v38, 0.0  ;;  %v4184_v43 = vsel %vm107_vm0, %v4119_v53, 0.0 }
 0x5b0   :  { %v2897_v46 = vpop.f32.mrf.mxu0 }
 0x5b1   :  { %v2898_v28 = vadd.f32 %v9385_v45, %v2897_v46  ;;  %v4318_v46 = vmul.f32 %v4120_v54, %v4120_v54 }
 0x5b2   :  { %v2899_v14 = vpop.f32.mrf.mxu0 }
 0x5b3   :  { %2984 = vst.msk [vmem:[%s11430_s9 + $0x90] sm:$0xff] %vm107_vm0, %v2898_v28  ;;  %v4379_v28 = vsel %vm107_vm0, %v4315_v47, 0.0  ;;  %v4183_v14 = vadd.f32 %v4182_v58, %v4181_v35 }
 0x5b4   :  { %v2902_v5 = vpop.f32.mrf.mxu0 }
 0x5b5   :  { %v2903_v62 = vadd.f32 %v9385_v45, %v2902_v5  ;;  %v4122_v5 = vld [vmem:[%s11430_s9 + $0x28] sm:$0xff] }
 0x5b6   :  { %v2904_v1 = vpop.f32.mrf.mxu0 }
 0x5b7   :  { %2985 = vst.msk [vmem:[%s11430_s9 + $0x98] sm:$0xff] %vm107_vm0, %v2903_v62  ;;  %v4382_v1 = vsel %vm107_vm0, %v4317_v24, 0.0  ;;  %v9706_v24 = vld [vmem:[%s11430_s9 + $0x60] sm:$0xff] }
 0x5b8   :  { %v2907_v0 = vpop.f32.mrf.mxu0 }
 0x5b9   :  { %v2908_v16 = vadd.f32 %v9385_v45, %v2907_v0  ;;  %v4186_v0 = vsel %vm107_vm0, %v4120_v54, 0.0 }
 0x5ba   :  { %v2909_v48 = vpop.f32.mrf.mxu0 }
 0x5bb   :  { %2986 = vst.msk [vmem:[%s11430_s9 + $0xa0] sm:$0xff] %vm107_vm0, %v2908_v16  ;;  %v4319_v16 = vmul.f32 %v4121_v7, %v4121_v7 }
 0x5bc   :  { %v2912_v60 = vpop.f32.mrf.mxu0 }
 0x5bd   :  { %v2913_v27 = vadd.f32 %v9385_v45, %v2912_v60  ;;  %v4381_v60 = vadd.f32 %v4380_v34, %v4379_v28 }
 0x5be   :  { %v2914_v31 = vpop.f32.mrf.mxu0 }
 0x5bf   :  { %2987 = vst.msk [vmem:[%s11430_s9 + $0xa8] sm:$0xff] %vm107_vm0, %v2913_v27  ;;  %v4185_v27 = vadd.f32 %v4184_v43, %v4183_v14  ;;  %v9635_v31 = vld [vmem:[%s11430_s9 + $0x30] sm:$0xff] }
 0x5c0   :  { %v2917_v26 = vpop.f32.mrf.mxu0 }
 0x5c1   :  { %v2918_v10 = vadd.f32 %v9385_v45, %v2917_v26 }
 0x5c2   :  { %v2919_v25 = vpop.f32.mrf.mxu0 }
 0x5c3   :  { %2988 = vst.msk [vmem:[%s11430_s9 + $0xb0] sm:$0xff] %vm107_vm0, %v2918_v10  ;;  %v4384_v10 = vsel %vm107_vm0, %v4318_v46, 0.0  ;;  %v4188_v25 = vsel %vm107_vm0, %v4121_v7, 0.0  ;;  %v9720_v46 = vld [vmem:[%s11430_s9 + $0x68] sm:$0xff] }
 0x5c4   :  { %v2922_v2 = vpop.f32.mrf.mxu0 }
 0x5c5   :  { %v2923_v51 = vadd.f32 %v9385_v45, %v2922_v2  ;;  %v4320_v2 = vmul.f32 %v4122_v5, %v4122_v5 }
 0x5c6   :  { %v2924_v13 = vpop.f32.mrf.mxu0 }
 0x5c7   :  { %2989 = vst.msk [vmem:[%s11430_s9 + $0xb8] sm:$0xff] %vm107_vm0, %v2923_v51  ;;  %v4383_v51 = vadd.f32 %v4382_v1, %v4381_v60  ;;  %v4187_v13 = vadd.f32 %v4186_v0, %v4185_v27 }
 0x5c8   :  { %v2927_v56 = vpop.f32.mrf.mxu0 }
 0x5c9   :  { %v2928_v41 = vadd.f32 %v9385_v45, %v2927_v56  ;;  %v9646_v56 = vld [vmem:[%s11430_s9 + $0x38] sm:$0xff] }
 0x5ca   :  { %v2929_v21 = vpop.f32.mrf.mxu0 }
 0x5cb   :  { %2990 = vst.msk [vmem:[%s11430_s9 + $0xc0] sm:$0xff] %vm107_vm0, %v2928_v41  ;;  %v4386_v21 = vsel %vm107_vm0, %v4319_v16, 0.0 }
 0x5cc   :  { %v2932_v19 = vpop.f32.mrf.mxu0 }
 0x5cd   :  { %v2933_v12 = vadd.f32 %v9385_v45, %v2932_v19  ;;  %v4190_v19 = vsel %vm107_vm0, %v4122_v5, 0.0 }
 0x5ce   :  { %v2934_v29 = vpop.f32.mrf.mxu0 }
 0x5cf   :  { %2991 = vst.msk [vmem:[%s11430_s9 + $0xc8] sm:$0xff] %vm107_vm0, %v2933_v12  ;;  %v4321_v12 = vmul.f32 %v9635_v31, %v9635_v31 }
 0x5d0   :  { %v2937_v37 = vpop.f32.mrf.mxu0 }
 0x5d1   :  { %v2938_v20 = vadd.f32 %v9385_v45, %v2937_v37  ;;  %v4385_v37 = vadd.f32 %v4384_v10, %v4383_v51  ;;  %v4328_v10 = vmul.f32 %v9720_v46, %v9720_v46  ;;  %v9745_v51 = vld [vmem:[%s11430_s9 + $0x78] sm:$0xff] }
 0x5d2   :  { %v2939_v30 = vpop.f32.mrf.mxu0 }
 0x5d3   :  { %2992 = vst.msk [vmem:[%s11430_s9 + $0xd0] sm:$0xff] %vm107_vm0, %v2938_v20  ;;  %v4189_v20 = vadd.f32 %v4188_v25, %v4187_v13  ;;  %v9656_v30 = vld [vmem:[%s11430_s9 + $0x40] sm:$0xff] }
 0x5d4   :  { %v2942_v59 = vpop.f32.mrf.mxu0 }
 0x5d5   :  { %v2943_v55 = vadd.f32 %v9385_v45, %v2942_v59 }
 0x5d6   :  { %v2944_v32 = vpop.f32.mrf.mxu0 }
 0x5d7   :  { %2993 = vst.msk [vmem:[%s11430_s9 + $0xd8] sm:$0xff] %vm107_vm0, %v2943_v55  ;;  %v4388_v55 = vsel %vm107_vm0, %v4320_v2, 0.0  ;;  %v4192_v32 = vsel %vm107_vm0, %v9635_v31, 0.0 }
 0x5d8   :  { %v2947_v22 = vpop.f32.mrf.mxu0 }
 0x5d9   :  { %v2948_v44 = vadd.f32 %v9385_v45, %v2947_v22  ;;  %v4322_v22 = vmul.f32 %v9646_v56, %v9646_v56 }
 0x5da   :  { %v2949_v18 = vpop.f32.mrf.mxu0 }
 0x5db   :  { %2994 = vst.msk [vmem:[%s11430_s9 + $0xe0] sm:$0xff] %vm107_vm0, %v2948_v44  ;;  %v4387_v44 = vadd.f32 %v4386_v21, %v4385_v37  ;;  %v4191_v18 = vadd.f32 %v4190_v19, %v4189_v20  ;;  %v4206_v21 = vsel %vm107_vm0, %v9720_v46, 0.0  ;;  %v9756_v20 = vld [vmem:[%s11430_s9 + $0x80] sm:$0xff] }
 0x5dc   :  { %v2952_v63 = vpop.f32.mrf.mxu0 }
 0x5dd   :  { %v2953_v42 = vadd.f32 %v9385_v45, %v2952_v63  ;;  %v9670_v63 = vld [vmem:[%s11430_s9 + $0x48] sm:$0xff] }
 0x5de   :  { %v2954_v61 = vpop.f32.mrf.mxu0  ;;  %v4324_v8 = vmul.f32 %v9670_v63, %v9670_v63  ;;  %v4198_v38 = vsel %vm107_vm0, %v9670_v63, 0.0 }
 0x5df   :  { %2995 = vst.msk [vmem:[%s11430_s9 + $0xe8] sm:$0xff] %vm107_vm0, %v2953_v42  ;;  %v4390_v61 = vsel %vm107_vm0, %v4321_v12, 0.0 }
 0x5e0   :  { %v2957_v33 = vpop.f32.mrf.mxu0  ;;  %v4396_v7 = vsel %vm107_vm0, %v4324_v8, 0.0 }
 0x5e1   :  { %v2958_v52 = vadd.f32 %v9385_v45, %v2957_v33  ;;  %v4194_v33 = vsel %vm107_vm0, %v9646_v56, 0.0 }
 0x5e2   :  { %v2959_v57 = vpop.f32.mrf.mxu0 }
 0x5e3   :  { %2996 = vst.msk [vmem:[%s11430_s9 + $0xf0] sm:$0xff] %vm107_vm0, %v2958_v52  ;;  %v4323_v52 = vmul.f32 %v9656_v30, %v9656_v30 }
 0x5e4   :  { %v2962_v50 = vpop.f32.mrf.mxu0 }
 0x5e5   :  { %v2963_v3 = vadd.f32 %v9385_v45, %v2962_v50  ;;  %v4389_v50 = vadd.f32 %v4388_v55, %v4387_v44  ;;  %v4404_v55 = vsel %vm107_vm0, %v4328_v10, 0.0 }
 0x5e6   :  { %v2964_v6 = vpop.f32.mrf.mxu0 }
 0x5e7   :  { %2997 = vst.msk [vmem:[%s11430_s9 + $0xf8] sm:$0xff] %vm107_vm0, %v2963_v3  ;;  %v4193_v3 = vadd.f32 %v4192_v32, %v4191_v18  ;;  %v9681_v6 = vld [vmem:[%s11430_s9 + $0x50] sm:$0xff] }
 0x5e8   :  { %v3926_v11 = vpop.f32.mrf.mxu0  ;;  %v4325_v47 = vmul.f32 %v9681_v6, %v9681_v6 }
 0x5e9   :  { %v3927_v15 = vadd.f32 %v9385_v45, %v3926_v11  ;;  %v4195_v9 = vadd.f32 %v4194_v33, %v4193_v3 }
 0x5ea   :  { %v3928_v4 = vpop.f32.mrf.mxu0  ;;  %v4398_v14 = vsel %vm107_vm0, %v4325_v47, 0.0 }
 0x5eb   :  { %4085 = vst.msk [vmem:[%s11430_s9 + $0x100] sm:$0xff] %vm107_vm0, %v3927_v15  ;;  %v4392_v15 = vsel %vm107_vm0, %v4322_v22, 0.0  ;;  %v4196_v4 = vsel %vm107_vm0, %v9656_v30, 0.0  ;;  %v4330_v22 = vmul.f32 %v9745_v51, %v9745_v51 }
 0x5ec   :  { %v3931_v17 = vpop.f32.mrf.mxu0  ;;  %v4197_v58 = vadd.f32 %v4196_v4, %v4195_v9 }
 0x5ed   :  { %v3932_v40 = vadd.f32 %v9385_v45, %v3931_v17  ;;  %v4391_v17 = vadd.f32 %v4390_v61, %v4389_v50  ;;  %v4408_v8 = vsel %vm107_vm0, %v4330_v22, 0.0 }
 0x5ee   :  { %v3933_v49 = vpop.f32.mrf.mxu0  ;;  %v4199_v43 = vadd.f32 %v4198_v38, %v4197_v58  ;;  %v9795_v38 = vld [vmem:[%s11430_s9 + $0x98] sm:$0xff] }
 0x5ef   :  { %4086 = vst.msk [vmem:[%s11430_s9 + $0x108] sm:$0xff] %vm107_vm0, %v3932_v40  ;;  %v9695_v40 = vld [vmem:[%s11430_s9 + $0x58] sm:$0xff]  ;;  %v4394_v49 = vsel %vm107_vm0, %v4323_v52, 0.0  ;;  %v4210_v52 = vsel %vm107_vm0, %v9745_v51, 0.0 }
 0x5f0   :  { %v3936_v39 = vpop.f32.mrf.mxu0  ;;  %v4326_v35 = vmul.f32 %v9695_v40, %v9695_v40  ;;  %v4202_v5 = vsel %vm107_vm0, %v9695_v40, 0.0 }
 0x5f1   :  { %v3937_v23 = vadd.f32 %v9385_v45, %v3936_v39  ;;  %v4393_v39 = vadd.f32 %v4392_v15, %v4391_v17  ;;  %v9781_v15 = vld [vmem:[%s11430_s9 + $0x90] sm:$0xff]  ;;  %v4212_v17 = vsel %vm107_vm0, %v9756_v20, 0.0 }
 0x5f2   :  { %v3938_v36 = vpop.f32.mrf.mxu0  ;;  %v4400_v27 = vsel %vm107_vm0, %v4326_v35, 0.0  ;;  %v4333_v58 = vmul.f32 %v9781_v15, %v9781_v15  ;;  %v9806_v35 = vld [vmem:[%s11430_s9 + $0xa0] sm:$0xff] }
 0x5f3   :  { %4087 = vst.msk [vmem:[%s11430_s9 + $0x110] sm:$0xff] %vm107_vm0, %v3937_v23  ;;  %v4200_v36 = vsel %vm107_vm0, %v9681_v6, 0.0  ;;  %v4395_v34 = vadd.f32 %v4394_v49, %v4393_v39 }
 0x5f4   :  { %v3941_v62 = vpop.f32.mrf.mxu0  ;;  %v4201_v16 = vadd.f32 %v4200_v36, %v4199_v43 }
 0x5f5   :  { %v3942_v48 = vadd.f32 %v9385_v45, %v3941_v62  ;;  %v4327_v62 = vmul.f32 %v9706_v24, %v9706_v24  ;;  %v4397_v0 = vadd.f32 %v4396_v7, %v4395_v34 }
 0x5f6   :  { %v3943_v26 = vpop.f32.mrf.mxu0  ;;  %v4203_v2 = vadd.f32 %v4202_v5, %v4201_v16  ;;  %v4414_v16 = vsel %vm107_vm0, %v4333_v58, 0.0  ;;  %v9881_v58 = vld [vmem:[%s11430_s9 + $0xd0] sm:$0xff] }
 0x5f7   :  { %4088 = vst.msk [vmem:[%s11430_s9 + $0x118] sm:$0xff] %vm107_vm0, %v3942_v48  ;;  %v9731_v48 = vld [vmem:[%s11430_s9 + $0x70] sm:$0xff]  ;;  %v4204_v26 = vsel %vm107_vm0, %v9706_v24, 0.0  ;;  %v4399_v25 = vadd.f32 %v4398_v14, %v4397_v0  ;;  %v4334_v14 = vmul.f32 %v9795_v38, %v9795_v38 }
 0x5f8   :  { %v3946_v41 = vpop.f32.mrf.mxu0  ;;  %v4329_v19 = vmul.f32 %v9731_v48, %v9731_v48  ;;  %v4205_v37 = vadd.f32 %v4204_v26, %v4203_v2  ;;  %v4208_v32 = vsel %vm107_vm0, %v9731_v48, 0.0  ;;  %v9831_v2 = vld [vmem:[%s11430_s9 + $0xb0] sm:$0xff] }
 0x5f9   :  { %v3947_v29 = vadd.f32 %v9385_v45, %v3946_v41  ;;  %v4402_v41 = vsel %vm107_vm0, %v4327_v62, 0.0  ;;  %v4337_v22 = vmul.f32 %v9831_v2, %v9831_v2 }
 0x5fa   :  { %v3948_v59 = vpop.f32.mrf.mxu0  ;;  %v4207_v18 = vadd.f32 %v4206_v21, %v4205_v37  ;;  %v4406_v33 = vsel %vm107_vm0, %v4329_v19, 0.0  ;;  %v4220_v21 = vsel %vm107_vm0, %v9806_v35, 0.0  ;;  %v9845_v37 = vld [vmem:[%s11430_s9 + $0xb8] sm:$0xff] }
 0x5fb   :  { %4089 = vst.msk [vmem:[%s11430_s9 + $0x120] sm:$0xff] %vm107_vm0, %v3947_v29  ;;  %v4401_v29 = vadd.f32 %v4400_v27, %v4399_v25  ;;  %v4335_v27 = vmul.f32 %v9806_v35, %v9806_v35 }
 0x5fc   :  { %v3951_v42 = vpop.f32.mrf.mxu0 }
 0x5fd   :  { %v3952_v57 = vadd.f32 %v9385_v45, %v3951_v42  ;;  %v4403_v44 = vadd.f32 %v4402_v41, %v4401_v29  ;;  %v9770_v42 = vld [vmem:[%s11430_s9 + $0x88] sm:$0xff]  ;;  %v4416_v41 = vsel %vm107_vm0, %v4334_v14, 0.0  ;;  %v9895_v14 = vld [vmem:[%s11430_s9 + $0xd8] sm:$0xff] }
 0x5fe   :  { %v3953_v11 = vpop.f32.mrf.mxu0  ;;  %v4332_v9 = vmul.f32 %v9770_v42, %v9770_v42  ;;  %v4214_v39 = vsel %vm107_vm0, %v9770_v42, 0.0 }
 0x5ff   :  { %4090 = vst.msk [vmem:[%s11430_s9 + $0x128] sm:$0xff] %vm107_vm0, %v3952_v57  ;;  %v4331_v57 = vmul.f32 %v9756_v20, %v9756_v20  ;;  %v4405_v3 = vadd.f32 %v4404_v55, %v4403_v44  ;;  %v4209_v11 = vadd.f32 %v4208_v32, %v4207_v18  ;;  %v4418_v55 = vsel %vm107_vm0, %v4335_v27, 0.0 }
 0x600   :  { %v3956_v53 = vpop.f32.mrf.mxu0  ;;  %v4412_v43 = vsel %vm107_vm0, %v4332_v9, 0.0  ;;  %v4422_v9 = vsel %vm107_vm0, %v4337_v22, 0.0 }
 0x601   :  { %v3957_v54 = vadd.f32 %v9385_v45, %v3956_v53  ;;  %v4407_v53 = vadd.f32 %v4406_v33, %v4405_v3  ;;  %v4211_v49 = vadd.f32 %v4210_v52, %v4209_v11  ;;  %v9856_v33 = vld [vmem:[%s11430_s9 + $0xc0] sm:$0xff]  ;;  %v4338_v3 = vmul.f32 %v9845_v37, %v9845_v37 }
 0x602   :  { %v3958_v23 = vpop.f32.mrf.mxu0 }
 0x603   :  { %4091 = vst.msk [vmem:[%s11430_s9 + $0x130] sm:$0xff] %vm107_vm0, %v3957_v54  ;;  %v4410_v54 = vsel %vm107_vm0, %v4331_v57, 0.0  ;;  %v4409_v7 = vadd.f32 %v4408_v8, %v4407_v53  ;;  %v4213_v36 = vadd.f32 %v4212_v17, %v4211_v49  ;;  %v9870_v8 = vld [vmem:[%s11430_s9 + $0xc8] sm:$0xff]  ;;  %v4226_v53 = vsel %vm107_vm0, %v9845_v37, 0.0 }
 0x604   :  { %v3961_v28 = vpop.f32.mrf.mxu0  ;;  %v4339_v49 = vmul.f32 %v9856_v33, %v9856_v33 }
 0x605   :  { %v3962_v1 = vadd.f32 %v9385_v45, %v3961_v28  ;;  %v4216_v28 = vsel %vm107_vm0, %v9781_v15, 0.0  ;;  %v4411_v5 = vadd.f32 %v4410_v54, %v4409_v7  ;;  %v4215_v62 = vadd.f32 %v4214_v39, %v4213_v36 }
 0x606   :  { %v3963_v60 = vpop.f32.mrf.mxu0  ;;  %v4424_v7 = vsel %vm107_vm0, %v4338_v3, 0.0  ;;  %v4228_v36 = vsel %vm107_vm0, %v9856_v33, 0.0 }
 0x607   :  { %4092 = vst.msk [vmem:[%s11430_s9 + $0x138] sm:$0xff] %vm107_vm0, %v3962_v1  ;;  %v9820_v1 = vld [vmem:[%s11430_s9 + $0xa8] sm:$0xff]  ;;  %v4218_v60 = vsel %vm107_vm0, %v9795_v38, 0.0  ;;  %v4413_v10 = vadd.f32 %v4412_v43, %v4411_v5  ;;  %v4217_v25 = vadd.f32 %v4216_v28, %v4215_v62  ;;  %v4426_v62 = vsel %vm107_vm0, %v4339_v49, 0.0 }
 0x608   :  { %v3966_v13 = vpop.f32.mrf.mxu0  ;;  %v4336_v19 = vmul.f32 %v9820_v1, %v9820_v1  ;;  %v4222_v32 = vsel %vm107_vm0, %v9820_v1, 0.0 }
 0x609   :  { %v3967_v12 = vadd.f32 %v9385_v45, %v3966_v13  ;;  %v4219_v29 = vadd.f32 %v4218_v60, %v4217_v25 }
 0x60a   :  { %v3968_v59 = vpop.f32.mrf.mxu0  ;;  %v4420_v57 = vsel %vm107_vm0, %v4336_v19, 0.0 }
 0x60b   :  { %4093 = vst.msk [vmem:[%s11430_s9 + $0x140] sm:$0xff] %vm107_vm0, %v3967_v12  ;;  %v4415_v12 = vadd.f32 %v4414_v16, %v4413_v10  ;;  %v4341_v16 = vmul.f32 %v9881_v58, %v9881_v58  ;;  %v9906_v10 = vld [vmem:[%s11430_s9 + $0xe0] sm:$0xff] }
 0x60c   :  { %v3971_v61 = vpop.f32.mrf.mxu0  ;;  %v4343_v22 = vmul.f32 %v9906_v10, %v9906_v10  ;;  %v4236_v3 = vsel %vm107_vm0, %v9906_v10, 0.0 }
 0x60d   :  { %v3972_v50 = vadd.f32 %v9385_v45, %v3971_v61  ;;  %v4417_v18 = vadd.f32 %v4416_v41, %v4415_v12  ;;  %v4221_v61 = vadd.f32 %v4220_v21, %v4219_v29  ;;  %v4232_v41 = vsel %vm107_vm0, %v9881_v58, 0.0  ;;  %v9920_v29 = vld [vmem:[%s11430_s9 + $0xe8] sm:$0xff] }
 0x60e   :  { %v3973_v4 = vpop.f32.mrf.mxu0  ;;  %v4342_v21 = vmul.f32 %v9895_v14, %v9895_v14  ;;  %v4434_v49 = vsel %vm107_vm0, %v4343_v22, 0.0 }
 0x60f   :  { %4094 = vst.msk [vmem:[%s11430_s9 + $0x148] sm:$0xff] %vm107_vm0, %v3972_v50  ;;  %v4224_v50 = vsel %vm107_vm0, %v9831_v2, 0.0  ;;  %v4419_v11 = vadd.f32 %v4418_v55, %v4417_v18  ;;  %v4223_v4 = vadd.f32 %v4222_v32, %v4221_v61  ;;  %v4430_v55 = vsel %vm107_vm0, %v4341_v16, 0.0  ;;  %v9970_v16 = vld [vmem:[%s11430_s9 + $0x108] sm:$0xff] }
 0x610   :  { %v3976_v47 = vpop.f32.mrf.mxu0  ;;  %v4234_v32 = vsel %vm107_vm0, %v9895_v14, 0.0 }
 0x611   :  { %v3977_v23 = vadd.f32 %v9385_v45, %v3976_v47  ;;  %v4421_v54 = vadd.f32 %v4420_v57, %v4419_v11  ;;  %v4225_v39 = vadd.f32 %v4224_v50, %v4223_v4  ;;  %v4432_v50 = vsel %vm107_vm0, %v4342_v21, 0.0 }
 0x612   :  { %v3978_v34 = vpop.f32.mrf.mxu0  ;;  %v4344_v11 = vmul.f32 %v9920_v29, %v9920_v29 }
 0x613   :  { %4095 = vst.msk [vmem:[%s11430_s9 + $0x150] sm:$0xff] %vm107_vm0, %v3977_v23  ;;  %v4340_v34 = vmul.f32 %v9870_v8, %v9870_v8  ;;  %v4423_v43 = vadd.f32 %v4422_v9, %v4421_v54  ;;  %v4227_v28 = vadd.f32 %v4226_v53, %v4225_v39  ;;  %v9945_v9 = vld [vmem:[%s11430_s9 + $0xf8] sm:$0xff] }
 0x614   :  { %v3981_v0 = vpop.f32.mrf.mxu0 }
 0x615   :  { %v3982_v26 = vadd.f32 %v9385_v45, %v3981_v0  ;;  %v4230_v0 = vsel %vm107_vm0, %v9870_v8, 0.0  ;;  %v4425_v27 = vadd.f32 %v4424_v7, %v4423_v43  ;;  %v4436_v43 = vsel %vm107_vm0, %v4344_v11, 0.0 }
 0x616   :  { %v3983_v13 = vpop.f32.mrf.mxu0 }
 0x617   :  { %4096 = vst.msk [vmem:[%s11430_s9 + $0x158] sm:$0xff] %vm107_vm0, %v3982_v26  ;;  %v4229_v26 = vadd.f32 %v4228_v36, %v4227_v28  ;;  %v4428_v13 = vsel %vm107_vm0, %v4340_v34, 0.0  ;;  %v4427_v19 = vadd.f32 %v4426_v62, %v4425_v27  ;;  %v9956_v36 = vld [vmem:[%s11430_s9 + $0x100] sm:$0xff] }
 0x618   :  { %v3986_v59 = vpop.f32.mrf.mxu0 }
 0x619   :  { %v3987_v44 = vadd.f32 %v9385_v45, %v3986_v59  ;;  %v4231_v12 = vadd.f32 %v4230_v0, %v4229_v26  ;;  %v4429_v18 = vadd.f32 %v4428_v13, %v4427_v19  ;;  %v4242_v26 = vsel %vm107_vm0, %v9945_v9, 0.0  ;;  %v9981_v19 = vld [vmem:[%s11430_s9 + $0x110] sm:$0xff] }
 0x61a   :  { %v3988_v52 = vpop.f32.mrf.mxu0 }
 0x61b   :  { %4097 = vst.msk [vmem:[%s11430_s9 + $0x160] sm:$0xff] %vm107_vm0, %v3987_v44  ;;  %v4233_v61 = vadd.f32 %v4232_v41, %v4231_v12  ;;  %v9931_v52 = vld [vmem:[%s11430_s9 + $0xf0] sm:$0xff]  ;;  %v4431_v4 = vadd.f32 %v4430_v55, %v4429_v18  ;;  %v4244_v55 = vsel %vm107_vm0, %v9956_v36, 0.0  ;;  %v9995_v18 = vld [vmem:[%s11430_s9 + $0x118] sm:$0xff] }
 0x61c   :  { %v3991_v17 = vpop.f32.mrf.mxu0  ;;  %v4345_v54 = vmul.f32 %v9931_v52, %v9931_v52  ;;  %v4240_v28 = vsel %vm107_vm0, %v9931_v52, 0.0 }
 0x61d   :  { %v3992_v47 = vadd.f32 %v9385_v45, %v3991_v17  ;;  %v4235_v17 = vadd.f32 %v4234_v32, %v4233_v61  ;;  %v4348_v32 = vmul.f32 %v9970_v16, %v9970_v16 }
 0x61e   :  { %v3993_v23 = vpop.f32.mrf.mxu0  ;;  %v4438_v27 = vsel %vm107_vm0, %v4345_v54, 0.0  ;;  %v4248_v54 = vsel %vm107_vm0, %v9981_v19, 0.0 }
 0x61f   :  { %4098 = vst.msk [vmem:[%s11430_s9 + $0x168] sm:$0xff] %vm107_vm0, %v3992_v47  ;;  %v4238_v47 = vsel %vm107_vm0, %v9920_v29, 0.0  ;;  %v4433_v23 = vadd.f32 %v4432_v50, %v4431_v4  ;;  %v4237_v7 = vadd.f32 %v4236_v3, %v4235_v17  ;;  %v4246_v50 = vsel %vm107_vm0, %v9970_v16, 0.0 }
 0x620   :  { %v3996_v5 = vpop.f32.mrf.mxu0  ;;  %v4349_v3 = vmul.f32 %v9981_v19, %v9981_v19 }
 0x621   :  { %v3997_v60 = vadd.f32 %v9385_v45, %v3996_v5  ;;  %v4346_v5 = vmul.f32 %v9945_v9, %v9945_v9  ;;  %v4435_v62 = vadd.f32 %v4434_v49, %v4433_v23  ;;  %v4239_v0 = vadd.f32 %v4238_v47, %v4237_v7 }
 0x622   :  { %v3998_v25 = vpop.f32.mrf.mxu0  ;;  %v4444_v47 = vsel %vm107_vm0, %v4348_v32, 0.0 }
 0x623   :  { %4099 = vst.msk [vmem:[%s11430_s9 + $0x170] sm:$0xff] %vm107_vm0, %v3997_v60  ;;  %v4347_v25 = vmul.f32 %v9956_v36, %v9956_v36  ;;  %v4437_v41 = vadd.f32 %v4436_v43, %v4435_v62  ;;  %v4241_v21 = vadd.f32 %v4240_v28, %v4239_v0  ;;  %v4446_v28 = vsel %vm107_vm0, %v4349_v3, 0.0 }
 0x624   :  { %v4001_v59 = vpop.f32.mrf.mxu0 }
 0x625   :  { %v4002_v44 = vadd.f32 %v9385_v45, %v4001_v59  ;;  %v4440_v59 = vsel %vm107_vm0, %v4346_v5, 0.0  ;;  %v4439_v22 = vadd.f32 %v4438_v27, %v4437_v41  ;;  %v4250_v5 = vsel %vm107_vm0, %v9995_v18, 0.0 }
 0x626   :  { %v4003_v57 = vpop.f32.mrf.mxu0 }
 0x627   :  { %4100 = vst.msk [vmem:[%s11430_s9 + $0x178] sm:$0xff] %vm107_vm0, %v4002_v44  ;;  %v4243_v44 = vadd.f32 %v4242_v26, %v4241_v21  ;;  %v4442_v57 = vsel %vm107_vm0, %v4347_v25, 0.0  ;;  %v4441_v4 = vadd.f32 %v4440_v59, %v4439_v22  ;;  %v10031_v26 = vld [vmem:[%s11430_s9 + $0x130] sm:$0xff] }
 0x628   :  { %v4006_v53 = vpop.f32.mrf.mxu0 }
 0x629   :  { %v4007_v39 = vadd.f32 %v9385_v45, %v4006_v53  ;;  %v4245_v17 = vadd.f32 %v4244_v55, %v4243_v44  ;;  %v10006_v53 = vld [vmem:[%s11430_s9 + $0x120] sm:$0xff]  ;;  %v4443_v23 = vadd.f32 %v4442_v57, %v4441_v4  ;;  %v10045_v55 = vld [vmem:[%s11430_s9 + $0x138] sm:$0xff] }
 0x62a   :  { %v4008_v34 = vpop.f32.mrf.mxu0  ;;  %v4351_v62 = vmul.f32 %v10006_v53, %v10006_v53  ;;  %v4252_v41 = vsel %vm107_vm0, %v10006_v53, 0.0 }
 0x62b   :  { %4101 = vst.msk [vmem:[%s11430_s9 + $0x180] sm:$0xff] %vm107_vm0, %v4007_v39  ;;  %v4350_v39 = vmul.f32 %v9995_v18, %v9995_v18  ;;  %v4247_v7 = vadd.f32 %v4246_v50, %v4245_v17  ;;  %v10020_v34 = vld [vmem:[%s11430_s9 + $0x128] sm:$0xff] }
 0x62c   :  { %v4011_v60 = vpop.f32.mrf.mxu0  ;;  %v4352_v21 = vmul.f32 %v10020_v34, %v10020_v34  ;;  %v4450_v22 = vsel %vm107_vm0, %v4351_v62, 0.0  ;;  %v4254_v44 = vsel %vm107_vm0, %v10020_v34, 0.0 }
 0x62d   :  { %v4012_v13 = vadd.f32 %v9385_v45, %v4011_v60  ;;  %v4445_v60 = vadd.f32 %v4444_v47, %v4443_v23  ;;  %v4249_v27 = vadd.f32 %v4248_v54, %v4247_v7  ;;  %v4354_v47 = vmul.f32 %v10045_v55, %v10045_v55  ;;  %v10070_v23 = vld [vmem:[%s11430_s9 + $0x148] sm:$0xff] }
 0x62e   :  { %v4013_v12 = vpop.f32.mrf.mxu0  ;;  %v4452_v17 = vsel %vm107_vm0, %v4352_v21, 0.0  ;;  %v4356_v21 = vmul.f32 %v10070_v23, %v10070_v23 }
 0x62f   :  { %4102 = vst.msk [vmem:[%s11430_s9 + $0x188] sm:$0xff] %vm107_vm0, %v4012_v13  ;;  %v4448_v13 = vsel %vm107_vm0, %v4350_v39, 0.0  ;;  %v4447_v12 = vadd.f32 %v4446_v28, %v4445_v60  ;;  %v4251_v59 = vadd.f32 %v4250_v5, %v4249_v27  ;;  %v4258_v28 = vsel %vm107_vm0, %v10045_v55, 0.0  ;;  %v10081_v27 = vld [vmem:[%s11430_s9 + $0x150] sm:$0xff] }
 0x630   :  { %v4016_v61 = vpop.f32.mrf.mxu0 }
 0x631   :  { %v4017_v11 = vadd.f32 %v9385_v45, %v4016_v61  ;;  %v4353_v61 = vmul.f32 %v10031_v26, %v10031_v26  ;;  %v4449_v50 = vadd.f32 %v4448_v13, %v4447_v12  ;;  %v4253_v3 = vadd.f32 %v4252_v41, %v4251_v59  ;;  %v10095_v59 = vld [vmem:[%s11430_s9 + $0x158] sm:$0xff] }
 0x632   :  { %v4018_v49 = vpop.f32.mrf.mxu0  ;;  %v4456_v13 = vsel %vm107_vm0, %v4354_v47, 0.0  ;;  %v4460_v47 = vsel %vm107_vm0, %v4356_v21, 0.0  ;;  %v10136_v21 = vld [vmem:[%s11430_s9 + $0x170] sm:$0xff] }
 0x633   :  { %4103 = vst.msk [vmem:[%s11430_s9 + $0x190] sm:$0xff] %vm107_vm0, %v4017_v11  ;;  %v10056_v11 = vld [vmem:[%s11430_s9 + $0x140] sm:$0xff]  ;;  %v4256_v49 = vsel %vm107_vm0, %v10031_v26, 0.0  ;;  %v4451_v54 = vadd.f32 %v4450_v22, %v4449_v50  ;;  %v4255_v39 = vadd.f32 %v4254_v44, %v4253_v3  ;;  %v4262_v44 = vsel %vm107_vm0, %v10070_v23, 0.0  ;;  %12065 = vst [vmem:[#allocation34_spill] sm:$0xff] %v10136_v21 }
 0x634   :  { %v4021_v43 = vpop.f32.mrf.mxu0  ;;  %v4355_v5 = vmul.f32 %v10056_v11, %v10056_v11  ;;  %v4260_v41 = vsel %vm107_vm0, %v10056_v11, 0.0 }
 0x635   :  { %v4022_v0 = vadd.f32 %v9385_v45, %v4021_v43  ;;  %v4454_v43 = vsel %vm107_vm0, %v4353_v61, 0.0  ;;  %v4257_v60 = vadd.f32 %v4256_v49, %v4255_v39  ;;  %v4357_v61 = vmul.f32 %v10081_v27, %v10081_v27 }
 0x636   :  { %v4023_v25 = vpop.f32.mrf.mxu0  ;;  %v4458_v22 = vsel %vm107_vm0, %v4355_v5, 0.0  ;;  %v4358_v39 = vmul.f32 %v10095_v59, %v10095_v59 }
 0x637   :  { %4104 = vst.msk [vmem:[%s11430_s9 + $0x198] sm:$0xff] %vm107_vm0, %v4022_v0  ;;  %v4453_v0 = vadd.f32 %v4452_v17, %v4451_v54  ;;  %v4259_v12 = vadd.f32 %v4258_v28, %v4257_v60  ;;  %v10111_v17 = vld [vmem:[%s11430_s9 + $0x160] sm:$0xff]  ;;  %v4264_v54 = vsel %vm107_vm0, %v10081_v27, 0.0  ;;  %v10125_v28 = vld [vmem:[%s11430_s9 + $0x168] sm:$0xff] }
 0x638   :  { %v4026_v32 = vpop.f32.mrf.mxu0  ;;  %v4359_v60 = vmul.f32 %v10111_v17, %v10111_v17 }
 0x639   :  { %v4027_v57 = vadd.f32 %v9385_v45, %v4026_v32 }
 0x63a   :  { %v4028_v4 = vpop.f32.mrf.mxu0 }
 0x63b   :  { %4105 = vst.msk [vmem:[%s11430_s9 + $0x1a0] sm:$0xff] %vm107_vm0, %v4027_v57  ;;  %v10105_v57 = vld [vmem:[%s11429_s6] ss:$0 sm:$0xff]  ;;  %v4261_v4 = vadd.f32 %v4260_v41, %v4259_v12  ;;  %v4464_v12 = vsel %vm107_vm0, %v4358_v39, 0.0 }
 0x63c   :  { %v4031_v7 = vpop.f32.mrf.mxu0 }
 0x63d   :  { %v4032_v62 = vadd.f32 %v9385_v45, %v4031_v7  ;;  %v4455_v45 = vadd.f32 %v4454_v43, %v4453_v0  ;;  %v4263_v43 = vadd.f32 %v4262_v44, %v4261_v4  ;;  %v4266_v0 = vsel %vm107_vm0, %v10095_v59, 0.0 }
 0x63e   :  { %v4033_v25 = vpop.f32.mrf.mxu0  ;;  %v4466_v4 = vsel %vm107_vm0, %v4359_v60, 0.0 }
 0x63f   :  { %4106 = vst.msk [vmem:[%s11430_s9 + $0x1a8] sm:$0xff] %vm107_vm0, %v4032_v62  ;;  %v4457_v3 = vadd.f32 %v4456_v13, %v4455_v45  ;;  %v4462_v62 = vsel %vm107_vm0, %v4357_v61, 0.0  ;;  %v4265_v41 = vadd.f32 %v4264_v54, %v4263_v43  ;;  %v10161_v43 = vld [vmem:[%s11430_s9 + $0x180] sm:$0xff] }
 0x640   :  { %v4036_v32 = vpop.f32.mrf.mxu0  ;;  %12067 = vst [vmem:[#allocation17_spill] sm:$0xff] %v10161_v43 }
 0x641   :  { %v4037_v50 = vadd.f32 %v10105_v57, %v4036_v32  ;;  %v4459_v7 = vadd.f32 %v4458_v22, %v4457_v3  ;;  %v4268_v32 = vsel %vm107_vm0, %v10111_v17, 0.0  ;;  %v4360_v22 = vmul.f32 %v10125_v28, %v10125_v28 }
 0x642   :  { %v4038_v49 = vpop.f32.mrf.mxu0  ;;  %v4267_v61 = vadd.f32 %v4266_v0, %v4265_v41  ;;  %v4272_v0 = vsel %vm107_vm0, %v10136_v21, 0.0  ;;  %v10175_v41 = vld [vmem:[%s11430_s9 + $0x188] sm:$0xff] }
 0x643   :  { %4107 = vst.msk [vmem:[%s11430_s9 + $0x1b0] sm:$0xff] %vm107_vm0, %v4037_v50  ;;  %v4461_v13 = vadd.f32 %v4460_v47, %v4459_v7  ;;  %v10150_v50 = vld [vmem:[%s11430_s9 + $0x178] sm:$0xff]  ;;  %v4270_v49 = vsel %vm107_vm0, %v10125_v28, 0.0  ;;  %v4361_v47 = vmul.f32 %v10136_v21, %v10136_v21  ;;  %12068 = vst [vmem:[#allocation83_spill] sm:$0xff] %v10175_v41 }
 0x644   :  { %v4041_v5 = vpop.f32.mrf.mxu0  ;;  %12066 = vst [vmem:[#allocation18_spill] sm:$0xff] %v10150_v50  ;;  %v4269_v7 = vadd.f32 %v4268_v32, %v4267_v61  ;;  %v4362_v60 = vmul.f32 %v10150_v50, %v10150_v50  ;;  %v4274_v32 = vsel %vm107_vm0, %v10150_v50, 0.0 }
 0x645   :  { %v4042_v25 = vadd.f32 %v10105_v57, %v4041_v5  ;;  %v4463_v44 = vadd.f32 %v4462_v62, %v4461_v13  ;;  %v4468_v62 = vsel %vm107_vm0, %v4360_v22, 0.0  ;;  %v4363_v22 = vmul.f32 %v10161_v43, %v10161_v43 }
 0x646   :  { %v4043_v45 = vpop.f32.mrf.mxu0  ;;  %v4271_v13 = vadd.f32 %v4270_v49, %v4269_v7 }
 0x647   :  { %4108 = vst.msk [vmem:[%s11430_s9 + $0x1b8] sm:$0xff] %vm107_vm0, %v4042_v25  ;;  %v4465_v39 = vadd.f32 %v4464_v12, %v4463_v44  ;;  %v4470_v12 = vsel %vm107_vm0, %v4361_v47, 0.0  ;;  %v4276_v47 = vsel %vm107_vm0, %v10161_v43, 0.0 }
 0x648   :  { %v4046_v3 = vpop.f32.mrf.mxu0 }
 0x649   :  { %v4047_v54 = vadd.f32 %v10105_v57, %v4046_v3  ;;  %v4467_v25 = vadd.f32 %v4466_v4, %v4465_v39  ;;  %v4273_v3 = vadd.f32 %v4272_v0, %v4271_v13  ;;  %v10186_v4 = vld [vmem:[%s11430_s9 + $0x190] sm:$0xff]  ;;  %v4364_v39 = vmul.f32 %v10175_v41, %v10175_v41 }
 0x64a   :  { %v4048_v5 = vpop.f32.mrf.mxu0  ;;  %12069 = vst [vmem:[#allocation68_spill] sm:$0xff] %v10186_v4  ;;  %v4365_v13 = vmul.f32 %v10186_v4, %v10186_v4 }
 0x64b   :  { %4109 = vst.msk [vmem:[%s11430_s9 + $0x1c0] sm:$0xff] %vm107_vm0, %v4047_v54  ;;  %v4469_v61 = vadd.f32 %v4468_v62, %v4467_v25  ;;  %v4472_v54 = vsel %vm107_vm0, %v4362_v60, 0.0  ;;  %v4275_v5 = vadd.f32 %v4274_v32, %v4273_v3  ;;  %v10200_v62 = vld [vmem:[%s11430_s9 + $0x198] sm:$0xff]  ;;  %v4474_v60 = vsel %vm107_vm0, %v4363_v22, 0.0 }
 0x64c   :  { %v4051_v45 = vpop.f32.mrf.mxu0  ;;  %12070 = vst [vmem:[#allocation57_spill] sm:$0xff] %v10200_v62  ;;  %v4278_v25 = vsel %vm107_vm0, %v10175_v41, 0.0  ;;  %v4280_v22 = vsel %vm107_vm0, %v10186_v4, 0.0  ;;  %v4366_v3 = vmul.f32 %v10200_v62, %v10200_v62 }
 0x64d   :  { %v4052_v44 = vadd.f32 %v10105_v57, %v4051_v45  ;;  %v4471_v7 = vadd.f32 %v4470_v12, %v4469_v61  ;;  %v10211_v12 = vld [vmem:[%s11430_s9 + $0x1a0] sm:$0xff]  ;;  %v4476_v61 = vsel %vm107_vm0, %v4364_v39, 0.0  ;;  %v4478_v39 = vsel %vm107_vm0, %v4365_v13, 0.0 }
 0x64e   :  { %v4053_v49 = vpop.f32.mrf.mxu0  ;;  %12071 = vst [vmem:[#allocation16_spill] sm:$0xff] %v10211_v12  ;;  %v4284_v13 = vsel %vm107_vm0, %v10211_v12, 0.0 }
 0x64f   :  { %4110 = vst.msk [vmem:[%s11430_s9 + $0x1c8] sm:$0xff] %vm107_vm0, %v4052_v44  ;;  %v4473_v49 = vadd.f32 %v4472_v54, %v4471_v7  ;;  %v4277_v44 = vadd.f32 %v4276_v47, %v4275_v5  ;;  %v10225_v7 = vld [vmem:[%s11430_s9 + $0x1a8] sm:$0xff] }
 0x650   :  { %v4056_v0 = vpop.f32.mrf.mxu0  ;;  %12072 = vst [vmem:[#allocation50_spill] sm:$0xff] %v10225_v7 }
 0x651   :  { %v4057_v45 = vadd.f32 %v10105_v57, %v4056_v0  ;;  %v4475_v54 = vadd.f32 %v4474_v60, %v4473_v49  ;;  %v4279_v47 = vadd.f32 %v4278_v25, %v4277_v44  ;;  %v4282_v0 = vsel %vm107_vm0, %v10200_v62, 0.0  ;;  %v10236_v60 = vld [vmem:[%s11430_s9 + $0x1b0] sm:$0xff] }
 0x652   :  { %v4058_v32 = vpop.f32.mrf.mxu0  ;;  %12073 = vst [vmem:[#allocation70_spill] sm:$0xff] %v10236_v60  ;;  %v4480_v49 = vsel %vm107_vm0, %v4366_v3, 0.0  ;;  %v4368_v44 = vmul.f32 %v10225_v7, %v10225_v7 }
 0x653   :  { %4111 = vst.msk [vmem:[%s11430_s9 + $0x1d0] sm:$0xff] %vm107_vm0, %v4057_v45  ;;  %v4367_v32 = vmul.f32 %v10211_v12, %v10211_v12  ;;  %v4477_v41 = vadd.f32 %v4476_v61, %v4475_v54  ;;  %v4281_v45 = vadd.f32 %v4280_v22, %v4279_v47  ;;  %v10250_v54 = vld [vmem:[%s11430_s9 + $0x1b8] sm:$0xff] }
 0x654   :  { %v4061_v5 = vpop.f32.mrf.mxu0  ;;  %12074 = vst [vmem:[#allocation72_spill] sm:$0xff] %v10250_v54 }
 0x655   :  { %v4062_v4 = vadd.f32 %v10105_v57, %v4061_v5  ;;  %v4479_v61 = vadd.f32 %v4478_v39, %v4477_v41  ;;  %v4283_v22 = vadd.f32 %v4282_v0, %v4281_v45  ;;  %v4482_v3 = vsel %vm107_vm0, %v4367_v32, 0.0  ;;  %v10261_v41 = vld [vmem:[%s11430_s9 + $0x1c0] sm:$0xff] }
 0x656   :  { %v4063_v25 = vpop.f32.mrf.mxu0  ;;  %v4286_v5 = vsel %vm107_vm0, %v10225_v7, 0.0  ;;  %12075 = vst [vmem:[#allocation59_spill] sm:$0xff] %v10261_v41  ;;  %v4484_v0 = vsel %vm107_vm0, %v4368_v44, 0.0  ;;  %v4288_v32 = vsel %vm107_vm0, %v10236_v60, 0.0  ;;  %v4370_v45 = vmul.f32 %v10250_v54, %v10250_v54 }
 0x657   :  { %4112 = vst.msk [vmem:[%s11430_s9 + $0x1d8] sm:$0xff] %vm107_vm0, %v4062_v4  ;;  %v4369_v25 = vmul.f32 %v10236_v60, %v10236_v60  ;;  %v4481_v62 = vadd.f32 %v4480_v49, %v4479_v61  ;;  %v4285_v4 = vadd.f32 %v4284_v13, %v4283_v22  ;;  %v10275_v61 = vld [vmem:[%s11430_s9 + $0x1c8] sm:$0xff]  ;;  %v4290_v60 = vsel %vm107_vm0, %v10250_v54, 0.0 }
 0x658   :  { %v4066_v47 = vpop.f32.mrf.mxu0  ;;  %12076 = vst [vmem:[#allocation15_spill] sm:$0xff] %v10275_v61 }
 0x659   :  { %v4067_v12 = vadd.f32 %v10105_v57, %v4066_v47  ;;  %v4483_v49 = vadd.f32 %v4482_v3, %v4481_v62  ;;  %v4287_v13 = vadd.f32 %v4286_v5, %v4285_v4  ;;  %v4486_v44 = vsel %vm107_vm0, %v4369_v25, 0.0 }
 0x65a   :  { %v4068_v39 = vpop.f32.mrf.mxu0  ;;  %v4371_v47 = vmul.f32 %v10261_v41, %v10261_v41  ;;  %v10286_v62 = vld [vmem:[%s11430_s9 + $0x1d0] sm:$0xff]  ;;  %v4292_v5 = vsel %vm107_vm0, %v10261_v41, 0.0  ;;  %v4372_v25 = vmul.f32 %v10275_v61, %v10275_v61  ;;  %v4488_v4 = vsel %vm107_vm0, %v4370_v45, 0.0 }
 0x65b   :  { %4113 = vst.msk [vmem:[%s11430_s9 + $0x1e0] sm:$0xff] %vm107_vm0, %v4067_v12  ;;  %v4485_v7 = vadd.f32 %v4484_v0, %v4483_v49  ;;  %12077 = vst [vmem:[#allocation35_spill] sm:$0xff] %v10286_v62  ;;  %v4289_v3 = vadd.f32 %v4288_v32, %v4287_v13 }
 0x65c   :  { %v4071_v22 = vpop.f32.mrf.mxu0  ;;  %v4490_v41 = vsel %vm107_vm0, %v4371_v47, 0.0 }
 0x65d   :  { %v4072_v39 = vadd.f32 %v10105_v57, %v4071_v22  ;;  %v4291_v32 = vadd.f32 %v4290_v60, %v4289_v3  ;;  %v4487_v13 = vadd.f32 %v4486_v44, %v4485_v7  ;;  %v4296_v7 = vsel %vm107_vm0, %v10286_v62, 0.0 }
 0x65e   :  { %v4073_v12 = vpop.f32.mrf.mxu0  ;;  %v10300_v49 = vld [vmem:[%s11430_s9 + $0x1d8] sm:$0xff] }
 0x65f   :  { %4114 = vst.msk [vmem:[%s11430_s9 + $0x1e8] sm:$0xff] %vm107_vm0, %v4072_v39  ;;  %12078 = vst [vmem:[#allocation60_spill] sm:$0xff] %v10300_v49  ;;  %v4294_v39 = vsel %vm107_vm0, %v10275_v61, 0.0  ;;  %v4373_v12 = vmul.f32 %v10286_v62, %v10286_v62  ;;  %v4293_v43 = vadd.f32 %v4292_v5, %v4291_v32  ;;  %v4489_v50 = vadd.f32 %v4488_v4, %v4487_v13 }
 0x660   :  { %v4076_v0 = vpop.f32.mrf.mxu0  ;;  %v4374_v60 = vmul.f32 %v10300_v49, %v10300_v49  ;;  %v4298_v5 = vsel %vm107_vm0, %v10300_v49, 0.0 }
 0x661   :  { %v4077_v22 = vadd.f32 %v10105_v57, %v4076_v0  ;;  %v4295_v47 = vadd.f32 %v4294_v39, %v4293_v43  ;;  %v4491_v3 = vadd.f32 %v4490_v41, %v4489_v50  ;;  %v4494_v32 = vsel %vm107_vm0, %v4373_v12, 0.0 }
 0x662   :  { %v4078_v54 = vpop.f32.mrf.mxu0  ;;  %v10311_v45 = vld [vmem:[%s11430_s9 + $0x1e0] sm:$0xff]  ;;  %v4496_v43 = vsel %vm107_vm0, %v4374_v60, 0.0 }
 0x663   :  { %12079 = vst [vmem:[#allocation14_spill] sm:$0xff] %v10311_v45  ;;  %4115 = vst.msk [vmem:[%s11430_s9 + $0x1f0] sm:$0xff] %vm107_vm0, %v4077_v22  ;;  %v4492_v54 = vsel %vm107_vm0, %v4372_v25, 0.0  ;;  %v4375_v4 = vmul.f32 %v10311_v45, %v10311_v45  ;;  %v4297_v22 = vadd.f32 %v4296_v7, %v4295_v47 }
 0x664   :  { %v4081_v44 = vpop.f32.mrf.mxu0  ;;  %v4493_v25 = vadd.f32 %v4492_v54, %v4491_v3 }
 0x665   :  { %v4082_v0 = vadd.f32 %v10105_v57, %v4081_v44  ;;  %v4300_v57 = vsel %vm107_vm0, %v10311_v45, 0.0  ;;  %v4299_v41 = vadd.f32 %v4298_v5, %v4297_v22 }
 0x666   :  { %v10331_v13 = vld [vmem:[%s11430_s9 + $0x1e8] sm:$0xff]  ;;  %v4083_v62 = vpop.f32.mrf.mxu0  ;;  %v4495_v39 = vadd.f32 %v4494_v32, %v4493_v25 }
 0x667   :  { %12080 = vst [vmem:[#allocation74_spill] sm:$0xff] %v10331_v13  ;;  %4116 = vst.msk [vmem:[%s11430_s9 + $0x1f8] sm:$0xff] %vm107_vm0, %v4082_v0  ;;  %v4376_v50 = vmul.f32 %v10331_v13, %v10331_v13  ;;  %v4302_v12 = vsel %vm107_vm0, %v10331_v13, 0.0  ;;  %v4498_v62 = vsel %vm107_vm0, %v4375_v4, 0.0  ;;  %v4301_v54 = vadd.f32 %v4300_v57, %v4299_v41 }
 0x668   :  { %v4497_v44 = vadd.f32 %v4496_v43, %v4495_v39 }
 0x669   :  { %v4500_v3 = vsel %vm107_vm0, %v4376_v50, 0.0  ;;  %v4303_v0 = vadd.f32 %v4302_v12, %v4301_v54 }
 0x66a   :  { %v10348_v7 = vld [vmem:[%s11430_s9 + $0x1f0] sm:$0xff]  ;;  %v4499_v5 = vadd.f32 %v4498_v62, %v4497_v44 }
 0x66b   :  { %12081 = vst [vmem:[#allocation62_spill] sm:$0xff] %v10348_v7  ;;  %v4304_v47 = vsel %vm107_vm0, %v10348_v7, 0.0  ;;  %v4377_v60 = vmul.f32 %v10348_v7, %v10348_v7 }
 0x66c   :  { %v4305_v22 = vadd.f32 %v4304_v47, %v4303_v0  ;;  %v4501_v25 = vadd.f32 %v4500_v3, %v4499_v5 }
 0x66d   :  { %v4502_v32 = vsel %vm107_vm0, %v4377_v60, 0.0 }
 0x66e   :  { %v10359_v4 = vld [vmem:[%s11430_s9 + $0x1f8] sm:$0xff]  ;;  %v4503_v39 = vadd.f32 %v4502_v32, %v4501_v25 }
 0x66f   :  { %12082 = vst [vmem:[#allocation13_spill] sm:$0xff] %v10359_v4  ;;  %v4306_v57 = vsel %vm107_vm0, %v10359_v4, 0.0  ;;  %v4378_v43 = vmul.f32 %v10359_v4, %v10359_v4 }
 0x670   :  { %v4307_v41 = vadd.f32 %v4306_v57, %v4305_v22  ;;  %v4516_v57 = vld [vmem:[%s11431_s7] sm:$0x1] }
 0x671   :  { %v4504_v50 = vsel %vm107_vm0, %v4378_v43, 0.0 }
 0x672   :  { %v4308_v12 = vrot.slane %v4307_v41, 4  ;;  %v4505_v62 = vadd.f32 %v4504_v50, %v4503_v39  ;;  %v5855_v50 = vld [vmem:[%s11430_s9 + $0x8] sm:$0xff] }
 0x674   :  { %v4309_v54 = vadd.f32 %v4308_v12, %v4307_v41  ;;  %v4506_v44 = vrot.slane %v4505_v62, 4  ;;  %v5856_v12 = vld [vmem:[%s11430_s9 + $0x10] sm:$0xff] }
 0x676   :  { %v4310_v60 = vrot.slane %v4309_v54, 2  ;;  %v4507_v7 = vadd.f32 %v4506_v44, %v4505_v62 }
 0x678   :  { %v4311_v13 = vadd.f32 %v4310_v60, %v4309_v54  ;;  %v4508_v45 = vrot.slane %v4507_v7, 2  ;;  %v5857_v54 = vld [vmem:[%s11430_s9 + $0x18] sm:$0xff]  ;;  %v5858_v60 = vld [vmem:[%s11430_s9 + $0x20] sm:$0xff] }
 0x67a   :  { %v4312_v47 = vrot.slane %v4311_v13, 1  ;;  %v4509_v3 = vadd.f32 %v4508_v45, %v4507_v7  ;;  %v10372_v45 = vld [vmem:[%s11432_s8] sm:$0x1] }
 0x67b   :  { %v12083_v7 = vld [vmem:[#allocation26_spill] sm:$0xff] }
 0x67c   :  { %v4313_v0 = vadd.f32 %v4312_v47, %v4311_v13  ;;  %v4510_v5 = vrot.slane %v4509_v3, 1 }
 0x67e   :  { %v4314_v49 = vmul.f32 0.001953125, %v4313_v0  ;;  %v4511_v61 = vadd.f32 %v4510_v5, %v4509_v3  ;;  %v5859_v3 = vld [vmem:[%s11430_s9 + $0x28] sm:$0xff] }
 0x680   :  { %v4512_v21 = vmul.f32 0.001953125, %v4511_v61  ;;  %v4513_v4 = vmul.f32 %v4314_v49, %v4314_v49 }
 0x682   :  { %v4514_v22 = vsub.f32 %v4512_v21, %v4513_v4  ;;  %v5854_v4 = vld [vmem:[%s11430_s9] sm:$0xff] }
 0x683   :  { %v12097_v21 = vld [vmem:[#allocation70_spill] sm:$0xff] }
 0x684   :  { %v4515_v32 = vmax.f32 %v4514_v22, 0.0 }
 0x686   :  { %v4517_v25 = vadd.f32 1e-05, %v4515_v32 }
 0x688   :  { %5851 = vrsqrt.f32 %v4517_v25 }
 0x695   :  { %v5852_v43 = vpop.eup %5851 }
 0x696   :  { %v4519_v41 = vmul.f32 %v5852_v43, %v4516_v57  ;;  %v12084_v43 = vld [vmem:[#allocation34_spill] sm:$0xff] }
 0x698   :  { %v10374_v13 = vmul.f32 %v4519_v41, %v4314_v49  ;;  %v10377_v61 = vrot.slane %v4519_v41, %v12083_v7  ;;  %v12085_v41 = vld [vmem:[#allocation18_spill] sm:$0xff] }
 0x69a   :  { %v10385_v39 = vmul.f32 %v5854_v4, %v10377_v61  ;;  %v10391_v49 = vmul.f32 %v5855_v50, %v10377_v61  ;;  %v10397_v62 = vmul.f32 %v5856_v12, %v10377_v61  ;;  %v10403_v44 = vmul.f32 %v5857_v54, %v10377_v61  ;;  %v12086_v4 = vld [vmem:[#allocation17_spill] sm:$0xff]  ;;  %v12087_v50 = vld [vmem:[#allocation83_spill] sm:$0xff]  ;;  %v12089_v12 = vld [vmem:[#allocation68_spill] sm:$0xff] }
 0x69b   :  { %v10409_v47 = vmul.f32 %v5858_v60, %v10377_v61  ;;  %v10415_v0 = vmul.f32 %v5859_v3, %v10377_v61  ;;  %v10419_v5 = vmul.f32 %v10377_v61, %v9635_v31  ;;  %v10423_v22 = vmul.f32 %v10377_v61, %v9646_v56  ;;  %v12091_v54 = vld [vmem:[#allocation57_spill] sm:$0xff]  ;;  %v12093_v3 = vld [vmem:[#allocation16_spill] sm:$0xff] }
 0x69c   :  { %v10427_v32 = vmul.f32 %v10377_v61, %v9656_v30  ;;  %v10431_v25 = vmul.f32 %v10377_v61, %v9670_v63  ;;  %v10435_v57 = vmul.f32 %v10377_v61, %v9681_v6  ;;  %v10439_v31 = vmul.f32 %v10377_v61, %v9695_v40 }
 0x69d   :  { %v10443_v56 = vmul.f32 %v10377_v61, %v9706_v24  ;;  %v10447_v30 = vmul.f32 %v10377_v61, %v9720_v46  ;;  %v10451_v63 = vmul.f32 %v10377_v61, %v9731_v48  ;;  %v10455_v6 = vmul.f32 %v10377_v61, %v9745_v51 }
 0x69e   :  { %v10459_v40 = vmul.f32 %v10377_v61, %v9756_v20  ;;  %v10463_v24 = vmul.f32 %v10377_v61, %v9770_v42  ;;  %v10467_v46 = vmul.f32 %v10377_v61, %v9781_v15  ;;  %v10471_v48 = vmul.f32 %v10377_v61, %v9795_v38 }
 0x69f   :  { %v10475_v51 = vmul.f32 %v10377_v61, %v9806_v35  ;;  %v10479_v20 = vmul.f32 %v10377_v61, %v9820_v1  ;;  %v10483_v42 = vmul.f32 %v10377_v61, %v9831_v2  ;;  %v10487_v15 = vmul.f32 %v10377_v61, %v9845_v37 }
 0x6a0   :  { %v10491_v38 = vmul.f32 %v10377_v61, %v9856_v33  ;;  %v10495_v35 = vmul.f32 %v10377_v61, %v9870_v8  ;;  %v10499_v1 = vmul.f32 %v10377_v61, %v9881_v58  ;;  %v10503_v2 = vmul.f32 %v10377_v61, %v9895_v14 }
 0x6a1   :  { %v10507_v37 = vmul.f32 %v10377_v61, %v9906_v10  ;;  %v10511_v33 = vmul.f32 %v10377_v61, %v9920_v29  ;;  %v10515_v8 = vmul.f32 %v10377_v61, %v9931_v52  ;;  %v10519_v58 = vmul.f32 %v10377_v61, %v9945_v9 }
 0x6a2   :  { %v10523_v14 = vmul.f32 %v10377_v61, %v9956_v36  ;;  %v10527_v10 = vmul.f32 %v10377_v61, %v9970_v16  ;;  %v10531_v29 = vmul.f32 %v10377_v61, %v9981_v19  ;;  %v10535_v52 = vmul.f32 %v10377_v61, %v9995_v18 }
 0x6a3   :  { %v10539_v9 = vmul.f32 %v10377_v61, %v10006_v53  ;;  %v10543_v36 = vmul.f32 %v10377_v61, %v10020_v34  ;;  %v10547_v16 = vmul.f32 %v10377_v61, %v10031_v26  ;;  %v10551_v19 = vmul.f32 %v10377_v61, %v10045_v55 }
 0x6a4   :  { %v10555_v18 = vmul.f32 %v10377_v61, %v10056_v11  ;;  %v10559_v53 = vmul.f32 %v10377_v61, %v10070_v23  ;;  %v10563_v34 = vmul.f32 %v10377_v61, %v10081_v27  ;;  %v10567_v26 = vmul.f32 %v10377_v61, %v10095_v59 }
 0x6a5   :  { %v10571_v55 = vmul.f32 %v10377_v61, %v10111_v17  ;;  %v10575_v11 = vmul.f32 %v10377_v61, %v10125_v28  ;;  %v10579_v23 = vmul.f32 %v10377_v61, %v12084_v43  ;;  %v10583_v27 = vmul.f32 %v10377_v61, %v12085_v41  ;;  %v12095_v41 = vld [vmem:[#allocation50_spill] sm:$0xff] }
 0x6a6   :  { %v10587_v59 = vmul.f32 %v10377_v61, %v12086_v4  ;;  %v10591_v17 = vmul.f32 %v10377_v61, %v12087_v50  ;;  %v10595_v28 = vmul.f32 %v10377_v61, %v12089_v12  ;;  %v10599_v60 = vmul.f32 %v10377_v61, %v12091_v54 }
 0x6a7   :  { %v10603_v43 = vmul.f32 %v10377_v61, %v12093_v3  ;;  %v10607_v4 = vmul.f32 %v10377_v61, %v12095_v41  ;;  %v10611_v50 = vmul.f32 %v10377_v61, %v12097_v21 }
 0x6a8   :  { %12088 = vst [vmem:[#allocation96_spill] sm:$0xff] %v10591_v17  ;;  %12090 = vst [vmem:[#allocation82_spill] sm:$0xff] %v10595_v28  ;;  %v12098_v17 = vld [vmem:[#allocation72_spill] sm:$0xff]  ;;  %v12100_v28 = vld [vmem:[#allocation59_spill] sm:$0xff] }
 0x6a9   :  { %12092 = vst [vmem:[#allocation63_spill] sm:$0xff] %v10599_v60  ;;  %12094 = vst [vmem:[#allocation12_spill] sm:$0xff] %v10603_v43  ;;  %v10615_v12 = vmul.f32 %v10377_v61, %v12098_v17  ;;  %v10619_v54 = vmul.f32 %v10377_v61, %v12100_v28  ;;  %v12102_v60 = vld [vmem:[#allocation15_spill] sm:$0xff]  ;;  %v12108_v17 = vsub.f32 %v10372_v45, %v10374_v13  ;;  %v12109_v28 = vld [vmem:[#allocation14_spill] sm:$0xff] }
 0x6aa   :  { %12096 = vst [vmem:[#allocation84_spill] sm:$0xff] %v10607_v4  ;;  %v10623_v3 = vmul.f32 %v10377_v61, %v12102_v60  ;;  %v12104_v43 = vld [vmem:[#allocation35_spill] sm:$0xff]  ;;  %v12106_v4 = vld [vmem:[#allocation60_spill] sm:$0xff]  ;;  %v12110_v60 = vld [vmem:[#allocation74_spill] sm:$0xff] }
 0x6ab   :  { %12099 = vst [vmem:[#allocation33_spill] sm:$0xff] %v10615_v12  ;;  %12101 = vst [vmem:[#allocation103_spill] sm:$0xff] %v10619_v54  ;;  %v10627_v41 = vmul.f32 %v10377_v61, %v12104_v43  ;;  %v10631_v21 = vmul.f32 %v10377_v61, %v12106_v4  ;;  %v10637_v12 = vrot.slane %v12108_v17, %v12083_v7  ;;  %v12111_v43 = vld [vmem:[#allocation62_spill] sm:$0xff]  ;;  %v12112_v4 = vld [vmem:[#allocation13_spill] sm:$0xff] }
 0x6ac   :  { %12103 = vst [vmem:[#allocation11_spill] sm:$0xff] %v10623_v3  ;;  %v10641_v54 = vmul.f32 %v10377_v61, %v12109_v28  ;;  %v10645_v3 = vmul.f32 %v10377_v61, %v12110_v60 }
 0x6ad   :  { %12105 = vst [vmem:[#allocation27_spill] sm:$0xff] %v10627_v41  ;;  %12107 = vst [vmem:[#allocation85_spill] sm:$0xff] %v10631_v21  ;;  %v10649_v41 = vmul.f32 %v10377_v61, %v12111_v43  ;;  %v10653_v21 = vmul.f32 %v10377_v61, %v12112_v4  ;;  %v10657_v45 = vadd.f32 %v10637_v12, %v10385_v39 }
 0x6ae   :  { %v10661_v13 = vadd.f32 %v10637_v12, %v10391_v49  ;;  %v10665_v7 = vadd.f32 %v10637_v12, %v10397_v62  ;;  %v10669_v17 = vadd.f32 %v10637_v12, %v10403_v44  ;;  %v10673_v61 = vadd.f32 %v10637_v12, %v10409_v47 }
 0x6af   :  { %v10677_v39 = vadd.f32 %v10637_v12, %v10415_v0  ;;  %v10681_v49 = vadd.f32 %v10637_v12, %v10419_v5  ;;  %v10685_v62 = vadd.f32 %v10637_v12, %v10423_v22  ;;  %v10689_v44 = vadd.f32 %v10637_v12, %v10427_v32  ;;  %v12114_v28 = vld [vmem:[#allocation96_spill] sm:$0xff]  ;;  %v12116_v60 = vld [vmem:[#allocation82_spill] sm:$0xff] }
 0x6b0   :  { %v10693_v47 = vadd.f32 %v10637_v12, %v10431_v25  ;;  %v10697_v0 = vadd.f32 %v10637_v12, %v10435_v57  ;;  %v10701_v5 = vadd.f32 %v10637_v12, %v10439_v31  ;;  %v10705_v22 = vadd.f32 %v10637_v12, %v10443_v56  ;;  %v12118_v43 = vld [vmem:[#allocation63_spill] sm:$0xff]  ;;  %v12120_v4 = vld [vmem:[#allocation12_spill] sm:$0xff] }
 0x6b1   :  { %v10709_v32 = vadd.f32 %v10637_v12, %v10447_v30  ;;  %v10713_v25 = vadd.f32 %v10637_v12, %v10451_v63  ;;  %v10717_v57 = vadd.f32 %v10637_v12, %v10455_v6  ;;  %v10721_v31 = vadd.f32 %v10637_v12, %v10459_v40 }
 0x6b2   :  { %v10725_v56 = vadd.f32 %v10637_v12, %v10463_v24  ;;  %v10729_v30 = vadd.f32 %v10637_v12, %v10467_v46  ;;  %v10733_v63 = vadd.f32 %v10637_v12, %v10471_v48  ;;  %v10737_v6 = vadd.f32 %v10637_v12, %v10475_v51 }
 0x6b3   :  { %v10741_v40 = vadd.f32 %v10637_v12, %v10479_v20  ;;  %v10745_v24 = vadd.f32 %v10637_v12, %v10483_v42  ;;  %v10749_v46 = vadd.f32 %v10637_v12, %v10487_v15  ;;  %v10753_v48 = vadd.f32 %v10637_v12, %v10491_v38 }
 0x6b4   :  { %v10757_v51 = vadd.f32 %v10637_v12, %v10495_v35  ;;  %v10761_v20 = vadd.f32 %v10637_v12, %v10499_v1  ;;  %v10765_v42 = vadd.f32 %v10637_v12, %v10503_v2  ;;  %v10769_v15 = vadd.f32 %v10637_v12, %v10507_v37 }
 0x6b5   :  { %v10773_v38 = vadd.f32 %v10637_v12, %v10511_v33  ;;  %v10777_v35 = vadd.f32 %v10637_v12, %v10515_v8  ;;  %v10781_v1 = vadd.f32 %v10637_v12, %v10519_v58  ;;  %v10785_v2 = vadd.f32 %v10637_v12, %v10523_v14 }
 0x6b6   :  { %v10789_v37 = vadd.f32 %v10637_v12, %v10527_v10  ;;  %v10793_v33 = vadd.f32 %v10637_v12, %v10531_v29  ;;  %v10797_v8 = vadd.f32 %v10637_v12, %v10535_v52  ;;  %v10801_v58 = vadd.f32 %v10637_v12, %v10539_v9 }
 0x6b7   :  { %v10805_v14 = vadd.f32 %v10637_v12, %v10543_v36  ;;  %v10809_v10 = vadd.f32 %v10637_v12, %v10547_v16  ;;  %v10813_v29 = vadd.f32 %v10637_v12, %v10551_v19  ;;  %v10817_v52 = vadd.f32 %v10637_v12, %v10555_v18 }
 0x6b8   :  { %v10821_v9 = vadd.f32 %v10637_v12, %v10559_v53  ;;  %v10825_v36 = vadd.f32 %v10637_v12, %v10563_v34  ;;  %v10829_v16 = vadd.f32 %v10637_v12, %v10567_v26  ;;  %v10833_v19 = vadd.f32 %v10637_v12, %v10571_v55 }
 0x6b9   :  { %v10837_v18 = vadd.f32 %v10637_v12, %v10575_v11  ;;  %v10841_v53 = vadd.f32 %v10637_v12, %v10579_v23  ;;  %v10845_v34 = vadd.f32 %v10637_v12, %v10583_v27  ;;  %v10849_v26 = vadd.f32 %v10637_v12, %v10587_v59 }
 0x6ba   :  { %v10853_v55 = vadd.f32 %v10637_v12, %v12114_v28  ;;  %v10857_v11 = vadd.f32 %v10637_v12, %v12116_v60  ;;  %v10861_v23 = vadd.f32 %v10637_v12, %v12118_v43  ;;  %v10865_v27 = vadd.f32 %v10637_v12, %v12120_v4 }
 0x6bb   :  { %12113 = vst [vmem:[#allocation10_spill] sm:$0xff] %v10845_v34  ;;  %v12122_v34 = vld [vmem:[#allocation84_spill] sm:$0xff]  ;;  %v10873_v28 = vadd.f32 %v10637_v12, %v10611_v50 }
 0x6bc   :  { %12115 = vst [vmem:[#allocation28_spill] sm:$0xff] %v10853_v55  ;;  %12117 = vst [vmem:[#allocation9_spill] sm:$0xff] %v10857_v11  ;;  %v10869_v59 = vadd.f32 %v10637_v12, %v12122_v34  ;;  %v12124_v55 = vld [vmem:[#allocation33_spill] sm:$0xff]  ;;  %v12125_v11 = vld [vmem:[#allocation103_spill] sm:$0xff] }
 0x6bd   :  { %12119 = vst [vmem:[#allocation71_spill] sm:$0xff] %v10861_v23  ;;  %12121 = vst [vmem:[#allocation86_spill] sm:$0xff] %v10865_v27  ;;  %v10877_v60 = vadd.f32 %v10637_v12, %v12124_v55  ;;  %v10881_v43 = vadd.f32 %v10637_v12, %v12125_v11  ;;  %v12126_v23 = vld [vmem:[#allocation11_spill] sm:$0xff]  ;;  %v10897_v55 = vadd.f32 %v10637_v12, %v10641_v54 }
 0x6be   :  { %12123 = vst [vmem:[#allocation41_spill] sm:$0xff] %v10869_v59  ;;  %v10885_v4 = vadd.f32 %v10637_v12, %v12126_v23  ;;  %v12127_v27 = vld [vmem:[#allocation27_spill] sm:$0xff]  ;;  %v12128_v59 = vld [vmem:[#allocation85_spill] sm:$0xff]  ;;  %v10901_v11 = vadd.f32 %v10637_v12, %v10645_v3  ;;  %v10905_v23 = vadd.f32 %v10637_v12, %v10649_v41  ;;  %v5862_v41 = vld [vmem:[%s11424_s0 + $0x10] sm:$0xff] }
 0x6bf   :  { %v10889_v34 = vadd.f32 %v10637_v12, %v12127_v27  ;;  %v10893_v50 = vadd.f32 %v10637_v12, %v12128_v59  ;;  %v10909_v27 = vadd.f32 %v10637_v12, %v10653_v21  ;;  %v5860_v59 = vld [vmem:[%s11424_s0] sm:$0xff]  ;;  %v5861_v54 = vld [vmem:[%s11424_s0 + $0x8] sm:$0xff]  ;;  %v5863_v12 = vld [vmem:[%s11424_s0 + $0x18] sm:$0xff] }
 0x6c0   :  { %12130 = vst [vmem:[#allocation42_spill] sm:$0xff] %v10905_v23  ;;  %v4664_v3 = vadd.f32 %v5861_v54, %v10661_v13  ;;  %v4665_v23 = vadd.f32 %v5862_v41, %v10665_v7  ;;  %v4666_v21 = vadd.f32 %v5863_v12, %v10669_v17  ;;  %v5865_v13 = vld [vmem:[%s11424_s0 + $0x28] sm:$0xff]  ;;  %v5866_v7 = vld [vmem:[%s11424_s0 + $0x30] sm:$0xff]  ;;  %v5867_v17 = vld [vmem:[%s11424_s0 + $0x38] sm:$0xff] }
 0x6c1   :  { %12129 = vst [vmem:[#allocation29_spill] sm:$0xff] %v10893_v50  ;;  %v4663_v50 = vadd.f32 %v5860_v59, %v10657_v45  ;;  %v5864_v45 = vld [vmem:[%s11424_s0 + $0x20] sm:$0xff]  ;;  %v4668_v54 = vadd.f32 %v5865_v13, %v10677_v39  ;;  %v4669_v41 = vadd.f32 %v5866_v7, %v10681_v49  ;;  %v4670_v12 = vadd.f32 %v5867_v17, %v10685_v62  ;;  %v5869_v39 = vld [vmem:[%s11424_s0 + $0x48] sm:$0xff]  ;;  %v5870_v49 = vld [vmem:[%s11424_s0 + $0x50] sm:$0xff] }
 0x6c2   :  { %v4667_v59 = vadd.f32 %v5864_v45, %v10673_v61  ;;  %v5868_v61 = vld [vmem:[%s11424_s0 + $0x40] sm:$0xff]  ;;  %v4672_v13 = vadd.f32 %v5869_v39, %v10693_v47  ;;  %v4673_v7 = vadd.f32 %v5870_v49, %v10697_v0  ;;  %v5871_v62 = vld [vmem:[%s11424_s0 + $0x58] sm:$0xff]  ;;  %4728 = vst.msk [vmem:[%s11430_s9 + $0x8] sm:$0xff] %vm107_vm0, %v4664_v3  ;;  %4729 = vst.msk [vmem:[%s11430_s9 + $0x10] sm:$0xff] %vm107_vm0, %v4665_v23 }
 0x6c3   :  { %v4671_v45 = vadd.f32 %v5868_v61, %v10689_v44  ;;  %v4674_v17 = vadd.f32 %v5871_v62, %v10701_v5  ;;  %4727 = vst.msk [vmem:[%s11430_s9] sm:$0xff] %vm107_vm0, %v4663_v50  ;;  %4730 = vst.msk [vmem:[%s11430_s9 + $0x18] sm:$0xff] %vm107_vm0, %v4666_v21  ;;  %v5872_v44 = vld [vmem:[%s11424_s0 + $0x60] sm:$0xff]  ;;  %v5873_v0 = vld [vmem:[%s11424_s0 + $0x68] sm:$0xff] }
 0x6c4   :  { %v4675_v47 = vadd.f32 %v5872_v44, %v10705_v22  ;;  %v4676_v5 = vadd.f32 %v5873_v0, %v10709_v32  ;;  %v5874_v50 = vld [vmem:[%s11424_s0 + $0x70] sm:$0xff]  ;;  %v5875_v3 = vld [vmem:[%s11424_s0 + $0x78] sm:$0xff]  ;;  %4731 = vst.msk [vmem:[%s11430_s9 + $0x20] sm:$0xff] %vm107_vm0, %v4667_v59  ;;  %4732 = vst.msk [vmem:[%s11430_s9 + $0x28] sm:$0xff] %vm107_vm0, %v4668_v54 }
 0x6c5   :  { %v4677_v23 = vadd.f32 %v5874_v50, %v10713_v25  ;;  %v4678_v21 = vadd.f32 %v5875_v3, %v10717_v57  ;;  %4733 = vst.msk [vmem:[%s11430_s9 + $0x30] sm:$0xff] %vm107_vm0, %v4669_v41  ;;  %4734 = vst.msk [vmem:[%s11430_s9 + $0x38] sm:$0xff] %vm107_vm0, %v4670_v12  ;;  %v5876_v22 = vld [vmem:[%s11424_s0 + $0x80] sm:$0xff]  ;;  %v5877_v25 = vld [vmem:[%s11424_s0 + $0x88] sm:$0xff] }
 0x6c6   :  { %v4679_v32 = vadd.f32 %v5876_v22, %v10721_v31  ;;  %v4680_v57 = vadd.f32 %v5877_v25, %v10725_v56  ;;  %v5878_v59 = vld [vmem:[%s11424_s0 + $0x90] sm:$0xff]  ;;  %v5879_v41 = vld [vmem:[%s11424_s0 + $0x98] sm:$0xff]  ;;  %4735 = vst.msk [vmem:[%s11430_s9 + $0x40] sm:$0xff] %vm107_vm0, %v4671_v45  ;;  %4736 = vst.msk [vmem:[%s11430_s9 + $0x48] sm:$0xff] %vm107_vm0, %v4672_v13 }
 0x6c7   :  { %v4681_v54 = vadd.f32 %v5878_v59, %v10729_v30  ;;  %v4682_v12 = vadd.f32 %v5879_v41, %v10733_v63  ;;  %4737 = vst.msk [vmem:[%s11430_s9 + $0x50] sm:$0xff] %vm107_vm0, %v4673_v7  ;;  %4738 = vst.msk [vmem:[%s11430_s9 + $0x58] sm:$0xff] %vm107_vm0, %v4674_v17  ;;  %v5880_v31 = vld [vmem:[%s11424_s0 + $0xa0] sm:$0xff]  ;;  %v5881_v30 = vld [vmem:[%s11424_s0 + $0xa8] sm:$0xff] }
 0x6c8   :  { %v4683_v56 = vadd.f32 %v5880_v31, %v10737_v6  ;;  %v4684_v63 = vadd.f32 %v5881_v30, %v10741_v40  ;;  %v5882_v61 = vld [vmem:[%s11424_s0 + $0xb0] sm:$0xff]  ;;  %v5883_v39 = vld [vmem:[%s11424_s0 + $0xb8] sm:$0xff]  ;;  %4739 = vst.msk [vmem:[%s11430_s9 + $0x60] sm:$0xff] %vm107_vm0, %v4675_v47  ;;  %4740 = vst.msk [vmem:[%s11430_s9 + $0x68] sm:$0xff] %vm107_vm0, %v4676_v5 }
 0x6c9   :  { %v4685_v45 = vadd.f32 %v5882_v61, %v10745_v24  ;;  %v4686_v13 = vadd.f32 %v5883_v39, %v10749_v46  ;;  %4741 = vst.msk [vmem:[%s11430_s9 + $0x70] sm:$0xff] %vm107_vm0, %v4677_v23  ;;  %4742 = vst.msk [vmem:[%s11430_s9 + $0x78] sm:$0xff] %vm107_vm0, %v4678_v21  ;;  %v5884_v6 = vld [vmem:[%s11424_s0 + $0xc0] sm:$0xff]  ;;  %v5885_v24 = vld [vmem:[%s11424_s0 + $0xc8] sm:$0xff] }
 0x6ca   :  { %v4687_v40 = vadd.f32 %v5884_v6, %v10753_v48  ;;  %v4688_v46 = vadd.f32 %v5885_v24, %v10757_v51  ;;  %v5886_v49 = vld [vmem:[%s11424_s0 + $0xd0] sm:$0xff]  ;;  %v5887_v62 = vld [vmem:[%s11424_s0 + $0xd8] sm:$0xff]  ;;  %4743 = vst.msk [vmem:[%s11430_s9 + $0x80] sm:$0xff] %vm107_vm0, %v4679_v32  ;;  %4744 = vst.msk [vmem:[%s11430_s9 + $0x88] sm:$0xff] %vm107_vm0, %v4680_v57 }
 0x6cb   :  { %v4689_v7 = vadd.f32 %v5886_v49, %v10761_v20  ;;  %v4690_v17 = vadd.f32 %v5887_v62, %v10765_v42  ;;  %4745 = vst.msk [vmem:[%s11430_s9 + $0x90] sm:$0xff] %vm107_vm0, %v4681_v54  ;;  %4746 = vst.msk [vmem:[%s11430_s9 + $0x98] sm:$0xff] %vm107_vm0, %v4682_v12  ;;  %v5888_v48 = vld [vmem:[%s11424_s0 + $0xe0] sm:$0xff]  ;;  %v5889_v20 = vld [vmem:[%s11424_s0 + $0xe8] sm:$0xff] }
 0x6cc   :  { %v4691_v51 = vadd.f32 %v5888_v48, %v10769_v15  ;;  %v4692_v42 = vadd.f32 %v5889_v20, %v10773_v38  ;;  %v5890_v44 = vld [vmem:[%s11424_s0 + $0xf0] sm:$0xff]  ;;  %v5891_v0 = vld [vmem:[%s11424_s0 + $0xf8] sm:$0xff]  ;;  %4747 = vst.msk [vmem:[%s11430_s9 + $0xa0] sm:$0xff] %vm107_vm0, %v4683_v56  ;;  %4748 = vst.msk [vmem:[%s11430_s9 + $0xa8] sm:$0xff] %vm107_vm0, %v4684_v63 }
 0x6cd   :  { %v4693_v47 = vadd.f32 %v5890_v44, %v10777_v35  ;;  %v4694_v5 = vadd.f32 %v5891_v0, %v10781_v1  ;;  %4749 = vst.msk [vmem:[%s11430_s9 + $0xb0] sm:$0xff] %vm107_vm0, %v4685_v45  ;;  %4750 = vst.msk [vmem:[%s11430_s9 + $0xb8] sm:$0xff] %vm107_vm0, %v4686_v13  ;;  %v5892_v15 = vld [vmem:[%s11424_s0 + $0x100] sm:$0xff]  ;;  %v5893_v35 = vld [vmem:[%s11424_s0 + $0x108] sm:$0xff] }
 0x6ce   :  { %v4695_v38 = vadd.f32 %v5892_v15, %v10785_v2  ;;  %v4696_v1 = vadd.f32 %v5893_v35, %v10789_v37  ;;  %v5894_v50 = vld [vmem:[%s11424_s0 + $0x110] sm:$0xff]  ;;  %v5895_v3 = vld [vmem:[%s11424_s0 + $0x118] sm:$0xff]  ;;  %4751 = vst.msk [vmem:[%s11430_s9 + $0xc0] sm:$0xff] %vm107_vm0, %v4687_v40  ;;  %4752 = vst.msk [vmem:[%s11430_s9 + $0xc8] sm:$0xff] %vm107_vm0, %v4688_v46 }
 0x6cf   :  { %v4697_v23 = vadd.f32 %v5894_v50, %v10793_v33  ;;  %v4698_v21 = vadd.f32 %v5895_v3, %v10797_v8  ;;  %4753 = vst.msk [vmem:[%s11430_s9 + $0xd0] sm:$0xff] %vm107_vm0, %v4689_v7  ;;  %4754 = vst.msk [vmem:[%s11430_s9 + $0xd8] sm:$0xff] %vm107_vm0, %v4690_v17  ;;  %v5896_v2 = vld [vmem:[%s11424_s0 + $0x120] sm:$0xff]  ;;  %v5897_v33 = vld [vmem:[%s11424_s0 + $0x128] sm:$0xff] }
 0x6d0   :  { %v4699_v37 = vadd.f32 %v5896_v2, %v10801_v58  ;;  %v4700_v8 = vadd.f32 %v5897_v33, %v10805_v14  ;;  %v5898_v22 = vld [vmem:[%s11424_s0 + $0x130] sm:$0xff]  ;;  %v5899_v25 = vld [vmem:[%s11424_s0 + $0x138] sm:$0xff]  ;;  %4755 = vst.msk [vmem:[%s11430_s9 + $0xe0] sm:$0xff] %vm107_vm0, %v4691_v51  ;;  %4756 = vst.msk [vmem:[%s11430_s9 + $0xe8] sm:$0xff] %vm107_vm0, %v4692_v42 }
 0x6d1   :  { %v4701_v32 = vadd.f32 %v5898_v22, %v10809_v10  ;;  %v4702_v57 = vadd.f32 %v5899_v25, %v10813_v29  ;;  %4757 = vst.msk [vmem:[%s11430_s9 + $0xf0] sm:$0xff] %vm107_vm0, %v4693_v47  ;;  %4758 = vst.msk [vmem:[%s11430_s9 + $0xf8] sm:$0xff] %vm107_vm0, %v4694_v5  ;;  %v5900_v58 = vld [vmem:[%s11424_s0 + $0x140] sm:$0xff]  ;;  %v5901_v10 = vld [vmem:[%s11424_s0 + $0x148] sm:$0xff] }
 0x6d2   :  { %v4703_v14 = vadd.f32 %v5900_v58, %v10817_v52  ;;  %v4704_v29 = vadd.f32 %v5901_v10, %v10821_v9  ;;  %v5902_v59 = vld [vmem:[%s11424_s0 + $0x150] sm:$0xff]  ;;  %v5903_v41 = vld [vmem:[%s11424_s0 + $0x158] sm:$0xff]  ;;  %4759 = vst.msk [vmem:[%s11430_s9 + $0x100] sm:$0xff] %vm107_vm0, %v4695_v38  ;;  %4760 = vst.msk [vmem:[%s11430_s9 + $0x108] sm:$0xff] %vm107_vm0, %v4696_v1 }
 0x6d3   :  { %v4705_v54 = vadd.f32 %v5902_v59, %v10825_v36  ;;  %v4706_v12 = vadd.f32 %v5903_v41, %v10829_v16  ;;  %4761 = vst.msk [vmem:[%s11430_s9 + $0x110] sm:$0xff] %vm107_vm0, %v4697_v23  ;;  %4762 = vst.msk [vmem:[%s11430_s9 + $0x118] sm:$0xff] %vm107_vm0, %v4698_v21  ;;  %v5904_v52 = vld [vmem:[%s11424_s0 + $0x160] sm:$0xff]  ;;  %v5905_v36 = vld [vmem:[%s11424_s0 + $0x168] sm:$0xff] }
 0x6d4   :  { %v4707_v9 = vadd.f32 %v5904_v52, %v10833_v19  ;;  %v4708_v16 = vadd.f32 %v5905_v36, %v10837_v18  ;;  %v5906_v31 = vld [vmem:[%s11424_s0 + $0x170] sm:$0xff]  ;;  %v5907_v30 = vld [vmem:[%s11424_s0 + $0x178] sm:$0xff]  ;;  %v12131_v63 = vld [vmem:[#allocation10_spill] sm:$0xff]  ;;  %4763 = vst.msk [vmem:[%s11430_s9 + $0x120] sm:$0xff] %vm107_vm0, %v4699_v37 }
 0x6d5   :  { %v4709_v56 = vadd.f32 %v5906_v31, %v10841_v53  ;;  %v4710_v61 = vadd.f32 %v5907_v30, %v12131_v63  ;;  %4764 = vst.msk [vmem:[%s11430_s9 + $0x128] sm:$0xff] %vm107_vm0, %v4700_v8  ;;  %4765 = vst.msk [vmem:[%s11430_s9 + $0x130] sm:$0xff] %vm107_vm0, %v4701_v32  ;;  %v5908_v19 = vld [vmem:[%s11424_s0 + $0x180] sm:$0xff]  ;;  %v5909_v53 = vld [vmem:[%s11424_s0 + $0x188] sm:$0xff] }
 0x6d6   :  { %4766 = vst.msk [vmem:[%s11430_s9 + $0x138] sm:$0xff] %vm107_vm0, %v4702_v57  ;;  %v4711_v18 = vadd.f32 %v5908_v19, %v10849_v26  ;;  %v12132_v45 = vld [vmem:[#allocation28_spill] sm:$0xff]  ;;  %v12133_v6 = vld [vmem:[#allocation9_spill] sm:$0xff]  ;;  %v12134_v46 = vld [vmem:[#allocation71_spill] sm:$0xff] }
 0x6d7   :  { %v4712_v39 = vadd.f32 %v5909_v53, %v12132_v45  ;;  %v5910_v13 = vld [vmem:[%s11424_s0 + $0x190] sm:$0xff]  ;;  %v5911_v24 = vld [vmem:[%s11424_s0 + $0x198] sm:$0xff]  ;;  %4767 = vst.msk [vmem:[%s11430_s9 + $0x140] sm:$0xff] %vm107_vm0, %v4703_v14  ;;  %4768 = vst.msk [vmem:[%s11430_s9 + $0x148] sm:$0xff] %vm107_vm0, %v4704_v29 }
 0x6d8   :  { %v4713_v40 = vadd.f32 %v5910_v13, %v12133_v6  ;;  %v4714_v49 = vadd.f32 %v5911_v24, %v12134_v46  ;;  %4769 = vst.msk [vmem:[%s11430_s9 + $0x150] sm:$0xff] %vm107_vm0, %v4705_v54  ;;  %4770 = vst.msk [vmem:[%s11430_s9 + $0x158] sm:$0xff] %vm107_vm0, %v4706_v12  ;;  %v5912_v26 = vld [vmem:[%s11424_s0 + $0x1a0] sm:$0xff]  ;;  %v5913_v17 = vld [vmem:[%s11424_s0 + $0x1a8] sm:$0xff] }
 0x6d9   :  { %v12135_v7 = vld [vmem:[#allocation86_spill] sm:$0xff]  ;;  %v12136_v48 = vld [vmem:[#allocation41_spill] sm:$0xff]  ;;  %v5914_v20 = vld [vmem:[%s11424_s0 + $0x1b0] sm:$0xff]  ;;  %4771 = vst.msk [vmem:[%s11430_s9 + $0x160] sm:$0xff] %vm107_vm0, %v4707_v9 }
 0x6da   :  { %v4715_v62 = vadd.f32 %v5912_v26, %v12135_v7  ;;  %v4716_v51 = vadd.f32 %v5913_v17, %v12136_v48  ;;  %v4717_v42 = vadd.f32 %v5914_v20, %v10873_v28  ;;  %v5915_v44 = vld [vmem:[%s11424_s0 + $0x1b8] sm:$0xff]  ;;  %4772 = vst.msk [vmem:[%s11430_s9 + $0x168] sm:$0xff] %vm107_vm0, %v4708_v16  ;;  %4773 = vst.msk [vmem:[%s11430_s9 + $0x170] sm:$0xff] %vm107_vm0, %v4709_v56  ;;  %v5916_v28 = vld [vmem:[%s11424_s0 + $0x1c0] sm:$0xff] }
 0x6db   :  { %v4718_v47 = vadd.f32 %v5915_v44, %v10877_v60  ;;  %4774 = vst.msk [vmem:[%s11430_s9 + $0x178] sm:$0xff] %vm107_vm0, %v4710_v61  ;;  %v4719_v60 = vadd.f32 %v5916_v28, %v10881_v43  ;;  %v5917_v0 = vld [vmem:[%s11424_s0 + $0x1c8] sm:$0xff]  ;;  %v5918_v15 = vld [vmem:[%s11424_s0 + $0x1d0] sm:$0xff]  ;;  %v5919_v35 = vld [vmem:[%s11424_s0 + $0x1d8] sm:$0xff] }
 0x6dc   :  { %v4720_v5 = vadd.f32 %v5917_v0, %v10885_v4  ;;  %v4721_v38 = vadd.f32 %v5918_v15, %v10889_v34  ;;  %v12137_v1 = vld [vmem:[#allocation29_spill] sm:$0xff]  ;;  %4775 = vst.msk [vmem:[%s11430_s9 + $0x180] sm:$0xff] %vm107_vm0, %v4711_v18  ;;  %4776 = vst.msk [vmem:[%s11430_s9 + $0x188] sm:$0xff] %vm107_vm0, %v4712_v39  ;;  %v5920_v43 = vld [vmem:[%s11424_s0 + $0x1e0] sm:$0xff] }
 0x6dd   :  { %v4722_v50 = vadd.f32 %v5919_v35, %v12137_v1  ;;  %4777 = vst.msk [vmem:[%s11430_s9 + $0x190] sm:$0xff] %vm107_vm0, %v4713_v40  ;;  %4778 = vst.msk [vmem:[%s11430_s9 + $0x198] sm:$0xff] %vm107_vm0, %v4714_v49  ;;  %v4723_v4 = vadd.f32 %v5920_v43, %v10897_v55  ;;  %v5921_v34 = vld [vmem:[%s11424_s0 + $0x1e8] sm:$0xff]  ;;  %v5922_v3 = vld [vmem:[%s11424_s0 + $0x1f0] sm:$0xff] }
 0x6de   :  { %v4724_v23 = vadd.f32 %v5921_v34, %v10901_v11  ;;  %v12138_v21 = vld [vmem:[#allocation42_spill] sm:$0xff]  ;;  %v5923_v37 = vld [vmem:[%s11424_s0 + $0x1f8] sm:$0xff]  ;;  %4779 = vst.msk [vmem:[%s11430_s9 + $0x1a0] sm:$0xff] %vm107_vm0, %v4715_v62  ;;  %4780 = vst.msk [vmem:[%s11430_s9 + $0x1a8] sm:$0xff] %vm107_vm0, %v4716_v51 }
 0x6df   :  { %v4725_v2 = vadd.f32 %v5922_v3, %v12138_v21  ;;  %v4726_v33 = vadd.f32 %v5923_v37, %v10909_v27  ;;  %4781 = vst.msk [vmem:[%s11430_s9 + $0x1b0] sm:$0xff] %vm107_vm0, %v4717_v42  ;;  %4782 = vst.msk [vmem:[%s11430_s9 + $0x1b8] sm:$0xff] %vm107_vm0, %v4718_v47 }
 0x6e0   :  { %4783 = vst.msk [vmem:[%s11430_s9 + $0x1c0] sm:$0xff] %vm107_vm0, %v4719_v60  ;;  %4784 = vst.msk [vmem:[%s11430_s9 + $0x1c8] sm:$0xff] %vm107_vm0, %v4720_v5 }
 0x6e1   :  { %4785 = vst.msk [vmem:[%s11430_s9 + $0x1d0] sm:$0xff] %vm107_vm0, %v4721_v38  ;;  %4786 = vst.msk [vmem:[%s11430_s9 + $0x1d8] sm:$0xff] %vm107_vm0, %v4722_v50 }
 0x6e2   :  { %4787 = vst.msk [vmem:[%s11430_s9 + $0x1e0] sm:$0xff] %vm107_vm0, %v4723_v4  ;;  %4788 = vst.msk [vmem:[%s11430_s9 + $0x1e8] sm:$0xff] %vm107_vm0, %v4724_v23 }
 0x6e3   :  { %4789 = vst.msk [vmem:[%s11430_s9 + $0x1f0] sm:$0xff] %vm107_vm0, %v4725_v2  ;;  %4790 = vst.msk [vmem:[%s11430_s9 + $0x1f8] sm:$0xff] %vm107_vm0, %v4726_v33 }

// kernel: attention_forward.5
= control target key start
LH: loop header
LB: loop body
LE: loop exit
PB: predicated region body
PF: predicated region fallthrough
CT: control target
= control target key end

     0   :  { %s2716_s9 = smov 0   ;;  %s3977_s0 = inlined_call_operand.vmem [shape: f32[2,18,18,32], index: 0, kind: input, shape index: {}]   ;;  %s3978_s1 = inlined_call_operand.vmem [shape: bf16[288,16], index: 1, kind: input, shape index: {}]   ;;  %s3979_s2 = inlined_call_operand.vmem [shape: f32[2,16,16,16], index: 2, kind: output, shape index: {}]  }
   0x1 LB: > { %s2241_s10 = sadd.s32 4294967295, %s2696_s9   ;;  %p2245_p0 = scmp.ge.s32.totalorder %s2696_s9, 1  ;;  %s2696_s9 = sphi %s2716_s9, %s12_s9  }
   0x2   : > { %p112_p1 = scmp.lt.s32.totalorder %s2696_s9, 3 }
   0x4   : > { %p113_p2 = pnand %p2245_p0, %p112_p1 }
   0x5   : > { %p134_p3 = scmp.lt.s32.totalorder (!%p113_p2), %s2241_s10, 1  ;;  %s2698_s15 = smov (!%p113_p2), 32  }
   0x6   : > { %116 = sbr.rel (%p113_p2) target bundleno = 726 (0x2d6), region = 28  ;;  %s2699_s26 = smov (!%p113_p2), 64  }
   0x7   : > { %s2700_s13 = smov (!%p113_p2), 96  }
   0xb   : > { %s3981_s10 = smov (!%p134_p3, %s2241_s10), 1  ;;  %vm177_vm0 = vcmask 261120   ;;  %v2672_v33 = vld [vmem:[%s3978_s1 + $0x78] sm:$0xff]   ;;  %v2674_v36 = vld [vmem:[%s3978_s1 + $0x70] sm:$0xff]   ;;  %v2676_v41 = vld [vmem:[%s3978_s1 + $0x68] sm:$0xff]   ;;  %vm370_vm1 = vcmask 523520  }
   0xc   : > { %s2660_s11 = smul.u32 432, %s3981_s10  ;;  %v2673_v34 = vld [vmem:[%s3978_s1 + $0x38] sm:$0xff]   ;;  %2478 = vmatprep.subr.bf16.mxu0 %v2672_v33  ;;  %v2675_v39 = vld [vmem:[%s3978_s1 + $0x30] sm:$0xff]   ;;  %2644 = vmatprep.subr.bf16.mxu1 %v2672_v33  ;;  %v2677_v42 = vld [vmem:[%s3978_s1 + $0x28] sm:$0xff]   ;;  %vm563_vm2 = vcmask 785920   ;;  %vm757_vm3 = vcmask 1048320  }
   0xd   : > { %2479 = vmatpush3.bf16.msra.mxu0 %v2673_v34  ;;  %2652 = vmatpush3.bf16.msra.mxu1 %v2673_v34  ;;  %v2678_v46 = vld [vmem:[%s3978_s1 + $0x60] sm:$0xff]   ;;  %v2680_v49 = vld [vmem:[%s3978_s1 + $0x58] sm:$0xff]   ;;  %v2682_v52 = vld [vmem:[%s3978_s1 + $0x50] sm:$0xff]   ;;  %vm2153_vm4 = vcmask 130048  }
   0xe   : > { %s2730_s14 = scalar_lea.vmem %s3977_s0, %s2660_s11  ;;  %2480 = vmatprep.subr.bf16.mxu0 %v2674_v36  ;;  %2645 = vmatprep.subr.bf16.mxu1 %v2674_v36  ;;  %v2679_v47 = vld [vmem:[%s3978_s1 + $0x20] sm:$0xff]   ;;  %v2681_v51 = vld [vmem:[%s3978_s1 + $0x18] sm:$0xff]   ;;  %v2683_v54 = vld [vmem:[%s3978_s1 + $0x10] sm:$0xff]  }
   0xf   : > { %v212_v0 = vld [vmem:[%s2730_s14 + $0x19] sm:$0xff]  ;;  %v210_v1 = vld [vmem:[%s2730_s14 + $0x1] sm:$0xff]  ;;  %v211_v3 = vld [vmem:[%s2730_s14 + $0x9] sm:$0xff] }
  0x10   : > { %v213_v2 = vld [vmem:[%s2730_s14 + $0x21] sm:$0xff]  ;;  %278 = vrot.lane.b32.xlu1 %v212_v0, %s2698_s15  ;;  %274 = vrot.lane.b32.xlu0 %v210_v1, %s2698_s15  ;;  %v2739_v4 = vld [vmem:[%s2730_s14 + $0x39] sm:$0xff]  ;;  %822 = vst.msk [vmem:[#allocation2 + $0x8] sm:$0xff] %vm177_vm0, %v212_v0 }
  0x11   : > { %823 = vst.msk [vmem:[#allocation2 + $0x20] sm:$0xff] %vm177_vm0, %v213_v2  ;;  %v2744_v5 = vld [vmem:[%s2730_s14 + $0x31] sm:$0xff]  ;;  %v2750_v7 = vld [vmem:[%s2730_s14 + $0x49] sm:$0xff]  ;;  %825 = vst.msk [vmem:[#allocation2 + $0x50] sm:$0xff] %vm177_vm0, %v2739_v4  ;;  %2481 = vmatpush3.bf16.msra.mxu0 %v2675_v39  ;;  %2653 = vmatpush3.bf16.msra.mxu1 %v2675_v39 }
  0x12   : > { %v2747_v6 = vld [vmem:[%s2730_s14 + $0x51] sm:$0xff]  ;;  %824 = vst.msk [vmem:[#allocation2 + $0x38] sm:$0xff] %vm177_vm0, %v2744_v5  ;;  %826 = vst.msk [vmem:[#allocation2 + $0x68] sm:$0xff] %vm177_vm0, %v2750_v7  ;;  %v2779_v12 = vld [vmem:[%s2730_s14 + $0x20] sm:$0xff]  ;;  %2482 = vmatprep.subr.bf16.mxu0 %v2676_v41  ;;  %2646 = vmatprep.subr.bf16.mxu1 %v2676_v41 }
  0x13   : > { %827 = vst.msk [vmem:[#allocation2 + $0x80] sm:$0xff] %vm177_vm0, %v2747_v6  ;;  %v2761_v8 = vld [vmem:[%s2730_s14 + $0x30] sm:$0xff]  ;;  %v2766_v9 = vld [vmem:[%s2730_s14 + $0x38] sm:$0xff]  ;;  %181 = vst.msk [vmem:[#allocation2 + $0x48] sm:$0xff] %vm177_vm0, %v2779_v12 }
  0x14   : > { %280 = vrot.lane.b32.xlu1 %v213_v2, %s2698_s15  ;;  %276 = vrot.lane.b32.xlu0 %v211_v3, %s2698_s15  ;;  %182 = vst.msk [vmem:[#allocation2 + $0x60] sm:$0xff] %vm177_vm0, %v2761_v8  ;;  %183 = vst.msk [vmem:[#allocation2 + $0x78] sm:$0xff] %vm177_vm0, %v2766_v9  ;;  %v2773_v10 = vld [vmem:[%s2730_s14 + $0x18] sm:$0xff]  ;;  %v2776_v11 = vld [vmem:[%s2730_s14 + $0x150] sm:$0xff] }
  0x15   : > { %180 = vst.msk [vmem:[#allocation2 + $0x30] sm:$0xff] %vm177_vm0, %v2773_v10  ;;  %v2788_v13 = vld [vmem:[%s2730_s14 + $0x158] sm:$0xff]  ;;  %206 = vst.msk [vmem:[#allocation2 + $0x2a0] sm:$0xff] %vm177_vm0, %v2776_v11  ;;  %v2808_v17 = vld [vmem:[%s2730_s14 + $0x140] sm:$0xff]  ;;  %2483 = vmatpush3.bf16.msra.mxu0 %v2677_v42  ;;  %2654 = vmatpush3.bf16.msra.mxu1 %v2677_v42 }
  0x16   : > { %v2791_v14 = vld [vmem:[%s2730_s14 + $0x151] sm:$0xff]  ;;  %v2801_v16 = vld [vmem:[%s2730_s14 + $0x159] sm:$0xff]  ;;  %207 = vst.msk [vmem:[#allocation2 + $0x2b8] sm:$0xff] %vm177_vm0, %v2788_v13  ;;  %v2811_v18 = vld [vmem:[%s2730_s14 + $0x48] sm:$0xff]  ;;  %2484 = vmatprep.subr.bf16.mxu0 %v2678_v46  ;;  %2647 = vmatprep.subr.bf16.mxu1 %v2678_v46 }
  0x17   : > { %v2798_v15 = vld [vmem:[%s2730_s14 + $0x138] sm:$0xff]  ;;  %848 = vst.msk [vmem:[#allocation2 + $0x278] sm:$0xff] %vm177_vm0, %v2791_v14  ;;  %849 = vst.msk [vmem:[#allocation2 + $0x290] sm:$0xff] %vm177_vm0, %v2801_v16  ;;  %v2818_v19 = vld [vmem:[%s2730_s14 + $0x50] sm:$0xff] }
  0x18   : > { %284 = vrot.lane.b32.xlu1 %v2739_v4, %s2698_s15  ;;  %282 = vrot.lane.b32.xlu0 %v2744_v5, %s2698_s15  ;;  %204 = vst.msk [vmem:[#allocation2 + $0x270] sm:$0xff] %vm177_vm0, %v2798_v15  ;;  %184 = vst.msk [vmem:[#allocation2 + $0x90] sm:$0xff] %vm177_vm0, %v2811_v18  ;;  %v2829_v20 = vld [vmem:[%s2730_s14 + $0x139] sm:$0xff]  ;;  %v2834_v21 = vld [vmem:[%s2730_s14 + $0x69] sm:$0xff] }
  0x19   : > { %205 = vst.msk [vmem:[#allocation2 + $0x288] sm:$0xff] %vm177_vm0, %v2808_v17  ;;  %185 = vst.msk [vmem:[#allocation2 + $0xa8] sm:$0xff] %vm177_vm0, %v2818_v19  ;;  %v2837_v22 = vld [vmem:[%s2730_s14 + $0x61] sm:$0xff]  ;;  %v2845_v24 = vld [vmem:[%s2730_s14 + $0x169] sm:$0xff]  ;;  %2485 = vmatpush3.bf16.msra.mxu0 %v2679_v47  ;;  %2655 = vmatpush3.bf16.msra.mxu1 %v2679_v47 }
  0x1a   : > { %v2840_v23 = vld [vmem:[%s2730_s14 + $0x141] sm:$0xff]  ;;  %846 = vst.msk [vmem:[#allocation2 + $0x248] sm:$0xff] %vm177_vm0, %v2829_v20  ;;  %v2848_v25 = vld [vmem:[%s2730_s14 + $0x171] sm:$0xff]  ;;  %850 = vst.msk [vmem:[#allocation2 + $0x2a8] sm:$0xff] %vm177_vm0, %v2845_v24  ;;  %2486 = vmatprep.subr.bf16.mxu0 %v2680_v49  ;;  %2648 = vmatprep.subr.bf16.mxu1 %v2680_v49 }
  0x1b   : > { %847 = vst.msk [vmem:[#allocation2 + $0x260] sm:$0xff] %vm177_vm0, %v2840_v23  ;;  %v2853_v26 = vld [vmem:[%s2730_s14 + $0x60] sm:$0xff]  ;;  %851 = vst.msk [vmem:[#allocation2 + $0x2c0] sm:$0xff] %vm177_vm0, %v2848_v25  ;;  %v2866_v28 = vld [vmem:[%s2730_s14 + $0x68] sm:$0xff] }
  0x1c   : > { %288 = vrot.lane.b32.xlu1 %v2747_v6, %s2698_s15  ;;  %286 = vrot.lane.b32.xlu0 %v2750_v7, %s2698_s15  ;;  %v145_v27 = vld [vmem:[%s2730_s14] sm:$0xff]  ;;  %v146_v29 = vld [vmem:[%s2730_s14 + $0x8] sm:$0xff]  ;;  %186 = vst.msk [vmem:[#allocation2 + $0xc0] sm:$0xff] %vm177_vm0, %v2853_v26  ;;  %187 = vst.msk [vmem:[#allocation2 + $0xd8] sm:$0xff] %vm177_vm0, %v2866_v28 }
  0x1d   : > { %178 = vst.msk [vmem:[#allocation2] sm:$0xff] %vm177_vm0, %v145_v27  ;;  %v2872_v30 = vld [vmem:[%s2730_s14 + $0x1a] sm:$0xff]  ;;  %179 = vst.msk [vmem:[#allocation2 + $0x18] sm:$0xff] %vm177_vm0, %v146_v29  ;;  %v2902_v37 = vld [vmem:[%s2730_s14 + $0x189] sm:$0xff]  ;;  %2487 = vmatpush3.bf16.msra.mxu0 %v2681_v51  ;;  %2656 = vmatpush3.bf16.msra.mxu1 %v2681_v51 }
  0x1e   : > { %v2875_v31 = vld [vmem:[%s2730_s14 + $0x79] sm:$0xff]  ;;  %v2892_v35 = vld [vmem:[%s2730_s14 + $0x181] sm:$0xff]  ;;  %853 = vst.msk [vmem:[#allocation2 + $0x2f0] sm:$0xff] %vm177_vm0, %v2902_v37  ;;  %v404_v45 = vld [vmem:[%s2730_s14 + $0xa] sm:$0xff]  ;;  %2488 = vmatprep.subr.bf16.mxu0 %v2682_v52  ;;  %2649 = vmatprep.subr.bf16.mxu1 %v2682_v52 }
  0x1f   : > { %v2881_v32 = vld [vmem:[%s2730_s14 + $0x78] sm:$0xff]  ;;  %852 = vst.msk [vmem:[#allocation2 + $0x2d8] sm:$0xff] %vm177_vm0, %v2892_v35  ;;  %v2907_v38 = vld [vmem:[%s2730_s14 + $0x22] sm:$0xff]  ;;  %v428_v62 = vld [vmem:[%s2730_s14 + $0x12a] sm:$0xff] }
  0x20   : > { %292 = vrot.lane.b32.xlu1 %v2834_v21, %s2698_s15  ;;  %290 = vrot.lane.b32.xlu0 %v2837_v22, %s2698_s15  ;;  %188 = vst.msk [vmem:[#allocation2 + $0xf0] sm:$0xff] %vm177_vm0, %v2881_v32  ;;  %v403_v40 = vld [vmem:[%s2730_s14 + $0x2] sm:$0xff]  ;;  %v2928_v44 = vld [vmem:[%s2730_s14 + $0x13a] sm:$0xff] }
  0x21   : > { %v169_v43 = vld [vmem:[%s2730_s14 + $0x120] sm:$0xff]  ;;  %v170_v48 = vld [vmem:[%s2730_s14 + $0x128] sm:$0xff]  ;;  %2489 = vmatpush3.bf16.msra.mxu0 %v2683_v54  ;;  %2657 = vmatpush3.bf16.msra.mxu1 %v2683_v54  ;;  %v3006_v63 = vld [vmem:[%s2730_s14 + $0x32] sm:$0xff] }
  0x22   : > { %202 = vst.msk [vmem:[#allocation2 + $0x240] sm:$0xff] %vm177_vm0, %v169_v43  ;;  %203 = vst.msk [vmem:[#allocation2 + $0x258] sm:$0xff] %vm177_vm0, %v170_v48  ;;  %v2949_v50 = vld [vmem:[%s2730_s14 + $0x142] sm:$0xff]  ;;  %v3013_v0 = vld [vmem:[%s2730_s14 + $0x3a] sm:$0xff] }
  0x23   : > { %v234_v53 = vld [vmem:[%s2730_s14 + $0x121] sm:$0xff]  ;;  %v235_v56 = vld [vmem:[%s2730_s14 + $0x129] sm:$0xff]  ;;  %v3125_v27 = vld [vmem:[%s2730_s14 + $0x52] sm:$0xff] }
  0x24   : > { %918 = vrot.lane.b32.xlu1 %v2872_v30, %s2698_s15  ;;  %294 = vrot.lane.b32.xlu0 %v2875_v31, %s2698_s15  ;;  %v2684_v55 = vld [vmem:[%s3978_s1 + $0x48] sm:$0xff]   ;;  %v2686_v58 = vld [vmem:[%s3978_s1 + $0x40] sm:$0xff]  }
  0x25   : > { %v2685_v57 = vld [vmem:[%s3978_s1 + $0x8] sm:$0xff]   ;;  %2490 = vmatprep.subr.bf16.mxu0 %v2684_v55  ;;  %2650 = vmatprep.subr.bf16.mxu1 %v2684_v55  ;;  %v2687_v60 = vld [vmem:[%s3978_s1] sm:$0xff]   ;;  %v3025_v2 = vld [vmem:[%s2730_s14 + $0x90] sm:$0xff] }
  0x26   : > { %v2979_v59 = vld [vmem:[%s2730_s14 + $0x81] sm:$0xff]  ;;  %2491 = vmatpush3.bf16.msra.mxu0 %v2685_v57  ;;  %2658 = vmatpush3.bf16.msra.mxu1 %v2685_v57  ;;  %190 = vst.msk [vmem:[#allocation2 + $0x120] sm:$0xff] %vm177_vm0, %v3025_v2  ;;  %v3131_v29 = vld [vmem:[%s2730_s14 + $0xaa] sm:$0xff] }
  0x27   : > { %831 = vst.msk [vmem:[#allocation2 + $0xe0] sm:$0xff] %vm177_vm0, %v2979_v59  ;;  %2492 = vmatprep.subr.bf16.mxu0 %v2686_v58  ;;  %2651 = vmatprep.subr.bf16.mxu1 %v2686_v58  ;;  %v427_v61 = vld [vmem:[%s2730_s14 + $0x122] sm:$0xff]  ;;  %v3016_v1 = vld [vmem:[%s2730_s14 + $0x7a] sm:$0xff]  ;;  %1473 = vst.msk [vmem:[#allocation2 + $0x100] sm:$0xff] %vm177_vm0, %v3131_v29 }
  0x28   : > { %1111 = vrot.lane.b32.xlu1 %v2761_v8, %s2699_s26  ;;  %920 = vrot.lane.b32.xlu0 %v2907_v38, %s2698_s15  ;;  %1469 = vst.msk [vmem:[#allocation2 + $0xa0] sm:$0xff] %vm177_vm0, %v3016_v1  ;;  %v3028_v3 = vld [vmem:[%s2730_s14 + $0x82] sm:$0xff]  ;;  %v3148_v33 = vld [vmem:[%s2730_s14 + $0x16a] sm:$0xff] }
  0x29   : > { %1470 = vst.msk [vmem:[#allocation2 + $0xb8] sm:$0xff] %vm177_vm0, %v3028_v3  ;;  %v3168_v43 = vld [vmem:[%s2730_s14 + $0xc9] sm:$0xff]  ;;  %v3237_v57 = vld [vmem:[%s2730_s14 + $0xe1] sm:$0xff]  ;;  %v3240_v58 = vld [vmem:[%s2730_s14 + $0xd9] sm:$0xff] }
  0x2a   : > { %2493 = vmatpush3.bf16.msra.mxu0 %v2687_v60  ;;  %2659 = vmatpush3.bf16.msra.mxu1 %v2687_v60  ;;  %837 = vst.msk [vmem:[#allocation2 + $0x170] sm:$0xff] %vm177_vm0, %v3168_v43  ;;  %v3193_v47 = vld [vmem:[%s2730_s14 + $0xca] sm:$0xff]  ;;  %v3196_v48 = vld [vmem:[%s2730_s14 + $0xc2] sm:$0xff]  ;;  %839 = vst.msk [vmem:[#allocation2 + $0x1a0] sm:$0xff] %vm177_vm0, %v3237_v57 }
  0x2b   : > { %1475 = vst.msk [vmem:[#allocation2 + $0x130] sm:$0xff] %vm177_vm0, %v3196_v48  ;;  %1476 = vst.msk [vmem:[#allocation2 + $0x148] sm:$0xff] %vm177_vm0, %v3193_v47  ;;  %v3232_v55 = vld [vmem:[%s2730_s14 + $0x62] sm:$0xff] }
  0x2c   : > { %467 = vrot.lane.b32.xlu1 %v403_v40, %s2699_s26  ;;  %1113 = vrot.lane.b32.xlu0 %v2766_v9, %s2699_s26  ;;  %838 = vst.msk [vmem:[#allocation2 + $0x188] sm:$0xff] %vm177_vm0, %v3240_v58 }
  0x30   : > { %966 = vrot.lane.b32.xlu1 %v2928_v44, %s2698_s15  ;;  %469 = vrot.lane.b32.xlu0 %v404_v45, %s2699_s26 }
  0x34   : > { %1303 = vrot.lane.b32.xlu1 %v2744_v5, %s2700_s13  ;;  %968 = vrot.lane.b32.xlu0 %v2949_v50, %s2698_s15  ;;  %v3042_v5 = vld [vmem:[%s2730_s14 + $0x98] sm:$0xff] }
  0x35   : > { %191 = vst.msk [vmem:[#allocation2 + $0x138] sm:$0xff] %vm177_vm0, %v3042_v5 }
  0x38   : > { %322 = vrot.lane.b32.xlu1 %v234_v53, %s2698_s15  ;;  %1305 = vrot.lane.b32.xlu0 %v2739_v4, %s2700_s13  ;;  %v3039_v4 = vld [vmem:[%s2730_s14 + $0x152] sm:$0xff] }
  0x3c   : > { %661 = vrot.lane.b32.xlu1 %v2773_v10, %s2700_s13  ;;  %324 = vrot.lane.b32.xlu0 %v235_v56, %s2698_s15  ;;  %v3051_v10 = vld [vmem:[%s2730_s14 + $0x15a] sm:$0xff] }
  0x40   : > { %1159 = vrot.lane.b32.xlu1 %v2776_v11, %s2699_s26  ;;  %663 = vrot.lane.b32.xlu0 %v2779_v12, %s2700_s13  ;;  %v3054_v12 = vld [vmem:[%s2730_s14 + $0x91] sm:$0xff] }
  0x41   : > { %832 = vst.msk [vmem:[#allocation2 + $0xf8] sm:$0xff] %vm177_vm0, %v3054_v12 }
  0x44   : > { %515 = vrot.lane.b32.xlu1 %v427_v61, %s2699_s26  ;;  %1161 = vrot.lane.b32.xlu0 %v2788_v13, %s2699_s26 }
  0x48   : > { %1351 = vrot.lane.b32.xlu1 %v2791_v14, %s2700_s13  ;;  %517 = vrot.lane.b32.xlu0 %v428_v62, %s2699_s26  ;;  %v3260_v62 = vld [vmem:[%s2730_s14 + $0x80] sm:$0xff] }
  0x4c   : > { %709 = vrot.lane.b32.xlu1 %v2798_v15, %s2700_s13  ;;  %1353 = vrot.lane.b32.xlu0 %v2801_v16, %s2700_s13  ;;  %v3063_v15 = vld [vmem:[%s2730_s14 + $0x99] sm:$0xff] }
  0x4d   : > { %833 = vst.msk [vmem:[#allocation2 + $0x110] sm:$0xff] %vm177_vm0, %v3063_v15 }
  0x50   : > { %922 = vrot.lane.b32.xlu1 %v3006_v63, %s2698_s15  ;;  %711 = vrot.lane.b32.xlu0 %v2808_v17, %s2700_s13  ;;  %v3081_v17 = vld [vmem:[%s2730_s14 + $0x168] sm:$0xff] }
  0x54   : > { %1115 = vrot.lane.b32.xlu1 %v2811_v18, %s2699_s26  ;;  %924 = vrot.lane.b32.xlu0 %v3013_v0, %s2698_s15 }
  0x58   : > { %471 = vrot.lane.b32.xlu1 %v2872_v30, %s2699_s26  ;;  %1117 = vrot.lane.b32.xlu0 %v2818_v19, %s2699_s26 }
  0x5c   : > { %970 = vrot.lane.b32.xlu1 %v3039_v4, %s2698_s15  ;;  %473 = vrot.lane.b32.xlu0 %v2907_v38, %s2699_s26  ;;  %v3157_v38 = vld [vmem:[%s2730_s14 + $0x172] sm:$0xff] }
  0x60   : > { %1307 = vrot.lane.b32.xlu1 %v2750_v7, %s2700_s13  ;;  %972 = vrot.lane.b32.xlu0 %v3051_v10, %s2698_s15  ;;  %v3072_v7 = vld [vmem:[%s2730_s14 + $0x92] sm:$0xff] }
  0x61   : > { %1471 = vst.msk [vmem:[#allocation2 + $0xd0] sm:$0xff] %vm177_vm0, %v3072_v7 }
  0x64   : > { %326 = vrot.lane.b32.xlu1 %v2829_v20, %s2698_s15  ;;  %1309 = vrot.lane.b32.xlu0 %v2747_v6, %s2700_s13  ;;  %v3084_v6 = vld [vmem:[%s2730_s14 + $0x9a] sm:$0xff]  ;;  %v3107_v20 = vld [vmem:[%s2730_s14 + $0xa9] sm:$0xff] }
  0x65   : > { %1472 = vst.msk [vmem:[#allocation2 + $0xe8] sm:$0xff] %vm177_vm0, %v3084_v6  ;;  %834 = vst.msk [vmem:[#allocation2 + $0x128] sm:$0xff] %vm177_vm0, %v3107_v20 }
  0x68   : > { %665 = vrot.lane.b32.xlu1 %v2761_v8, %s2700_s13  ;;  %328 = vrot.lane.b32.xlu0 %v2840_v23, %s2698_s15  ;;  %v3093_v8 = vld [vmem:[%s2730_s14 + $0x170] sm:$0xff] }
  0x69   : > { %v3118_v23 = vld [vmem:[%s2730_s14 + $0x4a] sm:$0xff] }
  0x6c   : > { %1163 = vrot.lane.b32.xlu1 %v3081_v17, %s2699_s26  ;;  %667 = vrot.lane.b32.xlu0 %v2766_v9, %s2700_s13  ;;  %v3104_v9 = vld [vmem:[%s2730_s14 + $0xb1] sm:$0xff] }
  0x6d   : > { %835 = vst.msk [vmem:[#allocation2 + $0x140] sm:$0xff] %vm177_vm0, %v3104_v9 }
  0x70   : > { %519 = vrot.lane.b32.xlu1 %v2928_v44, %s2699_s26  ;;  %1165 = vrot.lane.b32.xlu0 %v3093_v8, %s2699_s26  ;;  %v3171_v44 = vld [vmem:[%s2730_s14 + $0xc1] sm:$0xff] }
  0x71   : > { %836 = vst.msk [vmem:[#allocation2 + $0x158] sm:$0xff] %vm177_vm0, %v3171_v44 }
  0x74   : > { %1355 = vrot.lane.b32.xlu1 %v2845_v24, %s2700_s13  ;;  %521 = vrot.lane.b32.xlu0 %v2949_v50, %s2699_s26 }
  0x78   : > { %713 = vrot.lane.b32.xlu1 %v2776_v11, %s2700_s13  ;;  %1357 = vrot.lane.b32.xlu0 %v2848_v25, %s2700_s13  ;;  %v3128_v11 = vld [vmem:[%s2730_s14 + $0xb2] sm:$0xff] }
  0x79   : > { %1474 = vst.msk [vmem:[#allocation2 + $0x118] sm:$0xff] %vm177_vm0, %v3128_v11 }
  0x7c   : > { %926 = vrot.lane.b32.xlu1 %v3118_v23, %s2698_s15  ;;  %715 = vrot.lane.b32.xlu0 %v2788_v13, %s2700_s13 }
  0x80   : > { %1119 = vrot.lane.b32.xlu1 %v2853_v26, %s2699_s26  ;;  %928 = vrot.lane.b32.xlu0 %v3125_v27, %s2698_s15 }
  0x82   : > { %v279_v13 = vpop.permute.xlu1 %278  ;;  %v275_v30 = vpop.permute.xlu0 %274 }
  0x83   : > { %373 = vst.msk [vmem:[#allocation2 + $0x30] sm:$0xff] %vm370_vm1, %v279_v13  ;;  %371 = vst.msk [vmem:[#allocation2] sm:$0xff] %vm370_vm1, %v275_v30  ;;  %v176_v13 = vld [vmem:[%s2730_s14 + $0x170] sm:$0xff] }
  0x84   : > { %475 = vrot.lane.b32.xlu1 %v3006_v63, %s2699_s26  ;;  %1121 = vrot.lane.b32.xlu0 %v2866_v28, %s2699_s26  ;;  %v175_v63 = vld [vmem:[%s2730_s14 + $0x168] sm:$0xff]  ;;  %209 = vst.msk [vmem:[#allocation2 + $0x2e8] sm:$0xff] %vm177_vm0, %v176_v13 }
  0x85   : > { %208 = vst.msk [vmem:[#allocation2 + $0x2d0] sm:$0xff] %vm177_vm0, %v175_v63  ;;  %v2408_v13 = vld [vmem:[%s2730_s14 + $0x1a1] sm:$0xff] }
  0x86   : > { %v281_v34 = vpop.permute.xlu1 %280  ;;  %v277_v36 = vpop.permute.xlu0 %276 }
  0x87   : > { %374 = vst.msk [vmem:[#allocation2 + $0x48] sm:$0xff] %vm370_vm1, %v281_v34  ;;  %372 = vst.msk [vmem:[#allocation2 + $0x18] sm:$0xff] %vm370_vm1, %v277_v36 }
  0x88   : > { %974 = vrot.lane.b32.xlu1 %v3148_v33, %s2698_s15  ;;  %477 = vrot.lane.b32.xlu0 %v3013_v0, %s2699_s26 }
  0x8a   : > { %v285_v39 = vpop.permute.xlu1 %284  ;;  %v283_v40 = vpop.permute.xlu0 %282 }
  0x8b   : > { %376 = vst.msk [vmem:[#allocation2 + $0x78] sm:$0xff] %vm370_vm1, %v285_v39  ;;  %375 = vst.msk [vmem:[#allocation2 + $0x60] sm:$0xff] %vm370_vm1, %v283_v40  ;;  %v2344_v40 = vld [vmem:[%s2730_s14 + $0x18a] sm:$0xff] }
  0x8c   : > { %1311 = vrot.lane.b32.xlu1 %v2837_v22, %s2700_s13  ;;  %976 = vrot.lane.b32.xlu0 %v3157_v38, %s2698_s15 }
  0x8e   : > { %v289_v41 = vpop.permute.xlu1 %288  ;;  %v287_v42 = vpop.permute.xlu0 %286 }
  0x8f   : > { %378 = vst.msk [vmem:[#allocation2 + $0xa8] sm:$0xff] %vm370_vm1, %v289_v41  ;;  %377 = vst.msk [vmem:[#allocation2 + $0x90] sm:$0xff] %vm370_vm1, %v287_v42 }
  0x90   : > { %330 = vrot.lane.b32.xlu1 %v2791_v14, %s2698_s15  ;;  %1313 = vrot.lane.b32.xlu0 %v2834_v21, %s2700_s13  ;;  %v3188_v14 = vld [vmem:[%s2730_s14 + $0x180] sm:$0xff] }
  0x92   : > { %v293_v22 = vpop.permute.xlu1 %292  ;;  %v291_v45 = vpop.permute.xlu0 %290 }
  0x93   : > { %380 = vst.msk [vmem:[#allocation2 + $0xd8] sm:$0xff] %vm370_vm1, %v293_v22  ;;  %379 = vst.msk [vmem:[#allocation2 + $0xc0] sm:$0xff] %vm370_vm1, %v291_v45 }
  0x94   : > { %669 = vrot.lane.b32.xlu1 %v2811_v18, %s2700_s13  ;;  %332 = vrot.lane.b32.xlu0 %v2801_v16, %s2698_s15  ;;  %v2287_v16 = vld [vmem:[%s2730_s14 + $0x61] sm:$0xff] }
  0x95   : > { %v3208_v18 = vld [vmem:[%s2730_s14 + $0x188] sm:$0xff]  ;;  %828 = vst.msk [vmem:[#allocation2 + $0x98] sm:$0xff] %vm177_vm0, %v2287_v16 }
  0x96   : > { %v919_v21 = vpop.permute.xlu1 %918  ;;  %v295_v46 = vpop.permute.xlu0 %294 }
  0x97   : > { %1014 = vst.msk [vmem:[#allocation2 + $0x8] sm:$0xff] %vm370_vm1, %v919_v21  ;;  %381 = vst.msk [vmem:[#allocation2 + $0xf0] sm:$0xff] %vm370_vm1, %v295_v46 }
  0x98   : > { %1167 = vrot.lane.b32.xlu1 %v3188_v14, %s2699_s26  ;;  %671 = vrot.lane.b32.xlu0 %v2818_v19, %s2700_s13  ;;  %v2288_v19 = vld [vmem:[%s2730_s14 + $0x69] sm:$0xff] }
  0x99   : > { %829 = vst.msk [vmem:[#allocation2 + $0xb0] sm:$0xff] %vm177_vm0, %v2288_v19 }
  0x9a   : > { %v1112_v49 = vpop.permute.xlu1 %1111  ;;  %v921_v50 = vpop.permute.xlu0 %920 }
  0x9b   : > { %1207 = vst.msk [vmem:[#allocation2 + $0x8] sm:$0xff] %vm563_vm2, %v1112_v49  ;;  %v3303_v49 = vld [vmem:[%s2730_s14 + $0xf9] sm:$0xff] }
  0x9c   : > { %1015 = vst.msk [vmem:[#allocation2 + $0x20] sm:$0xff] %vm370_vm1, %v921_v50  ;;  %523 = vrot.lane.b32.xlu1 %v3039_v4, %s2699_s26  ;;  %1169 = vrot.lane.b32.xlu0 %v3208_v18, %s2699_s26  ;;  %v3306_v50 = vld [vmem:[%s2730_s14 + $0xf1] sm:$0xff] }
  0x9d   : > { %841 = vst.msk [vmem:[#allocation2 + $0x1d0] sm:$0xff] %vm177_vm0, %v3303_v49  ;;  %840 = vst.msk [vmem:[#allocation2 + $0x1b8] sm:$0xff] %vm177_vm0, %v3306_v50 }
  0x9e   : > { %v468_v51 = vpop.permute.xlu1 %467  ;;  %v1114_v52 = vpop.permute.xlu0 %1113 }
  0x9f   : > { %564 = vst.msk [vmem:[#allocation2] sm:$0xff] %vm563_vm2, %v468_v51  ;;  %1208 = vst.msk [vmem:[#allocation2 + $0x20] sm:$0xff] %vm563_vm2, %v1114_v52 }
  0xa0   : > { %1359 = vrot.lane.b32.xlu1 %v2892_v35, %s2700_s13  ;;  %525 = vrot.lane.b32.xlu0 %v3051_v10, %s2699_s26  ;;  %v3267_v10 = vld [vmem:[%s2730_s14 + $0xe2] sm:$0xff] }
  0xa1   : > { %1478 = vst.msk [vmem:[#allocation2 + $0x178] sm:$0xff] %vm177_vm0, %v3267_v10 }
  0xa2   : > { %v967_v53 = vpop.permute.xlu1 %966  ;;  %v470_v54 = vpop.permute.xlu0 %469 }
  0xa3   : > { %1038 = vst.msk [vmem:[#allocation2 + $0x248] sm:$0xff] %vm370_vm1, %v967_v53 }
  0xa4   : > { %565 = vst.msk [vmem:[#allocation2 + $0x18] sm:$0xff] %vm563_vm2, %v470_v54  ;;  %717 = vrot.lane.b32.xlu1 %v3081_v17, %s2700_s13  ;;  %1361 = vrot.lane.b32.xlu0 %v2902_v37, %s2700_s13  ;;  %v3251_v37 = vld [vmem:[%s2730_s14 + $0x6a] sm:$0xff]  ;;  %v3270_v17 = vld [vmem:[%s2730_s14 + $0xda] sm:$0xff] }
  0xa5   : > { %1477 = vst.msk [vmem:[#allocation2 + $0x160] sm:$0xff] %vm177_vm0, %v3270_v17 }
  0xa6   : > { %v1304_v35 = vpop.permute.xlu1 %1303  ;;  %v969_v56 = vpop.permute.xlu0 %968 }
  0xa7   : > { %1399 = vst.msk [vmem:[#allocation2 + $0x8] sm:$0xff] %vm757_vm3, %v1304_v35 }
  0xa8   : > { %1039 = vst.msk [vmem:[#allocation2 + $0x260] sm:$0xff] %vm370_vm1, %v969_v56  ;;  %930 = vrot.lane.b32.xlu1 %v3232_v55, %s2698_s15  ;;  %719 = vrot.lane.b32.xlu0 %v3093_v8, %s2700_s13  ;;  %v2343_v8 = vld [vmem:[%s2730_s14 + $0x182] sm:$0xff] }
  0xaa   : > { %v323_v60 = vpop.permute.xlu1 %322  ;;  %v1306_v61 = vpop.permute.xlu0 %1305 }
  0xab   : > { %395 = vst.msk [vmem:[#allocation2 + $0x240] sm:$0xff] %vm370_vm1, %v323_v60  ;;  %v3328_v60 = vld [vmem:[%s2730_s14 + $0xfa] sm:$0xff] }
  0xac   : > { %1400 = vst.msk [vmem:[#allocation2 + $0x20] sm:$0xff] %vm757_vm3, %v1306_v61  ;;  %1123 = vrot.lane.b32.xlu1 %v2881_v32, %s2699_s26  ;;  %932 = vrot.lane.b32.xlu0 %v3251_v37, %s2698_s15  ;;  %v3331_v61 = vld [vmem:[%s2730_s14 + $0xf2] sm:$0xff] }
  0xad   : > { %1479 = vst.msk [vmem:[#allocation2 + $0x190] sm:$0xff] %vm177_vm0, %v3331_v61  ;;  %1480 = vst.msk [vmem:[#allocation2 + $0x1a8] sm:$0xff] %vm177_vm0, %v3328_v60 }
  0xae   : > { %v662_v0 = vpop.permute.xlu1 %661  ;;  %v325_v4 = vpop.permute.xlu0 %324  ;;  %v1496_v36 = vld [vmem:[#allocation2 + $0x8] sm:$0xff] }
  0xaf   : > { %758 = vst.msk [vmem:[#allocation2] sm:$0xff] %vm757_vm3, %v662_v0 }
  0xb0   : > { %396 = vst.msk [vmem:[#allocation2 + $0x258] sm:$0xff] %vm370_vm1, %v325_v4  ;;  %479 = vrot.lane.b32.xlu1 %v3118_v23, %s2699_s26  ;;  %1125 = vrot.lane.b32.xlu0 %v3260_v62, %s2699_s26 }
  0xb2   : > { %v1160_v30 = vpop.permute.xlu1 %1159  ;;  %v664_v34 = vpop.permute.xlu0 %663 }
  0xb3   : > { %v1499_v39 = vld [vmem:[#allocation2 + $0x20] sm:$0xff]  ;;  %1231 = vst.msk [vmem:[#allocation2 + $0x248] sm:$0xff] %vm563_vm2, %v1160_v30  ;;  %v2409_v30 = vld [vmem:[%s2730_s14 + $0x32] sm:$0xff] }
  0xb4   : > { %759 = vst.msk [vmem:[#allocation2 + $0x18] sm:$0xff] %vm757_vm3, %v664_v34  ;;  %v1592_v23 = vpack.c.bf16 %v1499_v39, %v1496_v36  ;;  %978 = vrot.lane.b32.xlu1 %v2343_v8, %s2698_s15  ;;  %481 = vrot.lane.b32.xlu0 %v3125_v27, %s2699_s26  ;;  %v2410_v34 = vld [vmem:[%s2730_s14 + $0x3a] sm:$0xff] }
  0xb5   : > { %1463 = vst.msk [vmem:[#allocation2 + $0x10] sm:$0xff] %vm177_vm0, %v2409_v30  ;;  %1464 = vst.msk [vmem:[#allocation2 + $0x28] sm:$0xff] %vm177_vm0, %v2410_v34  ;;  %v3448_v30 = vld [vmem:[%s2730_s14 + $0xa8] sm:$0xff] }
  0xb6   : > { %1863 = vmatprep.mubr.bf16.mxu0 %v1592_v23  ;;  %v516_v41 = vpop.permute.xlu1 %515  ;;  %v1162_v42 = vpop.permute.xlu0 %1161  ;;  %v1495_v21 = vld [vmem:[#allocation2] sm:$0xff]  ;;  %v2411_v23 = vld [vmem:[%s2730_s14 + $0x4a] sm:$0xff] }
  0xb7   : > { %588 = vst.msk [vmem:[#allocation2 + $0x240] sm:$0xff] %vm563_vm2, %v516_v41  ;;  %1232 = vst.msk [vmem:[#allocation2 + $0x260] sm:$0xff] %vm563_vm2, %v1162_v42  ;;  %v3356_v41 = vld [vmem:[%s2730_s14 + $0x110] sm:$0xff]  ;;  %v3359_v42 = vld [vmem:[%s2730_s14 + $0x108] sm:$0xff] }
  0xb8   : > { %1315 = vrot.lane.b32.xlu1 %v2875_v31, %s2700_s13  ;;  %980 = vrot.lane.b32.xlu0 %v2344_v40, %s2698_s15  ;;  %v2412_v40 = vld [vmem:[%s2730_s14 + $0x52] sm:$0xff]  ;;  %1465 = vst.msk [vmem:[#allocation2 + $0x40] sm:$0xff] %vm177_vm0, %v2411_v23  ;;  %201 = vst.msk [vmem:[#allocation2 + $0x228] sm:$0xff] %vm177_vm0, %v3356_v41 }
  0xb9   : > { %1466 = vst.msk [vmem:[#allocation2 + $0x58] sm:$0xff] %vm177_vm0, %v2412_v40  ;;  %200 = vst.msk [vmem:[#allocation2 + $0x210] sm:$0xff] %vm177_vm0, %v3359_v42 }
  0xba   : > { %v1352_v22 = vpop.permute.xlu1 %1351  ;;  %v518_v45 = vpop.permute.xlu0 %517 }
  0xbb   : > { %v1498_v46 = vld [vmem:[#allocation2 + $0x18] sm:$0xff]  ;;  %1423 = vst.msk [vmem:[#allocation2 + $0x248] sm:$0xff] %vm757_vm3, %v1352_v22 }
  0xbc   : > { %589 = vst.msk [vmem:[#allocation2 + $0x258] sm:$0xff] %vm563_vm2, %v518_v45  ;;  %v1591_v27 = vpack.c.bf16 %v1498_v46, %v1495_v21  ;;  %334 = vrot.lane.b32.xlu1 %v2845_v24, %s2698_s15  ;;  %1317 = vrot.lane.b32.xlu0 %v2979_v59, %s2700_s13  ;;  %v2375_v24 = vld [vmem:[%s2730_s14 + $0x198] sm:$0xff]  ;;  %v2413_v21 = vld [vmem:[%s2730_s14 + $0x62] sm:$0xff] }
  0xbd   : > { %1467 = vst.msk [vmem:[#allocation2 + $0x70] sm:$0xff] %vm177_vm0, %v2413_v21 }
  0xbe   : > { %1864 = vmatmul.mubr.bf16.vlgmr.msra.gmra.mxu0 %v1591_v27  ;;  %v710_v31 = vpop.permute.xlu1 %709  ;;  %v1354_v16 = vpop.permute.xlu0 %1353 }
  0xbf   : > { %782 = vst.msk [vmem:[#allocation2 + $0x240] sm:$0xff] %vm757_vm3, %v710_v31  ;;  %1424 = vst.msk [vmem:[#allocation2 + $0x260] sm:$0xff] %vm757_vm3, %v1354_v16  ;;  %v2414_v31 = vld [vmem:[%s2730_s14 + $0x6a] sm:$0xff] }
  0xc0   : > { %673 = vrot.lane.b32.xlu1 %v2853_v26, %s2700_s13  ;;  %336 = vrot.lane.b32.xlu0 %v2848_v25, %s2698_s15  ;;  %v2289_v25 = vld [vmem:[%s2730_s14 + $0x79] sm:$0xff]  ;;  %v3388_v16 = vld [vmem:[%s2730_s14 + $0x111] sm:$0xff]  ;;  %1468 = vst.msk [vmem:[#allocation2 + $0x88] sm:$0xff] %vm177_vm0, %v2414_v31 }
  0xc1   : > { %v2376_v26 = vld [vmem:[%s2730_s14 + $0x1a0] sm:$0xff]  ;;  %830 = vst.msk [vmem:[#allocation2 + $0xc8] sm:$0xff] %vm177_vm0, %v2289_v25  ;;  %843 = vst.msk [vmem:[#allocation2 + $0x200] sm:$0xff] %vm177_vm0, %v3388_v16 }
  0xc2   : > { %v923_v19 = vpop.permute.xlu1 %922  ;;  %v712_v51 = vpop.permute.xlu0 %711  ;;  %v1568_v54 = vld [vmem:[#allocation2 + $0x248] sm:$0xff] }
  0xc3   : > { %1016 = vst.msk [vmem:[#allocation2 + $0x38] sm:$0xff] %vm370_vm1, %v923_v19 }
  0xc4   : > { %783 = vst.msk [vmem:[#allocation2 + $0x258] sm:$0xff] %vm757_vm3, %v712_v51  ;;  %1171 = vrot.lane.b32.xlu1 %v2375_v24, %s2699_s26  ;;  %675 = vrot.lane.b32.xlu0 %v2866_v28, %s2700_s13  ;;  %v2407_v28 = vld [vmem:[%s2730_s14 + $0x199] sm:$0xff]  ;;  %v3391_v24 = vld [vmem:[%s2730_s14 + $0x109] sm:$0xff] }
  0xc5   : > { %842 = vst.msk [vmem:[#allocation2 + $0x1e8] sm:$0xff] %vm177_vm0, %v3391_v24  ;;  %v156_v51 = vld [vmem:[%s2730_s14 + $0x80] sm:$0xff] }
  0xc6   : > { %v1116_v52 = vpop.permute.xlu1 %1115  ;;  %v925_v53 = vpop.permute.xlu0 %924  ;;  %v1571_v35 = vld [vmem:[#allocation2 + $0x260] sm:$0xff]  ;;  %189 = vst.msk [vmem:[#allocation2 + $0x108] sm:$0xff] %vm177_vm0, %v156_v51 }
  0xc7   : > { %1209 = vst.msk [vmem:[#allocation2 + $0x38] sm:$0xff] %vm563_vm2, %v1116_v52  ;;  %v1628_v56 = vpack.c.bf16 %v1571_v35, %v1568_v54  ;;  %v1567_v4 = vld [vmem:[#allocation2 + $0x240] sm:$0xff]  ;;  %v3413_v35 = vld [vmem:[%s2730_s14 + $0x112] sm:$0xff] }
  0xc8   : > { %1017 = vst.msk [vmem:[#allocation2 + $0x50] sm:$0xff] %vm370_vm1, %v925_v53  ;;  %527 = vrot.lane.b32.xlu1 %v3148_v33, %s2699_s26  ;;  %1173 = vrot.lane.b32.xlu0 %v2376_v26, %s2699_s26 }
  0xc9   : > { %1959 = vmatprep.mubr.bf16.mxu1 %v1628_v56  ;;  %v3416_v56 = vld [vmem:[%s2730_s14 + $0x10a] sm:$0xff]  ;;  %1482 = vst.msk [vmem:[#allocation2 + $0x1d8] sm:$0xff] %vm177_vm0, %v3413_v35 }
  0xca   : > { %v472_v63 = vpop.permute.xlu1 %471  ;;  %v1118_v0 = vpop.permute.xlu0 %1117  ;;  %1481 = vst.msk [vmem:[#allocation2 + $0x1c0] sm:$0xff] %vm177_vm0, %v3416_v56 }
  0xcb   : > { %v1570_v8 = vld [vmem:[#allocation2 + $0x258] sm:$0xff]  ;;  %566 = vst.msk [vmem:[#allocation2 + $0x30] sm:$0xff] %vm563_vm2, %v472_v63  ;;  %1210 = vst.msk [vmem:[#allocation2 + $0x50] sm:$0xff] %vm563_vm2, %v1118_v0 }
  0xcc   : > { %v1627_v33 = vpack.c.bf16 %v1570_v8, %v1567_v4  ;;  %1363 = vrot.lane.b32.xlu1 %v2407_v28, %s2700_s13  ;;  %529 = vrot.lane.b32.xlu0 %v3157_v38, %s2699_s26  ;;  %v2688_v38 = vld [vmem:[%s3978_s1 + $0x88] sm:$0xff]  }
  0xcd   : > { %2608 = vmatprep.subr.bf16.mxu1 %v2688_v38 }
  0xce   : > { %1960 = vmatmul.mubr.bf16.vlgmr.msra.gmra.mxu1 %v1627_v33  ;;  %v971_v36 = vpop.permute.xlu1 %970  ;;  %v474_v39 = vpop.permute.xlu0 %473 }
  0xcf   : > { %1040 = vst.msk [vmem:[#allocation2 + $0x278] sm:$0xff] %vm370_vm1, %v971_v36  ;;  %2609 = vmatpush3.bf16.msra.mxu1 %v2688_v38 }
  0xd0   : > { %567 = vst.msk [vmem:[#allocation2 + $0x48] sm:$0xff] %vm563_vm2, %v474_v39  ;;  %721 = vrot.lane.b32.xlu1 %v3188_v14, %s2700_s13  ;;  %1365 = vrot.lane.b32.xlu0 %v2408_v13, %s2700_s13  ;;  %v2689_v14 = vld [vmem:[%s3978_s1 + $0x80] sm:$0xff]   ;;  %v3445_v13 = vld [vmem:[%s2730_s14 + $0xb0] sm:$0xff] }
  0xd1   : > { %2610 = vmatprep.subr.bf16.mxu1 %v2689_v14  ;;  %v3456_v39 = vld [vmem:[%s2730_s14 + $0x121] sm:$0xff] }
  0xd2   : > { %v1308_v22 = vpop.permute.xlu1 %1307  ;;  %v973_v45 = vpop.permute.xlu0 %972  ;;  %844 = vst.msk [vmem:[#allocation2 + $0x218] sm:$0xff] %vm177_vm0, %v3456_v39 }
  0xd3   : > { %1401 = vst.msk [vmem:[#allocation2 + $0x38] sm:$0xff] %vm757_vm3, %v1308_v22  ;;  %2611 = vmatpush3.bf16.msra.mxu1 %v2689_v14  ;;  %v3476_v14 = vld [vmem:[%s2730_s14 + $0x122] sm:$0xff] }
  0xd4   : > { %1041 = vst.msk [vmem:[#allocation2 + $0x290] sm:$0xff] %vm370_vm1, %v973_v45  ;;  %934 = vrot.lane.b32.xlu1 %v3016_v1, %s2698_s15  ;;  %723 = vrot.lane.b32.xlu0 %v3208_v18, %s2700_s13  ;;  %v3473_v45 = vld [vmem:[%s2730_s14 + $0x12a] sm:$0xff] }
  0xd5   : > { %1483 = vst.msk [vmem:[#allocation2 + $0x1f0] sm:$0xff] %vm177_vm0, %v3476_v14  ;;  %1484 = vst.msk [vmem:[#allocation2 + $0x208] sm:$0xff] %vm177_vm0, %v3473_v45 }
  0xd6   : > { %v327_v46 = vpop.permute.xlu1 %326  ;;  %v1310_v27 = vpop.permute.xlu0 %1309 }
  0xd7   : > { %397 = vst.msk [vmem:[#allocation2 + $0x270] sm:$0xff] %vm370_vm1, %v327_v46 }
  0xd8   : > { %1402 = vst.msk [vmem:[#allocation2 + $0x50] sm:$0xff] %vm757_vm3, %v1310_v27  ;;  %1127 = vrot.lane.b32.xlu1 %v3025_v2, %s2699_s26  ;;  %936 = vrot.lane.b32.xlu0 %v3028_v3, %s2698_s15 }
  0xda   : > { %v666_v18 = vpop.permute.xlu1 %665  ;;  %v329_v19 = vpop.permute.xlu0 %328  ;;  %v1502_v52 = vld [vmem:[#allocation2 + $0x38] sm:$0xff] }
  0xdb   : > { %760 = vst.msk [vmem:[#allocation2 + $0x30] sm:$0xff] %vm757_vm3, %v666_v18  ;;  %v2432_v18 = vld [vmem:[%s2730_s14 + $0x142] sm:$0xff] }
  0xdc   : > { %398 = vst.msk [vmem:[#allocation2 + $0x288] sm:$0xff] %vm370_vm1, %v329_v19  ;;  %483 = vrot.lane.b32.xlu1 %v3232_v55, %s2699_s26  ;;  %1129 = vrot.lane.b32.xlu0 %v3042_v5, %s2699_s26 }
  0xdd   : > { %1486 = vst.msk [vmem:[#allocation2 + $0x238] sm:$0xff] %vm177_vm0, %v2432_v18 }
  0xde   : > { %v1164_v25 = vpop.permute.xlu1 %1163  ;;  %v668_v26 = vpop.permute.xlu0 %667 }
  0xdf   : > { %v1505_v53 = vld [vmem:[#allocation2 + $0x50] sm:$0xff]  ;;  %1233 = vst.msk [vmem:[#allocation2 + $0x278] sm:$0xff] %vm563_vm2, %v1164_v25 }
  0xe0   : > { %761 = vst.msk [vmem:[#allocation2 + $0x48] sm:$0xff] %vm757_vm3, %v668_v26  ;;  %v1595_v54 = vpack.c.bf16 %v1505_v53, %v1502_v52  ;;  %1319 = vrot.lane.b32.xlu1 %v3054_v12, %s2700_s13  ;;  %485 = vrot.lane.b32.xlu0 %v3251_v37, %s2699_s26  ;;  %v2433_v25 = vld [vmem:[%s2730_s14 + $0x152] sm:$0xff]  ;;  %v2434_v53 = vld [vmem:[%s2730_s14 + $0x15a] sm:$0xff] }
  0xe1   : > { %1487 = vst.msk [vmem:[#allocation2 + $0x250] sm:$0xff] %vm177_vm0, %v2433_v25  ;;  %1488 = vst.msk [vmem:[#allocation2 + $0x268] sm:$0xff] %vm177_vm0, %v2434_v53 }
  0xe2   : > { %1871 = vmatprep.mubr.bf16.mxu0 %v1595_v54  ;;  %v520_v55 = vpop.permute.xlu1 %519  ;;  %v1166_v28 = vpop.permute.xlu0 %1165  ;;  %v1501_v0 = vld [vmem:[#allocation2 + $0x30] sm:$0xff] }
  0xe3   : > { %590 = vst.msk [vmem:[#allocation2 + $0x270] sm:$0xff] %vm563_vm2, %v520_v55  ;;  %1234 = vst.msk [vmem:[#allocation2 + $0x290] sm:$0xff] %vm563_vm2, %v1166_v28  ;;  %v2435_v54 = vld [vmem:[%s2730_s14 + $0x16a] sm:$0xff]  ;;  %v2436_v55 = vld [vmem:[%s2730_s14 + $0x172] sm:$0xff] }
  0xe4   : > { %677 = vrot.lane.b32.xlu1 %v2881_v32, %s2700_s13  ;;  %1321 = vrot.lane.b32.xlu0 %v3063_v15, %s2700_s13  ;;  %1489 = vst.msk [vmem:[#allocation2 + $0x280] sm:$0xff] %vm177_vm0, %v2435_v54  ;;  %1490 = vst.msk [vmem:[#allocation2 + $0x298] sm:$0xff] %vm177_vm0, %v2436_v55  ;;  %v3519_v28 = vld [vmem:[%s2730_s14 + $0xc8] sm:$0xff] }
  0xe6   : > { %v1356_v37 = vpop.permute.xlu1 %1355  ;;  %v522_v63 = vpop.permute.xlu0 %521 }
  0xe7   : > { %v1504_v4 = vld [vmem:[#allocation2 + $0x48] sm:$0xff]  ;;  %1425 = vst.msk [vmem:[#allocation2 + $0x278] sm:$0xff] %vm757_vm3, %v1356_v37  ;;  %v3522_v37 = vld [vmem:[%s2730_s14 + $0xc0] sm:$0xff] }
  0xe8   : > { %591 = vst.msk [vmem:[#allocation2 + $0x288] sm:$0xff] %vm563_vm2, %v522_v63  ;;  %v1594_v8 = vpack.c.bf16 %v1504_v4, %v1501_v0  ;;  %938 = vrot.lane.b32.xlu1 %v3072_v7, %s2698_s15  ;;  %679 = vrot.lane.b32.xlu0 %v3260_v62, %s2700_s13  ;;  %v3453_v62 = vld [vmem:[%s2730_s14 + $0x129] sm:$0xff] }
  0xe9   : > { %845 = vst.msk [vmem:[#allocation2 + $0x230] sm:$0xff] %vm177_vm0, %v3453_v62  ;;  %v2437_v63 = vld [vmem:[%s2730_s14 + $0x182] sm:$0xff]  ;;  %v2438_v0 = vld [vmem:[%s2730_s14 + $0x18a] sm:$0xff] }
  0xea   : > { %1872 = vmatmul.mubr.bf16.gmra.mxu0 %v1594_v8  ;;  %v714_v32 = vpop.permute.xlu1 %713  ;;  %v1358_v33 = vpop.permute.xlu0 %1357  ;;  %1491 = vst.msk [vmem:[#allocation2 + $0x2b0] sm:$0xff] %vm177_vm0, %v2437_v63  ;;  %1492 = vst.msk [vmem:[#allocation2 + $0x2c8] sm:$0xff] %vm177_vm0, %v2438_v0 }
  0xeb   : > { %784 = vst.msk [vmem:[#allocation2 + $0x270] sm:$0xff] %vm757_vm3, %v714_v32  ;;  %1426 = vst.msk [vmem:[#allocation2 + $0x290] sm:$0xff] %vm757_vm3, %v1358_v33 }
  0xec   : > { %296 = vrot.lane.b32.xlu1 %v2979_v59, %s2698_s15  ;;  %940 = vrot.lane.b32.xlu0 %v3084_v6, %s2698_s15 }
  0xee   : > { %v927_v34 = vpop.permute.xlu1 %926  ;;  %v716_v36 = vpop.permute.xlu0 %715  ;;  %v1574_v40 = vld [vmem:[#allocation2 + $0x278] sm:$0xff] }
  0xef   : > { %1018 = vst.msk [vmem:[#allocation2 + $0x68] sm:$0xff] %vm370_vm1, %v927_v34 }
  0xf0   : > { %785 = vst.msk [vmem:[#allocation2 + $0x288] sm:$0xff] %vm757_vm3, %v716_v36  ;;  %1133 = vrot.lane.b32.xlu1 %v3445_v13, %s2699_s26  ;;  %1131 = vrot.lane.b32.xlu0 %v3448_v30, %s2699_s26 }
  0xf2   : > { %v1120_v59 = vpop.permute.xlu1 %1119  ;;  %v929_v23 = vpop.permute.xlu0 %928  ;;  %v1577_v38 = vld [vmem:[#allocation2 + $0x290] sm:$0xff] }
  0xf3   : > { %1211 = vst.msk [vmem:[#allocation2 + $0x68] sm:$0xff] %vm563_vm2, %v1120_v59  ;;  %v1631_v22 = vpack.c.bf16 %v1577_v38, %v1574_v40  ;;  %v1573_v27 = vld [vmem:[#allocation2 + $0x270] sm:$0xff]  ;;  %v159_v40 = vld [vmem:[%s2730_s14 + $0xa8] sm:$0xff] }
  0xf4   : > { %1019 = vst.msk [vmem:[#allocation2 + $0x80] sm:$0xff] %vm370_vm1, %v929_v23  ;;  %489 = vrot.lane.b32.xlu1 %v3028_v3, %s2699_s26  ;;  %487 = vrot.lane.b32.xlu0 %v3016_v1, %s2699_s26  ;;  %v2431_v3 = vld [vmem:[%s2730_s14 + $0x13a] sm:$0xff]  ;;  %v160_v23 = vld [vmem:[%s2730_s14 + $0xb0] sm:$0xff] }
  0xf5   : > { %1967 = vmatprep.mubr.bf16.mxu1 %v1631_v22  ;;  %1485 = vst.msk [vmem:[#allocation2 + $0x220] sm:$0xff] %vm177_vm0, %v2431_v3  ;;  %193 = vst.msk [vmem:[#allocation2 + $0x168] sm:$0xff] %vm177_vm0, %v160_v23  ;;  %v164_v23 = vld [vmem:[%s2730_s14 + $0xe0] sm:$0xff] }
  0xf6   : > { %v476_v21 = vpop.permute.xlu1 %475  ;;  %v1122_v46 = vpop.permute.xlu0 %1121  ;;  %192 = vst.msk [vmem:[#allocation2 + $0x150] sm:$0xff] %vm177_vm0, %v159_v40  ;;  %v163_v40 = vld [vmem:[%s2730_s14 + $0xd8] sm:$0xff]  ;;  %197 = vst.msk [vmem:[#allocation2 + $0x1c8] sm:$0xff] %vm177_vm0, %v164_v23 }
  0xf7   : > { %v1576_v31 = vld [vmem:[#allocation2 + $0x288] sm:$0xff]  ;;  %568 = vst.msk [vmem:[#allocation2 + $0x60] sm:$0xff] %vm563_vm2, %v476_v21  ;;  %1212 = vst.msk [vmem:[#allocation2 + $0x80] sm:$0xff] %vm563_vm2, %v1122_v46 }
  0xf8   : > { %v1630_v1 = vpack.c.bf16 %v1576_v31, %v1573_v27  ;;  %1325 = vrot.lane.b32.xlu1 %v3104_v9, %s2700_s13  ;;  %1323 = vrot.lane.b32.xlu0 %v3107_v20, %s2700_s13  ;;  %196 = vst.msk [vmem:[#allocation2 + $0x1b0] sm:$0xff] %vm177_vm0, %v163_v40 }
  0xfa   : > { %1968 = vmatmul.mubr.bf16.gmra.mxu1 %v1630_v1  ;;  %v975_v19 = vpop.permute.xlu1 %974  ;;  %v478_v51 = vpop.permute.xlu0 %477 }
  0xfb   : > { %1042 = vst.msk [vmem:[#allocation2 + $0x2a8] sm:$0xff] %vm370_vm1, %v975_v19 }
  0xfc   : > { %569 = vst.msk [vmem:[#allocation2 + $0x78] sm:$0xff] %vm563_vm2, %v478_v51  ;;  %683 = vrot.lane.b32.xlu1 %v3042_v5, %s2700_s13  ;;  %681 = vrot.lane.b32.xlu0 %v3025_v2, %s2700_s13 }
  0xfe   : > { %v1312_v26 = vpop.permute.xlu1 %1311  ;;  %v977_v52 = vpop.permute.xlu0 %976 }
  0xff   : > { %1403 = vst.msk [vmem:[#allocation2 + $0x68] sm:$0xff] %vm757_vm3, %v1312_v26 }
 0x100   : > { %1043 = vst.msk [vmem:[#allocation2 + $0x2c0] sm:$0xff] %vm370_vm1, %v977_v52  ;;  %944 = vrot.lane.b32.xlu1 %v3128_v11, %s2698_s15  ;;  %942 = vrot.lane.b32.xlu0 %v3131_v29, %s2698_s15 }
 0x102   : > { %v331_v2 = vpop.permute.xlu1 %330  ;;  %v1314_v5 = vpop.permute.xlu0 %1313 }
 0x103   : > { %399 = vst.msk [vmem:[#allocation2 + $0x2a0] sm:$0xff] %vm370_vm1, %v331_v2  ;;  %v162_v2 = vld [vmem:[%s2730_s14 + $0xc8] sm:$0xff] }
 0x104   : > { %1404 = vst.msk [vmem:[#allocation2 + $0x80] sm:$0xff] %vm757_vm3, %v1314_v5  ;;  %300 = vrot.lane.b32.xlu1 %v3063_v15, %s2698_s15  ;;  %298 = vrot.lane.b32.xlu0 %v3054_v12, %s2698_s15  ;;  %v2439_v12 = vld [vmem:[%s2730_s14 + $0x19a] sm:$0xff]  ;;  %v2440_v15 = vld [vmem:[%s2730_s14 + $0x1a2] sm:$0xff] }
 0x105   : > { %1493 = vst.msk [vmem:[#allocation2 + $0x2e0] sm:$0xff] %vm177_vm0, %v2439_v12  ;;  %1494 = vst.msk [vmem:[#allocation2 + $0x2f8] sm:$0xff] %vm177_vm0, %v2440_v15  ;;  %v161_v5 = vld [vmem:[%s2730_s14 + $0xc0] sm:$0xff] }
 0x106   : > { %v670_v4 = vpop.permute.xlu1 %669  ;;  %v333_v8 = vpop.permute.xlu0 %332  ;;  %v1508_v34 = vld [vmem:[#allocation2 + $0x68] sm:$0xff]  ;;  %195 = vst.msk [vmem:[#allocation2 + $0x198] sm:$0xff] %vm177_vm0, %v162_v2  ;;  %194 = vst.msk [vmem:[#allocation2 + $0x180] sm:$0xff] %vm177_vm0, %v161_v5 }
 0x107   : > { %762 = vst.msk [vmem:[#allocation2 + $0x60] sm:$0xff] %vm757_vm3, %v670_v4  ;;  %v1512_v2 = vld [vmem:[#allocation2 + $0x88] sm:$0xff] }
 0x108   : > { %400 = vst.msk [vmem:[#allocation2 + $0x2b8] sm:$0xff] %vm370_vm1, %v333_v8  ;;  %1137 = vrot.lane.b32.xlu1 %v3519_v28, %s2699_s26  ;;  %1135 = vrot.lane.b32.xlu0 %v3522_v37, %s2699_s26 }
 0x10a   : > { %v1168_v32 = vpop.permute.xlu1 %1167  ;;  %v672_v33 = vpop.permute.xlu0 %671 }
 0x10b   : > { %v1511_v36 = vld [vmem:[#allocation2 + $0x80] sm:$0xff]  ;;  %1235 = vst.msk [vmem:[#allocation2 + $0x2a8] sm:$0xff] %vm563_vm2, %v1168_v32 }
 0x10c   : > { %763 = vst.msk [vmem:[#allocation2 + $0x78] sm:$0xff] %vm757_vm3, %v672_v33  ;;  %v1598_v59 = vpack.c.bf16 %v1511_v36, %v1508_v34  ;;  %493 = vrot.lane.b32.xlu1 %v3084_v6, %s2699_s26  ;;  %491 = vrot.lane.b32.xlu0 %v3072_v7, %s2699_s26 }
 0x10e   : > { %1879 = vmatprep.mubr.bf16.mxu0 %v1598_v59  ;;  %v524_v38 = vpop.permute.xlu1 %523  ;;  %v1170_v22 = vpop.permute.xlu0 %1169  ;;  %v1507_v21 = vld [vmem:[#allocation2 + $0x60] sm:$0xff] }
 0x10f   : > { %592 = vst.msk [vmem:[#allocation2 + $0x2a0] sm:$0xff] %vm563_vm2, %v524_v38  ;;  %1236 = vst.msk [vmem:[#allocation2 + $0x2c0] sm:$0xff] %vm563_vm2, %v1170_v22 }
 0x110   : > { %1329 = vrot.lane.b32.xlu1 %v3168_v43, %s2700_s13  ;;  %1327 = vrot.lane.b32.xlu0 %v3171_v44, %s2700_s13 }
 0x112   : > { %v1360_v7 = vpop.permute.xlu1 %1359  ;;  %v526_v6 = vpop.permute.xlu0 %525 }
 0x113   : > { %v1510_v46 = vld [vmem:[#allocation2 + $0x78] sm:$0xff]  ;;  %1427 = vst.msk [vmem:[#allocation2 + $0x2a8] sm:$0xff] %vm757_vm3, %v1360_v7 }
 0x114   : > { %593 = vst.msk [vmem:[#allocation2 + $0x2b8] sm:$0xff] %vm563_vm2, %v526_v6  ;;  %v1597_v27 = vpack.c.bf16 %v1510_v46, %v1507_v21  ;;  %687 = vrot.lane.b32.xlu1 %v3445_v13, %s2700_s13  ;;  %685 = vrot.lane.b32.xlu0 %v3448_v30, %s2700_s13  ;;  %v3573_v13 = vld [vmem:[%s2730_s14 + $0xe0] sm:$0xff]  ;;  %v3576_v30 = vld [vmem:[%s2730_s14 + $0xd8] sm:$0xff] }
 0x116   : > { %1880 = vmatmul.mubr.bf16.gmra.mxu0 %v1597_v27  ;;  %v718_v31 = vpop.permute.xlu1 %717  ;;  %v1362_v1 = vpop.permute.xlu0 %1361 }
 0x117   : > { %786 = vst.msk [vmem:[#allocation2 + $0x2a0] sm:$0xff] %vm757_vm3, %v718_v31  ;;  %1428 = vst.msk [vmem:[#allocation2 + $0x2c0] sm:$0xff] %vm757_vm3, %v1362_v1 }
 0x118   : > { %948 = vrot.lane.b32.xlu1 %v3193_v47, %s2698_s15  ;;  %946 = vrot.lane.b32.xlu0 %v3196_v48, %s2698_s15 }
 0x11a   : > { %v931_v3 = vpop.permute.xlu1 %930  ;;  %v720_v18 = vpop.permute.xlu0 %719  ;;  %v1580_v25 = vld [vmem:[#allocation2 + $0x2a8] sm:$0xff] }
 0x11b   : > { %1020 = vst.msk [vmem:[#allocation2 + $0x98] sm:$0xff] %vm370_vm1, %v931_v3 }
 0x11c   : > { %787 = vst.msk [vmem:[#allocation2 + $0x2b8] sm:$0xff] %vm757_vm3, %v720_v18  ;;  %304 = vrot.lane.b32.xlu1 %v3104_v9, %s2698_s15  ;;  %302 = vrot.lane.b32.xlu0 %v3107_v20, %s2698_s15 }
 0x11e   : > { %v1124_v19 = vpop.permute.xlu1 %1123  ;;  %v933_v51 = vpop.permute.xlu0 %932  ;;  %v1583_v26 = vld [vmem:[#allocation2 + $0x2c0] sm:$0xff] }
 0x11f   : > { %1213 = vst.msk [vmem:[#allocation2 + $0x98] sm:$0xff] %vm563_vm2, %v1124_v19  ;;  %v1634_v52 = vpack.c.bf16 %v1583_v26, %v1580_v25  ;;  %v1579_v53 = vld [vmem:[#allocation2 + $0x2a0] sm:$0xff]  ;;  %v1500_v19 = vld [vmem:[#allocation2 + $0x28] sm:$0xff] }
 0x120   : > { %1021 = vst.msk [vmem:[#allocation2 + $0xb0] sm:$0xff] %vm370_vm1, %v933_v51  ;;  %1141 = vrot.lane.b32.xlu1 %v3573_v13, %s2699_s26  ;;  %1139 = vrot.lane.b32.xlu0 %v3576_v30, %s2699_s26 }
 0x121   : > { %1975 = vmatprep.mubr.bf16.mxu1 %v1634_v52 }
 0x122   : > { %v480_v9 = vpop.permute.xlu1 %479  ;;  %v1126_v20 = vpop.permute.xlu0 %1125 }
 0x123   : > { %v1582_v54 = vld [vmem:[#allocation2 + $0x2b8] sm:$0xff]  ;;  %570 = vst.msk [vmem:[#allocation2 + $0x90] sm:$0xff] %vm563_vm2, %v480_v9  ;;  %1214 = vst.msk [vmem:[#allocation2 + $0xb0] sm:$0xff] %vm563_vm2, %v1126_v20 }
 0x124   : > { %v1633_v55 = vpack.c.bf16 %v1582_v54, %v1579_v53  ;;  %497 = vrot.lane.b32.xlu1 %v3128_v11, %s2699_s26  ;;  %495 = vrot.lane.b32.xlu0 %v3131_v29, %s2699_s26  ;;  %v1503_v53 = vld [vmem:[#allocation2 + $0x40] sm:$0xff]  ;;  %v1506_v54 = vld [vmem:[#allocation2 + $0x58] sm:$0xff] }
 0x125   : > { %v1596_v5 = vpack.c.bf16 %v1506_v54, %v1503_v53  ;;  %v1557_v54 = vld [vmem:[#allocation2 + $0x1f0] sm:$0xff] }
 0x126   : > { %1976 = vmatmul.mubr.bf16.gmra.mxu1 %v1633_v55  ;;  %v979_v63 = vpop.permute.xlu1 %978  ;;  %v482_v0 = vpop.permute.xlu0 %481  ;;  %v1509_v55 = vld [vmem:[#allocation2 + $0x70] sm:$0xff] }
 0x127   : > { %1044 = vst.msk [vmem:[#allocation2 + $0x2d8] sm:$0xff] %vm370_vm1, %v979_v63  ;;  %v166_v63 = vld [vmem:[%s2730_s14 + $0xf8] sm:$0xff] }
 0x128   : > { %571 = vst.msk [vmem:[#allocation2 + $0xa8] sm:$0xff] %vm563_vm2, %v482_v0  ;;  %1333 = vrot.lane.b32.xlu1 %v3237_v57, %s2700_s13  ;;  %1331 = vrot.lane.b32.xlu0 %v3240_v58, %s2700_s13  ;;  %v165_v0 = vld [vmem:[%s2730_s14 + $0xf0] sm:$0xff] }
 0x129   : > { %199 = vst.msk [vmem:[#allocation2 + $0x1f8] sm:$0xff] %vm177_vm0, %v166_v63  ;;  %198 = vst.msk [vmem:[#allocation2 + $0x1e0] sm:$0xff] %vm177_vm0, %v165_v0 }
 0x12a   : > { %v1316_v11 = vpop.permute.xlu1 %1315  ;;  %v981_v29 = vpop.permute.xlu0 %980 }
 0x12b   : > { %1405 = vst.msk [vmem:[#allocation2 + $0x98] sm:$0xff] %vm757_vm3, %v1316_v11 }
 0x12c   : > { %1045 = vst.msk [vmem:[#allocation2 + $0x2f0] sm:$0xff] %vm370_vm1, %v981_v29  ;;  %691 = vrot.lane.b32.xlu1 %v3519_v28, %s2700_s13  ;;  %689 = vrot.lane.b32.xlu0 %v3522_v37, %s2700_s13  ;;  %v3619_v28 = vld [vmem:[%s2730_s14 + $0xf8] sm:$0xff]  ;;  %v3622_v37 = vld [vmem:[%s2730_s14 + $0xf0] sm:$0xff] }
 0x12e   : > { %v335_v4 = vpop.permute.xlu1 %334  ;;  %v1318_v8 = vpop.permute.xlu0 %1317 }
 0x12f   : > { %401 = vst.msk [vmem:[#allocation2 + $0x2d0] sm:$0xff] %vm370_vm1, %v335_v4  ;;  %v1599_v4 = vpack.c.bf16 %v1512_v2, %v1509_v55 }
 0x130   : > { %1406 = vst.msk [vmem:[#allocation2 + $0xb0] sm:$0xff] %vm757_vm3, %v1318_v8  ;;  %952 = vrot.lane.b32.xlu1 %v3267_v10, %s2698_s15  ;;  %950 = vrot.lane.b32.xlu0 %v3270_v17, %s2698_s15  ;;  %v1515_v8 = vld [vmem:[#allocation2 + $0xa0] sm:$0xff] }
 0x132   : > { %v674_v12 = vpop.permute.xlu1 %673  ;;  %v337_v15 = vpop.permute.xlu0 %336  ;;  %v1514_v34 = vld [vmem:[#allocation2 + $0x98] sm:$0xff] }
 0x133   : > { %764 = vst.msk [vmem:[#allocation2 + $0x90] sm:$0xff] %vm757_vm3, %v674_v12  ;;  %v1518_v12 = vld [vmem:[#allocation2 + $0xb8] sm:$0xff] }
 0x134   : > { %402 = vst.msk [vmem:[#allocation2 + $0x2e8] sm:$0xff] %vm370_vm1, %v337_v15  ;;  %308 = vrot.lane.b32.xlu1 %v3168_v43, %s2698_s15  ;;  %306 = vrot.lane.b32.xlu0 %v3171_v44, %s2698_s15  ;;  %v1521_v15 = vld [vmem:[#allocation2 + $0xd0] sm:$0xff] }
 0x136   : > { %v1172_v32 = vpop.permute.xlu1 %1171  ;;  %v676_v33 = vpop.permute.xlu0 %675 }
 0x137   : > { %v1517_v36 = vld [vmem:[#allocation2 + $0xb0] sm:$0xff]  ;;  %1237 = vst.msk [vmem:[#allocation2 + $0x2d8] sm:$0xff] %vm563_vm2, %v1172_v32  ;;  %v1524_v32 = vld [vmem:[#allocation2 + $0xe8] sm:$0xff] }
 0x138   : > { %765 = vst.msk [vmem:[#allocation2 + $0xa8] sm:$0xff] %vm757_vm3, %v676_v33  ;;  %v1601_v59 = vpack.c.bf16 %v1517_v36, %v1514_v34  ;;  %1145 = vrot.lane.b32.xlu1 %v3619_v28, %s2699_s26  ;;  %1143 = vrot.lane.b32.xlu0 %v3622_v37, %s2699_s26  ;;  %v1602_v33 = vpack.c.bf16 %v1518_v12, %v1515_v8 }
 0x13a   : > { %1887 = vmatprep.mubr.bf16.mxu0 %v1601_v59  ;;  %v528_v43 = vpop.permute.xlu1 %527  ;;  %v1174_v44 = vpop.permute.xlu0 %1173  ;;  %v1513_v7 = vld [vmem:[#allocation2 + $0x90] sm:$0xff] }
 0x13b   : > { %594 = vst.msk [vmem:[#allocation2 + $0x2d0] sm:$0xff] %vm563_vm2, %v528_v43  ;;  %1238 = vst.msk [vmem:[#allocation2 + $0x2f0] sm:$0xff] %vm563_vm2, %v1174_v44  ;;  %v1605_v44 = vpack.c.bf16 %v1524_v32, %v1521_v15 }
 0x13c   : > { %501 = vrot.lane.b32.xlu1 %v3193_v47, %s2699_s26  ;;  %499 = vrot.lane.b32.xlu0 %v3196_v48, %s2699_s26 }
 0x13e   : > { %v1364_v38 = vpop.permute.xlu1 %1363  ;;  %v530_v22 = vpop.permute.xlu0 %529 }
 0x13f   : > { %v1516_v6 = vld [vmem:[#allocation2 + $0xa8] sm:$0xff]  ;;  %1429 = vst.msk [vmem:[#allocation2 + $0x2d8] sm:$0xff] %vm757_vm3, %v1364_v38 }
 0x140   : > { %595 = vst.msk [vmem:[#allocation2 + $0x2e8] sm:$0xff] %vm563_vm2, %v530_v22  ;;  %v1600_v21 = vpack.c.bf16 %v1516_v6, %v1513_v7  ;;  %1337 = vrot.lane.b32.xlu1 %v3303_v49, %s2700_s13  ;;  %1335 = vrot.lane.b32.xlu0 %v3306_v50, %s2700_s13  ;;  %v1530_v7 = vld [vmem:[#allocation2 + $0x118] sm:$0xff] }
 0x142   : > { %1888 = vmatmul.mubr.bf16.gmra.mxu0 %v1600_v21  ;;  %v722_v47 = vpop.permute.xlu1 %721  ;;  %v1366_v48 = vpop.permute.xlu0 %1365  ;;  %v1533_v21 = vld [vmem:[#allocation2 + $0x130] sm:$0xff] }
 0x143   : > { %788 = vst.msk [vmem:[#allocation2 + $0x2d0] sm:$0xff] %vm757_vm3, %v722_v47  ;;  %1430 = vst.msk [vmem:[#allocation2 + $0x2f0] sm:$0xff] %vm757_vm3, %v1366_v48  ;;  %v1536_v47 = vld [vmem:[#allocation2 + $0x148] sm:$0xff] }
 0x144   : > { %695 = vrot.lane.b32.xlu1 %v3573_v13, %s2700_s13  ;;  %693 = vrot.lane.b32.xlu0 %v3576_v30, %s2700_s13  ;;  %v1497_v30 = vld [vmem:[#allocation2 + $0x10] sm:$0xff]  ;;  %v3710_v48 = vld [vmem:[%s2730_s14 + $0x128] sm:$0xff] }
 0x145   : > { %v1593_v9 = vpack.c.bf16 %v1500_v19, %v1497_v30  ;;  %v1545_v30 = vld [vmem:[#allocation2 + $0x190] sm:$0xff]  ;;  %v1548_v19 = vld [vmem:[#allocation2 + $0x1a8] sm:$0xff] }
 0x146   : > { %v935_v46 = vpop.permute.xlu1 %934  ;;  %v724_v27 = vpop.permute.xlu0 %723  ;;  %v1586_v3 = vld [vmem:[#allocation2 + $0x2d8] sm:$0xff] }
 0x147   : > { %1022 = vst.msk [vmem:[#allocation2 + $0xc8] sm:$0xff] %vm370_vm1, %v935_v46  ;;  %v3713_v46 = vld [vmem:[%s2730_s14 + $0x120] sm:$0xff] }
 0x148   : > { %789 = vst.msk [vmem:[#allocation2 + $0x2e8] sm:$0xff] %vm757_vm3, %v724_v27  ;;  %956 = vrot.lane.b32.xlu1 %v3328_v60, %s2698_s15  ;;  %954 = vrot.lane.b32.xlu0 %v3331_v61, %s2698_s15 }
 0x14a   : > { %v1128_v31 = vpop.permute.xlu1 %1127  ;;  %v937_v1 = vpop.permute.xlu0 %936  ;;  %v1589_v18 = vld [vmem:[#allocation2 + $0x2f0] sm:$0xff] }
 0x14b   : > { %1215 = vst.msk [vmem:[#allocation2 + $0xc8] sm:$0xff] %vm563_vm2, %v1128_v31  ;;  %v1637_v13 = vpack.c.bf16 %v1589_v18, %v1586_v3  ;;  %v1585_v26 = vld [vmem:[#allocation2 + $0x2d0] sm:$0xff]  ;;  %v1611_v3 = vpack.c.bf16 %v1536_v47, %v1533_v21  ;;  %v1539_v18 = vld [vmem:[#allocation2 + $0x160] sm:$0xff] }
 0x14c   : > { %1023 = vst.msk [vmem:[#allocation2 + $0xe0] sm:$0xff] %vm370_vm1, %v937_v1  ;;  %312 = vrot.lane.b32.xlu1 %v3237_v57, %s2698_s15  ;;  %310 = vrot.lane.b32.xlu0 %v3240_v58, %s2698_s15 }
 0x14d   : > { %1983 = vmatprep.mubr.bf16.mxu1 %v1637_v13  ;;  %v1542_v13 = vld [vmem:[#allocation2 + $0x178] sm:$0xff] }
 0x14e   : > { %v484_v51 = vpop.permute.xlu1 %483  ;;  %v1130_v25 = vpop.permute.xlu0 %1129 }
 0x14f   : > { %v1588_v52 = vld [vmem:[#allocation2 + $0x2e8] sm:$0xff]  ;;  %572 = vst.msk [vmem:[#allocation2 + $0xc0] sm:$0xff] %vm563_vm2, %v484_v51  ;;  %1216 = vst.msk [vmem:[#allocation2 + $0xe0] sm:$0xff] %vm563_vm2, %v1130_v25  ;;  %v1614_v51 = vpack.c.bf16 %v1542_v13, %v1539_v18 }
 0x150   : > { %v1636_v20 = vpack.c.bf16 %v1588_v52, %v1585_v26  ;;  %1149 = vrot.lane.b32.xlu1 %v3356_v41, %s2699_s26  ;;  %1147 = vrot.lane.b32.xlu0 %v3359_v42, %s2699_s26  ;;  %v1617_v52 = vpack.c.bf16 %v1548_v19, %v1545_v30 }
 0x152   : > { %1984 = vmatmul.mubr.bf16.gmra.mxu1 %v1636_v20  ;;  %v1320_v57 = vpop.permute.xlu1 %1319  ;;  %v486_v58 = vpop.permute.xlu0 %485 }
 0x153   : > { %2612 = vmatprep.mubr.msk.bf16.mxu1 %vm177_vm0, %v1593_v9  ;;  %1407 = vst.msk [vmem:[#allocation2 + $0xc8] sm:$0xff] %vm757_vm3, %v1320_v57 }
 0x154   : > { %573 = vst.msk [vmem:[#allocation2 + $0xd8] sm:$0xff] %vm563_vm2, %v486_v58  ;;  %505 = vrot.lane.b32.xlu1 %v3267_v10, %s2699_s26  ;;  %503 = vrot.lane.b32.xlu0 %v3270_v17, %s2699_s26  ;;  %v1554_v58 = vld [vmem:[#allocation2 + $0x1d8] sm:$0xff] }
 0x156   : > { %v678_v11 = vpop.permute.xlu1 %677  ;;  %v1322_v29 = vpop.permute.xlu0 %1321 }
 0x157   : > { %766 = vst.msk [vmem:[#allocation2 + $0xc0] sm:$0xff] %vm757_vm3, %v678_v11  ;;  %1408 = vst.msk [vmem:[#allocation2 + $0xe0] sm:$0xff] %vm757_vm3, %v1322_v29  ;;  %v1563_v29 = vld [vmem:[#allocation2 + $0x220] sm:$0xff] }
 0x158   : > { %1341 = vrot.lane.b32.xlu1 %v3388_v16, %s2700_s13  ;;  %1339 = vrot.lane.b32.xlu0 %v3391_v24, %s2700_s13 }
 0x15a   : > { %2613 = vmatmul.mubr.msk.bf16.vlgmr.msra.gmra.mxu1 %vm177_vm0, %v1596_v5  ;;  %v939_v10 = vpop.permute.xlu1 %938  ;;  %v680_v17 = vpop.permute.xlu0 %679  ;;  %v1520_v59 = vld [vmem:[#allocation2 + $0xc8] sm:$0xff] }
 0x15b   : > { %2616 = vmatprep.mubr.msk.bf16.mxu1 %vm177_vm0, %v1599_v4  ;;  %1024 = vst.msk [vmem:[#allocation2 + $0xf8] sm:$0xff] %vm370_vm1, %v939_v10  ;;  %v1566_v4 = vld [vmem:[#allocation2 + $0x238] sm:$0xff]  ;;  %v1569_v10 = vld [vmem:[#allocation2 + $0x250] sm:$0xff] }
 0x15c   : > { %767 = vst.msk [vmem:[#allocation2 + $0xd8] sm:$0xff] %vm757_vm3, %v680_v17  ;;  %699 = vrot.lane.b32.xlu1 %v3619_v28, %s2700_s13  ;;  %697 = vrot.lane.b32.xlu0 %v3622_v37, %s2700_s13  ;;  %v1527_v28 = vld [vmem:[#allocation2 + $0x100] sm:$0xff]  ;;  %v1572_v17 = vld [vmem:[#allocation2 + $0x268] sm:$0xff]  ;;  %v1626_v8 = vpack.c.bf16 %v1566_v4, %v1563_v29 }
 0x15d   : > { %v1608_v27 = vpack.c.bf16 %v1530_v7, %v1527_v28  ;;  %v1629_v32 = vpack.c.bf16 %v1572_v17, %v1569_v10 }
 0x15e   : > { %v297_v34 = vpop.permute.xlu1 %296  ;;  %v941_v36 = vpop.permute.xlu0 %940  ;;  %v1523_v43 = vld [vmem:[#allocation2 + $0xe0] sm:$0xff] }
 0x15f   : > { %382 = vst.msk [vmem:[#allocation2 + $0x108] sm:$0xff] %vm370_vm1, %v297_v34  ;;  %1025 = vst.msk [vmem:[#allocation2 + $0x110] sm:$0xff] %vm370_vm1, %v941_v36  ;;  %v1604_v23 = vpack.c.bf16 %v1523_v43, %v1520_v59  ;;  %v1519_v38 = vld [vmem:[#allocation2 + $0xc0] sm:$0xff]  ;;  %v1578_v34 = vld [vmem:[#allocation2 + $0x298] sm:$0xff] }
 0x160   : > { %960 = vrot.lane.b32.xlu1 %v3413_v35, %s2698_s15  ;;  %958 = vrot.lane.b32.xlu0 %v3416_v56, %s2698_s15  ;;  %v1581_v36 = vld [vmem:[#allocation2 + $0x2b0] sm:$0xff]  ;;  %v1584_v59 = vld [vmem:[#allocation2 + $0x2c8] sm:$0xff] }
 0x161   : > { %1895 = vmatprep.mubr.bf16.mxu0 %v1604_v23  ;;  %v2400_v43 = vld [vmem:[%s2730_s14 + $0x141] sm:$0xff] }
 0x162   : > { %2617 = vmatmul.mubr.msk.bf16.gmra.mxu1 %vm177_vm0, %v1602_v33  ;;  %v1134_v37 = vpop.permute.xlu1 %1133  ;;  %v1132_v40 = vpop.permute.xlu0 %1131  ;;  %v1575_v33 = vld [vmem:[#allocation2 + $0x280] sm:$0xff] }
 0x163   : > { %v1522_v22 = vld [vmem:[#allocation2 + $0xd8] sm:$0xff]  ;;  %2620 = vmatprep.mubr.msk.bf16.mxu1 %vm177_vm0, %v1605_v44  ;;  %1218 = vst.msk [vmem:[#allocation2 + $0x110] sm:$0xff] %vm563_vm2, %v1134_v37  ;;  %1217 = vst.msk [vmem:[#allocation2 + $0xf8] sm:$0xff] %vm563_vm2, %v1132_v40  ;;  %v1632_v23 = vpack.c.bf16 %v1578_v34, %v1575_v33  ;;  %v1635_v40 = vpack.c.bf16 %v1584_v59, %v1581_v36 }
 0x164   : > { %v1603_v6 = vpack.c.bf16 %v1522_v22, %v1519_v38  ;;  %316 = vrot.lane.b32.xlu1 %v3303_v49, %s2698_s15  ;;  %314 = vrot.lane.b32.xlu0 %v3306_v50, %s2698_s15  ;;  %v2399_v44 = vld [vmem:[%s2730_s14 + $0x139] sm:$0xff] }
 0x166   : > { %1896 = vmatmul.mubr.bf16.gmra.mxu0 %v1603_v6  ;;  %v490_v31 = vpop.permute.xlu1 %489  ;;  %v488_v1 = vpop.permute.xlu0 %487  ;;  %v1590_v6 = vld [vmem:[#allocation2 + $0x2f8] sm:$0xff] }
 0x167   : > { %575 = vst.msk [vmem:[#allocation2 + $0x108] sm:$0xff] %vm563_vm2, %v490_v31  ;;  %574 = vst.msk [vmem:[#allocation2 + $0xf0] sm:$0xff] %vm563_vm2, %v488_v1 }
 0x168   : > { %1153 = vrot.lane.b32.xlu1 %v3710_v48, %s2699_s26  ;;  %1151 = vrot.lane.b32.xlu0 %v3713_v46, %s2699_s26 }
 0x16a   : > { %2621 = vmatmul.mubr.msk.bf16.gmra.mxu1 %vm177_vm0, %v1608_v27  ;;  %v1326_v49 = vpop.permute.xlu1 %1325  ;;  %v1324_v50 = vpop.permute.xlu0 %1323 }
 0x16b   : > { %2624 = vmatprep.mubr.msk.bf16.mxu1 %vm177_vm0, %v1611_v3  ;;  %1410 = vst.msk [vmem:[#allocation2 + $0x110] sm:$0xff] %vm757_vm3, %v1326_v49  ;;  %1409 = vst.msk [vmem:[#allocation2 + $0xf8] sm:$0xff] %vm757_vm3, %v1324_v50 }
 0x16c   : > { %509 = vrot.lane.b32.xlu1 %v3328_v60, %s2699_s26  ;;  %507 = vrot.lane.b32.xlu0 %v3331_v61, %s2699_s26  ;;  %v1551_v60 = vld [vmem:[#allocation2 + $0x1c0] sm:$0xff] }
 0x16e   : > { %v684_v25 = vpop.permute.xlu1 %683  ;;  %v682_v26 = vpop.permute.xlu0 %681 }
 0x16f   : > { %769 = vst.msk [vmem:[#allocation2 + $0x108] sm:$0xff] %vm757_vm3, %v684_v25  ;;  %768 = vst.msk [vmem:[#allocation2 + $0xf0] sm:$0xff] %vm757_vm3, %v682_v26 }
 0x170   : > { %1345 = vrot.lane.b32.xlu1 %v3453_v62, %s2700_s13  ;;  %1343 = vrot.lane.b32.xlu0 %v3456_v39, %s2700_s13  ;;  %v1560_v62 = vld [vmem:[#allocation2 + $0x208] sm:$0xff]  ;;  %v1620_v39 = vpack.c.bf16 %v1554_v58, %v1551_v60 }
 0x171   : > { %v1623_v0 = vpack.c.bf16 %v1560_v62, %v1557_v54 }
 0x172   : > { %2625 = vmatmul.mubr.msk.bf16.gmra.mxu1 %vm177_vm0, %v1614_v51  ;;  %v945_v9 = vpop.permute.xlu1 %944  ;;  %v943_v20 = vpop.permute.xlu0 %942  ;;  %v1526_v61 = vld [vmem:[#allocation2 + $0xf8] sm:$0xff]  ;;  %v1529_v57 = vld [vmem:[#allocation2 + $0x110] sm:$0xff] }
 0x173   : > { %2628 = vmatprep.mubr.msk.bf16.mxu1 %vm177_vm0, %v1617_v52  ;;  %1027 = vst.msk [vmem:[#allocation2 + $0x140] sm:$0xff] %vm370_vm1, %v945_v9  ;;  %1026 = vst.msk [vmem:[#allocation2 + $0x128] sm:$0xff] %vm370_vm1, %v943_v20  ;;  %v1607_v53 = vpack.c.bf16 %v1529_v57, %v1526_v61 }
 0x174   : > { %703 = vrot.lane.b32.xlu1 %v3356_v41, %s2700_s13  ;;  %701 = vrot.lane.b32.xlu0 %v3359_v42, %s2700_s13 }
 0x175   : > { %1903 = vmatprep.mubr.bf16.mxu0 %v1607_v53 }
 0x176   : > { %v301_v55 = vpop.permute.xlu1 %300  ;;  %v299_v2 = vpop.permute.xlu0 %298  ;;  %v1525_v5 = vld [vmem:[#allocation2 + $0xf0] sm:$0xff]  ;;  %v1528_v63 = vld [vmem:[#allocation2 + $0x108] sm:$0xff] }
 0x177   : > { %384 = vst.msk [vmem:[#allocation2 + $0x138] sm:$0xff] %vm370_vm1, %v301_v55  ;;  %383 = vst.msk [vmem:[#allocation2 + $0x120] sm:$0xff] %vm370_vm1, %v299_v2  ;;  %v1606_v11 = vpack.c.bf16 %v1528_v63, %v1525_v5 }
 0x178   : > { %964 = vrot.lane.b32.xlu1 %v3473_v45, %s2698_s15  ;;  %962 = vrot.lane.b32.xlu0 %v3476_v14, %s2698_s15  ;;  %v2368_v45 = vld [vmem:[%s2730_s14 + $0x140] sm:$0xff]  ;;  %v2367_v14 = vld [vmem:[%s2730_s14 + $0x138] sm:$0xff]  ;;  %s2477_s14 = sshll.u32 %s3981_s10, 8 }
 0x179   : > { %1904 = vmatmul.mubr.bf16.gmra.mxu0 %v1606_v11  ;;  %s3868_s3 = scalar_lea.vmem %s3979_s2, %s2477_s14 }
 0x17a   : > { %2629 = vmatmul.mubr.msk.bf16.gmra.mxu1 %vm177_vm0, %v1620_v39  ;;  %v1138_v41 = vpop.permute.xlu1 %1137  ;;  %v1136_v42 = vpop.permute.xlu0 %1135 }
 0x17b   : > { %2632 = vmatprep.mubr.msk.bf16.mxu1 %vm177_vm0, %v1623_v0  ;;  %1220 = vst.msk [vmem:[#allocation2 + $0x140] sm:$0xff] %vm563_vm2, %v1138_v41  ;;  %1219 = vst.msk [vmem:[#allocation2 + $0x128] sm:$0xff] %vm563_vm2, %v1136_v42 }
 0x17c   : > { %320 = vrot.lane.b32.xlu1 %v3388_v16, %s2698_s15  ;;  %318 = vrot.lane.b32.xlu0 %v3391_v24, %s2698_s15 }
 0x17e   : > { %v494_v12 = vpop.permute.xlu1 %493  ;;  %v492_v15 = vpop.permute.xlu0 %491 }
 0x17f   : > { %577 = vst.msk [vmem:[#allocation2 + $0x138] sm:$0xff] %vm563_vm2, %v494_v12  ;;  %576 = vst.msk [vmem:[#allocation2 + $0x120] sm:$0xff] %vm563_vm2, %v492_v15 }
 0x180   : > { %1157 = vrot.lane.b32.xlu1 %v2368_v45, %s2699_s26  ;;  %1155 = vrot.lane.b32.xlu0 %v2367_v14, %s2699_s26 }
 0x182   : > { %2633 = vmatmul.mubr.msk.bf16.gmra.mxu1 %vm177_vm0, %v1626_v8  ;;  %v1330_v16 = vpop.permute.xlu1 %1329  ;;  %v1328_v24 = vpop.permute.xlu0 %1327 }
 0x183   : > { %2636 = vmatprep.mubr.msk.bf16.mxu1 %vm177_vm0, %v1629_v32  ;;  %1412 = vst.msk [vmem:[#allocation2 + $0x140] sm:$0xff] %vm757_vm3, %v1330_v16  ;;  %1411 = vst.msk [vmem:[#allocation2 + $0x128] sm:$0xff] %vm757_vm3, %v1328_v24 }
 0x184   : > { %513 = vrot.lane.b32.xlu1 %v3413_v35, %s2699_s26  ;;  %511 = vrot.lane.b32.xlu0 %v3416_v56, %s2699_s26  ;;  %v1587_v35 = vld [vmem:[#allocation2 + $0x2e0] sm:$0xff] }
 0x185   : > { %v1638_v27 = vpack.c.bf16 %v1590_v6, %v1587_v35 }
 0x186   : > { %v688_v28 = vpop.permute.xlu1 %687  ;;  %v686_v37 = vpop.permute.xlu0 %685 }
 0x187   : > { %771 = vst.msk [vmem:[#allocation2 + $0x138] sm:$0xff] %vm757_vm3, %v688_v28  ;;  %770 = vst.msk [vmem:[#allocation2 + $0x120] sm:$0xff] %vm757_vm3, %v686_v37 }
 0x188   : > { %1349 = vrot.lane.b32.xlu1 %v2400_v43, %s2700_s13  ;;  %1347 = vrot.lane.b32.xlu0 %v2399_v44, %s2700_s13 }
 0x18a   : > { %2637 = vmatmul.mubr.msk.bf16.gmra.mxu1 %vm177_vm0, %v1632_v23  ;;  %v949_v38 = vpop.permute.xlu1 %948  ;;  %v947_v22 = vpop.permute.xlu0 %946  ;;  %v1532_v56 = vld [vmem:[#allocation2 + $0x128] sm:$0xff]  ;;  %v1535_v7 = vld [vmem:[#allocation2 + $0x140] sm:$0xff] }
 0x18b   : > { %2640 = vmatprep.mubr.msk.bf16.mxu1 %vm177_vm0, %v1635_v40  ;;  %1029 = vst.msk [vmem:[#allocation2 + $0x170] sm:$0xff] %vm370_vm1, %v949_v38  ;;  %1028 = vst.msk [vmem:[#allocation2 + $0x158] sm:$0xff] %vm370_vm1, %v947_v22  ;;  %v1610_v21 = vpack.c.bf16 %v1535_v7, %v1532_v56 }
 0x18c   : > { %707 = vrot.lane.b32.xlu1 %v3710_v48, %s2700_s13  ;;  %705 = vrot.lane.b32.xlu0 %v3713_v46, %s2700_s13 }
 0x18d   : > { %1911 = vmatprep.mubr.bf16.mxu0 %v1610_v21 }
 0x18e   : > { %v2566_v47 = vpop.f32.mrf.mxu1  ;;  %v305_v31 = vpop.permute.xlu1 %304  ;;  %v1531_v3 = vld [vmem:[#allocation2 + $0x120] sm:$0xff]  ;;  %v1534_v49 = vld [vmem:[#allocation2 + $0x138] sm:$0xff] }
 0x18f   : > { %v303_v1 = vpop.permute.xlu0 %302  ;;  %386 = vst.msk [vmem:[#allocation2 + $0x168] sm:$0xff] %vm370_vm1, %v305_v31  ;;  %v1609_v18 = vpack.c.bf16 %v1534_v49, %v1531_v3 }
 0x190   : > { %385 = vst.msk [vmem:[#allocation2 + $0x150] sm:$0xff] %vm370_vm1, %v303_v1  ;;  %v2567_v50 = vpop.f32.mrf.mxu1 }
 0x191   : > { %v3787_v13 = vadd.f32 %v2567_v50, %v2566_v47  ;;  %1912 = vmatmul.mubr.bf16.gmra.mxu0 %v1609_v18 }
 0x192   : > { %v2569_v48 = vpop.f32.mrf.mxu1  ;;  %2641 = vmatmul.mubr.msk.bf16.gmra.mxu1 %vm177_vm0, %v1638_v27  ;;  %v1142_v46 = vpop.permute.xlu1 %1141 }
 0x193   : > { %v1140_v30 = vpop.permute.xlu0 %1139  ;;  %1222 = vst.msk [vmem:[#allocation2 + $0x170] sm:$0xff] %vm563_vm2, %v1142_v46 }
 0x194   : > { %1221 = vst.msk [vmem:[#allocation2 + $0x158] sm:$0xff] %vm563_vm2, %v1140_v30  ;;  %v2570_v19 = vpop.f32.mrf.mxu1 }
 0x195   : > { %v3792_v51 = vadd.f32 %v2570_v19, %v2569_v48 }
 0x196   : > { %v498_v25 = vpop.permute.xlu1 %497 }
 0x197   : > { %v496_v26 = vpop.permute.xlu0 %495  ;;  %579 = vst.msk [vmem:[#allocation2 + $0x168] sm:$0xff] %vm563_vm2, %v498_v25 }
 0x198   : > { %578 = vst.msk [vmem:[#allocation2 + $0x150] sm:$0xff] %vm563_vm2, %v496_v26 }
 0x19a   : > { %v1334_v52 = vpop.permute.xlu1 %1333 }
 0x19b   : > { %v1332_v60 = vpop.permute.xlu0 %1331  ;;  %1414 = vst.msk [vmem:[#allocation2 + $0x170] sm:$0xff] %vm757_vm3, %v1334_v52 }
 0x19c   : > { %1413 = vst.msk [vmem:[#allocation2 + $0x158] sm:$0xff] %vm757_vm3, %v1332_v60 }
 0x19e   : > { %v692_v9 = vpop.permute.xlu1 %691 }
 0x19f   : > { %v690_v20 = vpop.permute.xlu0 %689  ;;  %773 = vst.msk [vmem:[#allocation2 + $0x168] sm:$0xff] %vm757_vm3, %v692_v9 }
 0x1a0   : > { %772 = vst.msk [vmem:[#allocation2 + $0x150] sm:$0xff] %vm757_vm3, %v690_v20 }
 0x1a2   : > { %v953_v61 = vpop.permute.xlu1 %952  ;;  %v1541_v53 = vld [vmem:[#allocation2 + $0x170] sm:$0xff] }
 0x1a3   : > { %v951_v57 = vpop.permute.xlu0 %950  ;;  %v1538_v58 = vld [vmem:[#allocation2 + $0x158] sm:$0xff]  ;;  %1031 = vst.msk [vmem:[#allocation2 + $0x1a0] sm:$0xff] %vm370_vm1, %v953_v61 }
 0x1a4   : > { %1030 = vst.msk [vmem:[#allocation2 + $0x188] sm:$0xff] %vm370_vm1, %v951_v57  ;;  %v1613_v54 = vpack.c.bf16 %v1541_v53, %v1538_v58 }
 0x1a6   : > { %1919 = vmatprep.mubr.bf16.mxu0 %v1613_v54  ;;  %v309_v62 = vpop.permute.xlu1 %308  ;;  %v1540_v2 = vld [vmem:[#allocation2 + $0x168] sm:$0xff] }
 0x1a7   : > { %v307_v39 = vpop.permute.xlu0 %306  ;;  %v1537_v55 = vld [vmem:[#allocation2 + $0x150] sm:$0xff]  ;;  %388 = vst.msk [vmem:[#allocation2 + $0x198] sm:$0xff] %vm370_vm1, %v309_v62 }
 0x1a8   : > { %387 = vst.msk [vmem:[#allocation2 + $0x180] sm:$0xff] %vm370_vm1, %v307_v39  ;;  %v1612_v5 = vpack.c.bf16 %v1540_v2, %v1537_v55  ;;  %v2494_v39 = vpop.f32.mrf.mxu0 }
 0x1aa   : > { %1920 = vmatmul.mubr.bf16.gmra.mxu0 %v1612_v5  ;;  %v1146_v63 = vpop.permute.xlu1 %1145 }
 0x1ab   : > { %v1144_v0 = vpop.permute.xlu0 %1143  ;;  %1224 = vst.msk [vmem:[#allocation2 + $0x1a0] sm:$0xff] %vm563_vm2, %v1146_v63 }
 0x1ac   : > { %1223 = vst.msk [vmem:[#allocation2 + $0x188] sm:$0xff] %vm563_vm2, %v1144_v0 }
 0x1ae   : > { %v502_v11 = vpop.permute.xlu1 %501 }
 0x1af   : > { %v500_v41 = vpop.permute.xlu0 %499  ;;  %581 = vst.msk [vmem:[#allocation2 + $0x198] sm:$0xff] %vm563_vm2, %v502_v11 }
 0x1b0   : > { %580 = vst.msk [vmem:[#allocation2 + $0x180] sm:$0xff] %vm563_vm2, %v500_v41 }
 0x1b2   : > { %v1338_v42 = vpop.permute.xlu1 %1337 }
 0x1b3   : > { %v1336_v29 = vpop.permute.xlu0 %1335  ;;  %1416 = vst.msk [vmem:[#allocation2 + $0x1a0] sm:$0xff] %vm757_vm3, %v1338_v42  ;;  %v2495_v42 = vpop.f32.mrf.mxu0 }
 0x1b4   : > { %1415 = vst.msk [vmem:[#allocation2 + $0x188] sm:$0xff] %vm757_vm3, %v1336_v29 }
 0x1b6   : > { %v696_v4 = vpop.permute.xlu1 %695 }
 0x1b7   : > { %v694_v10 = vpop.permute.xlu0 %693  ;;  %775 = vst.msk [vmem:[#allocation2 + $0x198] sm:$0xff] %vm757_vm3, %v696_v4 }
 0x1b8   : > { %774 = vst.msk [vmem:[#allocation2 + $0x180] sm:$0xff] %vm757_vm3, %v694_v10 }
 0x1ba   : > { %v2572_v17 = vpop.f32.mrf.mxu1  ;;  %v957_v45 = vpop.permute.xlu1 %956  ;;  %v1547_v12 = vld [vmem:[#allocation2 + $0x1a0] sm:$0xff] }
 0x1bb   : > { %v955_v14 = vpop.permute.xlu0 %954  ;;  %v1544_v8 = vld [vmem:[#allocation2 + $0x188] sm:$0xff]  ;;  %1033 = vst.msk [vmem:[#allocation2 + $0x1d0] sm:$0xff] %vm370_vm1, %v957_v45 }
 0x1bc   : > { %1032 = vst.msk [vmem:[#allocation2 + $0x1b8] sm:$0xff] %vm370_vm1, %v955_v14  ;;  %v2573_v15 = vpop.f32.mrf.mxu1  ;;  %v1616_v32 = vpack.c.bf16 %v1547_v12, %v1544_v8 }
 0x1bd   : > { %v3814_v16 = vadd.f32 %v2573_v15, %v2572_v17  ;;  %v2497_v17 = vpop.f32.mrf.mxu0 }
 0x1be   : > { %1927 = vmatprep.mubr.bf16.mxu0 %v1616_v32  ;;  %v2575_v24 = vpop.f32.mrf.mxu1  ;;  %v313_v33 = vpop.permute.xlu1 %312  ;;  %v1546_v59 = vld [vmem:[#allocation2 + $0x198] sm:$0xff] }
 0x1bf   : > { %v311_v34 = vpop.permute.xlu0 %310  ;;  %v1543_v36 = vld [vmem:[#allocation2 + $0x180] sm:$0xff]  ;;  %390 = vst.msk [vmem:[#allocation2 + $0x1c8] sm:$0xff] %vm370_vm1, %v313_v33  ;;  %v2498_v8 = vpop.f32.mrf.mxu0 }
 0x1c0   : > { %389 = vst.msk [vmem:[#allocation2 + $0x1b0] sm:$0xff] %vm370_vm1, %v311_v34  ;;  %v2576_v43 = vpop.f32.mrf.mxu1  ;;  %v1615_v44 = vpack.c.bf16 %v1546_v59, %v1543_v36 }
 0x1c1   : > { %v3818_v23 = vadd.f32 %v2576_v43, %v2575_v24  ;;  %v2500_v12 = vpop.f32.mrf.mxu0 }
 0x1c2   : > { %1928 = vmatmul.mubr.bf16.gmra.mxu0 %v1615_v44  ;;  %v1150_v28 = vpop.permute.xlu1 %1149 }
 0x1c3   : > { %v1148_v37 = vpop.permute.xlu0 %1147  ;;  %1226 = vst.msk [vmem:[#allocation2 + $0x1d0] sm:$0xff] %vm563_vm2, %v1150_v28  ;;  %v2501_v24 = vpop.f32.mrf.mxu0 }
 0x1c4   : > { %1225 = vst.msk [vmem:[#allocation2 + $0x1b8] sm:$0xff] %vm563_vm2, %v1148_v37 }
 0x1c5   : > { %v2503_v36 = vpop.f32.mrf.mxu0 }
 0x1c6   : > { %v506_v40 = vpop.permute.xlu1 %505 }
 0x1c7   : > { %v504_v35 = vpop.permute.xlu0 %503  ;;  %583 = vst.msk [vmem:[#allocation2 + $0x1c8] sm:$0xff] %vm563_vm2, %v506_v40  ;;  %v2504_v28 = vpop.f32.mrf.mxu0 }
 0x1c8   : > { %582 = vst.msk [vmem:[#allocation2 + $0x1b0] sm:$0xff] %vm563_vm2, %v504_v35 }
 0x1ca   : > { %v1342_v38 = vpop.permute.xlu1 %1341 }
 0x1cb   : > { %v1340_v22 = vpop.permute.xlu0 %1339  ;;  %1418 = vst.msk [vmem:[#allocation2 + $0x1d0] sm:$0xff] %vm757_vm3, %v1342_v38 }
 0x1cc   : > { %1417 = vst.msk [vmem:[#allocation2 + $0x1b8] sm:$0xff] %vm757_vm3, %v1340_v22 }
 0x1ce   : > { %v700_v56 = vpop.permute.xlu1 %699 }
 0x1cf   : > { %v698_v7 = vpop.permute.xlu0 %697  ;;  %777 = vst.msk [vmem:[#allocation2 + $0x1c8] sm:$0xff] %vm757_vm3, %v700_v56 }
 0x1d0   : > { %776 = vst.msk [vmem:[#allocation2 + $0x1b0] sm:$0xff] %vm757_vm3, %v698_v7 }
 0x1d2   : > { %v961_v6 = vpop.permute.xlu1 %960  ;;  %v1553_v27 = vld [vmem:[#allocation2 + $0x1d0] sm:$0xff] }
 0x1d3   : > { %v959_v21 = vpop.permute.xlu0 %958  ;;  %v1550_v47 = vld [vmem:[#allocation2 + $0x1b8] sm:$0xff]  ;;  %1035 = vst.msk [vmem:[#allocation2 + $0x200] sm:$0xff] %vm370_vm1, %v961_v6 }
 0x1d4   : > { %1034 = vst.msk [vmem:[#allocation2 + $0x1e8] sm:$0xff] %vm370_vm1, %v959_v21  ;;  %v1619_v31 = vpack.c.bf16 %v1553_v27, %v1550_v47 }
 0x1d6   : > { %1935 = vmatprep.mubr.bf16.mxu0 %v1619_v31  ;;  %v317_v1 = vpop.permute.xlu1 %316  ;;  %v1552_v50 = vld [vmem:[#allocation2 + $0x1c8] sm:$0xff]  ;;  %v2506_v35 = vpop.f32.mrf.mxu0 }
 0x1d7   : > { %v315_v3 = vpop.permute.xlu0 %314  ;;  %v1549_v49 = vld [vmem:[#allocation2 + $0x1b0] sm:$0xff]  ;;  %392 = vst.msk [vmem:[#allocation2 + $0x1f8] sm:$0xff] %vm370_vm1, %v317_v1  ;;  %v2502_v1 = vadd.f32 %v2501_v24, %v2500_v12 }
 0x1d8   : > { %391 = vst.msk [vmem:[#allocation2 + $0x1e0] sm:$0xff] %vm370_vm1, %v315_v3  ;;  %v1618_v18 = vpack.c.bf16 %v1552_v50, %v1549_v49  ;;  %v2507_v22 = vpop.f32.mrf.mxu0  ;;  %v2496_v50 = vadd.f32 %v2495_v42, %v2494_v39 }
 0x1da   : > { %1936 = vmatmul.mubr.bf16.gmra.mxu0 %v1618_v18  ;;  %v1154_v48 = vpop.permute.xlu1 %1153  ;;  %v2509_v56 = vpop.f32.mrf.mxu0 }
 0x1db   : > { %v1152_v46 = vpop.permute.xlu0 %1151  ;;  %1228 = vst.msk [vmem:[#allocation2 + $0x200] sm:$0xff] %vm563_vm2, %v1154_v48 }
 0x1dc   : > { %1227 = vst.msk [vmem:[#allocation2 + $0x1e8] sm:$0xff] %vm563_vm2, %v1152_v46  ;;  %v2510_v6 = vpop.f32.mrf.mxu0  ;;  %v2505_v46 = vadd.f32 %v2504_v28, %v2503_v36 }
 0x1de   : > { %v510_v30 = vpop.permute.xlu1 %509 }
 0x1df   : > { %v508_v19 = vpop.permute.xlu0 %507  ;;  %585 = vst.msk [vmem:[#allocation2 + $0x1f8] sm:$0xff] %vm563_vm2, %v510_v30 }
 0x1e0   : > { %584 = vst.msk [vmem:[#allocation2 + $0x1e0] sm:$0xff] %vm563_vm2, %v508_v19 }
 0x1e2   : > { %v1346_v25 = vpop.permute.xlu1 %1345 }
 0x1e3   : > { %v1344_v26 = vpop.permute.xlu0 %1343  ;;  %1420 = vst.msk [vmem:[#allocation2 + $0x200] sm:$0xff] %vm757_vm3, %v1346_v25 }
 0x1e4   : > { %1419 = vst.msk [vmem:[#allocation2 + $0x1e8] sm:$0xff] %vm757_vm3, %v1344_v26  ;;  %v2499_v26 = vadd.f32 %v2498_v8, %v2497_v17 }
 0x1e6   : > { %v2578_v52 = vpop.f32.mrf.mxu1  ;;  %v704_v60 = vpop.permute.xlu1 %703 }
 0x1e7   : > { %v702_v9 = vpop.permute.xlu0 %701  ;;  %779 = vst.msk [vmem:[#allocation2 + $0x1f8] sm:$0xff] %vm757_vm3, %v704_v60 }
 0x1e8   : > { %778 = vst.msk [vmem:[#allocation2 + $0x1e0] sm:$0xff] %vm757_vm3, %v702_v9  ;;  %v2579_v20 = vpop.f32.mrf.mxu1 }
 0x1e9   : > { %v3840_v61 = vadd.f32 %v2579_v20, %v2578_v52 }
 0x1ea   : > { %v2581_v57 = vpop.f32.mrf.mxu1  ;;  %v965_v58 = vpop.permute.xlu1 %964  ;;  %v1559_v62 = vld [vmem:[#allocation2 + $0x200] sm:$0xff] }
 0x1eb   : > { %v963_v53 = vpop.permute.xlu0 %962  ;;  %v1556_v54 = vld [vmem:[#allocation2 + $0x1e8] sm:$0xff]  ;;  %1037 = vst.msk [vmem:[#allocation2 + $0x230] sm:$0xff] %vm370_vm1, %v965_v58 }
 0x1ec   : > { %1036 = vst.msk [vmem:[#allocation2 + $0x218] sm:$0xff] %vm370_vm1, %v963_v53  ;;  %v2582_v55 = vpop.f32.mrf.mxu1  ;;  %v1622_v2 = vpack.c.bf16 %v1559_v62, %v1556_v54  ;;  %v2508_v53 = vadd.f32 %v2507_v22, %v2506_v35 }
 0x1ed   : > { %v3844_v5 = vadd.f32 %v2582_v55, %v2581_v57 }
 0x1ee   : > { %1943 = vmatprep.mubr.bf16.mxu0 %v1622_v2  ;;  %v321_v63 = vpop.permute.xlu1 %320  ;;  %v1558_v41 = vld [vmem:[#allocation2 + $0x1f8] sm:$0xff] }
 0x1ef   : > { %v319_v0 = vpop.permute.xlu0 %318  ;;  %v1555_v11 = vld [vmem:[#allocation2 + $0x1e0] sm:$0xff]  ;;  %394 = vst.msk [vmem:[#allocation2 + $0x228] sm:$0xff] %vm370_vm1, %v321_v63 }
 0x1f0   : > { %393 = vst.msk [vmem:[#allocation2 + $0x210] sm:$0xff] %vm370_vm1, %v319_v0  ;;  %v1621_v29 = vpack.c.bf16 %v1558_v41, %v1555_v11  ;;  %v2511_v0 = vadd.f32 %v2510_v6, %v2509_v56 }
 0x1f2   : > { %1944 = vmatmul.mubr.bf16.gmra.mxu0 %v1621_v29  ;;  %v1158_v4 = vpop.permute.xlu1 %1157 }
 0x1f3   : > { %v1156_v10 = vpop.permute.xlu0 %1155  ;;  %1230 = vst.msk [vmem:[#allocation2 + $0x230] sm:$0xff] %vm563_vm2, %v1158_v4 }
 0x1f4   : > { %1229 = vst.msk [vmem:[#allocation2 + $0x218] sm:$0xff] %vm563_vm2, %v1156_v10 }
 0x1f6   : > { %v514_v45 = vpop.permute.xlu1 %513 }
 0x1f7   : > { %v512_v14 = vpop.permute.xlu0 %511  ;;  %587 = vst.msk [vmem:[#allocation2 + $0x228] sm:$0xff] %vm563_vm2, %v514_v45 }
 0x1f8   : > { %586 = vst.msk [vmem:[#allocation2 + $0x210] sm:$0xff] %vm563_vm2, %v512_v14 }
 0x1fa   : > { %v1350_v15 = vpop.permute.xlu1 %1349 }
 0x1fb   : > { %v1348_v32 = vpop.permute.xlu0 %1347  ;;  %1422 = vst.msk [vmem:[#allocation2 + $0x230] sm:$0xff] %vm757_vm3, %v1350_v15 }
 0x1fc   : > { %1421 = vst.msk [vmem:[#allocation2 + $0x218] sm:$0xff] %vm757_vm3, %v1348_v32 }
 0x1fe   : > { %v708_v33 = vpop.permute.xlu1 %707 }
 0x1ff   : > { %v706_v34 = vpop.permute.xlu0 %705  ;;  %781 = vst.msk [vmem:[#allocation2 + $0x228] sm:$0xff] %vm757_vm3, %v708_v33 }
 0x200   : > { %780 = vst.msk [vmem:[#allocation2 + $0x210] sm:$0xff] %vm757_vm3, %v706_v34 }
 0x202   : > { %v1565_v43 = vld [vmem:[#allocation2 + $0x230] sm:$0xff]  ;;  %v2512_v47 = vpop.f32.mrf.mxu0 }
 0x203   : > { %v1562_v59 = vld [vmem:[#allocation2 + $0x218] sm:$0xff] }
 0x204   : > { %v1625_v44 = vpack.c.bf16 %v1565_v43, %v1562_v59  ;;  %v2513_v3 = vpop.f32.mrf.mxu0 }
 0x205   : > { %v2514_v9 = vadd.f32 %v2513_v3, %v2512_v47 }
 0x206   : > { %1951 = vmatprep.mubr.bf16.mxu0 %v1625_v44  ;;  %v1564_v40 = vld [vmem:[#allocation2 + $0x228] sm:$0xff]  ;;  %v2515_v19 = vpop.f32.mrf.mxu0 }
 0x207   : > { %v1561_v37 = vld [vmem:[#allocation2 + $0x210] sm:$0xff] }
 0x208   : > { %v1624_v38 = vpack.c.bf16 %v1564_v40, %v1561_v37  ;;  %v2516_v57 = vpop.f32.mrf.mxu0 }
 0x209   : > { %v2517_v39 = vadd.f32 %v2516_v57, %v2515_v19 }
 0x20a   : > { %1952 = vmatmul.mubr.bf16.gmra.mxu0 %v1624_v38 }
 0x212   : > { %v3856_v7 = vpop.f32.mrf.mxu1 }
 0x214   : > { %v3858_v21 = vpop.f32.mrf.mxu1 }
 0x216   : > { %v3860_v27 = vpop.f32.mrf.mxu1 }
 0x218   : > { %v3863_v31 = vpop.f32.mrf.mxu1 }
 0x21a   : > { %v2614_v49 = vpop.f32.mrf.mxu1 }
 0x21b   : > { %v2035_v18 = vadd.f32 %v2614_v49, %v2502_v1 }
 0x21c   : > { %v2026_v48 = vpop.f32.mrf.mxu1 }
 0x21d   : > { %2156 = vst.msk [vmem:[%s3868_s3 + $0x10] sm:$0xff] %vm2153_vm4, %v2035_v18  ;;  %v2027_v30 = vadd.f32 %v2496_v50, %v2026_v48 }
 0x21e   : > { %v2615_v25 = vpop.f32.mrf.mxu1 }
 0x21f   : > { %2154 = vst.msk [vmem:[%s3868_s3] sm:$0xff] %vm2153_vm4, %v2027_v30  ;;  %v2038_v52 = vadd.f32 %v2615_v25, %v2505_v46 }
 0x220   : > { %v2029_v60 = vpop.f32.mrf.mxu1 }
 0x221   : > { %2157 = vst.msk [vmem:[%s3868_s3 + $0x18] sm:$0xff] %vm2153_vm4, %v2038_v52  ;;  %v2030_v20 = vadd.f32 %v2499_v26, %v2029_v60  ;;  %v2586_v60 = vadd.f32 %v3858_v21, %v3856_v7 }
 0x222   : > { %v2618_v58 = vpop.f32.mrf.mxu1 }
 0x223   : > { %2155 = vst.msk [vmem:[%s3868_s3 + $0x8] sm:$0xff] %vm2153_vm4, %v2030_v20  ;;  %v2051_v54 = vadd.f32 %v2618_v58, %v2514_v9 }
 0x224   : > { %v2042_v62 = vpop.f32.mrf.mxu1 }
 0x225   : > { %2160 = vst.msk [vmem:[%s3868_s3 + $0x30] sm:$0xff] %vm2153_vm4, %v2051_v54  ;;  %v2043_v55 = vadd.f32 %v2508_v53, %v2042_v62 }
 0x226   : > { %v2518_v2 = vpop.f32.mrf.mxu0  ;;  %v2619_v63 = vpop.f32.mrf.mxu1 }
 0x227   : > { %2158 = vst.msk [vmem:[%s3868_s3 + $0x20] sm:$0xff] %vm2153_vm4, %v2043_v55  ;;  %v2054_v11 = vadd.f32 %v2619_v63, %v2517_v39 }
 0x228   : > { %v2519_v41 = vpop.f32.mrf.mxu0  ;;  %v2045_v42 = vpop.f32.mrf.mxu1 }
 0x229   : > { %2161 = vst.msk [vmem:[%s3868_s3 + $0x38] sm:$0xff] %vm2153_vm4, %v2054_v11  ;;  %v2046_v29 = vadd.f32 %v2511_v0, %v2045_v42  ;;  %v2520_v17 = vadd.f32 %v2519_v41, %v2518_v2 }
 0x22a   : > { %v2521_v4 = vpop.f32.mrf.mxu0  ;;  %v2622_v10 = vpop.f32.mrf.mxu1 }
 0x22b   : > { %2159 = vst.msk [vmem:[%s3868_s3 + $0x28] sm:$0xff] %vm2153_vm4, %v2046_v29 }
 0x22c   : > { %v2522_v45 = vpop.f32.mrf.mxu0  ;;  %v2058_v14 = vpop.f32.mrf.mxu1 }
 0x22d   : > { %v2059_v8 = vadd.f32 %v2520_v17, %v2058_v14  ;;  %v2523_v15 = vadd.f32 %v2522_v45, %v2521_v4 }
 0x22e   : > { %v2623_v12 = vpop.f32.mrf.mxu1 }
 0x22f   : > { %2162 = vst.msk [vmem:[%s3868_s3 + $0x40] sm:$0xff] %vm2153_vm4, %v2059_v8 }
 0x230   : > { %v2061_v32 = vpop.f32.mrf.mxu1 }
 0x231   : > { %v2062_v24 = vadd.f32 %v2523_v15, %v2061_v32 }
 0x232   : > { %v3888_v33 = vpop.f32.mrf.mxu1 }
 0x233   : > { %2163 = vst.msk [vmem:[%s3868_s3 + $0x48] sm:$0xff] %vm2153_vm4, %v2062_v24 }
 0x234   : > { %v2074_v34 = vpop.f32.mrf.mxu1 }
 0x236   : > { %v3892_v36 = vpop.f32.mrf.mxu1 }
 0x238   : > { %v2077_v59 = vpop.f32.mrf.mxu1 }
 0x239   : > { %v2524_v43 = vpop.f32.mrf.mxu0 }
 0x23a   : > { %v3894_v44 = vpop.f32.mrf.mxu1 }
 0x23b   : > { %v2525_v28 = vpop.f32.mrf.mxu0 }
 0x23c   : > { %v3896_v37 = vpop.f32.mrf.mxu1  ;;  %v2526_v40 = vadd.f32 %v2525_v28, %v2524_v43 }
 0x23d   : > { %v2527_v35 = vpop.f32.mrf.mxu0 }
 0x23e   : > { %v3898_v38 = vpop.f32.mrf.mxu1  ;;  %v2067_v22 = vadd.f32 %v2622_v10, %v2526_v40 }
 0x23f   : > { %v2528_v56 = vpop.f32.mrf.mxu0 }
 0x240   : > { %v3900_v6 = vpop.f32.mrf.mxu1  ;;  %2164 = vst.msk [vmem:[%s3868_s3 + $0x50] sm:$0xff] %vm2153_vm4, %v2067_v22  ;;  %v2529_v47 = vadd.f32 %v2528_v56, %v2527_v35 }
 0x242   : > { %v3904_v1 = vpop.f32.mrf.mxu1  ;;  %v2070_v3 = vadd.f32 %v2623_v12, %v2529_v47 }
 0x244   : > { %v3906_v49 = vpop.f32.mrf.mxu1  ;;  %2165 = vst.msk [vmem:[%s3868_s3 + $0x58] sm:$0xff] %vm2153_vm4, %v2070_v3 }
 0x246   : > { %v3910_v50 = vpop.f32.mrf.mxu1 }
 0x248   : > { %v3912_v18 = vpop.f32.mrf.mxu1 }
 0x24a   : > { %v2638_v48 = vpop.f32.mrf.mxu1 }
 0x24b   : > { %v2131_v46 = vadd.f32 %v2638_v48, %v3814_v16 }
 0x24c   : > { %v2122_v30 = vpop.f32.mrf.mxu1 }
 0x24d   : > { %2180 = vst.msk [vmem:[%s3868_s3 + $0xd0] sm:$0xff] %vm2153_vm4, %v2131_v46  ;;  %v2123_v19 = vadd.f32 %v3787_v13, %v2122_v30 }
 0x24e   : > { %v2639_v25 = vpop.f32.mrf.mxu1 }
 0x24f   : > { %2178 = vst.msk [vmem:[%s3868_s3 + $0xc0] sm:$0xff] %vm2153_vm4, %v2123_v19  ;;  %v2134_v26 = vadd.f32 %v2639_v25, %v3818_v23  ;;  %v2589_v23 = vadd.f32 %v3863_v31, %v3860_v27 }
 0x250   : > { %v2125_v52 = vpop.f32.mrf.mxu1 }
 0x251   : > { %2181 = vst.msk [vmem:[%s3868_s3 + $0xd8] sm:$0xff] %vm2153_vm4, %v2134_v26  ;;  %v2126_v16 = vadd.f32 %v3792_v51, %v2125_v52  ;;  %v2530_v9 = vpop.f32.mrf.mxu0 }
 0x252   : > { %v2642_v20 = vpop.f32.mrf.mxu1 }
 0x253   : > { %2179 = vst.msk [vmem:[%s3868_s3 + $0xc8] sm:$0xff] %vm2153_vm4, %v2126_v16  ;;  %v2147_v13 = vadd.f32 %v2642_v20, %v2586_v60  ;;  %v2531_v57 = vpop.f32.mrf.mxu0 }
 0x254   : > { %v2138_v58 = vpop.f32.mrf.mxu1  ;;  %v2532_v7 = vadd.f32 %v2531_v57, %v2530_v9 }
 0x255   : > { %2184 = vst.msk [vmem:[%s3868_s3 + $0xf0] sm:$0xff] %vm2153_vm4, %v2147_v13  ;;  %v2139_v21 = vadd.f32 %v3840_v61, %v2138_v58  ;;  %v2533_v51 = vpop.f32.mrf.mxu0 }
 0x256   : > { %v2643_v53 = vpop.f32.mrf.mxu1  ;;  %v2075_v54 = vadd.f32 %v2532_v7, %v2074_v34 }
 0x257   : > { %2182 = vst.msk [vmem:[%s3868_s3 + $0xe0] sm:$0xff] %vm2153_vm4, %v2139_v21  ;;  %v2150_v62 = vadd.f32 %v2643_v53, %v2589_v23  ;;  %v2534_v39 = vpop.f32.mrf.mxu0 }
 0x258   : > { %v2141_v55 = vpop.f32.mrf.mxu1  ;;  %2166 = vst.msk [vmem:[%s3868_s3 + $0x60] sm:$0xff] %vm2153_vm4, %v2075_v54  ;;  %v2535_v27 = vadd.f32 %v2534_v39, %v2533_v51 }
 0x259   : > { %2185 = vst.msk [vmem:[%s3868_s3 + $0xf8] sm:$0xff] %vm2153_vm4, %v2150_v62  ;;  %v2142_v31 = vadd.f32 %v3844_v5, %v2141_v55 }
 0x25a   : > { %v2078_v2 = vadd.f32 %v2535_v27, %v2077_v59 }
 0x25b   : > { %2183 = vst.msk [vmem:[%s3868_s3 + $0xe8] sm:$0xff] %vm2153_vm4, %v2142_v31 }
 0x25c   : > { %2167 = vst.msk [vmem:[%s3868_s3 + $0x68] sm:$0xff] %vm2153_vm4, %v2078_v2 }
 0x26a   : > { %v2536_v61 = vpop.f32.mrf.mxu0 }
 0x26c   : > { %v2537_v63 = vpop.f32.mrf.mxu0 }
 0x26d   : > { %v2538_v0 = vadd.f32 %v2537_v63, %v2536_v61 }
 0x26e   : > { %v2539_v11 = vpop.f32.mrf.mxu0 }
 0x26f   : > { %v2083_v41 = vadd.f32 %v3888_v33, %v2538_v0 }
 0x270   : > { %v2540_v42 = vpop.f32.mrf.mxu0 }
 0x271   : > { %2168 = vst.msk [vmem:[%s3868_s3 + $0x70] sm:$0xff] %vm2153_vm4, %v2083_v41  ;;  %v2541_v29 = vadd.f32 %v2540_v42, %v2539_v11 }
 0x273   : > { %v2086_v4 = vadd.f32 %v3892_v36, %v2541_v29 }
 0x275   : > { %2169 = vst.msk [vmem:[%s3868_s3 + $0x78] sm:$0xff] %vm2153_vm4, %v2086_v4 }
 0x282   : > { %v2542_v5 = vpop.f32.mrf.mxu0 }
 0x284   : > { %v2543_v10 = vpop.f32.mrf.mxu0 }
 0x285   : > { %v2544_v17 = vadd.f32 %v2543_v10, %v2542_v5 }
 0x286   : > { %v2545_v45 = vpop.f32.mrf.mxu0 }
 0x287   : > { %v2091_v14 = vadd.f32 %v2544_v17, %v3896_v37 }
 0x288   : > { %v2546_v8 = vpop.f32.mrf.mxu0 }
 0x289   : > { %2170 = vst.msk [vmem:[%s3868_s3 + $0x80] sm:$0xff] %vm2153_vm4, %v2091_v14  ;;  %v2547_v12 = vadd.f32 %v2546_v8, %v2545_v45 }
 0x28b   : > { %v2094_v15 = vadd.f32 %v2547_v12, %v3900_v6 }
 0x28d   : > { %2171 = vst.msk [vmem:[%s3868_s3 + $0x88] sm:$0xff] %vm2153_vm4, %v2094_v15 }
 0x29a   : > { %v2548_v32 = vpop.f32.mrf.mxu0 }
 0x29c   : > { %v2549_v24 = vpop.f32.mrf.mxu0 }
 0x29d   : > { %v2550_v33 = vadd.f32 %v2549_v24, %v2548_v32 }
 0x29e   : > { %v2551_v34 = vpop.f32.mrf.mxu0 }
 0x29f   : > { %v2099_v36 = vadd.f32 %v3894_v44, %v2550_v33 }
 0x2a0   : > { %v2552_v59 = vpop.f32.mrf.mxu0 }
 0x2a1   : > { %2172 = vst.msk [vmem:[%s3868_s3 + $0x90] sm:$0xff] %vm2153_vm4, %v2099_v36  ;;  %v2553_v43 = vadd.f32 %v2552_v59, %v2551_v34 }
 0x2a3   : > { %v2102_v28 = vadd.f32 %v3898_v38, %v2553_v43 }
 0x2a5   : > { %2173 = vst.msk [vmem:[%s3868_s3 + $0x98] sm:$0xff] %vm2153_vm4, %v2102_v28 }
 0x2b2   : > { %v2554_v37 = vpop.f32.mrf.mxu0 }
 0x2b4   : > { %v2555_v40 = vpop.f32.mrf.mxu0 }
 0x2b5   : > { %v2556_v35 = vadd.f32 %v2555_v40, %v2554_v37 }
 0x2b6   : > { %v2557_v22 = vpop.f32.mrf.mxu0 }
 0x2b7   : > { %v2107_v56 = vadd.f32 %v2556_v35, %v3906_v49 }
 0x2b8   : > { %v2558_v6 = vpop.f32.mrf.mxu0 }
 0x2b9   : > { %2174 = vst.msk [vmem:[%s3868_s3 + $0xa0] sm:$0xff] %vm2153_vm4, %v2107_v56  ;;  %v2559_v44 = vadd.f32 %v2558_v6, %v2557_v22 }
 0x2bb   : > { %v2110_v47 = vadd.f32 %v2559_v44, %v3912_v18 }
 0x2bd   : > { %2175 = vst.msk [vmem:[%s3868_s3 + $0xa8] sm:$0xff] %vm2153_vm4, %v2110_v47 }
 0x2ca   : > { %v2560_v3 = vpop.f32.mrf.mxu0 }
 0x2cc   : > { %v2561_v38 = vpop.f32.mrf.mxu0 }
 0x2cd   : > { %v2562_v48 = vadd.f32 %v2561_v38, %v2560_v3 }
 0x2ce   : > { %v2563_v46 = vpop.f32.mrf.mxu0 }
 0x2cf   : > { %v2115_v30 = vadd.f32 %v3904_v1, %v2562_v48 }
 0x2d0   : > { %v2564_v19 = vpop.f32.mrf.mxu0 }
 0x2d1   : > { %2176 = vst.msk [vmem:[%s3868_s3 + $0xb0] sm:$0xff] %vm2153_vm4, %v2115_v30  ;;  %v2565_v25 = vadd.f32 %v2564_v19, %v2563_v46 }
 0x2d3   : > { %v2118_v49 = vadd.f32 %v3910_v50, %v2565_v25 }
 0x2d5   : > { %2177 = vst.msk [vmem:[%s3868_s3 + $0xb8] sm:$0xff] %vm2153_vm4, %v2118_v49 }
 0x2d6 PF: > { %s12_s9 = sadd.s32 1, %s2696_s9  }
 0x2d7   : > { %p9_p4 = scmp.ge.s32.totalorder %s12_s9, 4  }
 0x2d9   :  { %11 = sbr.rel (!%p9_p4) target bundleno = 1 (0x1), region = 60 }

</bundles_post_ra>
